<compile_context>
chip_gen: v6e
topology: v6e:2x2x1
jax: 0.10.0
libtpu: 0.0.40
codegen_flags: <defaults>
</compile_context>

<pallas_src>
import jax
import jax.numpy as jnp
from jax import lax
from jax.experimental import pallas as pl
from jax.experimental.pallas import tpu as pltpu


NY = 8  # number of PRMS storages / ODE states


# --------------------------------------------------------------------------- kernel
def _err_jac_kernel(yT_ref, y0T_ref, w_ref, wt_ref, tb_ref, invdt_ref, eyedt_ref,
                    fT_ref, jT_ref):
    """F^T = (y - y0)/dt - tanh(W^T y + t*b) and its analytic per-basin Jacobian.

    Layout: basins (batch) on lanes, states on sublanes.
      yT, y0T, F^T : (ny, B)
      Jacobian     : (ny, ny, B) with jT[i, j, b] = d F[b, j] / d y[b, i]
    """
    yT = yT_ref[...]                                            # (ny, B)
    u = (jnp.dot(wt_ref[...], yT, preferred_element_type=jnp.float32)
         + tb_ref[...])                                         # (ny, B)
    g = jnp.tanh(u)                                             # surrogate delta_S^T
    fT_ref[...] = (yT - y0T_ref[...]) * invdt_ref[...] - g      # error_func^T
    s = 1.0 - g * g                                             # d tanh / du, (ny, B)
    # jac[b, j, i] = eye[j, i]/dt - s[b, j] * W[i, j]    (stored as [i, j, b])
    jT_ref[...] = (eyedt_ref[...][:, :, None]
                   - w_ref[...][:, :, None] * s[None, :, :])


def _pick_batch_block(bs):
    for blk in (512, 256, 128):
        if bs % blk == 0:
            return blk
    return bs  # tiny / ragged batch: one full-array (lane-padded) block


def _eval_call(yT, y0T, w, wt, tb, invdt_col, eye_dt):
    ny, bs = yT.shape
    blk = _pick_batch_block(bs)
    nb = bs // blk
    grid_spec = pltpu.PrefetchScalarGridSpec(
        num_scalar_prefetch=0,
        grid=(nb,),
        in_specs=[
            pl.BlockSpec((ny, blk), lambda i: (0, i)),           # y^T
            pl.BlockSpec((ny, blk), lambda i: (0, i)),           # y0^T
            pl.BlockSpec((ny, ny), lambda i: (0, 0)),            # W
            pl.BlockSpec((ny, ny), lambda i: (0, 0)),            # W^T
            pl.BlockSpec((ny, 1), lambda i: (0, 0)),             # t * b (column)
            pl.BlockSpec((ny, 1), lambda i: (0, 0)),             # 1/dt  (column)
            pl.BlockSpec((ny, ny), lambda i: (0, 0)),            # eye / dt
        ],
        out_specs=(
            pl.BlockSpec((ny, blk), lambda i: (0, i)),           # F^T
            pl.BlockSpec((ny, ny, blk), lambda i: (0, 0, i)),    # Jacobian [i, j, b]
        ),
    )
    return pl.pallas_call(
        _err_jac_kernel,
        out_shape=(
            jax.ShapeDtypeStruct((ny, bs), jnp.float32),
            jax.ShapeDtypeStruct((ny, ny, bs), jnp.float32),
        ),
        grid_spec=grid_spec,
        compiler_params=pltpu.CompilerParams(
            dimension_semantics=("parallel",)),
    )(yT, y0T, w, wt, tb, invdt_col, eye_dt)


# --------------------------------------------------------------------------- solver
@jax.jit
def _nr_solve(y0, dt, t, W, b, tol_x, tol_fun, max_iter):
    ALPHA = 0.0001
    MIN_LAMBDA = 0.1
    MAX_LAMBDA = 0.5
    EPS = 2.2204e-16

    bs, ny = y0.shape
    y0T = y0.T                                        # (ny, bs), basins on lanes
    wt = W.T
    inv_dt = 1.0 / dt
    tb = (t * b).reshape(ny, 1)
    invdt_col = jnp.full((ny, 1), inv_dt, jnp.float32)
    eye_dt = jnp.eye(ny, dtype=jnp.float32) * inv_dt

    def evaluate(yT):
        return _eval_call(yT, y0T, W, wt, tb, invdt_col, eye_dt)

    FT0, JT0 = evaluate(y0T)
    exitflag0 = jnp.where(jnp.all(jnp.isfinite(JT0)), jnp.int32(1), jnp.int32(-1))
    resnorm_init = jnp.max(jnp.abs(FT0), axis=0)      # per-basin inf-norm, (bs,)

    state = dict(
        yT=y0T, yoldT=y0T, FT=FT0, JT_fresh=JT0, JT_used=JT0,
        resnorm=resnorm_init, resnorm0=100.0 * resnorm_init,
        dyT=jnp.zeros_like(y0T),
        fold_obj=jnp.zeros((bs,), jnp.float32),
        f2_obj=jnp.zeros((bs,), jnp.float32),
        slope=jnp.zeros((bs,), jnp.float32),
        lam=jnp.float32(1.0), lam2=jnp.float32(1.0),
        lam_min=jnp.float32(0.0),
        n_iter=jnp.int32(0), exitflag=exitflag0, done=jnp.array(False),
    )

    def cond_fn(st):
        return (jnp.logical_not(st["done"])
                & ((jnp.max(st["resnorm"]) > tol_fun) | (st["lam"] < 1.0))
                & (st["exitflag"] >= 0)
                & (st["n_iter"] <= max_iter))

    def body_fn(st):
        lam = st["lam"]

        # ---- Newton direction (only when the last step was a full step) -------
        def newton_true(_):
            n_iter = st["n_iter"] + 1
            recompute = jnp.max(st["resnorm"] / st["resnorm0"]) > 0.2
            JT_used = jnp.where(recompute, st["JT_fresh"], st["JT_used"])
            bad = recompute & jnp.logical_not(jnp.all(jnp.isfinite(st["JT_fresh"])))

            jac = jnp.transpose(JT_used, (2, 1, 0))    # (bs, ny, ny) = jac[b, j, i]
            F_b = st["FT"].T                           # (bs, ny)
            inv = jnp.linalg.inv(jac)                  # single factorization, reused
            inv_cond = 1.0 / (jnp.linalg.norm(jac, ord=1, axis=(1, 2))
                              * jnp.linalg.norm(inv, ord=1, axis=(1, 2)))
            use_pinv = jnp.min(inv_cond) <= EPS
            dy = lax.cond(
                use_pinv,
                lambda _: jnp.einsum('bij,bj->bi', jnp.linalg.pinv(jac), -F_b),
                lambda _: -jnp.einsum('bij,bj->bi', inv, F_b),
                None)
            slope = jnp.einsum('bj,bji,bi->b', F_b, jac, dy)   # F^T J dy
            fold_obj = jnp.sum(F_b * F_b, axis=1)              # F . F
            dyT = dy.T
            lam_min = tol_x / jnp.max(jnp.abs(dyT)
                                      / jnp.maximum(jnp.abs(st["yT"]), 1.0))
            return (JT_used, dyT, fold_obj, slope, lam_min, n_iter, st["yT"], bad)

        def newton_false(_):
            return (st["JT_used"], st["dyT"], st["fold_obj"], st["slope"],
                    st["lam_min"], st["n_iter"], st["yoldT"], jnp.array(False))

        (JT_used, dyT, fold_obj, slope, lam_min, n_iter, yoldT, bad_jac) = lax.cond(
            lam == 1.0, newton_true, newton_false, None)

        exitflag = jnp.where(bad_jac, jnp.int32(-1), st["exitflag"])
        done = st["done"] | bad_jac
        alive = jnp.logical_not(done)

        # ---- step-size / dy sanity checks ------------------------------------
        lam_too_small = lam < lam_min
        dy_bad = jnp.logical_not(jnp.all(jnp.isfinite(dyT)))
        exitflag = jnp.where(alive & lam_too_small, jnp.int32(2), exitflag)
        exitflag = jnp.where(alive & jnp.logical_not(lam_too_small) & dy_bad,
                             jnp.int32(-1), exitflag)
        done = done | (alive & (lam_too_small | dy_bad))
        alive = jnp.logical_not(done)

        # ---- trial step + line search ----------------------------------------
        def trial_true(_):
            yT_new = yoldT + dyT * lam
            FT_new, JT_new = evaluate(yT_new)
            f_obj = jnp.sum(FT_new * FT_new, axis=0)            # (bs,)
            resnorm_cand = jnp.max(jnp.abs(FT_new), axis=0)     # (bs,)
            lam1 = lam
            armijo_fail = jnp.any(f_obj > fold_obj + ALPHA * lam * slope)
            fobj_bad = jnp.logical_not(jnp.all(jnp.isfinite(f_obj)))

            def backtrack(_):
                def quad(_):
                    return jnp.min(-slope / 2.0 / (f_obj - fold_obj - slope))

                def cubic(_):
                    lam2 = st["lam2"]
                    f2_obj = st["f2_obj"]
                    A = 1.0 / (lam1 - lam2)
                    B = jnp.stack([
                        jnp.stack([1.0 / lam1 ** 2.0, -1.0 / lam2 ** 2.0]),
                        jnp.stack([-lam2 / lam1 ** 2.0, lam1 / lam2 ** 2.0]),
                    ])
                    C = jnp.stack([f_obj - fold_obj - lam1 * slope,
                                   f2_obj - fold_obj - lam2 * slope])
                    coeff = (A * B) @ C                          # (2, bs)
                    a = coeff[0]
                    bq = coeff[1]
                    disc = bq ** 2.0 - 3.0 * a * slope
                    lam_pos_b = -slope / (bq + jnp.sqrt(disc))
                    lam_neg_b = (-bq + jnp.sqrt(disc)) / 3.0 / a
                    lam_disc = jnp.where(
                        jnp.any(disc < 0.0),
                        jnp.full_like(slope, MAX_LAMBDA * lam1),
                        jnp.where(jnp.any(bq <= 0.0), lam_neg_b, lam_pos_b))
                    lam_tmp = jnp.where(jnp.all(a == 0.0),
                                        -slope / 2.0 / bq, lam_disc)
                    return jnp.min(jnp.minimum(lam_tmp, MAX_LAMBDA * lam1))

                return lax.cond(lam == 1.0, quad, cubic, None)

            def no_backtrack(_):
                return jnp.where(fobj_bad, MAX_LAMBDA * lam1, jnp.float32(1.0))

            lam_new = lax.cond(armijo_fail, backtrack, no_backtrack, None)

            take_continue = lam_new < 1.0
            lam2_new = jnp.where(take_continue, lam1, st["lam2"])
            f2_new = jnp.where(take_continue, f_obj, st["f2_obj"])
            lam_new = jnp.where(take_continue,
                                jnp.maximum(lam_new, MIN_LAMBDA * lam1), lam_new)
            resnorm0_new = jnp.where(take_continue, st["resnorm0"], st["resnorm"])
            resnorm_new = jnp.where(take_continue, st["resnorm"], resnorm_cand)
            return (yT_new, FT_new, JT_new, lam_new, lam2_new, f2_new,
                    resnorm_new, resnorm0_new)

        def trial_false(_):
            return (st["yT"], st["FT"], st["JT_fresh"], lam, st["lam2"],
                    st["f2_obj"], st["resnorm"], st["resnorm0"])

        (yT_new, FT_new, JT_fresh_new, lam_new, lam2_new, f2_new,
         resnorm_new, resnorm0_new) = lax.cond(alive, trial_true, trial_false, None)

        return dict(
            yT=yT_new, yoldT=yoldT, FT=FT_new, JT_fresh=JT_fresh_new,
            JT_used=JT_used, resnorm=resnorm_new, resnorm0=resnorm0_new,
            dyT=dyT, fold_obj=fold_obj, f2_obj=f2_new, slope=slope,
            lam=lam_new, lam2=lam2_new, lam_min=lam_min, n_iter=n_iter,
            exitflag=exitflag, done=done)

    final = lax.while_loop(cond_fn, body_fn, state)
    return final["yT"].T, final["FT"].T, final["exitflag"], final["n_iter"]


class FarshidNRODESolverPallas:
    """Batched Newton-Raphson implicit-Euler step solver (marrmot PRMS style)."""

    def __init__(self, W, b, settings=None):
        self.W = jnp.asarray(W, jnp.float32)
        self.b = jnp.asarray(b, jnp.float32)
        self.settings = settings or {'TolX': 1e-12, 'TolFun': 1e-06, 'MaxIter': 1000}

    # Surrogate flux model g(t, y) (reference only — the kernel computes it directly).
    def g(self, t, y):
        return jnp.tanh(y @ self.W + t * self.b), None

    def forward(self, y0, dt, t):
        y, F, exitflag, n_iter = _nr_solve(
            jnp.asarray(y0, jnp.float32),
            jnp.asarray(dt, jnp.float32),
            jnp.asarray(t, jnp.float32),
            self.W, self.b,
            float(self.settings['TolX']),
            float(self.settings['TolFun']),
            int(self.settings['MaxIter']))
        # print('day ', float(t), 'Iteration ', int(n_iter), 'Flag ', int(exitflag))
        return y, F, exitflag


# --------------------------------------------------------------------------- main
if __name__ == "__main__":
    key = jax.random.PRNGKey(0)
    k1, k2, k3 = jax.random.split(key, 3)

    bs, ny = 1024, NY                    # basins x PRMS storages
    W = 0.1 * jax.random.normal(k1, (ny, ny), jnp.float32)
    b = 0.1 * jax.random.normal(k2, (1, ny), jnp.float32)
    y0 = 1.0 + 0.5 * jax.random.normal(k3, (bs, ny), jnp.float32)
    dt = jnp.float32(1.0)
    t = jnp.float32(1.0)

    solver = FarshidNRODESolverPallas(W, b)
    y, F, exitflag = solver.forward(y0, dt, t)
    y, F = jax.block_until_ready((y, F))

    # consistency of the kernel error_func with the (pure-JAX) surrogate
    F_ref = (y - y0) / dt - jnp.tanh(y @ W + t * b)
    assert float(jnp.max(jnp.abs(F - F_ref))) < 1e-5, "kernel error_func mismatch"
    assert int(exitflag) >= 1, f"solver exitflag={int(exitflag)}"
    assert float(jnp.max(jnp.abs(F))) < 1e-3, "Newton residual did not converge"
    print("KERNEL_OK")
</pallas_src>

<mosaic_0001>
module attributes {stable_mosaic.version = 11 : i64} {
  func.func @_err_jac_kernel(%arg0: i32, %arg1: memref<8x512xf32, #tpu.memory_space<vmem>>, %arg2: memref<8x512xf32, #tpu.memory_space<vmem>>, %arg3: memref<8x8xf32, #tpu.memory_space<vmem>>, %arg4: memref<8x8xf32, #tpu.memory_space<vmem>>, %arg5: memref<8x1xf32, #tpu.memory_space<vmem>>, %arg6: memref<8x1xf32, #tpu.memory_space<vmem>>, %arg7: memref<8x8xf32, #tpu.memory_space<vmem>>, %arg8: memref<8x512xf32, #tpu.memory_space<vmem>>, %arg9: memref<8x8x512xf32, #tpu.memory_space<vmem>>) attributes {dimension_semantics = [#tpu.dimension_semantics<parallel>], iteration_bounds = array<i64: 2>, scalar_prefetch = 0 : i64, scratch_operands = 0 : i64, tpu.core_type = #tpu.core_type<tc>, window_params = [{transform_indices = @transform_0, window_bounds = array<i64: 8, 512>}, {transform_indices = @transform_1, window_bounds = array<i64: 8, 512>}, {pipeline_mode = #tpu.pipeline_mode<synchronous>, transform_indices = @transform_2, window_bounds = array<i64: 8, 8>}, {pipeline_mode = #tpu.pipeline_mode<synchronous>, transform_indices = @transform_3, window_bounds = array<i64: 8, 8>}, {pipeline_mode = #tpu.pipeline_mode<synchronous>, transform_indices = @transform_4, window_bounds = array<i64: 8, 1>}, {pipeline_mode = #tpu.pipeline_mode<synchronous>, transform_indices = @transform_5, window_bounds = array<i64: 8, 1>}, {pipeline_mode = #tpu.pipeline_mode<synchronous>, transform_indices = @transform_6, window_bounds = array<i64: 8, 8>}, {transform_indices = @transform_7, window_bounds = array<i64: 8, 512>}, {transform_indices = @transform_8, window_bounds = array<i64: 8, 8, 512>}]} {
    %c0 = arith.constant 0 : index
    %c0_0 = arith.constant 0 : index
    %0 = vector.load %arg1[%c0, %c0_0] : memref<8x512xf32, #tpu.memory_space<vmem>>, vector<8x512xf32>
    %c0_1 = arith.constant 0 : index
    %c0_2 = arith.constant 0 : index
    %1 = vector.load %arg4[%c0_1, %c0_2] : memref<8x8xf32, #tpu.memory_space<vmem>>, vector<8x8xf32>
    %cst = arith.constant dense<0.000000e+00> : vector<8x512xf32>
    %2 = tpu.matmul %1, %0, %cst {dimension_numbers = #tpu.dot_dimension_numbers<[1], [0], [0], [1], [0, 0, 1, 1], [], []>} : vector<8x8xf32>, vector<8x512xf32>, vector<8x512xf32> -> vector<8x512xf32>
    %c0_3 = arith.constant 0 : index
    %c0_4 = arith.constant 0 : index
    %3 = vector.load %arg5[%c0_3, %c0_4] : memref<8x1xf32, #tpu.memory_space<vmem>>, vector<8x1xf32>
    %4 = vector.broadcast %3 : vector<8x1xf32> to vector<8x512xf32>
    %5 = arith.addf %2, %4 : vector<8x512xf32>
    %6 = math.tanh %5 : vector<8x512xf32>
    %c0_5 = arith.constant 0 : index
    %c0_6 = arith.constant 0 : index
    %7 = vector.load %arg2[%c0_5, %c0_6] : memref<8x512xf32, #tpu.memory_space<vmem>>, vector<8x512xf32>
    %8 = arith.subf %0, %7 : vector<8x512xf32>
    %c0_7 = arith.constant 0 : index
    %c0_8 = arith.constant 0 : index
    %9 = vector.load %arg6[%c0_7, %c0_8] : memref<8x1xf32, #tpu.memory_space<vmem>>, vector<8x1xf32>
    %10 = vector.broadcast %9 : vector<8x1xf32> to vector<8x512xf32>
    %11 = arith.mulf %8, %10 : vector<8x512xf32>
    %12 = arith.subf %11, %6 : vector<8x512xf32>
    %c0_9 = arith.constant 0 : index
    %c0_10 = arith.constant 0 : index
    %13 = vector.load %arg8[%c0_9, %c0_10] : memref<8x512xf32, #tpu.memory_space<vmem>>, vector<8x512xf32>
    tpu.vector_store %arg8[%c0_9, %c0_10], %12 {strides = array<i32>} : memref<8x512xf32, #tpu.memory_space<vmem>>, vector<8x512xf32>,
    %14 = arith.mulf %6, %6 : vector<8x512xf32>
    %cst_11 = arith.constant 1.000000e+00 : f32
    %15 = vector.broadcast %cst_11 : f32 to vector<8x512xf32>
    %16 = arith.subf %15, %14 : vector<8x512xf32>
    %c0_12 = arith.constant 0 : index
    %c0_13 = arith.constant 0 : index
    %17 = vector.load %arg7[%c0_12, %c0_13] : memref<8x8xf32, #tpu.memory_space<vmem>>, vector<8x8xf32>
    %18 = vector.shape_cast %17 : vector<8x8xf32> to vector<8x8x1xf32>
    %c0_14 = arith.constant 0 : index
    %c0_15 = arith.constant 0 : index
    %19 = vector.load %arg3[%c0_14, %c0_15] : memref<8x8xf32, #tpu.memory_space<vmem>>, vector<8x8xf32>
    %20 = vector.shape_cast %19 : vector<8x8xf32> to vector<8x8x1xf32>
    %21 = vector.shape_cast %16 : vector<8x512xf32> to vector<1x8x512xf32>
    %22 = vector.broadcast %20 : vector<8x8x1xf32> to vector<8x8x512xf32>
    %23 = vector.broadcast %21 : vector<1x8x512xf32> to vector<8x8x512xf32>
    %24 = arith.mulf %22, %23 : vector<8x8x512xf32>
    %25 = vector.broadcast %18 : vector<8x8x1xf32> to vector<8x8x512xf32>
    %26 = arith.subf %25, %24 : vector<8x8x512xf32>
    %c0_16 = arith.constant 0 : index
    %c0_17 = arith.constant 0 : index
    %c0_18 = arith.constant 0 : index
    %27 = vector.load %arg9[%c0_16, %c0_17, %c0_18] : memref<8x8x512xf32, #tpu.memory_space<vmem>>, vector<8x8x512xf32>
    tpu.vector_store %arg9[%c0_16, %c0_17, %c0_18], %26 {strides = array<i32>} : memref<8x8x512xf32, #tpu.memory_space<vmem>>, vector<8x8x512xf32>,
    return
  }
  func.func @transform_0(%arg0: i32) -> (i32, i32) {
    %c0_i32 = arith.constant 0 : i32
    %c0_i32_0 = arith.constant 0 : i32
    return %c0_i32, %arg0 : i32, i32
  }
  func.func @transform_1(%arg0: i32) -> (i32, i32) {
    %c0_i32 = arith.constant 0 : i32
    %c0_i32_0 = arith.constant 0 : i32
    return %c0_i32, %arg0 : i32, i32
  }
  func.func @transform_2(%arg0: i32) -> (i32, i32) {
    %c0_i32 = arith.constant 0 : i32
    %c0_i32_0 = arith.constant 0 : i32
    %c0_i32_1 = arith.constant 0 : i32
    return %c0_i32, %c0_i32_0 : i32, i32
  }
  func.func @transform_3(%arg0: i32) -> (i32, i32) {
    %c0_i32 = arith.constant 0 : i32
    %c0_i32_0 = arith.constant 0 : i32
    %c0_i32_1 = arith.constant 0 : i32
    return %c0_i32, %c0_i32_0 : i32, i32
  }
  func.func @transform_4(%arg0: i32) -> (i32, i32) {
    %c0_i32 = arith.constant 0 : i32
    %c0_i32_0 = arith.constant 0 : i32
    %c0_i32_1 = arith.constant 0 : i32
    return %c0_i32, %c0_i32_0 : i32, i32
  }
  func.func @transform_5(%arg0: i32) -> (i32, i32) {
    %c0_i32 = arith.constant 0 : i32
    %c0_i32_0 = arith.constant 0 : i32
    %c0_i32_1 = arith.constant 0 : i32
    return %c0_i32, %c0_i32_0 : i32, i32
  }
  func.func @transform_6(%arg0: i32) -> (i32, i32) {
    %c0_i32 = arith.constant 0 : i32
    %c0_i32_0 = arith.constant 0 : i32
    %c0_i32_1 = arith.constant 0 : i32
    return %c0_i32, %c0_i32_0 : i32, i32
  }
  func.func @transform_7(%arg0: i32) -> (i32, i32) {
    %c0_i32 = arith.constant 0 : i32
    %c0_i32_0 = arith.constant 0 : i32
    return %c0_i32, %arg0 : i32, i32
  }
  func.func @transform_8(%arg0: i32) -> (i32, i32, i32) {
    %c0_i32 = arith.constant 0 : i32
    %c0_i32_0 = arith.constant 0 : i32
    %c0_i32_1 = arith.constant 0 : i32
    return %c0_i32, %c0_i32_0, %arg0 : i32, i32, i32
  }
}

module attributes {stable_mosaic.version = 11 : i64} {
  func.func @_err_jac_kernel(%arg0: i32, %arg1: memref<8x512xf32, #tpu.memory_space<vmem>>, %arg2: memref<8x512xf32, #tpu.memory_space<vmem>>, %arg3: memref<8x8xf32, #tpu.memory_space<vmem>>, %arg4: memref<8x8xf32, #tpu.memory_space<vmem>>, %arg5: memref<8x1xf32, #tpu.memory_space<vmem>>, %arg6: memref<8x1xf32, #tpu.memory_space<vmem>>, %arg7: memref<8x8xf32, #tpu.memory_space<vmem>>, %arg8: memref<8x512xf32, #tpu.memory_space<vmem>>, %arg9: memref<8x8x512xf32, #tpu.memory_space<vmem>>) attributes {dimension_semantics = [#tpu.dimension_semantics<parallel>], iteration_bounds = array<i64: 2>, scalar_prefetch = 0 : i64, scratch_operands = 0 : i64, tpu.core_type = #tpu.core_type<tc>, window_params = [{transform_indices = @transform_0, window_bounds = array<i64: 8, 512>}, {transform_indices = @transform_1, window_bounds = array<i64: 8, 512>}, {pipeline_mode = #tpu.pipeline_mode<synchronous>, transform_indices = @transform_2, window_bounds = array<i64: 8, 8>}, {pipeline_mode = #tpu.pipeline_mode<synchronous>, transform_indices = @transform_3, window_bounds = array<i64: 8, 8>}, {pipeline_mode = #tpu.pipeline_mode<synchronous>, transform_indices = @transform_4, window_bounds = array<i64: 8, 1>}, {pipeline_mode = #tpu.pipeline_mode<synchronous>, transform_indices = @transform_5, window_bounds = array<i64: 8, 1>}, {pipeline_mode = #tpu.pipeline_mode<synchronous>, transform_indices = @transform_6, window_bounds = array<i64: 8, 8>}, {transform_indices = @transform_7, window_bounds = array<i64: 8, 512>}, {transform_indices = @transform_8, window_bounds = array<i64: 8, 8, 512>}]} {
    %c0 = arith.constant 0 : index
    %c0_0 = arith.constant 0 : index
    %0 = vector.load %arg1[%c0, %c0_0] : memref<8x512xf32, #tpu.memory_space<vmem>>, vector<8x512xf32>
    %c0_1 = arith.constant 0 : index
    %c0_2 = arith.constant 0 : index
    %1 = vector.load %arg4[%c0_1, %c0_2] : memref<8x8xf32, #tpu.memory_space<vmem>>, vector<8x8xf32>
    %cst = arith.constant dense<0.000000e+00> : vector<8x512xf32>
    %2 = tpu.matmul %1, %0, %cst {dimension_numbers = #tpu.dot_dimension_numbers<[1], [0], [0], [1], [0, 0, 1, 1], [], []>} : vector<8x8xf32>, vector<8x512xf32>, vector<8x512xf32> -> vector<8x512xf32>
    %c0_3 = arith.constant 0 : index
    %c0_4 = arith.constant 0 : index
    %3 = vector.load %arg5[%c0_3, %c0_4] : memref<8x1xf32, #tpu.memory_space<vmem>>, vector<8x1xf32>
    %4 = vector.broadcast %3 : vector<8x1xf32> to vector<8x512xf32>
    %5 = arith.addf %2, %4 : vector<8x512xf32>
    %6 = math.tanh %5 : vector<8x512xf32>
    %c0_5 = arith.constant 0 : index
    %c0_6 = arith.constant 0 : index
    %7 = vector.load %arg2[%c0_5, %c0_6] : memref<8x512xf32, #tpu.memory_space<vmem>>, vector<8x512xf32>
    %8 = arith.subf %0, %7 : vector<8x512xf32>
    %c0_7 = arith.constant 0 : index
    %c0_8 = arith.constant 0 : index
    %9 = vector.load %arg6[%c0_7, %c0_8] : memref<8x1xf32, #tpu.memory_space<vmem>>, vector<8x1xf32>
    %10 = vector.broadcast %9 : vector<8x1xf32> to vector<8x512xf32>
    %11 = arith.mulf %8, %10 : vector<8x512xf32>
    %12 = arith.subf %11, %6 : vector<8x512xf32>
    %c0_9 = arith.constant 0 : index
    %c0_10 = arith.constant 0 : index
    %13 = vector.load %arg8[%c0_9, %c0_10] : memref<8x512xf32, #tpu.memory_space<vmem>>, vector<8x512xf32>
    tpu.vector_store %arg8[%c0_9, %c0_10], %12 {strides = array<i32>} : memref<8x512xf32, #tpu.memory_space<vmem>>, vector<8x512xf32>,
    %14 = arith.mulf %6, %6 : vector<8x512xf32>
    %cst_11 = arith.constant 1.000000e+00 : f32
    %15 = vector.broadcast %cst_11 : f32 to vector<8x512xf32>
    %16 = arith.subf %15, %14 : vector<8x512xf32>
    %c0_12 = arith.constant 0 : index
    %c0_13 = arith.constant 0 : index
    %17 = vector.load %arg7[%c0_12, %c0_13] : memref<8x8xf32, #tpu.memory_space<vmem>>, vector<8x8xf32>
    %18 = vector.shape_cast %17 : vector<8x8xf32> to vector<8x8x1xf32>
    %c0_14 = arith.constant 0 : index
    %c0_15 = arith.constant 0 : index
    %19 = vector.load %arg3[%c0_14, %c0_15] : memref<8x8xf32, #tpu.memory_space<vmem>>, vector<8x8xf32>
    %20 = vector.shape_cast %19 : vector<8x8xf32> to vector<8x8x1xf32>
    %21 = vector.shape_cast %16 : vector<8x512xf32> to vector<1x8x512xf32>
    %22 = vector.broadcast %20 : vector<8x8x1xf32> to vector<8x8x512xf32>
    %23 = vector.broadcast %21 : vector<1x8x512xf32> to vector<8x8x512xf32>
    %24 = arith.mulf %22, %23 : vector<8x8x512xf32>
    %25 = vector.broadcast %18 : vector<8x8x1xf32> to vector<8x8x512xf32>
    %26 = arith.subf %25, %24 : vector<8x8x512xf32>
    %c0_16 = arith.constant 0 : index
    %c0_17 = arith.constant 0 : index
    %c0_18 = arith.constant 0 : index
    %27 = vector.load %arg9[%c0_16, %c0_17, %c0_18] : memref<8x8x512xf32, #tpu.memory_space<vmem>>, vector<8x8x512xf32>
    tpu.vector_store %arg9[%c0_16, %c0_17, %c0_18], %26 {strides = array<i32>} : memref<8x8x512xf32, #tpu.memory_space<vmem>>, vector<8x8x512xf32>,
    return
  }
  func.func @transform_0(%arg0: i32) -> (i32, i32) {
    %c0_i32 = arith.constant 0 : i32
    %c0_i32_0 = arith.constant 0 : i32
    return %c0_i32, %arg0 : i32, i32
  }
  func.func @transform_1(%arg0: i32) -> (i32, i32) {
    %c0_i32 = arith.constant 0 : i32
    %c0_i32_0 = arith.constant 0 : i32
    return %c0_i32, %arg0 : i32, i32
  }
  func.func @transform_2(%arg0: i32) -> (i32, i32) {
    %c0_i32 = arith.constant 0 : i32
    %c0_i32_0 = arith.constant 0 : i32
    %c0_i32_1 = arith.constant 0 : i32
    return %c0_i32, %c0_i32_0 : i32, i32
  }
  func.func @transform_3(%arg0: i32) -> (i32, i32) {
    %c0_i32 = arith.constant 0 : i32
    %c0_i32_0 = arith.constant 0 : i32
    %c0_i32_1 = arith.constant 0 : i32
    return %c0_i32, %c0_i32_0 : i32, i32
  }
  func.func @transform_4(%arg0: i32) -> (i32, i32) {
    %c0_i32 = arith.constant 0 : i32
    %c0_i32_0 = arith.constant 0 : i32
    %c0_i32_1 = arith.constant 0 : i32
    return %c0_i32, %c0_i32_0 : i32, i32
  }
  func.func @transform_5(%arg0: i32) -> (i32, i32) {
    %c0_i32 = arith.constant 0 : i32
    %c0_i32_0 = arith.constant 0 : i32
    %c0_i32_1 = arith.constant 0 : i32
    return %c0_i32, %c0_i32_0 : i32, i32
  }
  func.func @transform_6(%arg0: i32) -> (i32, i32) {
    %c0_i32 = arith.constant 0 : i32
    %c0_i32_0 = arith.constant 0 : i32
    %c0_i32_1 = arith.constant 0 : i32
    return %c0_i32, %c0_i32_0 : i32, i32
  }
  func.func @transform_7(%arg0: i32) -> (i32, i32) {
    %c0_i32 = arith.constant 0 : i32
    %c0_i32_0 = arith.constant 0 : i32
    return %c0_i32, %arg0 : i32, i32
  }
  func.func @transform_8(%arg0: i32) -> (i32, i32, i32) {
    %c0_i32 = arith.constant 0 : i32
    %c0_i32_0 = arith.constant 0 : i32
    %c0_i32_1 = arith.constant 0 : i32
    return %c0_i32, %c0_i32_0, %arg0 : i32, i32, i32
  }
}

</mosaic_0001>

<bundles_post_ra>
// kernel: _nr_solve.1
= control target key start
LH: loop header
LB: loop body
LE: loop exit
PB: predicated region body
PF: predicated region fallthrough
CT: control target
= control target key end

     0   :  { %s1766_s0 = inlined_call_operand.hbm [shape: f32[8,1024], index: 0, kind: input, shape index: {}, may-alias: {0,1}]   ;;  %s1767_s1 = inlined_call_operand.hbm [shape: f32[8,1024], index: 1, kind: input, shape index: {}, may-alias: {0,1}]   ;;  %s1768_s2 = inlined_call_operand.hbm [shape: f32[8,8], index: 2, kind: input, shape index: {}]   ;;  %s1769_s3 = inlined_call_operand.vmem [shape: f32[8,8], index: 3, kind: input, shape index: {}]   ;;  %s1770_s4 = inlined_call_operand.vmem [shape: f32[8,1], index: 4, kind: input, shape index: {}]   ;;  %s1771_s5 = inlined_call_operand.vmem [shape: f32[8,1], index: 5, kind: input, shape index: {}]   ;;  %s1772_s6 = inlined_call_operand.vmem [shape: f32[8,8], index: 6, kind: input, shape index: {}]   ;;  %s1773_s7 = inlined_call_operand.hbm [shape: f32[8,1024], index: 7, kind: output, shape index: {0}]   ;;  %s1774_s8 = inlined_call_operand.hbm [shape: f32[8,8,1024], index: 8, kind: output, shape index: {1}]  }
   0x1   :  { %1783 = sst [smem:[#allocation20_spill]] %s1768_s2 }
   0x2   :  { %14 = vsyncpa [#allocation3], 0 }
   0x3   :  { %16 = vsyncpa [#allocation3 + $0x1], 0 }
   0x4   :  { %17 = vsyncpa [#allocation6], 0 }
   0x5   :  { %19 = vsyncpa [#allocation6 + $0x1], 0 }
   0x6   :  { %20 = vsyncpa [#allocation4], 0 }
   0x7   :  { %22 = vsyncpa [#allocation4 + $0x1], 0 }
   0x8   :  { %23 = vsyncpa [#allocation10], 0 }
   0x9   :  { %25 = vsyncpa [#allocation10 + $0x1], 0  ;;  %s1314_s27 = smov 0   ;;  %s1316_s28 = smov 0  }
   0xa   :  { %s1318_s29 = smov 0   ;;  %s1320_s30 = smov 0  }
   0xb LB: > { %1784 = sst [smem:[#allocation16_spill]] %s1253_s29  ;;  %s1335_s9 = sadd.s32 4294967295, %s1257_s30   ;;  %s1257_s30 = sphi %s1320_s30, %s1805_s30   ;;  %s1253_s29 = sphi %s1318_s29, %s1807_s29   ;;  %s1249_s28 = sphi %s1316_s28, %s1809_s28   ;;  %s1245_s27 = sphi %s1314_s27, %s1808_s27  }
   0xc   : > { %s962_s10 = sadd.s32 4294967294, %s1257_s30   ;;  %p51_p0 = scmp.ne.s32.totalorder %s1249_s28, %s1245_s27 }
   0xd   : > { %p1775_p1 = scmp.eq.s32.totalorder %s1335_s9, 0  ;;  %p212_p3 = scmp.eq.s32.totalorder %s962_s10, 1 }
   0xe   : > { %p963_p5 = scmp.ge.s32.totalorder %s1257_s30, 1  ;;  %p245_p7 = scmp.lt.s32.totalorder %s1257_s30, 3 }
   0xf   : > { %p1344_p4 = por %p1775_p1, %p51_p0  ;;  %p1349_p6 = por %p212_p3, %p51_p0 }
  0x10   : > { %p1354_p8 = pnand %p963_p5, %p245_p7  ;;  %s1259_s14 = smov [#allocation7]  }
  0x11   : > { %s1785_s11 = scalar_select %p1344_p4, 1, 0 }
  0x12   : > { %s1786_s12 = scalar_select %p1349_p6, 1, 0 }
  0x13   : > { %s1788_s13 = scalar_select %p1354_p8, 1, 0 }
  0x14   : > { %1787 = sst [smem:[#allocation17_spill]] %s1786_s12  ;;  %s258_s15 = sshll.u32 %s1259_s14, 4  ;;  %s259_s15 = int_to_ptr.vmem [resolvable:$true] %s258_s15 }
  0x15   : > { %p1004_p10 = pneg %p1354_p8  ;;  %s1362_s16 = sadd.s32 1, %s1257_s30  }
  0x16   : > { %1789 = sst [smem:[#allocation18_spill]] %s1362_s16  ;;  %s35_s18 = ssub.s32 %s1257_s30, %s1362_s16 }
  0x17   : > { %p1366_p11 = pnand %p1004_p10, %p1775_p1  ;;  %p1372_p12 = scmp.eq.s32.totalorder %s35_s18, 0 }
  0x18   : > { %s38_s20 = sadd.s32 1, %s1253_s29  ;;  %p45_p13 = scmp.ne.s32.totalorder %s1253_s29, %s1249_s28 }
  0x19   : > { %p1075_p0 = pneg %p1366_p11  ;;  %s1084_s21 = scalar_lea.vmem %s259_s15, 128 }
  0x1a   : > { %p1085_p3 = scmp.ne.s32.totalorder %s259_s15, %s1084_s21  ;;  %p1092_p9 = scmp.lt.s32.totalorder %s259_s15, %s259_s15 }
  0x1b   : > { %p1093_p2 = scmp.lt.s32.totalorder %s1084_s21, %s1084_s21 }
  0x1c   : > { %p1087_p5 = pnand %p1085_p3, %p1075_p0 }
  0x1d   : > { %p1094_p10 = por %p1093_p2, %p1092_p9 }
  0x1e   : > { %p1088_p7 = pneg %p1087_p5 }
  0x20   : > { %p1095_p1 = pnand %p1094_p10, %p1088_p7 }
  0x22   : > { %1098 = shalt.err (!%p1095_p1)
}
  0x23   : > { %s1792_s2 = sld [smem:[#allocation20_spill]]  ;;  %p46_p1 = scmp.eq.s32.totalorder %s1257_s30, 0 }
  0x24   : > { %s1389_s24 = scalar_select %p1372_p12, %s1253_s29, %s38_s20  }
  0x25   : > { %p1794_p2 = scmp.eq.s32.totalorder %s1335_s9, 1  ;;  %p1023_p0 = scmp.lt.s32.totalorder %s1257_s30, 2 }
  0x26   : > { %1793 = sst [smem:[#allocation19_spill]] %s1389_s24  ;;  %s281_s26 = sand.u32 1, %s1253_s29  }
  0x27   : > { %p1397_p9 = por %p1794_p2, %p45_p13  ;;  %p47_p3 = por %p46_p1, %p45_p13 }
  0x28   : > { %s1406_s10 = sshll.u32 %s281_s26, 5  ;;  %s988_s14 = sshll.u32 %s1257_s30, 9 }
  0x29   : > { %1007 = dma.hbm_to_vmem [thread:$0]  (!%p1366_p11), %s1792_s2, 128, %s259_s15, [#allocation6]  }
  0x2a   : > { %s1795_s25 = scalar_select %p1397_p9, 1, 0 }
  0x2b   : > { %s1412_s18 = scalar_lea.hbm %s1766_s0, %s988_s14  ;;  %s285_s19 = scalar_lea.vmem [#allocation2], %s1406_s10 }
  0x2c   : > { %s293_s20 = sshll.u32 %s285_s19, 4  ;;  %p1415_p11 = pnand %p1023_p0, %p47_p3  ;;  %s294_s20 = int_to_ptr.vmem [resolvable:$true] %s293_s20 }
  0x2d   : > { %s1422_s2 = scalar_lea.hbm %s1767_s1, %s988_s14  ;;  %s282_s17 = scalar_lea.sflag [#allocation3], %s281_s26 }
  0x2e   : > { %s1099_s15 = scalar_lea.hbm %s1412_s18, 512  ;;  %p1101_p13 = pneg %p1415_p11 }
  0x2f   : > { %p1100_p12 = scmp.ne.s32.totalorder %s1412_s18, %s1099_s15  ;;  %s1104_s29 = scalar_lea.hbm %s1766_s0, 1024 }
  0x30   : > { %p1105_p10 = scmp.lt.s32.totalorder %s1412_s18, %s1766_s0  ;;  %p1106_p1 = scmp.lt.s32.totalorder %s1104_s29, %s1099_s15 }
  0x31   : > { %p1102_p5 = pnand %p1101_p13, %p1100_p12 }
  0x32   : > { %p1107_p2 = por %p1106_p1, %p1105_p10 }
  0x33   : > { %p1103_p7 = pneg %p1102_p5 }
  0x35   : > { %p1108_p0 = pnand %p1107_p2, %p1103_p7 }
  0x37   : > { %1111 = shalt.err (!%p1108_p0)
}
  0x38   : > { %s1112_s26 = scalar_lea.vmem %s294_s20, 512  ;;  %s1260_s14 = smov [#allocation2]  }
  0x39   : > { %p1113_p3 = scmp.ne.s32.totalorder %s294_s20, %s1112_s26  ;;  %s1117_s22 = sshll.u32 %s1260_s14, 4  ;;  %s1118_s22 = int_to_ptr.vmem [resolvable:$false] %s1117_s22 }
  0x3a   : > { %s1119_s24 = scalar_lea.vmem %s1118_s22, 1024  ;;  %p1120_p5 = scmp.lt.s32.totalorder %s294_s20, %s1118_s22 }
  0x3b   : > { %p1115_p6 = pnand %p1113_p3, %p1101_p13  ;;  %p1121_p9 = scmp.lt.s32.totalorder %s1119_s24, %s1112_s26 }
  0x3d   : > { %p1116_p12 = pneg %p1115_p6  ;;  %p1122_p4 = por %p1121_p9, %p1120_p5 }
  0x3f   : > { %p1123_p8 = pnand %p1122_p4, %p1116_p12 }
  0x41   : > { %1126 = shalt.err (!%p1123_p8)
}
  0x42   : > { %1011 = dma.hbm_to_vmem [thread:$0]  (!%p1415_p11), %s1412_s18, 512, %s294_s20, %s282_s17  }
  0x43   : > { %s300_s29 = sand.u32 1, %s1257_s30   ;;  %s304_s12 = scalar_lea.vmem [#allocation5], %s1406_s10 }
  0x44   : > { %s312_s16 = sshll.u32 %s304_s12, 4  ;;  %s301_s23 = scalar_lea.sflag [#allocation6], %s300_s29  ;;  %s313_s16 = int_to_ptr.vmem [resolvable:$true] %s312_s16 }
  0x45   : > { %s1127_s15 = scalar_lea.hbm %s1422_s2, 512  ;;  %s1132_s14 = scalar_lea.hbm %s1767_s1, 1024 }
  0x46   : > { %p1128_p6 = scmp.ne.s32.totalorder %s1422_s2, %s1127_s15  ;;  %p1133_p9 = scmp.lt.s32.totalorder %s1422_s2, %s1767_s1 }
  0x47   : > { %p1134_p7 = scmp.lt.s32.totalorder %s1132_s14, %s1127_s15 }
  0x48   : > { %p1130_p4 = pnand %p1128_p6, %p1101_p13 }
  0x49   : > { %p1135_p10 = por %p1134_p7, %p1133_p9 }
  0x4a   : > { %p1131_p8 = pneg %p1130_p4 }
  0x4c   : > { %p1136_p1 = pnand %p1135_p10, %p1131_p8 }
  0x4e   : > { %1139 = shalt.err (!%p1136_p1)
}
  0x4f   : > { %s1140_s10 = scalar_lea.vmem %s313_s16, 512  ;;  %s1261_s18 = smov [#allocation5]  }
  0x50   : > { %p1141_p2 = scmp.ne.s32.totalorder %s313_s16, %s1140_s10  ;;  %s1145_s20 = sshll.u32 %s1261_s18, 4  ;;  %s1146_s20 = int_to_ptr.vmem [resolvable:$false] %s1145_s20 }
  0x51   : > { %s1147_s17 = scalar_lea.vmem %s1146_s20, 1024  ;;  %p1148_p12 = scmp.lt.s32.totalorder %s313_s16, %s1146_s20 }
  0x52   : > { %p1143_p0 = pnand %p1141_p2, %p1101_p13  ;;  %p1149_p5 = scmp.lt.s32.totalorder %s1147_s17, %s1140_s10 }
  0x54   : > { %p1144_p3 = pneg %p1143_p0  ;;  %p1150_p6 = por %p1149_p5, %p1148_p12 }
  0x56   : > { %p1151_p4 = pnand %p1150_p6, %p1144_p3 }
  0x58   : > { %1154 = shalt.err (!%p1151_p4)
}
  0x59   : > { %1014 = dma.hbm_to_vmem [thread:$0]  (!%p1415_p11), %s1422_s2, 512, %s313_s16, %s301_s23  }
  0x5a   : > { %p1797_p8 = scmp.ne.s32.totalorder %s1788_s13, 0 }
  0x5b   : > { %s1467_s29 = sand.u32 (!%p1797_p8), 1, %s1249_s28   ;;  %p1798_p13 = scmp.ne.s32.totalorder (!%p1797_p8), %s1785_s11, 0 }
  0x5c   : > { %321 = sbr.rel (%p1797_p8) target bundleno = 369 (0x171), region = 48  ;;  %s1470_s12 = sshll.u32 (!%p1797_p8), %s1467_s29, 5 }
  0x5d   : > { %s324_s15 = scalar_lea.sflag (!%p1797_p8), [#allocation3], %s1467_s29  ;;  %s327_s19 = scalar_lea.vmem (!%p1797_p8), [#allocation2], %s1470_s12 }
  0x61   : > { %1224 = dma.done.wait (%p1798_p13), %s324_s15, 512  }
  0x62   : > { %1226 = vsyncadd (%p1798_p13), %s324_s15, 4294966784  ;;  %s332_s2 = sand.u32 1, %s1335_s9   ;;  %s1480_s21 = scalar_lea.vmem [#allocation5], %s1470_s12 }
  0x63   : > { %s333_s13 = scalar_lea.sflag [#allocation6], %s332_s2 }
  0x64   : > { %1228 = dma.done.wait (%p1798_p13), %s333_s13, 512  }
  0x65   : > { %1230 = vsyncadd (%p1798_p13), %s333_s13, 4294966784  ;;  %p1799_p11 = scmp.eq.s32.totalorder %s1335_s9, 0 }
  0x67   : > { %1232 = dma.done.wait (%p1799_p11), [#allocation6], 128   ;;  %p1800_p9 = pmov %p1799_p11 }
  0x68   : > { %v583_v0 = vlaneseq  ;;  %v1262_v1 = vmov 0.0   ;;  %v1263_v2 = vmov 0   ;;  %v1490_v4 = vld [vmem:[%s327_s19 + $0x8] sm:$0xff]  ;;  %v1492_v5 = vld [vmem:[%s327_s19 + $0x18] sm:$0xff]  ;;  %vm398_vm0 = vcmask 64512   ;;  %v1496_v7 = vld [vmem:[%s327_s19] sm:$0xff] }
  0x69   : > { %1234 = vsyncadd (%p1800_p9), [#allocation6], 4294967168  ;;  %466 = vmatprep.mubr.f32.mxu0 %v1262_v1  ;;  %537 = vmatprep.mubr.f32.mxu1 %v1262_v1  ;;  %v1499_v8 = vld [vmem:[%s327_s19 + $0x10] sm:$0xff]  ;;  %v391_v9 = vld [vmem:[%s1769_s3] sm:$0xff]  ;;  %s990_s18 = sshll.u32 %s1335_s9, 9  ;;  %s375_s20 = scalar_lea.vmem [#allocation8], %s1470_s12 }
  0x6a   : > { %1064 = vset.pattern.permute.xlu0 %v1263_v2  ;;  %v584_v3 = vshrl.u32 %v583_v0, 7  ;;  %432 = vmatprep.subr.mxu0 %v1490_v4  ;;  %v392_v11 = vld [vmem:[%s1770_s4] sm:$0xff]  ;;  %v550_v55 = vld [vmem:[%s1480_s21 + $0x10] sm:$0xff]  ;;  %v549_v57 = vld [vmem:[%s1480_s21 + $0x8] sm:$0xff]  ;;  %s812_s17 = sshll.u32 %s375_s20, 4  ;;  %s977_s15 = sshll.u32 %s1467_s29, 8  ;;  %s1558_s17 = int_to_ptr.vmem [resolvable:$true] %s812_s17 }
  0x6b   : > { %503 = vmatprep.subr.mxu1 %v1492_v5  ;;  %433 = vmatpush1.msra.mxu0 %v1496_v7  ;;  %v639_v12 = vld [vmem:[#allocation7] sm:$0xff]  ;;  %v551_v58 = vld [vmem:[%s1480_s21 + $0x18] sm:$0xff]  ;;  %v554_v60 = vsub.f32 %v1499_v8, %v550_v55  ;;  %v553_v61 = vsub.f32 %v1490_v4, %v549_v57  ;;  %s1556_s2 = scalar_lea.hbm %s1773_s7, %s990_s18  ;;  %s793_s13 = scalar_lea.sflag [#allocation4], %s1467_s29 }
  0x6c   : > { %v585_v6 = vsub.s32 0, %v584_v3  ;;  %v592_v10 = vsub.s32 1, %v584_v3  ;;  %504 = vmatpush1.msra.mxu1 %v1499_v8  ;;  %978 = vmatmul.mubr.msk.f32.vlgmr.msra.gmra.mxu0 %vm398_vm0, %v391_v9  ;;  %v599_v14 = vsub.s32 2, %v584_v3  ;;  %v556_v15 = vld [vmem:[%s1771_s5] sm:$0xff]  ;;  %v606_v17 = vsub.s32 3, %v584_v3  ;;  %p1801_p10 = scmp.ne.s32.totalorder %s1795_s25, 0 }
  0x6d   : > { %979 = vmatmul.mubr.msk.f32.vlgmr.msra.gmra.mxu1 %vm398_vm0, %v391_v9  ;;  %395 = vperm.xlu0 %1064, %v392_v11   ;;  %v613_v19 = vsub.s32 4, %v584_v3  ;;  %v620_v21 = vsub.s32 5, %v584_v3  ;;  %v627_v23 = vsub.s32 6, %v584_v3  ;;  %v634_v25 = vsub.s32 7, %v584_v3  ;;  %v582_v27 = vld [vmem:[%s1772_s6] sm:$0xff]  ;;  %s1264_s11 = smov [#allocation8]  }
  0x6e   : > { %v643_v13 = vrot.slane %v639_v12, %v585_v6  ;;  %v650_v16 = vrot.slane %v639_v12, %v592_v10  ;;  %v657_v18 = vrot.slane %v639_v12, %v599_v14  ;;  %v664_v20 = vrot.slane %v639_v12, %v606_v17  ;;  %v548_v53 = vld [vmem:[%s1480_s21] sm:$0xff]  ;;  %s1155_s21 = scalar_lea.vmem %s1558_s17, 512  ;;  %s1159_s16 = sshll.u32 %s1264_s11, 4  ;;  %s1160_s16 = int_to_ptr.vmem [resolvable:$false] %s1159_s16 }
  0x6f   : > { %v671_v22 = vrot.slane %v639_v12, %v613_v19  ;;  %v678_v24 = vrot.slane %v639_v12, %v620_v21  ;;  %v685_v26 = vrot.slane %v639_v12, %v627_v23  ;;  %v692_v28 = vrot.slane %v639_v12, %v634_v25  ;;  %p1156_p7 = scmp.ne.s32.totalorder %s1558_s17, %s1155_s21  ;;  %s1161_s23 = scalar_lea.vmem %s1160_s16, 1024 }
  0x70   : > { %645 = vbcast.lane.b32.xlu1 %v643_v13, 256  ;;  %v586_v29 = vrot.slane %v582_v27, %v585_v6  ;;  %v593_v30 = vrot.slane %v582_v27, %v592_v10  ;;  %v600_v31 = vrot.slane %v582_v27, %v599_v14  ;;  %v607_v32 = vrot.slane %v582_v27, %v606_v17  ;;  %p1162_p0 = scmp.lt.s32.totalorder %s1558_s17, %s1160_s16  ;;  %p1163_p3 = scmp.lt.s32.totalorder %s1161_s23, %s1155_s21 }
  0x71   : > { %559 = vperm.xlu0 %1064, %v556_v15   ;;  %v614_v33 = vrot.slane %v582_v27, %v613_v19  ;;  %v621_v34 = vrot.slane %v582_v27, %v620_v21  ;;  %v628_v35 = vrot.slane %v582_v27, %v627_v23  ;;  %v635_v36 = vrot.slane %v582_v27, %v634_v25  ;;  %p1157_p1 = pnand %p1156_p7, %p1801_p10 }
  0x72   : > { %v552_v59 = vsub.f32 %v1496_v7, %v548_v53  ;;  %v555_v62 = vsub.f32 %v1492_v5, %v551_v58  ;;  %p1164_p12 = por %p1163_p3, %p1162_p0 }
  0x73   : > { %p1158_p2 = pneg %p1157_p1 }
  0x74   : > { %652 = vbcast.lane.b32.xlu1 %v650_v16, 256 }
  0x75   : > { %659 = vbcast.lane.b32.xlu0 %v657_v18, 256  ;;  %p1165_p5 = pnand %p1164_p12, %p1158_p2 }
  0x78   : > { %666 = vbcast.lane.b32.xlu1 %v664_v20, 256 }
  0x79   : > { %673 = vbcast.lane.b32.xlu0 %v671_v22, 256 }
  0x7c   : > { %680 = vbcast.lane.b32.xlu1 %v678_v24, 256 }
  0x7d   : > { %687 = vbcast.lane.b32.xlu0 %v685_v26, 256 }
  0x80   : > { %694 = vbcast.lane.b32.xlu1 %v692_v28, 256 }
  0x81   : > { %588 = vbcast.lane.b32.xlu0 %v586_v29, 256 }
  0x84   : > { %595 = vbcast.lane.b32.xlu1 %v593_v30, 256 }
  0x85   : > { %602 = vbcast.lane.b32.xlu0 %v600_v31, 256 }
  0x88   : > { %609 = vbcast.lane.b32.xlu1 %v607_v32, 256 }
  0x89   : > { %616 = vbcast.lane.b32.xlu0 %v614_v33, 256 }
  0x8c   : > { %623 = vbcast.lane.b32.xlu1 %v621_v34, 256 }
  0x8d   : > { %630 = vbcast.lane.b32.xlu0 %v628_v35, 256 }
  0x90   : > { %637 = vbcast.lane.b32.xlu1 %v635_v36, 256 }
  0xe2   : > { %v1514_v37 = vpop.permute.xlu1 %645 }
  0xe6   : > { %v1516_v39 = vpop.permute.xlu1 %652 }
  0xe8   : > { %v396_v38 = vpop.permute.xlu0 %395 }
  0xea   : > { %v1518_v41 = vpop.permute.xlu1 %666 }
  0xec   : > { %v560_v40 = vpop.permute.xlu0 %559 }
  0xed   : > { %v562_v0 = vmul.f32 %v560_v40, %v552_v59  ;;  %v564_v3 = vmul.f32 %v560_v40, %v554_v60  ;;  %v563_v9 = vmul.f32 %v560_v40, %v553_v61  ;;  %v565_v4 = vmul.f32 %v560_v40, %v555_v62 }
  0xee   : > { %v1522_v47 = vpop.permute.xlu1 %680 }
  0xf0   : > { %v1520_v42 = vpop.permute.xlu0 %659 }
  0xf2   : > { %v1527_v54 = vpop.permute.xlu1 %694 }
  0xf4   : > { %v1524_v49 = vpop.permute.xlu0 %673 }
  0xf6   : > { %v1538_v63 = vpop.permute.xlu1 %595 }
  0xf8   : > { %v1530_v56 = vpop.permute.xlu0 %687 }
  0xfa   : > { %v1549_v19 = vpop.permute.xlu1 %609 }
  0xfc   : > { %v1540_v1 = vpop.permute.xlu0 %588 }
 0x100   : > { %v1572_v24 = vpop.permute.xlu0 %602 }
 0x12c   : > { %v468_v43 = vpop.f32.mrf.mxu0 }
 0x12d   : > { %v469_v44 = vadd.f32 %v468_v43, %v396_v38  ;;  %v539_v45 = vpop.f32.mrf.mxu1 }
 0x12e   : > { %v540_v46 = vadd.f32 %v539_v45, %v396_v38  ;;  %v470_v48 = vpop.f32.mrf.mxu0 }
 0x12f   : > { %1065 = vtanh.f32 %v469_v44  ;;  %v471_v50 = vadd.f32 %v470_v48, %v396_v38  ;;  %v541_v51 = vpop.f32.mrf.mxu1 }
 0x130   : > { %1067 = vtanh.f32 %v540_v46  ;;  %v542_v52 = vadd.f32 %v541_v51, %v396_v38 }
 0x131   : > { %1069 = vtanh.f32 %v471_v50 }
 0x132   : > { %1071 = vtanh.f32 %v542_v52 }
 0x13c   : > { %v1066_v2 = vpop.eup %1065 }
 0x13d   : > { %v1068_v6 = vpop.eup %1067  ;;  %v566_v10 = vsub.f32 %v562_v0, %v1066_v2  ;;  %v574_v11 = vmul.f32 %v1066_v2, %v1066_v2 }
 0x13e   : > { %v1070_v7 = vpop.eup %1069  ;;  %v568_v8 = vsub.f32 %v564_v3, %v1068_v6  ;;  %v576_v5 = vmul.f32 %v1068_v6, %v1068_v6 }
 0x13f   : > { %v1072_v12 = vpop.eup %1071  ;;  %v1544_v13 = vsub.f32 1.0, %v574_v11  ;;  %v567_v14 = vsub.f32 %v563_v9, %v1070_v7  ;;  %v575_v15 = vmul.f32 %v1070_v7, %v1070_v7  ;;  %570 = vst [vmem:[%s375_s20] sm:$0xff] %v566_v10 }
 0x140   : > { %v1547_v16 = vsub.f32 1.0, %v576_v5  ;;  %v569_v17 = vsub.f32 %v565_v4, %v1072_v12  ;;  %v577_v18 = vmul.f32 %v1072_v12, %v1072_v12  ;;  %572 = vst [vmem:[%s375_s20 + $0x10] sm:$0xff] %v568_v8 }
 0x141   : > { %v1562_v20 = vmul.f32 %v1522_v47, %v1544_v13  ;;  %v1566_v21 = vmul.f32 %v1524_v49, %v1544_v13  ;;  %v1568_v22 = vsub.f32 1.0, %v575_v15  ;;  %v700_v23 = vmul.f32 %v1516_v39, %v1544_v13  ;;  %571 = vst [vmem:[%s375_s20 + $0x8] sm:$0xff] %v567_v14 }
 0x142   : > { %v1576_v25 = vmul.f32 %v1522_v47, %v1547_v16  ;;  %v1580_v26 = vmul.f32 %v1524_v49, %v1547_v16  ;;  %v1582_v27 = vsub.f32 1.0, %v577_v18  ;;  %v702_v28 = vmul.f32 %v1516_v39, %v1547_v16  ;;  %573 = vst [vmem:[%s375_s20 + $0x18] sm:$0xff] %v569_v17 }
 0x143   : > { %v701_v29 = vmul.f32 %v1516_v39, %v1568_v22  ;;  %v732_v30 = vsub.f32 %v1538_v63, %v700_v23  ;;  %v696_v31 = vmul.f32 %v1514_v37, %v1544_v13  ;;  %v697_v32 = vmul.f32 %v1514_v37, %v1568_v22 }
 0x144   : > { %1168 = shalt.err (!%p1165_p5)
}
 0x145   : > { %s1169_s26 = scalar_lea.hbm %s1556_s2, 512  ;;  %s1173_s24 = scalar_lea.hbm %s1773_s7, 1024 }
 0x146   : > { %p1170_p6 = scmp.ne.s32.totalorder %s1556_s2, %s1169_s26  ;;  %p1174_p13 = scmp.lt.s32.totalorder %s1556_s2, %s1773_s7 }
 0x147   : > { %p1175_p11 = scmp.lt.s32.totalorder %s1173_s24, %s1169_s26 }
 0x148   : > { %p1171_p4 = pnand %p1170_p6, %p1801_p10 }
 0x149   : > { %p1176_p9 = por %p1175_p11, %p1174_p13 }
 0x14a   : > { %p1172_p8 = pneg %p1171_p4 }
 0x14c   : > { %p1177_p7 = pnand %p1176_p9, %p1172_p8 }
 0x14e   : > { %1180 = shalt.err (!%p1177_p7)
}
 0x14f   : > { %1000 = dma.vmem_to_hbm [thread:$0]  (%p1801_p10), %s1558_s17, 512, %s1556_s2, %s793_s13   ;;  %v703_v33 = vmul.f32 %v1516_v39, %v1582_v27  ;;  %v734_v34 = vsub.f32 %v1538_v63, %v702_v28  ;;  %v698_v35 = vmul.f32 %v1514_v37, %v1547_v16  ;;  %v699_v36 = vmul.f32 %v1514_v37, %v1582_v27  ;;  %v624_v48 = vpop.permute.xlu1 %623  ;;  %v617_v55 = vpop.permute.xlu0 %616 }
 0x150   : > { %v733_v38 = vsub.f32 %v1538_v63, %v701_v29  ;;  %s1624_s12 = scalar_lea.vmem [#allocation9], %s977_s15  ;;  %v728_v39 = vsub.f32 %v1540_v1, %v696_v31  ;;  %v729_v40 = vsub.f32 %v1540_v1, %v697_v32  ;;  %v708_v43 = vmul.f32 %v1518_v41, %v1544_v13  ;;  %s1713_s2 = scalar_lea.hbm %s1774_s8, %s990_s18 }
 0x151   : > { %764 = vst [vmem:[%s1624_s12 + $0x20] sm:$0xff] %v732_v30  ;;  %v735_v37 = vsub.f32 %v1538_v63, %v703_v33  ;;  %766 = vst [vmem:[%s1624_s12 + $0x30] sm:$0xff] %v734_v34  ;;  %v730_v44 = vsub.f32 %v1540_v1, %v698_v35  ;;  %v731_v45 = vsub.f32 %v1540_v1, %v699_v36  ;;  %s825_s17 = sshll.u32 %s1624_s12, 4  ;;  %s798_s9 = scalar_lea.sflag [#allocation10], %s1467_s29  ;;  %s1718_s17 = int_to_ptr.vmem [resolvable:$true] %s825_s17 }
 0x152   : > { %v709_v46 = vmul.f32 %v1518_v41, %v1568_v22  ;;  %765 = vst [vmem:[%s1624_s12 + $0x28] sm:$0xff] %v733_v38  ;;  %760 = vst [vmem:[%s1624_s12] sm:$0xff] %v728_v39  ;;  %v710_v50 = vmul.f32 %v1518_v41, %v1547_v16  ;;  %v711_v51 = vmul.f32 %v1518_v41, %v1582_v27  ;;  %s1181_s13 = scalar_lea.vmem %s1718_s17, 4096  ;;  %s1265_s18 = smov [#allocation9]  }
 0x153   : > { %761 = vst [vmem:[%s1624_s12 + $0x8] sm:$0xff] %v729_v40  ;;  %v740_v52 = vsub.f32 %v1549_v19, %v708_v43  ;;  %v704_v53 = vmul.f32 %v1520_v42, %v1544_v13  ;;  %767 = vst [vmem:[%s1624_s12 + $0x38] sm:$0xff] %v735_v37  ;;  %v705_v58 = vmul.f32 %v1520_v42, %v1568_v22  ;;  %v638_v8 = vpop.permute.xlu1 %637  ;;  %v631_v15 = vpop.permute.xlu0 %630  ;;  %p1182_p1 = scmp.ne.s32.totalorder %s1718_s17, %s1181_s13  ;;  %s1185_s21 = sshll.u32 %s1265_s18, 4  ;;  %s1186_s21 = int_to_ptr.vmem [resolvable:$false] %s1185_s21 }
 0x154   : > { %762 = vst [vmem:[%s1624_s12 + $0x10] sm:$0xff] %v730_v44  ;;  %763 = vst [vmem:[%s1624_s12 + $0x18] sm:$0xff] %v731_v45  ;;  %v741_v57 = vsub.f32 %v1549_v19, %v709_v46  ;;  %v706_v41 = vmul.f32 %v1520_v42, %v1547_v16  ;;  %v707_v59 = vmul.f32 %v1520_v42, %v1582_v27  ;;  %s1187_s11 = scalar_lea.vmem %s1186_s21, 8192  ;;  %p1188_p3 = scmp.lt.s32.totalorder %s1718_s17, %s1186_s21 }
 0x155   : > { %v742_v60 = vsub.f32 %v1549_v19, %v710_v50  ;;  %v743_v61 = vsub.f32 %v1549_v19, %v711_v51  ;;  %772 = vst [vmem:[%s1624_s12 + $0x60] sm:$0xff] %v740_v52  ;;  %v736_v62 = vsub.f32 %v1572_v24, %v704_v53  ;;  %v717_v63 = vmul.f32 %v1522_v47, %v1568_v22  ;;  %p1183_p2 = pnand %p1182_p1, %p1801_p10  ;;  %p1189_p12 = scmp.lt.s32.totalorder %s1187_s11, %s1181_s13 }
 0x156   : > { %773 = vst [vmem:[%s1624_s12 + $0x68] sm:$0xff] %v741_v57  ;;  %v737_v0 = vsub.f32 %v1572_v24, %v705_v58  ;;  %v738_v1 = vsub.f32 %v1572_v24, %v706_v41  ;;  %v739_v42 = vsub.f32 %v1572_v24, %v707_v59  ;;  %v719_v2 = vmul.f32 %v1522_v47, %v1582_v27 }
 0x157   : > { %774 = vst [vmem:[%s1624_s12 + $0x70] sm:$0xff] %v742_v60  ;;  %775 = vst [vmem:[%s1624_s12 + $0x78] sm:$0xff] %v743_v61  ;;  %v748_v3 = vsub.f32 %v624_v48, %v1562_v20  ;;  %v749_v6 = vsub.f32 %v624_v48, %v717_v63  ;;  %v750_v9 = vsub.f32 %v624_v48, %v1576_v25  ;;  %p1184_p0 = pneg %p1183_p2  ;;  %p1190_p5 = por %p1189_p12, %p1188_p3 }
 0x158   : > { %768 = vst [vmem:[%s1624_s12 + $0x40] sm:$0xff] %v736_v62  ;;  %v713_v10 = vmul.f32 %v1524_v49, %v1568_v22  ;;  %769 = vst [vmem:[%s1624_s12 + $0x48] sm:$0xff] %v737_v0  ;;  %v751_v47 = vsub.f32 %v624_v48, %v719_v2  ;;  %v715_v11 = vmul.f32 %v1524_v49, %v1582_v27 }
 0x159   : > { %770 = vst [vmem:[%s1624_s12 + $0x50] sm:$0xff] %v738_v1  ;;  %771 = vst [vmem:[%s1624_s12 + $0x58] sm:$0xff] %v739_v42  ;;  %v744_v7 = vsub.f32 %v617_v55, %v1566_v21  ;;  %v746_v4 = vsub.f32 %v617_v55, %v1580_v26  ;;  %v724_v12 = vmul.f32 %v1527_v54, %v1544_v13  ;;  %p1191_p6 = pnand %p1190_p5, %p1184_p0 }
 0x15a   : > { %780 = vst [vmem:[%s1624_s12 + $0xa0] sm:$0xff] %v748_v3  ;;  %781 = vst [vmem:[%s1624_s12 + $0xa8] sm:$0xff] %v749_v6  ;;  %v745_v5 = vsub.f32 %v617_v55, %v713_v10  ;;  %v725_v14 = vmul.f32 %v1527_v54, %v1568_v22  ;;  %v726_v49 = vmul.f32 %v1527_v54, %v1547_v16 }
 0x15b   : > { %782 = vst [vmem:[%s1624_s12 + $0xb0] sm:$0xff] %v750_v9  ;;  %783 = vst [vmem:[%s1624_s12 + $0xb8] sm:$0xff] %v751_v47  ;;  %v747_v17 = vsub.f32 %v617_v55, %v715_v11  ;;  %v727_v18 = vmul.f32 %v1527_v54, %v1582_v27  ;;  %v720_v19 = vmul.f32 %v1530_v56, %v1544_v13 }
 0x15c   : > { %776 = vst [vmem:[%s1624_s12 + $0x80] sm:$0xff] %v744_v7  ;;  %778 = vst [vmem:[%s1624_s12 + $0x90] sm:$0xff] %v746_v4  ;;  %v721_v20 = vmul.f32 %v1530_v56, %v1568_v22  ;;  %v756_v21 = vsub.f32 %v638_v8, %v724_v12  ;;  %v757_v23 = vsub.f32 %v638_v8, %v725_v14 }
 0x15d   : > { %777 = vst [vmem:[%s1624_s12 + $0x88] sm:$0xff] %v745_v5  ;;  %v758_v24 = vsub.f32 %v638_v8, %v726_v49  ;;  %v722_v25 = vmul.f32 %v1530_v56, %v1547_v16  ;;  %779 = vst [vmem:[%s1624_s12 + $0x98] sm:$0xff] %v747_v17  ;;  %v759_v54 = vsub.f32 %v638_v8, %v727_v18 }
 0x15e   : > { %v723_v13 = vmul.f32 %v1530_v56, %v1582_v27  ;;  %v752_v22 = vsub.f32 %v631_v15, %v720_v19  ;;  %v753_v26 = vsub.f32 %v631_v15, %v721_v20  ;;  %788 = vst [vmem:[%s1624_s12 + $0xe0] sm:$0xff] %v756_v21  ;;  %789 = vst [vmem:[%s1624_s12 + $0xe8] sm:$0xff] %v757_v23 }
 0x15f   : > { %790 = vst [vmem:[%s1624_s12 + $0xf0] sm:$0xff] %v758_v24  ;;  %v754_v16 = vsub.f32 %v631_v15, %v722_v25  ;;  %791 = vst [vmem:[%s1624_s12 + $0xf8] sm:$0xff] %v759_v54 }
 0x160   : > { %v755_v56 = vsub.f32 %v631_v15, %v723_v13  ;;  %784 = vst [vmem:[%s1624_s12 + $0xc0] sm:$0xff] %v752_v22  ;;  %785 = vst [vmem:[%s1624_s12 + $0xc8] sm:$0xff] %v753_v26 }
 0x161   : > { %786 = vst [vmem:[%s1624_s12 + $0xd0] sm:$0xff] %v754_v16 }
 0x162   : > { %787 = vst [vmem:[%s1624_s12 + $0xd8] sm:$0xff] %v755_v56 }
 0x163   : > { %1194 = shalt.err (!%p1191_p6)
}
 0x164   : > { %s1195_s16 = scalar_lea.hbm %s1713_s2, 4096  ;;  %s1199_s14 = scalar_lea.hbm %s1774_s8, 8192 }
 0x165   : > { %p1196_p4 = scmp.ne.s32.totalorder %s1713_s2, %s1195_s16  ;;  %p1200_p11 = scmp.lt.s32.totalorder %s1713_s2, %s1774_s8 }
 0x166   : > { %p1201_p9 = scmp.lt.s32.totalorder %s1199_s14, %s1195_s16 }
 0x167   : > { %p1197_p8 = pnand %p1196_p4, %p1801_p10 }
 0x168   : > { %p1202_p7 = por %p1201_p9, %p1200_p11 }
 0x169   : > { %p1198_p13 = pneg %p1197_p8 }
 0x16b   : > { %p1203_p1 = pnand %p1202_p7, %p1198_p13 }
 0x16d   : > { %1206 = shalt.err (!%p1203_p1)
}
 0x16e   : > { %s1266_s10 = smov 512   ;;  %s1267_s20 = smov 1024  }
 0x16f   : > { %s1268_s12 = smov 32  }
 0x170   : > { %1001 = dma.vmem_to_hbm [thread:$0]  (%p1801_p10), %s1718_s17, 4096, %s1713_s2, %s798_s9, %s1266_s10, %s1267_s20, %s1268_s12  }
 0x171 PF: > { %s1802_s15 = sld [smem:[#allocation17_spill]]  ;;  %s840_s19 = sand.u32 1, %s1245_s27  }
 0x172   : > { %p1804_p0 = scmp.ge.s32.totalorder %s1257_s30, 2  ;;  %s841_s13 = scalar_lea.sflag [#allocation4], %s840_s19 }
 0x177   : > { %p1803_p2 = scmp.ne.s32.totalorder %s1802_s15, 0 }
 0x179   : > { %p1016_p3 = pnand %p1804_p0, %p1803_p2 }
 0x17b   : > { %p1017_p12 = pneg %p1016_p3 }
 0x17d   : > { %1236 = dma.done.wait (%p1017_p12), %s841_s13, 512  }
 0x17e   : > { %1238 = vsyncadd (%p1017_p12), %s841_s13, 4294966784  ;;  %s850_s18 = scalar_lea.sflag [#allocation10], %s840_s19 }
 0x17f   : > { %1240 = dma.done.wait (%p1017_p12), %s850_s18, 4096  }
 0x180   : > { %1242 = vsyncadd (%p1017_p12), %s850_s18, 4294963200  ;;  %s1805_s30 = sld [smem:[#allocation18_spill]]  ;;  %s1808_s27 = smov %s1249_s28 }
 0x181   : > { %s1806_s25 = sld [smem:[#allocation16_spill]] }
 0x182   : > { %s1807_s29 = sld [smem:[#allocation19_spill]] }
 0x186   : > { %p28_p10 = scmp.ge.s32.totalorder %s1805_s30, 4  }
 0x187   : > { %s1809_s28 = smov %s1806_s25 }
 0x188   :  { %30 = sbr.rel (!%p28_p10) target bundleno = 11 (0xb), region = 127 }
 0x18d   :  { %855 = vsyncpa [#allocation3], 1 }
 0x18e   :  { %857 = vsyncpa [#allocation3 + $0x1], 1 }
 0x18f   :  { %858 = vsyncpa [#allocation6], 1 }
 0x190   :  { %860 = vsyncpa [#allocation6 + $0x1], 1 }
 0x191   :  { %861 = vsyncpa [#allocation4], 1 }
 0x192   :  { %863 = vsyncpa [#allocation4 + $0x1], 1 }
 0x193   :  { %864 = vsyncpa [#allocation10], 1 }
 0x194   :  { %866 = vsyncpa [#allocation10 + $0x1], 1 }

// kernel: custom-call.35
= control target key start
LH: loop header
LB: loop body
LE: loop exit
PB: predicated region body
PF: predicated region fallthrough
CT: control target
= control target key end

     0   :  { %5 = vsyncpa [#allocation1], 0  ;;  %s906_s0 = inlined_call_operand.hbm [shape: f32[1024,8,8], index: 0, kind: input, shape index: {}]   ;;  %s907_s1 = inlined_call_operand.vmem [shape: f32[1024,8,8], index: 1, kind: output, shape index: {0}]   ;;  %s908_s2 = inlined_call_operand.hbm [shape: s32[1024,8], index: 2, kind: output, shape index: {1}]   ;;  %s909_s3 = inlined_call_operand.vmem [shape: s32[1024,8], index: 3, kind: output, shape index: {2}]  }
   0x1   :  { %7 = vsyncpa [#allocation1 + $0x1], 0 }
   0x2   :  { %8 = vsyncpa [#allocation2], 0 }
   0x3   :  { %10 = vsyncpa [#allocation2 + $0x1], 0  ;;  %s713_s12 = smov 0   ;;  %s715_s13 = smov 0  }
   0x4   :  { %s717_s14 = smov 0   ;;  %s719_s15 = smov 0  }
   0x5 LB: > { %s734_s16 = sadd.s32 4294967295, %s684_s15   ;;  %s518_s17 = sadd.s32 4294967294, %s684_s15   ;;  %s684_s15 = sphi %s719_s15, %s918_s15   ;;  %s680_s14 = sphi %s717_s14, %s917_s14   ;;  %s676_s13 = sphi %s715_s13, %s916_s13   ;;  %s672_s12 = sphi %s713_s12, %s915_s12  }
   0x6   : > { %s738_s18 = sadd.s32 1, %s684_s15   ;;  %s20_s19 = sshrl.u32 %s684_s15, 3 }
   0x7   : > { %s21_s20 = sshrl.u32 %s738_s18, 3  ;;  %s25_s21 = sadd.s32 1, %s680_s14 }
   0x8   : > { %s22_s22 = ssub.s32 %s20_s19, %s21_s20  ;;  %p35_p0 = scmp.ne.s32.totalorder %s680_s14, %s676_s13 }
   0x9   : > { %p23_p1 = scmp.eq.s32.totalorder %s22_s22, 0  ;;  %p36_p2 = scmp.eq.s32.totalorder %s734_s16, 1023 }
   0xa   : > { %p41_p3 = scmp.ne.s32.totalorder %s676_s13, %s672_s12  ;;  %p42_p4 = scmp.eq.s32.totalorder %s518_s17, 1023 }
   0xb   : > { %s749_s23 = scalar_select %p23_p1, %s680_s14, %s25_s21  }
   0xc   : > { %p751_p5 = por %p36_p2, %p35_p0  ;;  %p755_p6 = por %p42_p4, %p41_p3 }
   0xd   : > { %p547_p7 = scmp.lt.s32.totalorder %s684_s15, 1024  ;;  %s87_s26 = sand.u32 1, %s684_s15  }
   0xe   : > { %s911_s25 = scalar_select %p755_p6, 1, 0 }
   0xf   : > { %s522_s27 = sshll.u32 %s684_s15, 7  ;;  %s521_s28 = sshll.u32 %s87_s26, 3 }
  0x10   : > { %s765_s4 = scalar_lea.hbm %s906_s0, %s522_s27  ;;  %s91_s5 = scalar_lea.vmem [#allocation0], %s521_s28 }
  0x11   : > { %s98_s6 = sshll.u32 %s91_s5, 4  ;;  %s88_s7 = scalar_lea.sflag [#allocation1], %s87_s26  ;;  %s99_s6 = int_to_ptr.vmem [resolvable:$true] %s98_s6 }
  0x12   : > { %s592_s8 = scalar_lea.hbm %s765_s4, 128  ;;  %s596_s11 = scalar_lea.hbm %s906_s0, 131072 }
  0x13   : > { %p593_p10 = scmp.ne.s32.totalorder %s765_s4, %s592_s8  ;;  %p597_p13 = scmp.lt.s32.totalorder %s765_s4, %s906_s0 }
  0x14   : > { %p598_p0 = scmp.lt.s32.totalorder %s596_s11, %s592_s8 }
  0x15   : > { %p594_p11 = pnand %p593_p10, %p547_p7 }
  0x16   : > { %p599_p1 = por %p598_p0, %p597_p13 }
  0x17   : > { %p595_p12 = pneg %p594_p11 }
  0x19   : > { %p600_p2 = pnand %p599_p1, %p595_p12 }
  0x1b   : > { %603 = shalt.err (!%p600_p2)
}
  0x1c   : > { %s604_s20 = scalar_lea.vmem %s99_s6, 128  ;;  %s690_s21 = smov [#allocation0]  }
  0x1d   : > { %p605_p3 = scmp.ne.s32.totalorder %s99_s6, %s604_s20  ;;  %s608_s22 = sshll.u32 %s690_s21, 4  ;;  %s609_s22 = int_to_ptr.vmem [resolvable:$false] %s608_s22 }
  0x1e   : > { %s610_s26 = scalar_lea.vmem %s609_s22, 256  ;;  %p611_p10 = scmp.lt.s32.totalorder %s99_s6, %s609_s22 }
  0x1f   : > { %p606_p4 = pnand %p605_p3, %p547_p7  ;;  %p612_p11 = scmp.lt.s32.totalorder %s610_s26, %s604_s20 }
  0x21   : > { %p607_p8 = pneg %p606_p4  ;;  %p613_p9 = por %p612_p11, %p611_p10 }
  0x23   : > { %p614_p6 = pnand %p613_p9, %p607_p8 }
  0x25   : > { %617 = shalt.err (!%p614_p6)
}
  0x26   : > { %540 = dma.hbm_to_vmem [thread:$0]  (%p547_p7), %s765_s4, 128, %s99_s6, %s88_s7  }
  0x27   : > { %p912_p12 = scmp.lt.s32.totalorder %s684_s15, 1025  ;;  %p913_p13 = scmp.ge.s32.totalorder %s684_s15, 1 }
  0x29   : > { %p104_p0 = pnand %p913_p13, %p912_p12 }
  0x2b   : > { %107 = sbr.rel (%p104_p0) target bundleno = 451 (0x1c3), region = 20 }
  0x30   : > { %s109_s27 = sand.u32 1, %s734_s16  }
  0x31   : > { %s524_s28 = sshll.u32 %s109_s27, 3  ;;  %s110_s29 = scalar_lea.sflag [#allocation1], %s109_s27 }
  0x32   : > { %s113_s30 = scalar_lea.vmem [#allocation0], %s524_s28 }
  0x33   : > { %664 = dma.done.wait %s110_s29, 128  }
  0x34   : > { %665 = vsyncadd %s110_s29, 4294967168  ;;  %s128_s5 = sand.u32 1, %s676_s13   ;;  %v146_v0 = vlaneseq  ;;  %s141_s4 = sand.u32 7, %s734_s16   ;;  %v691_v2 = vmov 0   ;;  %v139_v3 = vld [vmem:[%s113_s30] sm:$0xff] }
  0x35   : > { %s793_s8 = sshll.u32 %s128_s5, 3  ;;  %s811_s11 = scalar_lea.vmem [#allocation3], %s524_s28 }
  0x36   : > { %v797_v1 = vshrl.u32 %v146_v0, 7  ;;  %s130_s6 = scalar_lea.vmem [#allocation4], %s793_s8  ;;  %s136_s9 = scalar_lea.vmem [#allocation5], %s793_s8  ;;  %140 = vst [vmem:[%s811_s11] sm:$0xff] %v139_v3 }
  0x37   : > { %s802_s7 = scalar_lea.vmem %s130_s6, %s141_s4 [#allocation4]  ;;  %s807_s10 = scalar_lea.vmem %s136_s9, %s141_s4 [#allocation5] }
  0x38   : > { %145 = vst [vmem:[%s802_s7] sm:$0x1] %v691_v2  ;;  %150 = vst [vmem:[#allocation6] sm:$0xff] %v797_v1  ;;  %s814_s17 = smov 0  }
  0x39 LB: >> { %v821_v6 = vstv %s688_s17  ;;  %s207_s19 = ssub.s32 128, %s688_s17  ;;  %v213_v36 = vand.u32 127, %v146_v0  ;;  %s219_s20 = scalar_lea.vmem %s811_s11, %s688_s17 [#allocation3]  ;;  %s688_s17 = sphi %s814_s17, %s156_s17  }
  0x3a   : >> { %vm165_vm0 = vcmp.ge.s32.totalorder %v797_v1, %v821_v6  ;;  %s225_s22 = scalar_lea.vmem [#allocation6], %s688_s17  ;;  %vm245_vm13 = vcmp.gt.s32.totalorder %v797_v1, %v821_v6  ;;  %s156_s17 = sadd.s32 1, %s688_s17  }
  0x3b   : >> { %vm237_vm10 = vcmp.gt.s32.totalorder %v213_v36, %v821_v6  ;;  %vm214_vm11 = vcmp.eq.s32.totalorder %v213_v36, %v821_v6  ;;  %p153_p6 = scmp.ge.s32.totalorder %s156_s17, 8  }
  0x3c   : >> { %vm249_vm15 = vmand %vm245_vm13, %vm214_vm11  ;;  %s532_s28 = sshll.u32 (%p153_p6), %s734_s16, 3 }
  0x3d   : >> { %v161_v4 = vld [vmem:[%s811_s11] sm:$0xff]  ;;  %v221_v39 = vld [vmem:[%s219_s20] ss:$0 sm:$0xff]  ;;  %s319_s4 = scalar_lea.vmem (%p153_p6), %s907_s1, %s532_s28 }
  0x3e   : >> { %v162_v5 = vand.u32 2147483647, %v161_v4 }
  0x3f   : >> { %v216_v38 = vld [vmem:[%s802_s7] ss:$0 sm:$0xff] }
  0x40   : >> { %vm528_vm1 = vcmp.gt.f32.partialorder %v162_v5, -inf  ;;  %v227_v40 = vld [vmem:[%s225_s22] ss:$0 sm:$0xff] }
  0x41   : >> { %vm169_vm2 = vmand %vm165_vm0, %vm528_vm1 }
  0x42   : >> { %v170_v7 = vsel %vm169_vm2, %v797_v1, %v821_v6  ;;  %v171_v8 = vsel %vm169_vm2, %v162_v5, -inf }
  0x43   : >> { %v172_v9 = vrot.slane %v171_v8, 1  ;;  %v173_v10 = vrot.slane %v170_v7, 1 }
  0x45   : >> { %vm174_vm3 = vcmp.ge.f32.partialorder %v172_v9, %v171_v8  ;;  %v177_v11 = vrot.slane %v172_v9, 1  ;;  %v178_v12 = vrot.slane %v173_v10, 1 }
  0x46   : >> { %v175_v13 = vsel %vm174_vm3, %v172_v9, %v171_v8  ;;  %v176_v14 = vsel %vm174_vm3, %v173_v10, %v170_v7 }
  0x47   : >> { %vm179_vm4 = vcmp.ge.f32.partialorder %v177_v11, %v175_v13  ;;  %v182_v15 = vrot.slane %v177_v11, 1  ;;  %v183_v16 = vrot.slane %v178_v12, 1 }
  0x48   : >> { %v180_v17 = vsel %vm179_vm4, %v177_v11, %v175_v13  ;;  %v181_v18 = vsel %vm179_vm4, %v178_v12, %v176_v14 }
  0x49   : >> { %vm184_vm5 = vcmp.ge.f32.partialorder %v182_v15, %v180_v17  ;;  %v187_v19 = vrot.slane %v182_v15, 1  ;;  %v188_v20 = vrot.slane %v183_v16, 1 }
  0x4a   : >> { %v185_v21 = vsel %vm184_vm5, %v182_v15, %v180_v17  ;;  %v186_v22 = vsel %vm184_vm5, %v183_v16, %v181_v18 }
  0x4b   : >> { %vm189_vm6 = vcmp.ge.f32.partialorder %v187_v19, %v185_v21  ;;  %v192_v23 = vrot.slane %v187_v19, 1  ;;  %v193_v24 = vrot.slane %v188_v20, 1 }
  0x4c   : >> { %v190_v25 = vsel %vm189_vm6, %v187_v19, %v185_v21  ;;  %v191_v26 = vsel %vm189_vm6, %v188_v20, %v186_v22 }
  0x4d   : >> { %vm194_vm7 = vcmp.ge.f32.partialorder %v192_v23, %v190_v25  ;;  %v197_v27 = vrot.slane %v192_v23, 1  ;;  %v198_v28 = vrot.slane %v193_v24, 1 }
  0x4e   : >> { %v195_v29 = vsel %vm194_vm7, %v192_v23, %v190_v25  ;;  %v196_v30 = vsel %vm194_vm7, %v193_v24, %v191_v26 }
  0x4f   : >> { %vm199_vm8 = vcmp.ge.f32.partialorder %v197_v27, %v195_v29  ;;  %v202_v31 = vrot.slane %v197_v27, 1  ;;  %v203_v32 = vrot.slane %v198_v28, 1 }
  0x50   : >> { %v200_v33 = vsel %vm199_vm8, %v197_v27, %v195_v29  ;;  %v201_v34 = vsel %vm199_vm8, %v198_v28, %v196_v30 }
  0x51   : >> { %vm204_vm9 = vcmp.ge.f32.partialorder %v202_v31, %v200_v33 }
  0x52   : >> { %v206_v35 = vsel %vm204_vm9, %v203_v32, %v201_v34 }
  0x53   : >> { %208 = vrot.lane.b32.xlu0 %v206_v35, %s207_s19  ;;  %s356_s19 = sshrl.u32 (%p153_p6), %s734_s16, 3 }
  0x54   : > { %s533_s17 = sshll.u32 (%p153_p6), %s356_s19, 7 }
  0xc5   : >> { %v209_v37 = vpop.permute.xlu0 %208 }
  0xc6   : >> { %537 = vpush %v209_v37 }
  0xf7   : >> { %s538_s21 = spop %537 }
  0xf8   : >> { %v215_v41 = vstv %s538_s21  ;;  %s220_s26 = scalar_lea.vmem %s811_s11, %s538_s21 [#allocation3]  ;;  %s226_s27 = scalar_lea.vmem [#allocation6], %s538_s21 }
  0xf9   : >> { %v222_v42 = vld [vmem:[%s220_s26] ss:$0 sm:$0xff]  ;;  %v217_v44 = vsel %vm214_vm11, %v215_v41, %v216_v38 }
  0xfa   : >> { %v228_v43 = vld [vmem:[%s226_s27] ss:$0 sm:$0xff]  ;;  %223 = vst [vmem:[%s220_s26] sm:$0x1] %v221_v39  ;;  %vm231_vm12 = vcmp.ne.f32.partialorder %v222_v42, 0.0  ;;  %218 = vst [vmem:[%s802_s7] sm:$0x1] %v217_v44  ;;  %v238_v51 = vsel %vm237_vm10, %v222_v42, 0.0 }
  0xfb   : >> { %229 = vst [vmem:[%s226_s27] sm:$0x1] %v227_v40  ;;  %224 = vst [vmem:[%s219_s20] sm:$0x1] %v222_v42  ;;  %s363_s7 = sshll.u32 (%p153_p6), %s130_s6, 4  ;;  %s310_s26 = scalar_lea.sflag (%p153_p6), [#allocation2], %s128_s5  ;;  %s364_s7 = int_to_ptr.vmem [resolvable:$true] %s363_s7 }
  0xfc   : >> { %230 = vst [vmem:[%s225_s22] sm:$0x1] %v228_v43  ;;  %vm232_vm14 = vmand %vm214_vm11, %vm231_vm12  ;;  %s361_s22 = scalar_lea.hbm (%p153_p6), %s908_s2, %s533_s17  ;;  %s618_s27 = scalar_lea.vmem (%p153_p6), %s364_s7, 128 }
  0xfd   : >> { %v233_v45 = vsel %vm232_vm14, %v222_v42, 1.0  ;;  %p619_p7 = scmp.ne.s32.totalorder (%p153_p6), %s364_s7, %s618_s27 }
  0xfe   : >> { %v246_v46 = vsel %vm245_vm13, %v233_v45, 1.0 }
  0xff   : >> { %590 = vrcp.f32 %v246_v46  ;;  %p620_p8 = pnand (%p153_p6), %p619_p7, %p751_p5 }
 0x101   : > { %p621_p9 = pneg (%p153_p6), %p620_p8 }
 0x102   : >> { %v242_v48 = vld [vmem:[%s811_s11] sm:$0xff] }
 0x103   : > { %v256_v55 = vld [vmem:[#allocation6] sm:$0xff] (%p153_p6) }
 0x10c   : >> { %v591_v47 = vpop.eup %590 }
 0x10d   : >> { %v248_v49 = vmul.f32 %v591_v47, %v242_v48 }
 0x10f   : >> { %v250_v50 = vsel %vm249_vm15, %v248_v49, 0.0 }
 0x110   : >> { %251 = vadd.xlane.f32.xlu0 %v250_v50 }
 0x13d   : > { %272 = vxpose.xlu0.b32.start.end [1/1] (short) (narrow) (%p153_p6), %v256_v55, 8 }
 0x199   : >> { %v252_v52 = vpop.xlane.xlu0 %251 }
 0x19a   : >> { %v253_v53 = vmul.f32 %v252_v52, %v238_v51  ;;  %155 = sbr.rel (!%p153_p6) target bundleno = 57 (0x39), region = 181 }
 0x19c   : >> { %v254_v54 = vsub.f32 %v248_v49, %v253_v53 }
 0x19e   : >> { %255 = vst [vmem:[%s811_s11] sm:$0xff] %v254_v54 }
 0x1a5   : > { %v348_v56 = vld [vmem:[%s811_s11] sm:$0xff]  ;;  %s692_s11 = smov [#allocation4]  }
 0x1a6   : > { %349 = vst [vmem:[%s319_s4] sm:$0xff] %v348_v56  ;;  %s622_s28 = sshll.u32 %s692_s11, 4  ;;  %s623_s28 = int_to_ptr.vmem [resolvable:$false] %s622_s28 }
 0x1a7   : > { %s624_s29 = scalar_lea.vmem %s623_s28, 256  ;;  %p625_p1 = scmp.lt.s32.totalorder %s364_s7, %s623_s28 }
 0x1a8   : > { %p626_p2 = scmp.lt.s32.totalorder %s624_s29, %s618_s27 }
 0x1aa   : > { %p627_p3 = por %p626_p2, %p625_p1 }
 0x1ac   : > { %p628_p4 = pnand %p627_p3, %p621_p9 }
 0x1ae   : > { %631 = shalt.err (!%p628_p4)
}
 0x1af   : > { %s632_s6 = scalar_lea.hbm %s361_s22, 128  ;;  %s636_s4 = scalar_lea.hbm %s908_s2, 16384 }
 0x1b0   : > { %p633_p10 = scmp.ne.s32.totalorder %s361_s22, %s632_s6  ;;  %p637_p13 = scmp.lt.s32.totalorder %s361_s22, %s908_s2 }
 0x1b1   : > { %p638_p0 = scmp.lt.s32.totalorder %s636_s4, %s632_s6 }
 0x1b2   : > { %p634_p11 = pnand %p633_p10, %p751_p5 }
 0x1b3   : > { %p639_p6 = por %p638_p0, %p637_p13 }
 0x1b4   : > { %p635_p12 = pneg %p634_p11 }
 0x1b6   : > { %p640_p7 = pnand %p639_p6, %p635_p12 }
 0x1b8   : > { %643 = shalt.err (!%p640_p7)
}
 0x1b9   : > { %541 = dma.vmem_to_hbm [thread:$0]  (%p751_p5), %s364_s7, 128, %s361_s22, %s310_s26   ;;  %v288_v57 = vpop.trf.xlu0 }
 0x1ba   : > { %304 = vst [vmem:[%s807_s10] sm:$0x1] %v288_v57  ;;  %369 = sbr.rel (!%p751_p5) target bundleno = 451 (0x1c3), region = 70  ;;  %s534_s21 = sshll.u32 (%p751_p5), %s356_s19, 3 }
 0x1bb   : > { %s372_s28 = scalar_lea.vmem (%p751_p5), %s909_s3, %s534_s21 }
 0x1c1   : > { %v401_v58 = vld [vmem:[%s136_s9] sm:$0xff] }
 0x1c2   : > { %402 = vst [vmem:[%s372_s28] sm:$0xff] %v401_v58 }
 0x1c3 PF: > { %p548_p8 = scmp.ge.s32.totalorder %s684_s15, 2  ;;  %s418_s10 = sand.u32 1, %s672_s12  }
 0x1c4   : > { %p914_p9 = scmp.ne.s32.totalorder %s911_s25, 0  ;;  %s419_s16 = scalar_lea.sflag [#allocation2], %s418_s10 }
 0x1c6   : > { %p544_p5 = pnand %p548_p8, %p914_p9 }
 0x1c8   : > { %p545_p1 = pneg %p544_p5 }
 0x1ca   : > { %667 = dma.done.wait (%p545_p1), %s419_s16, 128  }
 0x1cb   : > { %669 = vsyncadd (%p545_p1), %s419_s16, 4294967168  ;;  %p13_p2 = scmp.ge.s32.totalorder %s738_s18, 1026   ;;  %s915_s12 = smov %s676_s13 }
 0x1cc   : > { %s916_s13 = smov %s680_s14  ;;  %s917_s14 = smov %s749_s23 }
 0x1cd   : > { %s918_s15 = smov %s738_s18  ;;  %15 = sbr.rel (!%p13_p2) target bundleno = 5 (0x5), region = 192 }
 0x1d2   :  { %431 = vsyncpa [#allocation1], 1 }
 0x1d3   :  { %433 = vsyncpa [#allocation1 + $0x1], 1 }
 0x1d4   :  { %434 = vsyncpa [#allocation2], 1 }
 0x1d5   :  { %436 = vsyncpa [#allocation2 + $0x1], 1 }

// kernel: custom-call.37
= control target key start
LH: loop header
LB: loop body
LE: loop exit
PB: predicated region body
PF: predicated region fallthrough
CT: control target
= control target key end

     0   :  { %s694_s6 = smov 0   ;;  %s696_s7 = smov 0   ;;  %s788_s0 = inlined_call_operand.vmem [shape: f32[1024,1,8,8], index: 0, kind: input, shape index: {}]   ;;  %s789_s1 = inlined_call_operand.vmem [shape: f32[1024,1,8,8], index: 1, kind: output, shape index: {}]  }
   0x1   :  { %s698_s8 = smov 0  }
   0x2 LB: > { %s526_s9 = sadd.s32 4294967295, %s664_s8   ;;  %s22_s10 = sadd.s32 1, %s660_s7  ;;  %s664_s8 = sphi %s698_s8, %s7_s8   ;;  %s660_s7 = sphi %s696_s7, %s791_s7   ;;  %s656_s6 = sphi %s694_s6, %s790_s6  }
   0x3   : > { %p23_p0 = scmp.ge.s32.totalorder %s22_s10, 8  ;;  %p528_p1 = scmp.ge.s32.totalorder %s664_s8, 8 }
   0x4   : > { %s49_s11 = sand.u32 (!%p528_p1), 1, %s664_s8   ;;  %s530_s12 = sshll.u32 (!%p528_p1), %s660_s7, 3 }
   0x5   : > { %s793_s10 = smov (%p23_p0, %s22_s10), 0  ;;  %47 = sbr.rel (%p528_p1) target bundleno = 19 (0x13), region = 16 }
   0x6   : > { %s529_s13 = sshll.u32 (!%p528_p1), %s49_s11, 6  ;;  %s59_s16 = scalar_lea.vmem (!%p528_p1), %s788_s0, %s530_s12 }
   0x7   : > { %s51_s17 = scalar_lea.vmem (!%p528_p1), [#allocation0], %s529_s13 }
   0xa   : > { %v102_v0 = vld [vmem:[%s59_s16] sm:$0xff] }
   0xb   : > { %v104_v1 = vld [vmem:[%s59_s16 + $0x40] sm:$0xff]  ;;  %103 = vst [vmem:[%s51_s17] sm:$0xff] %v102_v0 }
   0xc   : > { %v106_v2 = vld [vmem:[%s59_s16 + $0x80] sm:$0xff]  ;;  %105 = vst [vmem:[%s51_s17 + $0x8] sm:$0xff] %v104_v1 }
   0xd   : > { %107 = vst [vmem:[%s51_s17 + $0x10] sm:$0xff] %v106_v2  ;;  %v108_v3 = vld [vmem:[%s59_s16 + $0xc0] sm:$0xff] }
   0xe   : > { %v110_v4 = vld [vmem:[%s59_s16 + $0x100] sm:$0xff]  ;;  %109 = vst [vmem:[%s51_s17 + $0x18] sm:$0xff] %v108_v3 }
   0xf   : > { %v112_v5 = vld [vmem:[%s59_s16 + $0x140] sm:$0xff]  ;;  %111 = vst [vmem:[%s51_s17 + $0x20] sm:$0xff] %v110_v4 }
  0x10   : > { %113 = vst [vmem:[%s51_s17 + $0x28] sm:$0xff] %v112_v5  ;;  %v114_v6 = vld [vmem:[%s59_s16 + $0x180] sm:$0xff] }
  0x11   : > { %v116_v7 = vld [vmem:[%s59_s16 + $0x1c0] sm:$0xff]  ;;  %115 = vst [vmem:[%s51_s17 + $0x30] sm:$0xff] %v114_v6 }
  0x12   : > { %117 = vst [vmem:[%s51_s17 + $0x38] sm:$0xff] %v116_v7 }
  0x13 PF: > { %p531_p2 = scmp.ge.s32.totalorder %s664_s8, 1  ;;  %p122_p3 = scmp.lt.s32.totalorder %s664_s8, 9 }
  0x15   : > { %p123_p4 = pnand %p531_p2, %p122_p3 }
  0x17   : > { %126 = sbr.rel (%p123_p4) target bundleno = 267 (0x10b), region = 54 }
  0x1c   : > { %s129_s18 = sand.u32 1, %s526_s9   ;;  %s666_s22 = smov 0  }
  0x1d   : > { %s532_s19 = sshll.u32 %s129_s18, 6 }
  0x1e   : > { %s131_s20 = scalar_lea.vmem [#allocation0], %s532_s19  ;;  %s723_s21 = scalar_lea.vmem [#allocation1], %s532_s19 }
  0x1f LB: >> { %s534_s23 = sshll.u32 %s668_s22, 3  ;;  %s150_s26 = scalar_lea.vmem [#allocation3], %s668_s22  ;;  %v156_v9 = vlaneseq  ;;  %v159_v11 = vstv %s668_s22  ;;  %s668_s22 = sphi %s666_s22, %s145_s22  }
  0x20   : >> { %s147_s24 = sadd.s32 %s668_s22, %s534_s23  ;;  %s153_s27 = scalar_lea.vmem %s131_s20, %s534_s23 [#allocation0] }
  0x21   : >> { %s148_s25 = scalar_lea.vmem %s131_s20, %s147_s24 [#allocation0]  ;;  %v157_v10 = vshrl.u32 %v156_v9, 7  ;;  %v155_v12 = vld [vmem:[%s153_s27] sm:$0xff]  ;;  %s154_s28 = scalar_lea.vmem [#allocation2], %s534_s23 }
  0x22   : >> { %v149_v8 = vld [vmem:[%s148_s25] ss:$0 sm:$0xff]  ;;  %s145_s22 = sadd.s32 1, %s668_s22  }
  0x23   : >> { %151 = vst [vmem:[%s150_s26] sm:$0x1] %v149_v8  ;;  %622 = vrcp.f32 %v149_v8  ;;  %vm160_vm0 = vcmp.ge.s32.totalorder %v159_v11, %v157_v10  ;;  %p142_p5 = scmp.ge.s32.totalorder %s145_s22, 8  }
  0x24   : >> { %v163_v13 = vsel %vm160_vm0, %v155_v12, 0.0  ;;  %s670_s29 = smov (%p142_p5), 0  }
  0x30   : >> { %v623_v14 = vpop.eup %622 }
  0x31   : >> { %v165_v15 = vmul.f32 %v623_v14, %v163_v13  ;;  %144 = sbr.rel (!%p142_p5) target bundleno = 31 (0x1f), region = 176 }
  0x33   : >> { %v166_v16 = vxor.u32 2147483648, %v165_v15 }
  0x35   : >> { %167 = vst [vmem:[%s154_s28] sm:$0xff] %v166_v16 }
  0x36 LB: >> { %v174_v17 = vstv %s672_s29  ;;  %s536_s30 = sshll.u32 %s672_s29, 3  ;;  %v682_v18 = vmov 0.0   ;;  %s173_s29 = sadd.s32 1, %s672_s29   ;;  %s672_s29 = sphi %s670_s29, %s173_s29  }
  0x37   : >> { %vm178_vm1 = vcmp.eq.s32.totalorder %v174_v17, %v157_v10  ;;  %s180_s2 = scalar_lea.vmem %s723_s21, %s536_s30 [#allocation1]  ;;  %p170_p6 = scmp.ge.s32.totalorder %s173_s29, 8  }
  0x38   : >> { %v181_v19 = vsel %vm178_vm1, -1.0, %v682_v18  ;;  %v683_v20 = vmov (%p170_p6), 1.0   ;;  %s727_s3 = smov (%p170_p6), 1  }
  0x39   : >> { %182 = vst [vmem:[%s180_s2] sm:$0xff] %v181_v19  ;;  %172 = sbr.rel (!%p170_p6) target bundleno = 54 (0x36), region = 187 }
  0x3a   : > { %183 = vst [vmem:[%s723_s21] sm:$0x1] (%p170_p6), %v683_v20 }
  0x3e LB: >> { %s537_s4 = sshll.u32 %s676_s3, 3  ;;  %s739_s9 = scalar_lea.vmem %s723_s21, %s676_s3 [#allocation1]  ;;  %s676_s3 = sphi %s727_s3, %s189_s3  }
  0x3f   : >> { %s191_s5 = scalar_lea.vmem [#allocation2], %s537_s4  ;;  %s189_s3 = sadd.s32 1, %s676_s3  }
  0x40   : >> { %v734_v22 = vld [vmem:[%s191_s5] sm:$0xff]  ;;  %p186_p7 = scmp.ge.s32.totalorder %s189_s3, 8  }
  0x41   : >> { %v193_v21 = vld [vmem:[%s723_s21] sm:$0xff]  ;;  %s678_s11 = smov (%p186_p7), 0  }
  0x42   : >> { %v194_v23 = vmul.f32 %v193_v21, %v734_v22 }
  0x44   : >> { %v196_v24 = vrot.slane %v194_v23, 4 }
  0x46   : >> { %v197_v25 = vadd.f32 %v196_v24, %v194_v23 }
  0x48   : >> { %v198_v26 = vrot.slane %v197_v25, 2 }
  0x4a   : >> { %v199_v27 = vadd.f32 %v198_v26, %v197_v25 }
  0x4c   : >> { %v200_v28 = vrot.slane %v199_v27, 1 }
  0x4e   : >> { %v201_v29 = vadd.f32 %v200_v28, %v199_v27 }
  0x50   : >> { %202 = vst [vmem:[%s739_s9] sm:$0x1] %v201_v29 }
  0x57   : >> { %v539_v30 = vld [vmem:[%s723_s21 + $0x8] sm:$0xff] }
  0x58   : >> { %v208_v31 = vmul.f32 %v539_v30, %v734_v22 }
  0x5a   : >> { %v211_v32 = vrot.slane %v208_v31, 4 }
  0x5c   : >> { %v212_v33 = vadd.f32 %v211_v32, %v208_v31 }
  0x5e   : >> { %v213_v34 = vrot.slane %v212_v33, 2 }
  0x60   : >> { %v214_v35 = vadd.f32 %v213_v34, %v212_v33 }
  0x62   : >> { %v215_v36 = vrot.slane %v214_v35, 1 }
  0x64   : >> { %v216_v37 = vadd.f32 %v215_v36, %v214_v35 }
  0x66   : >> { %540 = vst [vmem:[%s739_s9 + $0x8] sm:$0x1] %v216_v37 }
  0x6d   : >> { %v542_v38 = vld [vmem:[%s723_s21 + $0x10] sm:$0xff] }
  0x6e   : >> { %v223_v39 = vmul.f32 %v542_v38, %v734_v22 }
  0x70   : >> { %v226_v40 = vrot.slane %v223_v39, 4 }
  0x72   : >> { %v227_v41 = vadd.f32 %v226_v40, %v223_v39 }
  0x74   : >> { %v228_v42 = vrot.slane %v227_v41, 2 }
  0x76   : >> { %v229_v43 = vadd.f32 %v228_v42, %v227_v41 }
  0x78   : >> { %v230_v44 = vrot.slane %v229_v43, 1 }
  0x7a   : >> { %v231_v45 = vadd.f32 %v230_v44, %v229_v43 }
  0x7c   : >> { %543 = vst [vmem:[%s739_s9 + $0x10] sm:$0x1] %v231_v45 }
  0x83   : >> { %v545_v46 = vld [vmem:[%s723_s21 + $0x18] sm:$0xff] }
  0x84   : >> { %v238_v47 = vmul.f32 %v545_v46, %v734_v22 }
  0x86   : >> { %v241_v48 = vrot.slane %v238_v47, 4 }
  0x88   : >> { %v242_v49 = vadd.f32 %v241_v48, %v238_v47 }
  0x8a   : >> { %v243_v50 = vrot.slane %v242_v49, 2 }
  0x8c   : >> { %v244_v51 = vadd.f32 %v243_v50, %v242_v49 }
  0x8e   : >> { %v245_v52 = vrot.slane %v244_v51, 1 }
  0x90   : >> { %v246_v53 = vadd.f32 %v245_v52, %v244_v51 }
  0x92   : >> { %546 = vst [vmem:[%s739_s9 + $0x18] sm:$0x1] %v246_v53 }
  0x99   : >> { %v548_v54 = vld [vmem:[%s723_s21 + $0x20] sm:$0xff] }
  0x9a   : >> { %v253_v55 = vmul.f32 %v548_v54, %v734_v22 }
  0x9c   : >> { %v256_v56 = vrot.slane %v253_v55, 4 }
  0x9e   : >> { %v257_v57 = vadd.f32 %v256_v56, %v253_v55 }
  0xa0   : >> { %v258_v58 = vrot.slane %v257_v57, 2 }
  0xa2   : >> { %v259_v59 = vadd.f32 %v258_v58, %v257_v57 }
  0xa4   : >> { %v260_v60 = vrot.slane %v259_v59, 1 }
  0xa6   : >> { %v261_v61 = vadd.f32 %v260_v60, %v259_v59 }
  0xa8   : >> { %549 = vst [vmem:[%s739_s9 + $0x20] sm:$0x1] %v261_v61 }
  0xaf   : >> { %v551_v62 = vld [vmem:[%s723_s21 + $0x28] sm:$0xff] }
  0xb0   : >> { %v268_v63 = vmul.f32 %v551_v62, %v734_v22 }
  0xb2   : >> { %v271_v0 = vrot.slane %v268_v63, 4 }
  0xb4   : >> { %v272_v1 = vadd.f32 %v271_v0, %v268_v63 }
  0xb6   : >> { %v273_v2 = vrot.slane %v272_v1, 2 }
  0xb8   : >> { %v274_v3 = vadd.f32 %v273_v2, %v272_v1 }
  0xba   : >> { %v275_v4 = vrot.slane %v274_v3, 1 }
  0xbc   : >> { %v276_v5 = vadd.f32 %v275_v4, %v274_v3 }
  0xbe   : >> { %552 = vst [vmem:[%s739_s9 + $0x28] sm:$0x1] %v276_v5 }
  0xc5   : >> { %v554_v6 = vld [vmem:[%s723_s21 + $0x30] sm:$0xff] }
  0xc6   : >> { %v283_v7 = vmul.f32 %v554_v6, %v734_v22 }
  0xc8   : >> { %v286_v8 = vrot.slane %v283_v7, 4 }
  0xca   : >> { %v287_v9 = vadd.f32 %v286_v8, %v283_v7 }
  0xcc   : >> { %v288_v10 = vrot.slane %v287_v9, 2 }
  0xce   : >> { %v289_v11 = vadd.f32 %v288_v10, %v287_v9 }
  0xd0   : >> { %v290_v12 = vrot.slane %v289_v11, 1 }
  0xd2   : >> { %v291_v13 = vadd.f32 %v290_v12, %v289_v11 }
  0xd4   : >> { %555 = vst [vmem:[%s739_s9 + $0x30] sm:$0x1] %v291_v13 }
  0xdb   : >> { %v557_v14 = vld [vmem:[%s723_s21 + $0x38] sm:$0xff] }
  0xdc   : >> { %v298_v15 = vmul.f32 %v557_v14, %v734_v22 }
  0xde   : >> { %v301_v16 = vrot.slane %v298_v15, 4 }
  0xe0   : >> { %v302_v17 = vadd.f32 %v301_v16, %v298_v15 }
  0xe2   : >> { %v303_v18 = vrot.slane %v302_v17, 2 }
  0xe4   : >> { %v304_v19 = vadd.f32 %v303_v18, %v302_v17 }
  0xe6   : >> { %v305_v20 = vrot.slane %v304_v19, 1  ;;  %188 = sbr.rel (!%p186_p7) target bundleno = 62 (0x3e), region = 198 }
  0xe8   : >> { %v306_v21 = vadd.f32 %v305_v20, %v304_v19 }
  0xea   : >> { %558 = vst [vmem:[%s739_s9 + $0x38] sm:$0x1] %v306_v21 }
  0xeb LB: >> { %s314_s12 = scalar_lea.vmem [#allocation3], %s680_s11  ;;  %s559_s13 = sshll.u32 %s680_s11, 3  ;;  %s680_s11 = sphi %s678_s11, %s313_s11  }
  0xec   : >> { %v315_v22 = vld [vmem:[%s314_s12] ss:$0 sm:$0xff]  ;;  %s317_s14 = scalar_lea.vmem %s723_s21, %s559_s13 [#allocation1]  ;;  %s313_s11 = sadd.s32 1, %s680_s11  }
  0xed   : >> { %624 = vrcp.f32 %v315_v22  ;;  %vm321_vm2 = vweird.f32 %v315_v22  ;;  %p310_p8 = scmp.ge.s32.totalorder %s313_s11, 8  }
  0xee   : > { %s561_s15 = sshll.u32 (%p310_p8), %s656_s6, 3 }
  0xef   : > { %s335_s18 = scalar_lea.vmem (%p310_p8), %s789_s1, %s561_s15 }
  0xf1   : >> { %v318_v23 = vld [vmem:[%s317_s14] sm:$0xff] }
  0xfa   : >> { %v625_v24 = vpop.eup %624  ;;  %312 = sbr.rel (!%p310_p8) target bundleno = 235 (0xeb), region = 209 }
  0xfb   : >> { %v320_v25 = vmul.f32 %v625_v24, %v318_v23 }
  0xfd   : >> { %v322_v26 = vsel %vm321_vm2, %v318_v23, %v320_v25 }
  0xfe   : >> { %323 = vst [vmem:[%s317_s14] sm:$0xff] %v322_v26 }
 0x105   : > { %v378_v27 = vld [vmem:[%s723_s21] sm:$0xff]  ;;  %v380_v28 = vld [vmem:[%s723_s21 + $0x8] sm:$0xff]  ;;  %v382_v29 = vld [vmem:[%s723_s21 + $0x10] sm:$0xff] }
 0x106   : > { %v384_v30 = vld [vmem:[%s723_s21 + $0x18] sm:$0xff]  ;;  %v386_v31 = vld [vmem:[%s723_s21 + $0x20] sm:$0xff]  ;;  %v388_v32 = vld [vmem:[%s723_s21 + $0x28] sm:$0xff]  ;;  %379 = vst [vmem:[%s335_s18] sm:$0xff] %v378_v27 }
 0x107   : > { %381 = vst [vmem:[%s335_s18 + $0x40] sm:$0xff] %v380_v28  ;;  %383 = vst [vmem:[%s335_s18 + $0x80] sm:$0xff] %v382_v29  ;;  %v390_v33 = vld [vmem:[%s723_s21 + $0x30] sm:$0xff]  ;;  %v392_v34 = vld [vmem:[%s723_s21 + $0x38] sm:$0xff] }
 0x108   : > { %385 = vst [vmem:[%s335_s18 + $0xc0] sm:$0xff] %v384_v30  ;;  %387 = vst [vmem:[%s335_s18 + $0x100] sm:$0xff] %v386_v31 }
 0x109   : > { %389 = vst [vmem:[%s335_s18 + $0x140] sm:$0xff] %v388_v32  ;;  %391 = vst [vmem:[%s335_s18 + $0x180] sm:$0xff] %v390_v33 }
 0x10a   : > { %393 = vst [vmem:[%s335_s18 + $0x1c0] sm:$0xff] %v392_v34 }
 0x10b PF: > { %s7_s8 = sadd.s32 1, %s664_s8   ;;  %s790_s6 = smov %s660_s7 }
 0x10c   : > { %p4_p9 = scmp.ge.s32.totalorder %s7_s8, 10   ;;  %s791_s7 = smov %s793_s10 }
 0x10e   :  { %6 = sbr.rel (!%p4_p9) target bundleno = 2 (0x2), region = 220 }

// kernel: custom-call.36
= control target key start
LH: loop header
LB: loop body
LE: loop exit
PB: predicated region body
PF: predicated region fallthrough
CT: control target
= control target key end

     0   :  { %s697_s6 = smov 0   ;;  %s699_s7 = smov 0   ;;  %s790_s0 = inlined_call_operand.vmem [shape: f32[1024,1,8,8], index: 0, kind: input, shape index: {}]   ;;  %s791_s1 = inlined_call_operand.vmem [shape: f32[1024,1,8,8], index: 1, kind: output, shape index: {}]  }
   0x1   :  { %s701_s8 = smov 0  }
   0x2 LB: > { %s528_s9 = sadd.s32 4294967295, %s667_s8   ;;  %s22_s10 = sadd.s32 1, %s663_s7  ;;  %s667_s8 = sphi %s701_s8, %s7_s8   ;;  %s663_s7 = sphi %s699_s7, %s793_s7   ;;  %s659_s6 = sphi %s697_s6, %s792_s6  }
   0x3   : > { %p23_p0 = scmp.ge.s32.totalorder %s22_s10, 8  ;;  %p530_p1 = scmp.ge.s32.totalorder %s667_s8, 8 }
   0x4   : > { %s49_s11 = sand.u32 (!%p530_p1), 1, %s667_s8   ;;  %s532_s12 = sshll.u32 (!%p530_p1), %s663_s7, 3 }
   0x5   : > { %s795_s10 = smov (%p23_p0, %s22_s10), 0  ;;  %47 = sbr.rel (%p530_p1) target bundleno = 19 (0x13), region = 16 }
   0x6   : > { %s531_s13 = sshll.u32 (!%p530_p1), %s49_s11, 6  ;;  %s59_s16 = scalar_lea.vmem (!%p530_p1), %s790_s0, %s532_s12 }
   0x7   : > { %s51_s17 = scalar_lea.vmem (!%p530_p1), [#allocation0], %s531_s13 }
   0xa   : > { %v102_v0 = vld [vmem:[%s59_s16] sm:$0xff] }
   0xb   : > { %v104_v1 = vld [vmem:[%s59_s16 + $0x40] sm:$0xff]  ;;  %103 = vst [vmem:[%s51_s17] sm:$0xff] %v102_v0 }
   0xc   : > { %v106_v2 = vld [vmem:[%s59_s16 + $0x80] sm:$0xff]  ;;  %105 = vst [vmem:[%s51_s17 + $0x8] sm:$0xff] %v104_v1 }
   0xd   : > { %107 = vst [vmem:[%s51_s17 + $0x10] sm:$0xff] %v106_v2  ;;  %v108_v3 = vld [vmem:[%s59_s16 + $0xc0] sm:$0xff] }
   0xe   : > { %v110_v4 = vld [vmem:[%s59_s16 + $0x100] sm:$0xff]  ;;  %109 = vst [vmem:[%s51_s17 + $0x18] sm:$0xff] %v108_v3 }
   0xf   : > { %v112_v5 = vld [vmem:[%s59_s16 + $0x140] sm:$0xff]  ;;  %111 = vst [vmem:[%s51_s17 + $0x20] sm:$0xff] %v110_v4 }
  0x10   : > { %113 = vst [vmem:[%s51_s17 + $0x28] sm:$0xff] %v112_v5  ;;  %v114_v6 = vld [vmem:[%s59_s16 + $0x180] sm:$0xff] }
  0x11   : > { %v116_v7 = vld [vmem:[%s59_s16 + $0x1c0] sm:$0xff]  ;;  %115 = vst [vmem:[%s51_s17 + $0x30] sm:$0xff] %v114_v6 }
  0x12   : > { %117 = vst [vmem:[%s51_s17 + $0x38] sm:$0xff] %v116_v7 }
  0x13 PF: > { %p533_p2 = scmp.ge.s32.totalorder %s667_s8, 1  ;;  %p122_p3 = scmp.lt.s32.totalorder %s667_s8, 9 }
  0x15   : > { %p123_p4 = pnand %p533_p2, %p122_p3 }
  0x17   : > { %126 = sbr.rel (%p123_p4) target bundleno = 267 (0x10b), region = 54 }
  0x1c   : > { %s129_s18 = sand.u32 1, %s528_s9   ;;  %s669_s22 = smov 0  }
  0x1d   : > { %s534_s19 = sshll.u32 %s129_s18, 6 }
  0x1e   : > { %s131_s20 = scalar_lea.vmem [#allocation0], %s534_s19  ;;  %s726_s21 = scalar_lea.vmem [#allocation1], %s534_s19 }
  0x1f LB: >> { %s536_s23 = sshll.u32 %s671_s22, 3  ;;  %s150_s26 = scalar_lea.vmem [#allocation3], %s671_s22  ;;  %v156_v9 = vlaneseq  ;;  %v159_v11 = vstv %s671_s22  ;;  %s671_s22 = sphi %s669_s22, %s145_s22  }
  0x20   : >> { %s147_s24 = sadd.s32 %s671_s22, %s536_s23  ;;  %s153_s27 = scalar_lea.vmem %s131_s20, %s536_s23 [#allocation0] }
  0x21   : >> { %s148_s25 = scalar_lea.vmem %s131_s20, %s147_s24 [#allocation0]  ;;  %v157_v10 = vshrl.u32 %v156_v9, 7  ;;  %v155_v12 = vld [vmem:[%s153_s27] sm:$0xff]  ;;  %s154_s28 = scalar_lea.vmem [#allocation2], %s536_s23 }
  0x22   : >> { %v149_v8 = vld [vmem:[%s148_s25] ss:$0 sm:$0xff]  ;;  %s145_s22 = sadd.s32 1, %s671_s22  }
  0x23   : >> { %151 = vst [vmem:[%s150_s26] sm:$0x1] %v149_v8  ;;  %625 = vrcp.f32 %v149_v8  ;;  %vm160_vm0 = vcmp.le.s32.totalorder %v159_v11, %v157_v10  ;;  %p142_p5 = scmp.ge.s32.totalorder %s145_s22, 8  }
  0x24   : >> { %v163_v13 = vsel %vm160_vm0, %v155_v12, 0.0  ;;  %s673_s29 = smov (%p142_p5), 0  }
  0x30   : >> { %v626_v14 = vpop.eup %625 }
  0x31   : >> { %v165_v15 = vmul.f32 %v626_v14, %v163_v13  ;;  %144 = sbr.rel (!%p142_p5) target bundleno = 31 (0x1f), region = 177 }
  0x33   : >> { %v166_v16 = vxor.u32 2147483648, %v165_v15 }
  0x35   : >> { %167 = vst [vmem:[%s154_s28] sm:$0xff] %v166_v16 }
  0x36 LB: >> { %v174_v17 = vstv %s675_s29  ;;  %s538_s30 = sshll.u32 %s675_s29, 3  ;;  %v685_v18 = vmov 0.0   ;;  %s173_s29 = sadd.s32 1, %s675_s29   ;;  %s675_s29 = sphi %s673_s29, %s173_s29  }
  0x37   : >> { %vm178_vm1 = vcmp.eq.s32.totalorder %v174_v17, %v157_v10  ;;  %s180_s2 = scalar_lea.vmem %s726_s21, %s538_s30 [#allocation1]  ;;  %p170_p6 = scmp.ge.s32.totalorder %s173_s29, 8  }
  0x38   : >> { %v181_v19 = vsel %vm178_vm1, -1.0, %v685_v18  ;;  %v686_v20 = vmov (%p170_p6), 1.0   ;;  %s730_s3 = smov (%p170_p6), 1  }
  0x39   : >> { %182 = vst [vmem:[%s180_s2] sm:$0xff] %v181_v19  ;;  %172 = sbr.rel (!%p170_p6) target bundleno = 54 (0x36), region = 188 }
  0x3a   : > { %539 = vst [vmem:[%s726_s21 + $0x3f] sm:$0x1] (%p170_p6), %v686_v20 }
  0x3e LB: >> { %s191_s4 = ssub.s32 7, %s679_s3  ;;  %s190_s3 = sadd.s32 1, %s679_s3   ;;  %s679_s3 = sphi %s730_s3, %s190_s3  }
  0x3f   : >> { %s540_s5 = sshll.u32 %s191_s4, 3  ;;  %s741_s11 = scalar_lea.vmem %s726_s21, %s191_s4 [#allocation1] }
  0x40   : >> { %v195_v21 = vld [vmem:[%s726_s21] sm:$0xff]  ;;  %s193_s9 = scalar_lea.vmem [#allocation2], %s540_s5  ;;  %p187_p7 = scmp.ge.s32.totalorder %s190_s3, 8  }
  0x41   : >> { %v737_v22 = vld [vmem:[%s193_s9] sm:$0xff]  ;;  %s681_s12 = smov (%p187_p7), 0  }
  0x42   : >> { %v196_v23 = vmul.f32 %v195_v21, %v737_v22 }
  0x44   : >> { %v198_v24 = vrot.slane %v196_v23, 4 }
  0x46   : >> { %v199_v25 = vadd.f32 %v198_v24, %v196_v23 }
  0x48   : >> { %v200_v26 = vrot.slane %v199_v25, 2 }
  0x4a   : >> { %v201_v27 = vadd.f32 %v200_v26, %v199_v25 }
  0x4c   : >> { %v202_v28 = vrot.slane %v201_v27, 1 }
  0x4e   : >> { %v203_v29 = vadd.f32 %v202_v28, %v201_v27 }
  0x50   : >> { %204 = vst [vmem:[%s741_s11] sm:$0x1] %v203_v29 }
  0x57   : >> { %v542_v30 = vld [vmem:[%s726_s21 + $0x8] sm:$0xff] }
  0x58   : >> { %v210_v31 = vmul.f32 %v542_v30, %v737_v22 }
  0x5a   : >> { %v213_v32 = vrot.slane %v210_v31, 4 }
  0x5c   : >> { %v214_v33 = vadd.f32 %v213_v32, %v210_v31 }
  0x5e   : >> { %v215_v34 = vrot.slane %v214_v33, 2 }
  0x60   : >> { %v216_v35 = vadd.f32 %v215_v34, %v214_v33 }
  0x62   : >> { %v217_v36 = vrot.slane %v216_v35, 1 }
  0x64   : >> { %v218_v37 = vadd.f32 %v217_v36, %v216_v35 }
  0x66   : >> { %543 = vst [vmem:[%s741_s11 + $0x8] sm:$0x1] %v218_v37 }
  0x6d   : >> { %v545_v38 = vld [vmem:[%s726_s21 + $0x10] sm:$0xff] }
  0x6e   : >> { %v225_v39 = vmul.f32 %v545_v38, %v737_v22 }
  0x70   : >> { %v228_v40 = vrot.slane %v225_v39, 4 }
  0x72   : >> { %v229_v41 = vadd.f32 %v228_v40, %v225_v39 }
  0x74   : >> { %v230_v42 = vrot.slane %v229_v41, 2 }
  0x76   : >> { %v231_v43 = vadd.f32 %v230_v42, %v229_v41 }
  0x78   : >> { %v232_v44 = vrot.slane %v231_v43, 1 }
  0x7a   : >> { %v233_v45 = vadd.f32 %v232_v44, %v231_v43 }
  0x7c   : >> { %546 = vst [vmem:[%s741_s11 + $0x10] sm:$0x1] %v233_v45 }
  0x83   : >> { %v548_v46 = vld [vmem:[%s726_s21 + $0x18] sm:$0xff] }
  0x84   : >> { %v240_v47 = vmul.f32 %v548_v46, %v737_v22 }
  0x86   : >> { %v243_v48 = vrot.slane %v240_v47, 4 }
  0x88   : >> { %v244_v49 = vadd.f32 %v243_v48, %v240_v47 }
  0x8a   : >> { %v245_v50 = vrot.slane %v244_v49, 2 }
  0x8c   : >> { %v246_v51 = vadd.f32 %v245_v50, %v244_v49 }
  0x8e   : >> { %v247_v52 = vrot.slane %v246_v51, 1 }
  0x90   : >> { %v248_v53 = vadd.f32 %v247_v52, %v246_v51 }
  0x92   : >> { %549 = vst [vmem:[%s741_s11 + $0x18] sm:$0x1] %v248_v53 }
  0x99   : >> { %v551_v54 = vld [vmem:[%s726_s21 + $0x20] sm:$0xff] }
  0x9a   : >> { %v255_v55 = vmul.f32 %v551_v54, %v737_v22 }
  0x9c   : >> { %v258_v56 = vrot.slane %v255_v55, 4 }
  0x9e   : >> { %v259_v57 = vadd.f32 %v258_v56, %v255_v55 }
  0xa0   : >> { %v260_v58 = vrot.slane %v259_v57, 2 }
  0xa2   : >> { %v261_v59 = vadd.f32 %v260_v58, %v259_v57 }
  0xa4   : >> { %v262_v60 = vrot.slane %v261_v59, 1 }
  0xa6   : >> { %v263_v61 = vadd.f32 %v262_v60, %v261_v59 }
  0xa8   : >> { %552 = vst [vmem:[%s741_s11 + $0x20] sm:$0x1] %v263_v61 }
  0xaf   : >> { %v554_v62 = vld [vmem:[%s726_s21 + $0x28] sm:$0xff] }
  0xb0   : >> { %v270_v63 = vmul.f32 %v554_v62, %v737_v22 }
  0xb2   : >> { %v273_v0 = vrot.slane %v270_v63, 4 }
  0xb4   : >> { %v274_v1 = vadd.f32 %v273_v0, %v270_v63 }
  0xb6   : >> { %v275_v2 = vrot.slane %v274_v1, 2 }
  0xb8   : >> { %v276_v3 = vadd.f32 %v275_v2, %v274_v1 }
  0xba   : >> { %v277_v4 = vrot.slane %v276_v3, 1 }
  0xbc   : >> { %v278_v5 = vadd.f32 %v277_v4, %v276_v3 }
  0xbe   : >> { %555 = vst [vmem:[%s741_s11 + $0x28] sm:$0x1] %v278_v5 }
  0xc5   : >> { %v557_v6 = vld [vmem:[%s726_s21 + $0x30] sm:$0xff] }
  0xc6   : >> { %v285_v7 = vmul.f32 %v557_v6, %v737_v22 }
  0xc8   : >> { %v288_v8 = vrot.slane %v285_v7, 4 }
  0xca   : >> { %v289_v9 = vadd.f32 %v288_v8, %v285_v7 }
  0xcc   : >> { %v290_v10 = vrot.slane %v289_v9, 2 }
  0xce   : >> { %v291_v11 = vadd.f32 %v290_v10, %v289_v9 }
  0xd0   : >> { %v292_v12 = vrot.slane %v291_v11, 1 }
  0xd2   : >> { %v293_v13 = vadd.f32 %v292_v12, %v291_v11 }
  0xd4   : >> { %558 = vst [vmem:[%s741_s11 + $0x30] sm:$0x1] %v293_v13 }
  0xdb   : >> { %v560_v14 = vld [vmem:[%s726_s21 + $0x38] sm:$0xff] }
  0xdc   : >> { %v300_v15 = vmul.f32 %v560_v14, %v737_v22 }
  0xde   : >> { %v303_v16 = vrot.slane %v300_v15, 4 }
  0xe0   : >> { %v304_v17 = vadd.f32 %v303_v16, %v300_v15 }
  0xe2   : >> { %v305_v18 = vrot.slane %v304_v17, 2 }
  0xe4   : >> { %v306_v19 = vadd.f32 %v305_v18, %v304_v17 }
  0xe6   : >> { %v307_v20 = vrot.slane %v306_v19, 1  ;;  %189 = sbr.rel (!%p187_p7) target bundleno = 62 (0x3e), region = 199 }
  0xe8   : >> { %v308_v21 = vadd.f32 %v307_v20, %v306_v19 }
  0xea   : >> { %561 = vst [vmem:[%s741_s11 + $0x38] sm:$0x1] %v308_v21 }
  0xeb LB: >> { %s316_s13 = scalar_lea.vmem [#allocation3], %s683_s12  ;;  %s562_s14 = sshll.u32 %s683_s12, 3  ;;  %s683_s12 = sphi %s681_s12, %s315_s12  }
  0xec   : >> { %v317_v22 = vld [vmem:[%s316_s13] ss:$0 sm:$0xff]  ;;  %s319_s15 = scalar_lea.vmem %s726_s21, %s562_s14 [#allocation1]  ;;  %s315_s12 = sadd.s32 1, %s683_s12  }
  0xed   : >> { %627 = vrcp.f32 %v317_v22  ;;  %vm323_vm2 = vweird.f32 %v317_v22  ;;  %p312_p8 = scmp.ge.s32.totalorder %s315_s12, 8  }
  0xee   : > { %s564_s16 = sshll.u32 (%p312_p8), %s659_s6, 3 }
  0xef   : > { %s337_s19 = scalar_lea.vmem (%p312_p8), %s791_s1, %s564_s16 }
  0xf1   : >> { %v320_v23 = vld [vmem:[%s319_s15] sm:$0xff] }
  0xfa   : >> { %v628_v24 = vpop.eup %627  ;;  %314 = sbr.rel (!%p312_p8) target bundleno = 235 (0xeb), region = 210 }
  0xfb   : >> { %v322_v25 = vmul.f32 %v628_v24, %v320_v23 }
  0xfd   : >> { %v324_v26 = vsel %vm323_vm2, %v320_v23, %v322_v25 }
  0xfe   : >> { %325 = vst [vmem:[%s319_s15] sm:$0xff] %v324_v26 }
 0x105   : > { %v380_v27 = vld [vmem:[%s726_s21] sm:$0xff]  ;;  %v382_v28 = vld [vmem:[%s726_s21 + $0x8] sm:$0xff]  ;;  %v384_v29 = vld [vmem:[%s726_s21 + $0x10] sm:$0xff] }
 0x106   : > { %v386_v30 = vld [vmem:[%s726_s21 + $0x18] sm:$0xff]  ;;  %v388_v31 = vld [vmem:[%s726_s21 + $0x20] sm:$0xff]  ;;  %v390_v32 = vld [vmem:[%s726_s21 + $0x28] sm:$0xff]  ;;  %381 = vst [vmem:[%s337_s19] sm:$0xff] %v380_v27 }
 0x107   : > { %383 = vst [vmem:[%s337_s19 + $0x40] sm:$0xff] %v382_v28  ;;  %385 = vst [vmem:[%s337_s19 + $0x80] sm:$0xff] %v384_v29  ;;  %v392_v33 = vld [vmem:[%s726_s21 + $0x30] sm:$0xff]  ;;  %v394_v34 = vld [vmem:[%s726_s21 + $0x38] sm:$0xff] }
 0x108   : > { %387 = vst [vmem:[%s337_s19 + $0xc0] sm:$0xff] %v386_v30  ;;  %389 = vst [vmem:[%s337_s19 + $0x100] sm:$0xff] %v388_v31 }
 0x109   : > { %391 = vst [vmem:[%s337_s19 + $0x140] sm:$0xff] %v390_v32  ;;  %393 = vst [vmem:[%s337_s19 + $0x180] sm:$0xff] %v392_v33 }
 0x10a   : > { %395 = vst [vmem:[%s337_s19 + $0x1c0] sm:$0xff] %v394_v34 }
 0x10b PF: > { %s7_s8 = sadd.s32 1, %s667_s8   ;;  %s792_s6 = smov %s663_s7 }
 0x10c   : > { %p4_p9 = scmp.ge.s32.totalorder %s7_s8, 10   ;;  %s793_s7 = smov %s795_s10 }
 0x10e   :  { %6 = sbr.rel (!%p4_p9) target bundleno = 2 (0x2), region = 221 }

// kernel: neg.1
= control target key start
LH: loop header
LB: loop body
LE: loop exit
PB: predicated region body
PF: predicated region fallthrough
CT: control target
= control target key end

     0   :  { %s136_s0 = inlined_call_operand.vmem [shape: f32[1024,8], index: 0, kind: input, shape index: {}]   ;;  %s137_s1 = inlined_call_operand.vmem [shape: f32[1024,8], index: 1, kind: output, shape index: {}]  }
   0x1   :  { %v2_v0 = vld [vmem:[%s136_s0] sm:$0xff]  ;;  %v64_v1 = vld [vmem:[%s136_s0 + $0x8] sm:$0xff]  ;;  %v66_v2 = vld [vmem:[%s136_s0 + $0x10] sm:$0xff] }
   0x2   :  { %v5_v3 = vxor.u32 2147483648, %v2_v0  ;;  %v12_v4 = vxor.u32 2147483648, %v64_v1  ;;  %v20_v5 = vxor.u32 2147483648, %v66_v2  ;;  %v68_v6 = vld [vmem:[%s136_s0 + $0x18] sm:$0xff]  ;;  %v70_v7 = vld [vmem:[%s136_s0 + $0x20] sm:$0xff]  ;;  %v72_v8 = vld [vmem:[%s136_s0 + $0x28] sm:$0xff] }
   0x3   :  { %v28_v9 = vxor.u32 2147483648, %v68_v6  ;;  %v36_v10 = vxor.u32 2147483648, %v70_v7  ;;  %v44_v11 = vxor.u32 2147483648, %v72_v8  ;;  %v74_v12 = vld [vmem:[%s136_s0 + $0x30] sm:$0xff]  ;;  %v76_v13 = vld [vmem:[%s136_s0 + $0x38] sm:$0xff] }
   0x4   :  { %7 = vst [vmem:[%s137_s1] sm:$0xff] %v5_v3  ;;  %65 = vst [vmem:[%s137_s1 + $0x8] sm:$0xff] %v12_v4  ;;  %v52_v14 = vxor.u32 2147483648, %v74_v12  ;;  %v60_v15 = vxor.u32 2147483648, %v76_v13 }
   0x5   :  { %67 = vst [vmem:[%s137_s1 + $0x10] sm:$0xff] %v20_v5  ;;  %69 = vst [vmem:[%s137_s1 + $0x18] sm:$0xff] %v28_v9 }
   0x6   :  { %71 = vst [vmem:[%s137_s1 + $0x20] sm:$0xff] %v36_v10  ;;  %73 = vst [vmem:[%s137_s1 + $0x28] sm:$0xff] %v44_v11 }
   0x7   :  { %75 = vst [vmem:[%s137_s1 + $0x30] sm:$0xff] %v52_v14  ;;  %77 = vst [vmem:[%s137_s1 + $0x38] sm:$0xff] %v60_v15 }

// kernel: custom-call.69
= control target key start
LH: loop header
LB: loop body
LE: loop exit
PB: predicated region body
PF: predicated region fallthrough
CT: control target
= control target key end

     0   :  { %s6_s0 = inlined_call_operand.hbm [shape: pred[1024], index: 0, kind: output, shape index: {}]  }

// kernel: custom-call.76
= control target key start
LH: loop header
LB: loop body
LE: loop exit
PB: predicated region body
PF: predicated region fallthrough
CT: control target
= control target key end

     0   :  { %s1873_s13 = smov 0   ;;  %s2388_s0 = inlined_call_operand.vmem [shape: f32[1024,16,8], index: 0, kind: input, shape index: {}]   ;;  %s2389_s1 = inlined_call_operand.vmem [shape: f32[1024,16,8], index: 1, kind: output, shape index: {0}]   ;;  %s2390_s2 = inlined_call_operand.vmem [shape: f32[1024,8], index: 2, kind: output, shape index: {1}]  }
   0x1   :  { %v16_v0 = vld [vmem:[%s2388_s0] sm:$0xff]  ;;  %v18_v1 = vld [vmem:[%s2388_s0 + $0x8] sm:$0xff]  ;;  %v20_v2 = vld [vmem:[%s2388_s0 + $0x10] sm:$0xff] }
   0x2   :  { %v22_v3 = vld [vmem:[%s2388_s0 + $0x18] sm:$0xff]  ;;  %v24_v4 = vld [vmem:[%s2388_s0 + $0x20] sm:$0xff]  ;;  %v26_v5 = vld [vmem:[%s2388_s0 + $0x28] sm:$0xff]  ;;  %276 = vst [vmem:[#allocation1] sm:$0xff] %v16_v0 }
   0x3   :  { %280 = vst [vmem:[#allocation1 + $0x8] sm:$0xff] %v18_v1  ;;  %284 = vst [vmem:[#allocation1 + $0x10] sm:$0xff] %v20_v2  ;;  %v28_v6 = vld [vmem:[%s2388_s0 + $0x30] sm:$0xff]  ;;  %v30_v7 = vld [vmem:[%s2388_s0 + $0x38] sm:$0xff] }
   0x4   :  { %v32_v8 = vld [vmem:[%s2388_s0 + $0x40] sm:$0xff]  ;;  %288 = vst [vmem:[#allocation1 + $0x18] sm:$0xff] %v22_v3  ;;  %292 = vst [vmem:[#allocation1 + $0x20] sm:$0xff] %v24_v4  ;;  %v34_v9 = vld [vmem:[%s2388_s0 + $0x48] sm:$0xff] }
   0x5   :  { %296 = vst [vmem:[#allocation1 + $0x28] sm:$0xff] %v26_v5  ;;  %v36_v10 = vld [vmem:[%s2388_s0 + $0x50] sm:$0xff]  ;;  %v38_v11 = vld [vmem:[%s2388_s0 + $0x58] sm:$0xff]  ;;  %300 = vst [vmem:[#allocation1 + $0x30] sm:$0xff] %v28_v6 }
   0x6   :  { %304 = vst [vmem:[#allocation1 + $0x38] sm:$0xff] %v30_v7  ;;  %308 = vst [vmem:[#allocation1 + $0x40] sm:$0xff] %v32_v8  ;;  %v40_v12 = vld [vmem:[%s2388_s0 + $0x60] sm:$0xff]  ;;  %v42_v13 = vld [vmem:[%s2388_s0 + $0x68] sm:$0xff] }
   0x7   :  { %v44_v14 = vld [vmem:[%s2388_s0 + $0x70] sm:$0xff]  ;;  %312 = vst [vmem:[#allocation1 + $0x48] sm:$0xff] %v34_v9  ;;  %316 = vst [vmem:[#allocation1 + $0x50] sm:$0xff] %v36_v10  ;;  %v46_v15 = vld [vmem:[%s2388_s0 + $0x78] sm:$0xff] }
   0x8   :  { %320 = vst [vmem:[#allocation1 + $0x58] sm:$0xff] %v38_v11  ;;  %v48_v16 = vld [vmem:[%s2388_s0 + $0x80] sm:$0xff]  ;;  %v50_v17 = vld [vmem:[%s2388_s0 + $0x88] sm:$0xff]  ;;  %324 = vst [vmem:[#allocation1 + $0x60] sm:$0xff] %v40_v12 }
   0x9   :  { %328 = vst [vmem:[#allocation1 + $0x68] sm:$0xff] %v42_v13  ;;  %332 = vst [vmem:[#allocation1 + $0x70] sm:$0xff] %v44_v14  ;;  %v52_v18 = vld [vmem:[%s2388_s0 + $0x90] sm:$0xff]  ;;  %v54_v19 = vld [vmem:[%s2388_s0 + $0x98] sm:$0xff] }
   0xa   :  { %v56_v20 = vld [vmem:[%s2388_s0 + $0xa0] sm:$0xff]  ;;  %336 = vst [vmem:[#allocation1 + $0x78] sm:$0xff] %v46_v15  ;;  %340 = vst [vmem:[#allocation1 + $0x80] sm:$0xff] %v48_v16  ;;  %v58_v21 = vld [vmem:[%s2388_s0 + $0xa8] sm:$0xff] }
   0xb   :  { %344 = vst [vmem:[#allocation1 + $0x88] sm:$0xff] %v50_v17  ;;  %v60_v22 = vld [vmem:[%s2388_s0 + $0xb0] sm:$0xff]  ;;  %v62_v23 = vld [vmem:[%s2388_s0 + $0xb8] sm:$0xff]  ;;  %348 = vst [vmem:[#allocation1 + $0x90] sm:$0xff] %v52_v18 }
   0xc   :  { %352 = vst [vmem:[#allocation1 + $0x98] sm:$0xff] %v54_v19  ;;  %356 = vst [vmem:[#allocation1 + $0xa0] sm:$0xff] %v56_v20  ;;  %v64_v24 = vld [vmem:[%s2388_s0 + $0xc0] sm:$0xff]  ;;  %v66_v25 = vld [vmem:[%s2388_s0 + $0xc8] sm:$0xff] }
   0xd   :  { %v68_v26 = vld [vmem:[%s2388_s0 + $0xd0] sm:$0xff]  ;;  %360 = vst [vmem:[#allocation1 + $0xa8] sm:$0xff] %v58_v21  ;;  %364 = vst [vmem:[#allocation1 + $0xb0] sm:$0xff] %v60_v22  ;;  %v70_v27 = vld [vmem:[%s2388_s0 + $0xd8] sm:$0xff] }
   0xe   :  { %368 = vst [vmem:[#allocation1 + $0xb8] sm:$0xff] %v62_v23  ;;  %v72_v28 = vld [vmem:[%s2388_s0 + $0xe0] sm:$0xff]  ;;  %v74_v29 = vld [vmem:[%s2388_s0 + $0xe8] sm:$0xff]  ;;  %372 = vst [vmem:[#allocation1 + $0xc0] sm:$0xff] %v64_v24 }
   0xf   :  { %376 = vst [vmem:[#allocation1 + $0xc8] sm:$0xff] %v66_v25  ;;  %380 = vst [vmem:[#allocation1 + $0xd0] sm:$0xff] %v68_v26  ;;  %v76_v30 = vld [vmem:[%s2388_s0 + $0xf0] sm:$0xff]  ;;  %v78_v31 = vld [vmem:[%s2388_s0 + $0xf8] sm:$0xff] }
  0x10   :  { %v80_v32 = vld [vmem:[%s2388_s0 + $0x100] sm:$0xff]  ;;  %384 = vst [vmem:[#allocation1 + $0xd8] sm:$0xff] %v70_v27  ;;  %388 = vst [vmem:[#allocation1 + $0xe0] sm:$0xff] %v72_v28  ;;  %v82_v33 = vld [vmem:[%s2388_s0 + $0x108] sm:$0xff] }
  0x11   :  { %392 = vst [vmem:[#allocation1 + $0xe8] sm:$0xff] %v74_v29  ;;  %v84_v34 = vld [vmem:[%s2388_s0 + $0x110] sm:$0xff]  ;;  %v86_v35 = vld [vmem:[%s2388_s0 + $0x118] sm:$0xff]  ;;  %396 = vst [vmem:[#allocation1 + $0xf0] sm:$0xff] %v76_v30 }
  0x12   :  { %400 = vst [vmem:[#allocation1 + $0xf8] sm:$0xff] %v78_v31  ;;  %404 = vst [vmem:[#allocation1 + $0x100] sm:$0xff] %v80_v32  ;;  %v88_v36 = vld [vmem:[%s2388_s0 + $0x120] sm:$0xff]  ;;  %v90_v37 = vld [vmem:[%s2388_s0 + $0x128] sm:$0xff] }
  0x13   :  { %v92_v38 = vld [vmem:[%s2388_s0 + $0x130] sm:$0xff]  ;;  %408 = vst [vmem:[#allocation1 + $0x108] sm:$0xff] %v82_v33  ;;  %412 = vst [vmem:[#allocation1 + $0x110] sm:$0xff] %v84_v34  ;;  %v94_v39 = vld [vmem:[%s2388_s0 + $0x138] sm:$0xff] }
  0x14   :  { %416 = vst [vmem:[#allocation1 + $0x118] sm:$0xff] %v86_v35  ;;  %v96_v40 = vld [vmem:[%s2388_s0 + $0x140] sm:$0xff]  ;;  %v98_v41 = vld [vmem:[%s2388_s0 + $0x148] sm:$0xff]  ;;  %420 = vst [vmem:[#allocation1 + $0x120] sm:$0xff] %v88_v36 }
  0x15   :  { %424 = vst [vmem:[#allocation1 + $0x128] sm:$0xff] %v90_v37  ;;  %428 = vst [vmem:[#allocation1 + $0x130] sm:$0xff] %v92_v38  ;;  %v100_v42 = vld [vmem:[%s2388_s0 + $0x150] sm:$0xff]  ;;  %v102_v43 = vld [vmem:[%s2388_s0 + $0x158] sm:$0xff] }
  0x16   :  { %v104_v44 = vld [vmem:[%s2388_s0 + $0x160] sm:$0xff]  ;;  %432 = vst [vmem:[#allocation1 + $0x138] sm:$0xff] %v94_v39  ;;  %436 = vst [vmem:[#allocation1 + $0x140] sm:$0xff] %v96_v40  ;;  %v106_v45 = vld [vmem:[%s2388_s0 + $0x168] sm:$0xff] }
  0x17   :  { %440 = vst [vmem:[#allocation1 + $0x148] sm:$0xff] %v98_v41  ;;  %v108_v46 = vld [vmem:[%s2388_s0 + $0x170] sm:$0xff]  ;;  %v110_v47 = vld [vmem:[%s2388_s0 + $0x178] sm:$0xff]  ;;  %444 = vst [vmem:[#allocation1 + $0x150] sm:$0xff] %v100_v42 }
  0x18   :  { %448 = vst [vmem:[#allocation1 + $0x158] sm:$0xff] %v102_v43  ;;  %452 = vst [vmem:[#allocation1 + $0x160] sm:$0xff] %v104_v44  ;;  %v112_v48 = vld [vmem:[%s2388_s0 + $0x180] sm:$0xff]  ;;  %v114_v49 = vld [vmem:[%s2388_s0 + $0x188] sm:$0xff] }
  0x19   :  { %v116_v50 = vld [vmem:[%s2388_s0 + $0x190] sm:$0xff]  ;;  %456 = vst [vmem:[#allocation1 + $0x168] sm:$0xff] %v106_v45  ;;  %460 = vst [vmem:[#allocation1 + $0x170] sm:$0xff] %v108_v46  ;;  %v118_v51 = vld [vmem:[%s2388_s0 + $0x198] sm:$0xff] }
  0x1a   :  { %464 = vst [vmem:[#allocation1 + $0x178] sm:$0xff] %v110_v47  ;;  %v120_v52 = vld [vmem:[%s2388_s0 + $0x1a0] sm:$0xff]  ;;  %v122_v53 = vld [vmem:[%s2388_s0 + $0x1a8] sm:$0xff]  ;;  %468 = vst [vmem:[#allocation1 + $0x180] sm:$0xff] %v112_v48 }
  0x1b   :  { %472 = vst [vmem:[#allocation1 + $0x188] sm:$0xff] %v114_v49  ;;  %476 = vst [vmem:[#allocation1 + $0x190] sm:$0xff] %v116_v50  ;;  %v124_v54 = vld [vmem:[%s2388_s0 + $0x1b0] sm:$0xff]  ;;  %v126_v55 = vld [vmem:[%s2388_s0 + $0x1b8] sm:$0xff] }
  0x1c   :  { %v128_v56 = vld [vmem:[%s2388_s0 + $0x1c0] sm:$0xff]  ;;  %480 = vst [vmem:[#allocation1 + $0x198] sm:$0xff] %v118_v51  ;;  %484 = vst [vmem:[#allocation1 + $0x1a0] sm:$0xff] %v120_v52  ;;  %v130_v57 = vld [vmem:[%s2388_s0 + $0x1c8] sm:$0xff] }
  0x1d   :  { %488 = vst [vmem:[#allocation1 + $0x1a8] sm:$0xff] %v122_v53  ;;  %v132_v58 = vld [vmem:[%s2388_s0 + $0x1d0] sm:$0xff]  ;;  %v134_v59 = vld [vmem:[%s2388_s0 + $0x1d8] sm:$0xff]  ;;  %492 = vst [vmem:[#allocation1 + $0x1b0] sm:$0xff] %v124_v54 }
  0x1e   :  { %496 = vst [vmem:[#allocation1 + $0x1b8] sm:$0xff] %v126_v55  ;;  %500 = vst [vmem:[#allocation1 + $0x1c0] sm:$0xff] %v128_v56  ;;  %v136_v60 = vld [vmem:[%s2388_s0 + $0x1e0] sm:$0xff]  ;;  %v138_v61 = vld [vmem:[%s2388_s0 + $0x1e8] sm:$0xff] }
  0x1f   :  { %v140_v62 = vld [vmem:[%s2388_s0 + $0x1f0] sm:$0xff]  ;;  %504 = vst [vmem:[#allocation1 + $0x1c8] sm:$0xff] %v130_v57  ;;  %508 = vst [vmem:[#allocation1 + $0x1d0] sm:$0xff] %v132_v58  ;;  %v142_v63 = vld [vmem:[%s2388_s0 + $0x1f8] sm:$0xff] }
  0x20   :  { %512 = vst [vmem:[#allocation1 + $0x1d8] sm:$0xff] %v134_v59  ;;  %v144_v0 = vld [vmem:[%s2388_s0 + $0x200] sm:$0xff]  ;;  %v146_v1 = vld [vmem:[%s2388_s0 + $0x208] sm:$0xff]  ;;  %516 = vst [vmem:[#allocation1 + $0x1e0] sm:$0xff] %v136_v60 }
  0x21   :  { %520 = vst [vmem:[#allocation1 + $0x1e8] sm:$0xff] %v138_v61  ;;  %524 = vst [vmem:[#allocation1 + $0x1f0] sm:$0xff] %v140_v62  ;;  %v148_v2 = vld [vmem:[%s2388_s0 + $0x210] sm:$0xff]  ;;  %v150_v3 = vld [vmem:[%s2388_s0 + $0x218] sm:$0xff] }
  0x22   :  { %v152_v4 = vld [vmem:[%s2388_s0 + $0x220] sm:$0xff]  ;;  %528 = vst [vmem:[#allocation1 + $0x1f8] sm:$0xff] %v142_v63  ;;  %532 = vst [vmem:[#allocation1 + $0x200] sm:$0xff] %v144_v0  ;;  %v154_v5 = vld [vmem:[%s2388_s0 + $0x228] sm:$0xff] }
  0x23   :  { %536 = vst [vmem:[#allocation1 + $0x208] sm:$0xff] %v146_v1  ;;  %v156_v6 = vld [vmem:[%s2388_s0 + $0x230] sm:$0xff]  ;;  %v158_v7 = vld [vmem:[%s2388_s0 + $0x238] sm:$0xff]  ;;  %540 = vst [vmem:[#allocation1 + $0x210] sm:$0xff] %v148_v2 }
  0x24   :  { %544 = vst [vmem:[#allocation1 + $0x218] sm:$0xff] %v150_v3  ;;  %548 = vst [vmem:[#allocation1 + $0x220] sm:$0xff] %v152_v4  ;;  %v160_v8 = vld [vmem:[%s2388_s0 + $0x240] sm:$0xff]  ;;  %v162_v9 = vld [vmem:[%s2388_s0 + $0x248] sm:$0xff] }
  0x25   :  { %v164_v10 = vld [vmem:[%s2388_s0 + $0x250] sm:$0xff]  ;;  %552 = vst [vmem:[#allocation1 + $0x228] sm:$0xff] %v154_v5  ;;  %556 = vst [vmem:[#allocation1 + $0x230] sm:$0xff] %v156_v6  ;;  %v166_v11 = vld [vmem:[%s2388_s0 + $0x258] sm:$0xff] }
  0x26   :  { %560 = vst [vmem:[#allocation1 + $0x238] sm:$0xff] %v158_v7  ;;  %v168_v12 = vld [vmem:[%s2388_s0 + $0x260] sm:$0xff]  ;;  %v170_v13 = vld [vmem:[%s2388_s0 + $0x268] sm:$0xff]  ;;  %564 = vst [vmem:[#allocation1 + $0x240] sm:$0xff] %v160_v8 }
  0x27   :  { %568 = vst [vmem:[#allocation1 + $0x248] sm:$0xff] %v162_v9  ;;  %572 = vst [vmem:[#allocation1 + $0x250] sm:$0xff] %v164_v10  ;;  %v172_v14 = vld [vmem:[%s2388_s0 + $0x270] sm:$0xff]  ;;  %v174_v15 = vld [vmem:[%s2388_s0 + $0x278] sm:$0xff] }
  0x28   :  { %v176_v16 = vld [vmem:[%s2388_s0 + $0x280] sm:$0xff]  ;;  %576 = vst [vmem:[#allocation1 + $0x258] sm:$0xff] %v166_v11  ;;  %580 = vst [vmem:[#allocation1 + $0x260] sm:$0xff] %v168_v12  ;;  %v178_v17 = vld [vmem:[%s2388_s0 + $0x288] sm:$0xff] }
  0x29   :  { %584 = vst [vmem:[#allocation1 + $0x268] sm:$0xff] %v170_v13  ;;  %v180_v18 = vld [vmem:[%s2388_s0 + $0x290] sm:$0xff]  ;;  %v182_v19 = vld [vmem:[%s2388_s0 + $0x298] sm:$0xff]  ;;  %588 = vst [vmem:[#allocation1 + $0x270] sm:$0xff] %v172_v14 }
  0x2a   :  { %592 = vst [vmem:[#allocation1 + $0x278] sm:$0xff] %v174_v15  ;;  %596 = vst [vmem:[#allocation1 + $0x280] sm:$0xff] %v176_v16  ;;  %v184_v20 = vld [vmem:[%s2388_s0 + $0x2a0] sm:$0xff]  ;;  %v186_v21 = vld [vmem:[%s2388_s0 + $0x2a8] sm:$0xff] }
  0x2b   :  { %v188_v22 = vld [vmem:[%s2388_s0 + $0x2b0] sm:$0xff]  ;;  %600 = vst [vmem:[#allocation1 + $0x288] sm:$0xff] %v178_v17  ;;  %604 = vst [vmem:[#allocation1 + $0x290] sm:$0xff] %v180_v18  ;;  %v190_v23 = vld [vmem:[%s2388_s0 + $0x2b8] sm:$0xff] }
  0x2c   :  { %608 = vst [vmem:[#allocation1 + $0x298] sm:$0xff] %v182_v19  ;;  %v192_v24 = vld [vmem:[%s2388_s0 + $0x2c0] sm:$0xff]  ;;  %v194_v25 = vld [vmem:[%s2388_s0 + $0x2c8] sm:$0xff]  ;;  %612 = vst [vmem:[#allocation1 + $0x2a0] sm:$0xff] %v184_v20 }
  0x2d   :  { %616 = vst [vmem:[#allocation1 + $0x2a8] sm:$0xff] %v186_v21  ;;  %620 = vst [vmem:[#allocation1 + $0x2b0] sm:$0xff] %v188_v22  ;;  %v196_v26 = vld [vmem:[%s2388_s0 + $0x2d0] sm:$0xff]  ;;  %v198_v27 = vld [vmem:[%s2388_s0 + $0x2d8] sm:$0xff] }
  0x2e   :  { %v200_v28 = vld [vmem:[%s2388_s0 + $0x2e0] sm:$0xff]  ;;  %624 = vst [vmem:[#allocation1 + $0x2b8] sm:$0xff] %v190_v23  ;;  %628 = vst [vmem:[#allocation1 + $0x2c0] sm:$0xff] %v192_v24  ;;  %v202_v29 = vld [vmem:[%s2388_s0 + $0x2e8] sm:$0xff] }
  0x2f   :  { %632 = vst [vmem:[#allocation1 + $0x2c8] sm:$0xff] %v194_v25  ;;  %v204_v30 = vld [vmem:[%s2388_s0 + $0x2f0] sm:$0xff]  ;;  %v206_v31 = vld [vmem:[%s2388_s0 + $0x2f8] sm:$0xff]  ;;  %636 = vst [vmem:[#allocation1 + $0x2d0] sm:$0xff] %v196_v26 }
  0x30   :  { %640 = vst [vmem:[#allocation1 + $0x2d8] sm:$0xff] %v198_v27  ;;  %644 = vst [vmem:[#allocation1 + $0x2e0] sm:$0xff] %v200_v28  ;;  %v208_v32 = vld [vmem:[%s2388_s0 + $0x300] sm:$0xff]  ;;  %v210_v33 = vld [vmem:[%s2388_s0 + $0x308] sm:$0xff] }
  0x31   :  { %v212_v34 = vld [vmem:[%s2388_s0 + $0x310] sm:$0xff]  ;;  %648 = vst [vmem:[#allocation1 + $0x2e8] sm:$0xff] %v202_v29  ;;  %652 = vst [vmem:[#allocation1 + $0x2f0] sm:$0xff] %v204_v30  ;;  %v214_v35 = vld [vmem:[%s2388_s0 + $0x318] sm:$0xff] }
  0x32   :  { %656 = vst [vmem:[#allocation1 + $0x2f8] sm:$0xff] %v206_v31  ;;  %v216_v36 = vld [vmem:[%s2388_s0 + $0x320] sm:$0xff]  ;;  %v218_v37 = vld [vmem:[%s2388_s0 + $0x328] sm:$0xff]  ;;  %660 = vst [vmem:[#allocation1 + $0x300] sm:$0xff] %v208_v32 }
  0x33   :  { %664 = vst [vmem:[#allocation1 + $0x308] sm:$0xff] %v210_v33  ;;  %668 = vst [vmem:[#allocation1 + $0x310] sm:$0xff] %v212_v34  ;;  %v220_v38 = vld [vmem:[%s2388_s0 + $0x330] sm:$0xff]  ;;  %v222_v39 = vld [vmem:[%s2388_s0 + $0x338] sm:$0xff] }
  0x34   :  { %v224_v40 = vld [vmem:[%s2388_s0 + $0x340] sm:$0xff]  ;;  %672 = vst [vmem:[#allocation1 + $0x318] sm:$0xff] %v214_v35  ;;  %676 = vst [vmem:[#allocation1 + $0x320] sm:$0xff] %v216_v36  ;;  %v226_v41 = vld [vmem:[%s2388_s0 + $0x348] sm:$0xff] }
  0x35   :  { %680 = vst [vmem:[#allocation1 + $0x328] sm:$0xff] %v218_v37  ;;  %v228_v42 = vld [vmem:[%s2388_s0 + $0x350] sm:$0xff]  ;;  %v230_v43 = vld [vmem:[%s2388_s0 + $0x358] sm:$0xff]  ;;  %684 = vst [vmem:[#allocation1 + $0x330] sm:$0xff] %v220_v38 }
  0x36   :  { %688 = vst [vmem:[#allocation1 + $0x338] sm:$0xff] %v222_v39  ;;  %692 = vst [vmem:[#allocation1 + $0x340] sm:$0xff] %v224_v40  ;;  %v232_v44 = vld [vmem:[%s2388_s0 + $0x360] sm:$0xff]  ;;  %v234_v45 = vld [vmem:[%s2388_s0 + $0x368] sm:$0xff] }
  0x37   :  { %v236_v46 = vld [vmem:[%s2388_s0 + $0x370] sm:$0xff]  ;;  %696 = vst [vmem:[#allocation1 + $0x348] sm:$0xff] %v226_v41  ;;  %700 = vst [vmem:[#allocation1 + $0x350] sm:$0xff] %v228_v42  ;;  %v238_v47 = vld [vmem:[%s2388_s0 + $0x378] sm:$0xff] }
  0x38   :  { %704 = vst [vmem:[#allocation1 + $0x358] sm:$0xff] %v230_v43  ;;  %v240_v48 = vld [vmem:[%s2388_s0 + $0x380] sm:$0xff]  ;;  %v242_v49 = vld [vmem:[%s2388_s0 + $0x388] sm:$0xff]  ;;  %708 = vst [vmem:[#allocation1 + $0x360] sm:$0xff] %v232_v44 }
  0x39   :  { %712 = vst [vmem:[#allocation1 + $0x368] sm:$0xff] %v234_v45  ;;  %716 = vst [vmem:[#allocation1 + $0x370] sm:$0xff] %v236_v46  ;;  %v244_v50 = vld [vmem:[%s2388_s0 + $0x390] sm:$0xff]  ;;  %v246_v51 = vld [vmem:[%s2388_s0 + $0x398] sm:$0xff] }
  0x3a   :  { %v248_v52 = vld [vmem:[%s2388_s0 + $0x3a0] sm:$0xff]  ;;  %720 = vst [vmem:[#allocation1 + $0x378] sm:$0xff] %v238_v47  ;;  %724 = vst [vmem:[#allocation1 + $0x380] sm:$0xff] %v240_v48  ;;  %v250_v53 = vld [vmem:[%s2388_s0 + $0x3a8] sm:$0xff] }
  0x3b   :  { %728 = vst [vmem:[#allocation1 + $0x388] sm:$0xff] %v242_v49  ;;  %v252_v54 = vld [vmem:[%s2388_s0 + $0x3b0] sm:$0xff]  ;;  %v254_v55 = vld [vmem:[%s2388_s0 + $0x3b8] sm:$0xff]  ;;  %732 = vst [vmem:[#allocation1 + $0x390] sm:$0xff] %v244_v50 }
  0x3c   :  { %736 = vst [vmem:[#allocation1 + $0x398] sm:$0xff] %v246_v51  ;;  %740 = vst [vmem:[#allocation1 + $0x3a0] sm:$0xff] %v248_v52  ;;  %v256_v56 = vld [vmem:[%s2388_s0 + $0x3c0] sm:$0xff]  ;;  %v258_v57 = vld [vmem:[%s2388_s0 + $0x3c8] sm:$0xff] }
  0x3d   :  { %v260_v58 = vld [vmem:[%s2388_s0 + $0x3d0] sm:$0xff]  ;;  %744 = vst [vmem:[#allocation1 + $0x3a8] sm:$0xff] %v250_v53  ;;  %748 = vst [vmem:[#allocation1 + $0x3b0] sm:$0xff] %v252_v54  ;;  %v262_v59 = vld [vmem:[%s2388_s0 + $0x3d8] sm:$0xff] }
  0x3e   :  { %752 = vst [vmem:[#allocation1 + $0x3b8] sm:$0xff] %v254_v55  ;;  %v264_v60 = vld [vmem:[%s2388_s0 + $0x3e0] sm:$0xff]  ;;  %v266_v61 = vld [vmem:[%s2388_s0 + $0x3e8] sm:$0xff]  ;;  %756 = vst [vmem:[#allocation1 + $0x3c0] sm:$0xff] %v256_v56 }
  0x3f   :  { %760 = vst [vmem:[#allocation1 + $0x3c8] sm:$0xff] %v258_v57  ;;  %764 = vst [vmem:[#allocation1 + $0x3d0] sm:$0xff] %v260_v58  ;;  %v268_v62 = vld [vmem:[%s2388_s0 + $0x3f0] sm:$0xff]  ;;  %v270_v63 = vld [vmem:[%s2388_s0 + $0x3f8] sm:$0xff] }
  0x40   :  { %768 = vst [vmem:[#allocation1 + $0x3d8] sm:$0xff] %v262_v59  ;;  %772 = vst [vmem:[#allocation1 + $0x3e0] sm:$0xff] %v264_v60 }
  0x41   :  { %776 = vst [vmem:[#allocation1 + $0x3e8] sm:$0xff] %v266_v61  ;;  %780 = vst [vmem:[#allocation1 + $0x3f0] sm:$0xff] %v268_v62 }
  0x42   :  { %784 = vst [vmem:[#allocation1 + $0x3f8] sm:$0xff] %v270_v63 }
  0x43 LB: > { %s1387_s14 = sshll.u32 %s1462_s13, 3  ;;  %v1472_v0 = vmov 0.0   ;;  %s1881_s0 = smov 0   ;;  %s1462_s13 = sphi %s1873_s13, %s790_s13  }
  0x44   : > { %s792_s15 = scalar_lea.vmem [#allocation2], %s1387_s14 }
  0x45   : > { %793 = vst [vmem:[%s792_s15] sm:$0xff] %v1472_v0 }
  0x46 LB: >> { %v805_v1 = vlaneseq  ;;  %s1388_s16 = sshll.u32 %s1466_s0, 4  ;;  %v1890_v3 = vstv %s1466_s0  ;;  %s838_s19 = sshrl.u32 %s1466_s0, 3  ;;  %v1473_v63 = vmov 1.0   ;;  %s1466_s0 = sphi %s1881_s0, %s2394_s0  }
  0x47   : >> { %s801_s17 = sadd.s32 %s1462_s13, %s1388_s16  ;;  %s839_s21 = sand.u32 7, %s1466_s0  }
  0x48   : >> { %v1887_v2 = vshrl.u32 %v805_v1, 7  ;;  %s1389_s18 = sshll.u32 %s801_s17, 3  ;;  %s1906_s22 = sshll.u32 %s838_s19, 6 }
  0x49   : >> { %s1899_s20 = scalar_lea.vmem [#allocation1], %s1389_s18  ;;  %s1911_s23 = sadd.s32 %s1387_s14, %s839_s21 }
  0x4a   : >> { %vm809_vm0 = vcmp.gt.s32.totalorder %v1887_v2, %v1890_v3  ;;  %v816_v4 = vadd.s32 8, %v1887_v2  ;;  %v881_v2 = vmov %v1887_v2  ;;  %v804_v6 = vld [vmem:[%s1899_s20] sm:$0xff]  ;;  %s911_s24 = sadd.s32 %s1906_s22, %s1911_s23  ;;  %s1920_s25 = sadd.s32 1, %s1466_s0  }
  0x4b   : >> { %vm885_vm1 = vcmp.gt.s32.totalorder %v881_v2, %v1890_v3  ;;  %v893_v5 = vadd.s32 8, %v881_v2  ;;  %v1390_v7 = vld [vmem:[%s1899_s20 + $0x40] sm:$0xff]  ;;  %s878_s20 = smov %s1899_s20  ;;  %v810_v8 = vsel %vm809_vm0, %v804_v6, 0.0  ;;  %s841_s26 = sadd.s32 %s1906_s22, %s839_s21 }
  0x4c   : >> { %vm818_vm2 = vcmp.gt.s32.totalorder %v816_v4, %v1890_v3  ;;  %v882_v10 = vld [vmem:[%s878_s20] sm:$0xff]  ;;  %v811_v11 = vmul.f32 %v810_v8, %v810_v8  ;;  %s842_s27 = scalar_lea.vmem %s1899_s20, %s841_s26 [#allocation1]  ;;  %s912_s28 = scalar_lea.vmem [#allocation2], %s911_s24 }
  0x4d   : >> { %v821_v9 = vsel %vm818_vm2, %v1390_v7, 0.0  ;;  %vm895_vm3 = vcmp.gt.s32.totalorder %v893_v5, %v1890_v3  ;;  %v1913_v13 = vld [vmem:[%s878_s20 + $0x40] sm:$0xff]  ;;  %v886_v14 = vsel %vm885_vm1, %v882_v10, 0.0  ;;  %vm896_vm4 = vcmp.lt.s32.totalorder %v893_v5, 16  ;;  %s904_s29 = scalar_lea.vmem [#allocation3], %s1466_s0  ;;  %p1373_p0 = scmp.ge.s32.totalorder %s1920_s25, 8 }
  0x4e   : >> { %v822_v12 = vmul.f32 %v821_v9, %v821_v9  ;;  %vm1922_vm5 = vmand %vm895_vm3, %vm896_vm4  ;;  %v843_v24 = vld [vmem:[%s842_s27] ss:$0 sm:$0xff]  ;;  %s2393_s30 = smov (!%p1373_p0), %s1920_s25 }
  0x4f   : >> { %v898_v17 = vsel %vm1922_vm5, %v1913_v13, 0.0  ;;  %v844_v25 = vand.u32 2147483647, %v843_v24  ;;  %vm869_vm11 = vcmp.lt.f32.partialorder %v843_v24, 0.0 }
  0x50   : >> { %v823_v15 = vadd.f32 %v822_v12, %v811_v11 }
  0x51   : >> { %v845_v30 = vmax.f32 %v844_v25, 0.0 }
  0x52   : >> { %v824_v18 = vrot.slane %v823_v15, 4 }
  0x54   : >> { %v825_v19 = vadd.f32 %v824_v18, %v823_v15 }
  0x56   : >> { %v826_v20 = vrot.slane %v825_v19, 2 }
  0x58   : >> { %v827_v21 = vadd.f32 %v826_v20, %v825_v19 }
  0x5a   : >> { %v828_v22 = vrot.slane %v827_v21, 1 }
  0x5c   : >> { %v829_v23 = vadd.f32 %v828_v22, %v827_v21 }
  0x5e   : >> { %1438 = vrsqrt.f32 %v829_v23  ;;  %vm832_vm6 = vcmp.eq.f32.partialorder %v829_v23, inf  ;;  %v835_v27 = vand.u32 2147483648, %v829_v23  ;;  %vm834_vm7 = vcmp.eq.f32.partialorder %v829_v23, 0.0 }
  0x6b   : >> { %v1439_v26 = vpop.eup %1438 }
  0x6c   : >> { %v831_v28 = vmul.f32 %v1439_v26, %v829_v23 }
  0x6e   : >> { %v833_v29 = vsel %vm832_vm6, %v829_v23, %v831_v28 }
  0x6f   : >> { %v836_v31 = vsel %vm834_vm7, %v835_v27, %v833_v29 }
  0x70   : >> { %v846_v32 = vand.u32 2147483647, %v836_v31 }
  0x72   : >> { %v847_v33 = vmax.f32 %v845_v30, %v846_v32 }
  0x74   : >> { %1440 = vrcp.f32 %v847_v33  ;;  %vm859_vm10 = vcmp.eq.f32.partialorder %v847_v33, 0.0 }
  0x81   : >> { %v1441_v34 = vpop.eup %1440 }
  0x82   : >> { %v849_v35 = vmul.f32 %v1441_v34, %v844_v25  ;;  %v852_v36 = vmul.f32 0.0, %v1441_v34  ;;  %v856_v37 = vmul.f32 %v1441_v34, %v846_v32 }
  0x84   : >> { %v850_v38 = vmul.f32 %v849_v35, %v849_v35  ;;  %v853_v39 = vmul.f32 %v852_v36, %v852_v36  ;;  %v857_v40 = vmul.f32 %v856_v37, %v856_v37 }
  0x86   : >> { %v854_v41 = vadd.f32 %v853_v39, %v850_v38 }
  0x88   : >> { %v858_v42 = vadd.f32 %v857_v40, %v854_v41 }
  0x8a   : >> { %1442 = vrsqrt.f32 %v858_v42  ;;  %vm862_vm8 = vcmp.eq.f32.partialorder %v858_v42, inf  ;;  %v865_v44 = vand.u32 2147483648, %v858_v42  ;;  %vm864_vm9 = vcmp.eq.f32.partialorder %v858_v42, 0.0 }
  0x97   : >> { %v1443_v43 = vpop.eup %1442 }
  0x98   : >> { %v861_v45 = vmul.f32 %v1443_v43, %v858_v42 }
  0x9a   : >> { %v863_v46 = vsel %vm862_vm8, %v858_v42, %v861_v45 }
  0x9b   : >> { %v866_v47 = vsel %vm864_vm9, %v865_v44, %v863_v46 }
  0x9c   : >> { %v867_v48 = vmul.f32 %v866_v47, %v847_v33 }
  0x9e   : >> { %v868_v49 = vsel %vm859_vm10, 0.0, %v867_v48 }
  0x9f   : >> { %v870_v50 = vxor.u32 2147483648, %v868_v49 }
  0xa1   : >> { %v871_v51 = vsel %vm869_vm11, %v868_v49, %v870_v50 }
  0xa2   : >> { %1444 = vrcp.f32 %v871_v51  ;;  %v1933_v52 = vsel %vm834_vm7, %v843_v24, %v871_v51  ;;  %v872_v54 = vsub.f32 %v871_v51, %v843_v24 }
  0xa3   : >> { %v877_v53 = vsub.f32 %v843_v24, %v1933_v52 }
  0xa5   : >> { %1446 = vrcp.f32 %v877_v53 }
  0xaf   : >> { %v1445_v55 = vpop.eup %1444 }
  0xb0   : >> { %v874_v56 = vmul.f32 %v1445_v55, %v872_v54 }
  0xb2   : >> { %v1447_v57 = vpop.eup %1446  ;;  %v876_v58 = vsel %vm834_vm7, 0.0, %v874_v56 }
  0xb3   : >> { %v888_v59 = vmul.f32 %v1447_v57, %v886_v14  ;;  %v900_v60 = vmul.f32 %v1447_v57, %v898_v17  ;;  %913 = vst [vmem:[%s912_s28] sm:$0x1] %v876_v58  ;;  %1374 = sbr.rel (%p1373_p0) target bundleno = 216 (0xd8), region = 366 }
  0xb5   : >> { %v889_v61 = vsel %vm834_vm7, 0.0, %v888_v59  ;;  %v901_v62 = vsel %vm834_vm7, 0.0, %v900_v60 }
  0xb6   : >> { %890 = vst [vmem:[#allocation3] sm:$0xff] %v889_v61  ;;  %903 = vst [vmem:[#allocation3 + $0x8] sm:$0xff] %v901_v62 }
  0xb7   : >> { %905 = vst [vmem:[%s904_s29] sm:$0x1] %v1473_v63 }
  0xb8 LB: >>> { %v923_v2 = vmov %v1887_v2  ;;  %s1395_s3 = sshll.u32 %s1470_s30, 4  ;;  %s918_s30 = sadd.s32 1, %s1470_s30   ;;  %s1470_s30 = sphi %s2393_s30, %s918_s30  }
  0xb9   : >>> { %v932_v0 = vadd.s32 8, %v923_v2  ;;  %s927_s4 = sadd.s32 %s1462_s13, %s1395_s3  ;;  %v953_v2 = vmov %v1887_v2  ;;  %p917_p1 = scmp.ge.s32.totalorder %s918_s30, 8 }
  0xba   : >>> { %s1396_s5 = sshll.u32 %s927_s4, 3  ;;  %v968_v17 = vadd.s32 8, %v953_v2  ;;  %vm964_vm13 = vcmp.ge.s32.totalorder %v953_v2, %v1890_v3 }
  0xbb   : >>> { %s929_s6 = scalar_lea.vmem [#allocation1], %s1396_s5  ;;  %vm942_vm12 = vcmp.lt.s32.totalorder %v932_v0, 16 }
  0xbc   : >>> { %v930_v5 = vld [vmem:[%s929_s6] sm:$0xff]  ;;  %vm979_vm14 = vcmp.ge.s32.totalorder %v968_v17, %v1890_v3 }
  0xbd   : >>> { %v1399_v6 = vld [vmem:[%s929_s6 + $0x40] sm:$0xff] }
  0xbe   : >>> { %v925_v1 = vld [vmem:[#allocation3] sm:$0xff]  ;;  %v934_v4 = vld [vmem:[#allocation3 + $0x8] sm:$0xff] }
  0xbf   : >>> { %v931_v7 = vmul.f32 %v930_v5, %v925_v1  ;;  %v941_v8 = vmul.f32 %v1399_v6, %v934_v4 }
  0xc1   : >>> { %v943_v9 = vsel %vm942_vm12, %v941_v8, 0.0 }
  0xc2   : >>> { %v944_v10 = vadd.f32 %v943_v9, %v931_v7 }
  0xc4   : >>> { %v945_v11 = vrot.slane %v944_v10, 4 }
  0xc6   : >>> { %v946_v12 = vadd.f32 %v945_v11, %v944_v10 }
  0xc8   : >>> { %v947_v13 = vrot.slane %v946_v12, 2 }
  0xca   : >>> { %v948_v14 = vadd.f32 %v947_v13, %v946_v12 }
  0xcc   : >>> { %v949_v15 = vrot.slane %v948_v14, 1 }
  0xce   : >>> { %v950_v16 = vadd.f32 %v949_v15, %v948_v14 }
  0xd0   : >>> { %v954_v18 = vmul.f32 %v950_v16, %v876_v58 }
  0xd2   : >>> { %v957_v19 = vmul.f32 %v954_v18, %v925_v1  ;;  %v971_v20 = vmul.f32 %v954_v18, %v934_v4 }
  0xd3   : >> { %920 = sbr.rel (!%p917_p1) target bundleno = 184 (0xb8), region = 372 }
  0xd4   : >>> { %v965_v21 = vsub.f32 %v930_v5, %v957_v19  ;;  %v980_v22 = vsub.f32 %v1399_v6, %v971_v20 }
  0xd6   : >>> { %v966_v23 = vsel %vm964_vm13, %v965_v21, %v930_v5  ;;  %v981_v24 = vsel %vm979_vm14, %v980_v22, %v1399_v6 }
  0xd7   : >>> { %967 = vst [vmem:[%s929_s6] sm:$0xff] %v966_v23  ;;  %1405 = vst [vmem:[%s929_s6 + $0x40] sm:$0xff] %v981_v24 }
  0xd8 PF: >> { %v985_v2 = vmov %v1887_v2  ;;  %s2394_s0 = smov %s1920_s25  ;;  %s790_s13 = sadd.s32 (%p1373_p0), 1, %s1462_s13  }
  0xd9   : >> { %vm994_vm15 = vcmp.gt.s32.totalorder %v985_v2, %v1890_v3  ;;  %vm997_vm0 = vcmp.eq.s32.totalorder %v985_v2, %v1890_v3  ;;  %v1000_v27 = vadd.s32 8, %v985_v2  ;;  %p787_p2 = scmp.ge.s32.totalorder (%p1373_p0), %s790_s13, 8  }
  0xdb   : >> { %vm1010_vm1 = vcmp.gt.s32.totalorder %v1000_v27, %v1890_v3  ;;  %vm1013_vm2 = vcmp.eq.s32.totalorder %v1000_v27, %v1890_v3 }
  0xde   : >> { %v987_v25 = vld [vmem:[#allocation3] sm:$0xff]  ;;  %v1002_v28 = vld [vmem:[#allocation3 + $0x8] sm:$0xff] }
  0xdf   : >> { %v992_v26 = vld [vmem:[%s1899_s20] sm:$0xff]  ;;  %798 = sbr.rel (!%p1373_p0) target bundleno = 70 (0x46), region = 383 }
  0xe0   : >> { %v1410_v29 = vld [vmem:[%s1899_s20 + $0x40] sm:$0xff]  ;;  %v995_v30 = vsel %vm994_vm15, %v987_v25, %v992_v26 }
  0xe1   : >> { %v998_v31 = vsel %vm997_vm0, %v1933_v52, %v995_v30  ;;  %v1011_v32 = vsel %vm1010_vm1, %v1002_v28, %v1410_v29 }
  0xe2   : >> { %999 = vst [vmem:[%s1899_s20] sm:$0xff] %v998_v31  ;;  %v1014_v33 = vsel %vm1013_vm2, %v1933_v52, %v1011_v32 }
  0xe3   : >> { %1411 = vst [vmem:[%s1899_s20 + $0x40] sm:$0xff] %v1014_v33 }
  0xe4   :  { %789 = sbr.rel (!%p787_p2) target bundleno = 67 (0x43), region = 394 }
  0xea   :  { %v1028_v2 = vld [vmem:[#allocation1] sm:$0xff]  ;;  %v1030_v34 = vld [vmem:[#allocation1 + $0x8] sm:$0xff]  ;;  %v1032_v3 = vld [vmem:[#allocation1 + $0x10] sm:$0xff] }
  0xeb   :  { %1029 = vst [vmem:[%s2389_s1] sm:$0xff] %v1028_v2  ;;  %1031 = vst [vmem:[%s2389_s1 + $0x8] sm:$0xff] %v1030_v34  ;;  %v1034_v35 = vld [vmem:[#allocation1 + $0x18] sm:$0xff]  ;;  %v1036_v36 = vld [vmem:[#allocation1 + $0x20] sm:$0xff] }
  0xec   :  { %1033 = vst [vmem:[%s2389_s1 + $0x10] sm:$0xff] %v1032_v3  ;;  %v1038_v37 = vld [vmem:[#allocation1 + $0x28] sm:$0xff]  ;;  %1035 = vst [vmem:[%s2389_s1 + $0x18] sm:$0xff] %v1034_v35  ;;  %v1040_v38 = vld [vmem:[#allocation1 + $0x30] sm:$0xff] }
  0xed   :  { %1037 = vst [vmem:[%s2389_s1 + $0x20] sm:$0xff] %v1036_v36  ;;  %1039 = vst [vmem:[%s2389_s1 + $0x28] sm:$0xff] %v1038_v37  ;;  %v1042_v39 = vld [vmem:[#allocation1 + $0x38] sm:$0xff]  ;;  %v1044_v40 = vld [vmem:[#allocation1 + $0x40] sm:$0xff] }
  0xee   :  { %1041 = vst [vmem:[%s2389_s1 + $0x30] sm:$0xff] %v1040_v38  ;;  %1043 = vst [vmem:[%s2389_s1 + $0x38] sm:$0xff] %v1042_v39  ;;  %v1046_v41 = vld [vmem:[#allocation1 + $0x48] sm:$0xff]  ;;  %v1048_v42 = vld [vmem:[#allocation1 + $0x50] sm:$0xff] }
  0xef   :  { %1045 = vst [vmem:[%s2389_s1 + $0x40] sm:$0xff] %v1044_v40  ;;  %v1050_v43 = vld [vmem:[#allocation1 + $0x58] sm:$0xff]  ;;  %1047 = vst [vmem:[%s2389_s1 + $0x48] sm:$0xff] %v1046_v41  ;;  %v1052_v44 = vld [vmem:[#allocation1 + $0x60] sm:$0xff] }
  0xf0   :  { %1049 = vst [vmem:[%s2389_s1 + $0x50] sm:$0xff] %v1048_v42  ;;  %1051 = vst [vmem:[%s2389_s1 + $0x58] sm:$0xff] %v1050_v43  ;;  %v1054_v45 = vld [vmem:[#allocation1 + $0x68] sm:$0xff]  ;;  %v1056_v46 = vld [vmem:[#allocation1 + $0x70] sm:$0xff] }
  0xf1   :  { %1053 = vst [vmem:[%s2389_s1 + $0x60] sm:$0xff] %v1052_v44  ;;  %1055 = vst [vmem:[%s2389_s1 + $0x68] sm:$0xff] %v1054_v45  ;;  %v1058_v47 = vld [vmem:[#allocation1 + $0x78] sm:$0xff]  ;;  %v1060_v48 = vld [vmem:[#allocation1 + $0x80] sm:$0xff] }
  0xf2   :  { %1057 = vst [vmem:[%s2389_s1 + $0x70] sm:$0xff] %v1056_v46  ;;  %v1062_v49 = vld [vmem:[#allocation1 + $0x88] sm:$0xff]  ;;  %1059 = vst [vmem:[%s2389_s1 + $0x78] sm:$0xff] %v1058_v47  ;;  %v1064_v50 = vld [vmem:[#allocation1 + $0x90] sm:$0xff] }
  0xf3   :  { %1061 = vst [vmem:[%s2389_s1 + $0x80] sm:$0xff] %v1060_v48  ;;  %1063 = vst [vmem:[%s2389_s1 + $0x88] sm:$0xff] %v1062_v49  ;;  %v1066_v51 = vld [vmem:[#allocation1 + $0x98] sm:$0xff]  ;;  %v1068_v52 = vld [vmem:[#allocation1 + $0xa0] sm:$0xff] }
  0xf4   :  { %1065 = vst [vmem:[%s2389_s1 + $0x90] sm:$0xff] %v1064_v50  ;;  %1067 = vst [vmem:[%s2389_s1 + $0x98] sm:$0xff] %v1066_v51  ;;  %v1070_v53 = vld [vmem:[#allocation1 + $0xa8] sm:$0xff]  ;;  %v1072_v54 = vld [vmem:[#allocation1 + $0xb0] sm:$0xff] }
  0xf5   :  { %1069 = vst [vmem:[%s2389_s1 + $0xa0] sm:$0xff] %v1068_v52  ;;  %v1074_v55 = vld [vmem:[#allocation1 + $0xb8] sm:$0xff]  ;;  %1071 = vst [vmem:[%s2389_s1 + $0xa8] sm:$0xff] %v1070_v53  ;;  %v1076_v56 = vld [vmem:[#allocation1 + $0xc0] sm:$0xff] }
  0xf6   :  { %1073 = vst [vmem:[%s2389_s1 + $0xb0] sm:$0xff] %v1072_v54  ;;  %1075 = vst [vmem:[%s2389_s1 + $0xb8] sm:$0xff] %v1074_v55  ;;  %v1078_v57 = vld [vmem:[#allocation1 + $0xc8] sm:$0xff]  ;;  %v1080_v58 = vld [vmem:[#allocation1 + $0xd0] sm:$0xff] }
  0xf7   :  { %1077 = vst [vmem:[%s2389_s1 + $0xc0] sm:$0xff] %v1076_v56  ;;  %1079 = vst [vmem:[%s2389_s1 + $0xc8] sm:$0xff] %v1078_v57  ;;  %v1082_v59 = vld [vmem:[#allocation1 + $0xd8] sm:$0xff]  ;;  %v1084_v60 = vld [vmem:[#allocation1 + $0xe0] sm:$0xff] }
  0xf8   :  { %1081 = vst [vmem:[%s2389_s1 + $0xd0] sm:$0xff] %v1080_v58  ;;  %v1086_v61 = vld [vmem:[#allocation1 + $0xe8] sm:$0xff]  ;;  %1083 = vst [vmem:[%s2389_s1 + $0xd8] sm:$0xff] %v1082_v59  ;;  %v1088_v62 = vld [vmem:[#allocation1 + $0xf0] sm:$0xff] }
  0xf9   :  { %1085 = vst [vmem:[%s2389_s1 + $0xe0] sm:$0xff] %v1084_v60  ;;  %1087 = vst [vmem:[%s2389_s1 + $0xe8] sm:$0xff] %v1086_v61  ;;  %v1090_v63 = vld [vmem:[#allocation1 + $0xf8] sm:$0xff]  ;;  %v1092_v0 = vld [vmem:[#allocation1 + $0x100] sm:$0xff] }
  0xfa   :  { %1089 = vst [vmem:[%s2389_s1 + $0xf0] sm:$0xff] %v1088_v62  ;;  %1091 = vst [vmem:[%s2389_s1 + $0xf8] sm:$0xff] %v1090_v63  ;;  %v1094_v1 = vld [vmem:[#allocation1 + $0x108] sm:$0xff]  ;;  %v1096_v4 = vld [vmem:[#allocation1 + $0x110] sm:$0xff] }
  0xfb   :  { %1093 = vst [vmem:[%s2389_s1 + $0x100] sm:$0xff] %v1092_v0  ;;  %v1098_v5 = vld [vmem:[#allocation1 + $0x118] sm:$0xff]  ;;  %1095 = vst [vmem:[%s2389_s1 + $0x108] sm:$0xff] %v1094_v1  ;;  %v1100_v6 = vld [vmem:[#allocation1 + $0x120] sm:$0xff] }
  0xfc   :  { %1097 = vst [vmem:[%s2389_s1 + $0x110] sm:$0xff] %v1096_v4  ;;  %1099 = vst [vmem:[%s2389_s1 + $0x118] sm:$0xff] %v1098_v5  ;;  %v1102_v7 = vld [vmem:[#allocation1 + $0x128] sm:$0xff]  ;;  %v1104_v8 = vld [vmem:[#allocation1 + $0x130] sm:$0xff] }
  0xfd   :  { %1101 = vst [vmem:[%s2389_s1 + $0x120] sm:$0xff] %v1100_v6  ;;  %1103 = vst [vmem:[%s2389_s1 + $0x128] sm:$0xff] %v1102_v7  ;;  %v1106_v9 = vld [vmem:[#allocation1 + $0x138] sm:$0xff]  ;;  %v1108_v10 = vld [vmem:[#allocation1 + $0x140] sm:$0xff] }
  0xfe   :  { %1105 = vst [vmem:[%s2389_s1 + $0x130] sm:$0xff] %v1104_v8  ;;  %v1110_v11 = vld [vmem:[#allocation1 + $0x148] sm:$0xff]  ;;  %1107 = vst [vmem:[%s2389_s1 + $0x138] sm:$0xff] %v1106_v9  ;;  %v1112_v12 = vld [vmem:[#allocation1 + $0x150] sm:$0xff] }
  0xff   :  { %1109 = vst [vmem:[%s2389_s1 + $0x140] sm:$0xff] %v1108_v10  ;;  %1111 = vst [vmem:[%s2389_s1 + $0x148] sm:$0xff] %v1110_v11  ;;  %v1114_v13 = vld [vmem:[#allocation1 + $0x158] sm:$0xff]  ;;  %v1116_v14 = vld [vmem:[#allocation1 + $0x160] sm:$0xff] }
 0x100   :  { %1113 = vst [vmem:[%s2389_s1 + $0x150] sm:$0xff] %v1112_v12  ;;  %1115 = vst [vmem:[%s2389_s1 + $0x158] sm:$0xff] %v1114_v13  ;;  %v1118_v15 = vld [vmem:[#allocation1 + $0x168] sm:$0xff]  ;;  %v1120_v16 = vld [vmem:[#allocation1 + $0x170] sm:$0xff] }
 0x101   :  { %1117 = vst [vmem:[%s2389_s1 + $0x160] sm:$0xff] %v1116_v14  ;;  %v1122_v17 = vld [vmem:[#allocation1 + $0x178] sm:$0xff]  ;;  %1119 = vst [vmem:[%s2389_s1 + $0x168] sm:$0xff] %v1118_v15  ;;  %v1124_v18 = vld [vmem:[#allocation1 + $0x180] sm:$0xff] }
 0x102   :  { %1121 = vst [vmem:[%s2389_s1 + $0x170] sm:$0xff] %v1120_v16  ;;  %1123 = vst [vmem:[%s2389_s1 + $0x178] sm:$0xff] %v1122_v17  ;;  %v1126_v19 = vld [vmem:[#allocation1 + $0x188] sm:$0xff]  ;;  %v1128_v20 = vld [vmem:[#allocation1 + $0x190] sm:$0xff] }
 0x103   :  { %1125 = vst [vmem:[%s2389_s1 + $0x180] sm:$0xff] %v1124_v18  ;;  %1127 = vst [vmem:[%s2389_s1 + $0x188] sm:$0xff] %v1126_v19  ;;  %v1130_v21 = vld [vmem:[#allocation1 + $0x198] sm:$0xff]  ;;  %v1132_v22 = vld [vmem:[#allocation1 + $0x1a0] sm:$0xff] }
 0x104   :  { %1129 = vst [vmem:[%s2389_s1 + $0x190] sm:$0xff] %v1128_v20  ;;  %v1134_v23 = vld [vmem:[#allocation1 + $0x1a8] sm:$0xff]  ;;  %1131 = vst [vmem:[%s2389_s1 + $0x198] sm:$0xff] %v1130_v21  ;;  %v1136_v24 = vld [vmem:[#allocation1 + $0x1b0] sm:$0xff] }
 0x105   :  { %1133 = vst [vmem:[%s2389_s1 + $0x1a0] sm:$0xff] %v1132_v22  ;;  %1135 = vst [vmem:[%s2389_s1 + $0x1a8] sm:$0xff] %v1134_v23  ;;  %v1138_v25 = vld [vmem:[#allocation1 + $0x1b8] sm:$0xff]  ;;  %v1140_v26 = vld [vmem:[#allocation1 + $0x1c0] sm:$0xff] }
 0x106   :  { %1137 = vst [vmem:[%s2389_s1 + $0x1b0] sm:$0xff] %v1136_v24  ;;  %1139 = vst [vmem:[%s2389_s1 + $0x1b8] sm:$0xff] %v1138_v25  ;;  %v1142_v27 = vld [vmem:[#allocation1 + $0x1c8] sm:$0xff]  ;;  %v1144_v28 = vld [vmem:[#allocation1 + $0x1d0] sm:$0xff] }
 0x107   :  { %1141 = vst [vmem:[%s2389_s1 + $0x1c0] sm:$0xff] %v1140_v26  ;;  %v1146_v29 = vld [vmem:[#allocation1 + $0x1d8] sm:$0xff]  ;;  %1143 = vst [vmem:[%s2389_s1 + $0x1c8] sm:$0xff] %v1142_v27  ;;  %v1148_v30 = vld [vmem:[#allocation1 + $0x1e0] sm:$0xff] }
 0x108   :  { %1145 = vst [vmem:[%s2389_s1 + $0x1d0] sm:$0xff] %v1144_v28  ;;  %1147 = vst [vmem:[%s2389_s1 + $0x1d8] sm:$0xff] %v1146_v29  ;;  %v1150_v31 = vld [vmem:[#allocation1 + $0x1e8] sm:$0xff]  ;;  %v1152_v32 = vld [vmem:[#allocation1 + $0x1f0] sm:$0xff] }
 0x109   :  { %1149 = vst [vmem:[%s2389_s1 + $0x1e0] sm:$0xff] %v1148_v30  ;;  %1151 = vst [vmem:[%s2389_s1 + $0x1e8] sm:$0xff] %v1150_v31  ;;  %v1154_v33 = vld [vmem:[#allocation1 + $0x1f8] sm:$0xff]  ;;  %v1156_v2 = vld [vmem:[#allocation1 + $0x200] sm:$0xff] }
 0x10a   :  { %1153 = vst [vmem:[%s2389_s1 + $0x1f0] sm:$0xff] %v1152_v32  ;;  %v1158_v34 = vld [vmem:[#allocation1 + $0x208] sm:$0xff]  ;;  %1155 = vst [vmem:[%s2389_s1 + $0x1f8] sm:$0xff] %v1154_v33  ;;  %v1160_v3 = vld [vmem:[#allocation1 + $0x210] sm:$0xff] }
 0x10b   :  { %1157 = vst [vmem:[%s2389_s1 + $0x200] sm:$0xff] %v1156_v2  ;;  %1159 = vst [vmem:[%s2389_s1 + $0x208] sm:$0xff] %v1158_v34  ;;  %v1162_v35 = vld [vmem:[#allocation1 + $0x218] sm:$0xff]  ;;  %v1164_v36 = vld [vmem:[#allocation1 + $0x220] sm:$0xff] }
 0x10c   :  { %1161 = vst [vmem:[%s2389_s1 + $0x210] sm:$0xff] %v1160_v3  ;;  %1163 = vst [vmem:[%s2389_s1 + $0x218] sm:$0xff] %v1162_v35  ;;  %v1166_v37 = vld [vmem:[#allocation1 + $0x228] sm:$0xff]  ;;  %v1168_v38 = vld [vmem:[#allocation1 + $0x230] sm:$0xff] }
 0x10d   :  { %1165 = vst [vmem:[%s2389_s1 + $0x220] sm:$0xff] %v1164_v36  ;;  %v1170_v39 = vld [vmem:[#allocation1 + $0x238] sm:$0xff]  ;;  %1167 = vst [vmem:[%s2389_s1 + $0x228] sm:$0xff] %v1166_v37  ;;  %v1172_v40 = vld [vmem:[#allocation1 + $0x240] sm:$0xff] }
 0x10e   :  { %1169 = vst [vmem:[%s2389_s1 + $0x230] sm:$0xff] %v1168_v38  ;;  %1171 = vst [vmem:[%s2389_s1 + $0x238] sm:$0xff] %v1170_v39  ;;  %v1174_v41 = vld [vmem:[#allocation1 + $0x248] sm:$0xff]  ;;  %v1176_v42 = vld [vmem:[#allocation1 + $0x250] sm:$0xff] }
 0x10f   :  { %1173 = vst [vmem:[%s2389_s1 + $0x240] sm:$0xff] %v1172_v40  ;;  %1175 = vst [vmem:[%s2389_s1 + $0x248] sm:$0xff] %v1174_v41  ;;  %v1178_v43 = vld [vmem:[#allocation1 + $0x258] sm:$0xff]  ;;  %v1180_v44 = vld [vmem:[#allocation1 + $0x260] sm:$0xff] }
 0x110   :  { %1177 = vst [vmem:[%s2389_s1 + $0x250] sm:$0xff] %v1176_v42  ;;  %v1182_v45 = vld [vmem:[#allocation1 + $0x268] sm:$0xff]  ;;  %1179 = vst [vmem:[%s2389_s1 + $0x258] sm:$0xff] %v1178_v43  ;;  %v1184_v46 = vld [vmem:[#allocation1 + $0x270] sm:$0xff] }
 0x111   :  { %1181 = vst [vmem:[%s2389_s1 + $0x260] sm:$0xff] %v1180_v44  ;;  %1183 = vst [vmem:[%s2389_s1 + $0x268] sm:$0xff] %v1182_v45  ;;  %v1186_v47 = vld [vmem:[#allocation1 + $0x278] sm:$0xff]  ;;  %v1188_v48 = vld [vmem:[#allocation1 + $0x280] sm:$0xff] }
 0x112   :  { %1185 = vst [vmem:[%s2389_s1 + $0x270] sm:$0xff] %v1184_v46  ;;  %1187 = vst [vmem:[%s2389_s1 + $0x278] sm:$0xff] %v1186_v47  ;;  %v1190_v49 = vld [vmem:[#allocation1 + $0x288] sm:$0xff]  ;;  %v1192_v50 = vld [vmem:[#allocation1 + $0x290] sm:$0xff] }
 0x113   :  { %1189 = vst [vmem:[%s2389_s1 + $0x280] sm:$0xff] %v1188_v48  ;;  %v1194_v51 = vld [vmem:[#allocation1 + $0x298] sm:$0xff]  ;;  %1191 = vst [vmem:[%s2389_s1 + $0x288] sm:$0xff] %v1190_v49  ;;  %v1196_v52 = vld [vmem:[#allocation1 + $0x2a0] sm:$0xff] }
 0x114   :  { %1193 = vst [vmem:[%s2389_s1 + $0x290] sm:$0xff] %v1192_v50  ;;  %1195 = vst [vmem:[%s2389_s1 + $0x298] sm:$0xff] %v1194_v51  ;;  %v1198_v53 = vld [vmem:[#allocation1 + $0x2a8] sm:$0xff]  ;;  %v1200_v54 = vld [vmem:[#allocation1 + $0x2b0] sm:$0xff] }
 0x115   :  { %1197 = vst [vmem:[%s2389_s1 + $0x2a0] sm:$0xff] %v1196_v52  ;;  %1199 = vst [vmem:[%s2389_s1 + $0x2a8] sm:$0xff] %v1198_v53  ;;  %v1202_v55 = vld [vmem:[#allocation1 + $0x2b8] sm:$0xff]  ;;  %v1204_v56 = vld [vmem:[#allocation1 + $0x2c0] sm:$0xff] }
 0x116   :  { %1201 = vst [vmem:[%s2389_s1 + $0x2b0] sm:$0xff] %v1200_v54  ;;  %v1206_v57 = vld [vmem:[#allocation1 + $0x2c8] sm:$0xff]  ;;  %1203 = vst [vmem:[%s2389_s1 + $0x2b8] sm:$0xff] %v1202_v55  ;;  %v1208_v58 = vld [vmem:[#allocation1 + $0x2d0] sm:$0xff] }
 0x117   :  { %1205 = vst [vmem:[%s2389_s1 + $0x2c0] sm:$0xff] %v1204_v56  ;;  %1207 = vst [vmem:[%s2389_s1 + $0x2c8] sm:$0xff] %v1206_v57  ;;  %v1210_v59 = vld [vmem:[#allocation1 + $0x2d8] sm:$0xff]  ;;  %v1212_v60 = vld [vmem:[#allocation1 + $0x2e0] sm:$0xff] }
 0x118   :  { %1209 = vst [vmem:[%s2389_s1 + $0x2d0] sm:$0xff] %v1208_v58  ;;  %1211 = vst [vmem:[%s2389_s1 + $0x2d8] sm:$0xff] %v1210_v59  ;;  %v1214_v61 = vld [vmem:[#allocation1 + $0x2e8] sm:$0xff]  ;;  %v1216_v62 = vld [vmem:[#allocation1 + $0x2f0] sm:$0xff] }
 0x119   :  { %1213 = vst [vmem:[%s2389_s1 + $0x2e0] sm:$0xff] %v1212_v60  ;;  %v1218_v63 = vld [vmem:[#allocation1 + $0x2f8] sm:$0xff]  ;;  %1215 = vst [vmem:[%s2389_s1 + $0x2e8] sm:$0xff] %v1214_v61  ;;  %v1220_v0 = vld [vmem:[#allocation1 + $0x300] sm:$0xff] }
 0x11a   :  { %1217 = vst [vmem:[%s2389_s1 + $0x2f0] sm:$0xff] %v1216_v62  ;;  %1219 = vst [vmem:[%s2389_s1 + $0x2f8] sm:$0xff] %v1218_v63  ;;  %v1222_v1 = vld [vmem:[#allocation1 + $0x308] sm:$0xff]  ;;  %v1224_v4 = vld [vmem:[#allocation1 + $0x310] sm:$0xff] }
 0x11b   :  { %1221 = vst [vmem:[%s2389_s1 + $0x300] sm:$0xff] %v1220_v0  ;;  %1223 = vst [vmem:[%s2389_s1 + $0x308] sm:$0xff] %v1222_v1  ;;  %v1226_v5 = vld [vmem:[#allocation1 + $0x318] sm:$0xff]  ;;  %v1228_v6 = vld [vmem:[#allocation1 + $0x320] sm:$0xff] }
 0x11c   :  { %1225 = vst [vmem:[%s2389_s1 + $0x310] sm:$0xff] %v1224_v4  ;;  %v1230_v7 = vld [vmem:[#allocation1 + $0x328] sm:$0xff]  ;;  %1227 = vst [vmem:[%s2389_s1 + $0x318] sm:$0xff] %v1226_v5  ;;  %v1232_v8 = vld [vmem:[#allocation1 + $0x330] sm:$0xff] }
 0x11d   :  { %1229 = vst [vmem:[%s2389_s1 + $0x320] sm:$0xff] %v1228_v6  ;;  %1231 = vst [vmem:[%s2389_s1 + $0x328] sm:$0xff] %v1230_v7  ;;  %v1234_v9 = vld [vmem:[#allocation1 + $0x338] sm:$0xff]  ;;  %v1236_v10 = vld [vmem:[#allocation1 + $0x340] sm:$0xff] }
 0x11e   :  { %1233 = vst [vmem:[%s2389_s1 + $0x330] sm:$0xff] %v1232_v8  ;;  %1235 = vst [vmem:[%s2389_s1 + $0x338] sm:$0xff] %v1234_v9  ;;  %v1238_v11 = vld [vmem:[#allocation1 + $0x348] sm:$0xff]  ;;  %v1240_v12 = vld [vmem:[#allocation1 + $0x350] sm:$0xff] }
 0x11f   :  { %1237 = vst [vmem:[%s2389_s1 + $0x340] sm:$0xff] %v1236_v10  ;;  %v1242_v13 = vld [vmem:[#allocation1 + $0x358] sm:$0xff]  ;;  %1239 = vst [vmem:[%s2389_s1 + $0x348] sm:$0xff] %v1238_v11  ;;  %v1244_v14 = vld [vmem:[#allocation1 + $0x360] sm:$0xff] }
 0x120   :  { %1241 = vst [vmem:[%s2389_s1 + $0x350] sm:$0xff] %v1240_v12  ;;  %1243 = vst [vmem:[%s2389_s1 + $0x358] sm:$0xff] %v1242_v13  ;;  %v1246_v15 = vld [vmem:[#allocation1 + $0x368] sm:$0xff]  ;;  %v1248_v16 = vld [vmem:[#allocation1 + $0x370] sm:$0xff] }
 0x121   :  { %1245 = vst [vmem:[%s2389_s1 + $0x360] sm:$0xff] %v1244_v14  ;;  %1247 = vst [vmem:[%s2389_s1 + $0x368] sm:$0xff] %v1246_v15  ;;  %v1250_v17 = vld [vmem:[#allocation1 + $0x378] sm:$0xff]  ;;  %v1252_v18 = vld [vmem:[#allocation1 + $0x380] sm:$0xff] }
 0x122   :  { %1249 = vst [vmem:[%s2389_s1 + $0x370] sm:$0xff] %v1248_v16  ;;  %v1254_v19 = vld [vmem:[#allocation1 + $0x388] sm:$0xff]  ;;  %1251 = vst [vmem:[%s2389_s1 + $0x378] sm:$0xff] %v1250_v17  ;;  %v1256_v20 = vld [vmem:[#allocation1 + $0x390] sm:$0xff] }
 0x123   :  { %1253 = vst [vmem:[%s2389_s1 + $0x380] sm:$0xff] %v1252_v18  ;;  %1255 = vst [vmem:[%s2389_s1 + $0x388] sm:$0xff] %v1254_v19  ;;  %v1258_v21 = vld [vmem:[#allocation1 + $0x398] sm:$0xff]  ;;  %v1260_v22 = vld [vmem:[#allocation1 + $0x3a0] sm:$0xff] }
 0x124   :  { %1257 = vst [vmem:[%s2389_s1 + $0x390] sm:$0xff] %v1256_v20  ;;  %1259 = vst [vmem:[%s2389_s1 + $0x398] sm:$0xff] %v1258_v21  ;;  %v1262_v23 = vld [vmem:[#allocation1 + $0x3a8] sm:$0xff]  ;;  %v1264_v24 = vld [vmem:[#allocation1 + $0x3b0] sm:$0xff] }
 0x125   :  { %1261 = vst [vmem:[%s2389_s1 + $0x3a0] sm:$0xff] %v1260_v22  ;;  %v1266_v25 = vld [vmem:[#allocation1 + $0x3b8] sm:$0xff]  ;;  %1263 = vst [vmem:[%s2389_s1 + $0x3a8] sm:$0xff] %v1262_v23  ;;  %v1268_v26 = vld [vmem:[#allocation1 + $0x3c0] sm:$0xff] }
 0x126   :  { %1265 = vst [vmem:[%s2389_s1 + $0x3b0] sm:$0xff] %v1264_v24  ;;  %1267 = vst [vmem:[%s2389_s1 + $0x3b8] sm:$0xff] %v1266_v25  ;;  %v1270_v27 = vld [vmem:[#allocation1 + $0x3c8] sm:$0xff]  ;;  %v1272_v28 = vld [vmem:[#allocation1 + $0x3d0] sm:$0xff] }
 0x127   :  { %1269 = vst [vmem:[%s2389_s1 + $0x3c0] sm:$0xff] %v1268_v26  ;;  %1271 = vst [vmem:[%s2389_s1 + $0x3c8] sm:$0xff] %v1270_v27  ;;  %v1274_v29 = vld [vmem:[#allocation1 + $0x3d8] sm:$0xff]  ;;  %v1276_v30 = vld [vmem:[#allocation1 + $0x3e0] sm:$0xff] }
 0x128   :  { %1273 = vst [vmem:[%s2389_s1 + $0x3d0] sm:$0xff] %v1272_v28  ;;  %v1278_v31 = vld [vmem:[#allocation1 + $0x3e8] sm:$0xff]  ;;  %1275 = vst [vmem:[%s2389_s1 + $0x3d8] sm:$0xff] %v1274_v29  ;;  %v1280_v32 = vld [vmem:[#allocation1 + $0x3f0] sm:$0xff] }
 0x129   :  { %1277 = vst [vmem:[%s2389_s1 + $0x3e0] sm:$0xff] %v1276_v30  ;;  %1279 = vst [vmem:[%s2389_s1 + $0x3e8] sm:$0xff] %v1278_v31  ;;  %v1282_v33 = vld [vmem:[#allocation1 + $0x3f8] sm:$0xff]  ;;  %v1299_v2 = vld [vmem:[#allocation2] sm:$0xff] }
 0x12a   :  { %1281 = vst [vmem:[%s2389_s1 + $0x3f0] sm:$0xff] %v1280_v32  ;;  %1283 = vst [vmem:[%s2389_s1 + $0x3f8] sm:$0xff] %v1282_v33  ;;  %v1301_v34 = vld [vmem:[#allocation2 + $0x8] sm:$0xff]  ;;  %v1303_v3 = vld [vmem:[#allocation2 + $0x10] sm:$0xff] }
 0x12b   :  { %1300 = vst [vmem:[%s2390_s2] sm:$0xff] %v1299_v2  ;;  %v1305_v35 = vld [vmem:[#allocation2 + $0x18] sm:$0xff]  ;;  %1302 = vst [vmem:[%s2390_s2 + $0x8] sm:$0xff] %v1301_v34  ;;  %v1307_v36 = vld [vmem:[#allocation2 + $0x20] sm:$0xff] }
 0x12c   :  { %1304 = vst [vmem:[%s2390_s2 + $0x10] sm:$0xff] %v1303_v3  ;;  %1306 = vst [vmem:[%s2390_s2 + $0x18] sm:$0xff] %v1305_v35  ;;  %v1309_v37 = vld [vmem:[#allocation2 + $0x28] sm:$0xff]  ;;  %v1311_v38 = vld [vmem:[#allocation2 + $0x30] sm:$0xff] }
 0x12d   :  { %1308 = vst [vmem:[%s2390_s2 + $0x20] sm:$0xff] %v1307_v36  ;;  %1310 = vst [vmem:[%s2390_s2 + $0x28] sm:$0xff] %v1309_v37  ;;  %v1313_v39 = vld [vmem:[#allocation2 + $0x38] sm:$0xff] }
 0x12e   :  { %1312 = vst [vmem:[%s2390_s2 + $0x30] sm:$0xff] %v1311_v38  ;;  %1314 = vst [vmem:[%s2390_s2 + $0x38] sm:$0xff] %v1313_v39 }

// kernel: custom-call.77
= control target key start
LH: loop header
LB: loop body
LE: loop exit
PB: predicated region body
PF: predicated region fallthrough
CT: control target
= control target key end

     0   :  { %s292_s6 = smov 0   ;;  %s333_s0 = inlined_call_operand.vmem [shape: f32[1024,8,8], index: 0, kind: input, shape index: {}]   ;;  %s334_s1 = inlined_call_operand.vmem [shape: f32[1024,8,8], index: 1, kind: output, shape index: {}]  }
   0x1 LB: > { %s247_s7 = sadd.s32 4294967295, %s280_s6   ;;  %p249_p0 = scmp.ge.s32.totalorder %s280_s6, 1024  ;;  %s280_s6 = sphi %s292_s6, %s7_s6  }
   0x2   : > { %s23_s8 = sand.u32 (!%p249_p0), 1, %s280_s6   ;;  %s251_s9 = sshll.u32 (!%p249_p0), %s280_s6, 3 }
   0x3   : > { %21 = sbr.rel (%p249_p0) target bundleno = 10 (0xa), region = 16  ;;  %s250_s10 = sshll.u32 (!%p249_p0), %s23_s8, 3 }
   0x4   : > { %s27_s13 = scalar_lea.vmem (!%p249_p0), %s333_s0, %s251_s9  ;;  %s25_s14 = scalar_lea.vmem (!%p249_p0), [#allocation0], %s250_s10 }
   0x8   : > { %v56_v0 = vld [vmem:[%s27_s13] sm:$0xff] }
   0x9   : > { %57 = vst [vmem:[%s25_s14] sm:$0xff] %v56_v0 }
   0xa PF: > { %p252_p1 = scmp.ge.s32.totalorder %s280_s6, 1  ;;  %p62_p2 = scmp.lt.s32.totalorder %s280_s6, 1025 }
   0xc   : > { %p63_p3 = pnand %p252_p1, %p62_p2 }
   0xd   : > { %s69_s15 = sand.u32 (!%p63_p3), 1, %s247_s7   ;;  %s263_s18 = sshll.u32 (!%p63_p3), %s247_s7, 3 }
   0xe   : > { %66 = sbr.rel (%p63_p3) target bundleno = 1014 (0x3f6), region = 54  ;;  %s253_s16 = sshll.u32 (!%p63_p3), %s69_s15, 3 }
   0xf   : > { %s308_s17 = scalar_lea.vmem (!%p63_p3), [#allocation0], %s253_s16  ;;  %s175_s21 = scalar_lea.vmem (!%p63_p3), %s334_s1, %s263_s18 }
  0x13   : > { %v80_v1 = vlaneseq  ;;  %vm94_vm0 = vcmask 64512   ;;  %v86_v4 = vld [vmem:[%s308_s17] sm:$0xff] }
  0x14   : > { %v255_v5 = vld [vmem:[%s308_s17 + $0x1] ss:$0 sm:$0xff]  ;;  %v256_v10 = vld [vmem:[%s308_s17 + $0x2] ss:$0 sm:$0xff]  ;;  %v257_v15 = vld [vmem:[%s308_s17 + $0x3] ss:$0 sm:$0xff] }
  0x15   : > { %v81_v2 = vand.u32 127, %v80_v1  ;;  %v83_v3 = vshrl.u32 %v80_v1, 7  ;;  %v95_v6 = vsel %vm94_vm0, %v255_v5, 0.0  ;;  %v106_v11 = vsel %vm94_vm0, %v256_v10, 0.0  ;;  %v258_v20 = vld [vmem:[%s308_s17 + $0x4] ss:$0 sm:$0xff] }
  0x16   : > { %v117_v16 = vsel %vm94_vm0, %v257_v15, 0.0  ;;  %v128_v21 = vsel %vm94_vm0, %v258_v20, 0.0  ;;  %v259_v25 = vld [vmem:[%s308_s17 + $0x5] ss:$0 sm:$0xff]  ;;  %v260_v30 = vld [vmem:[%s308_s17 + $0x6] ss:$0 sm:$0xff] }
  0x17   : > { %vm85_vm1 = vcmp.eq.s32.totalorder %v81_v2, %v83_v3  ;;  %vm89_vm2 = vcmp.eq.s32.totalorder %v81_v2, 0  ;;  %vm98_vm3 = vcmp.eq.s32.totalorder %v81_v2, 1  ;;  %vm109_vm4 = vcmp.eq.s32.totalorder %v81_v2, 2  ;;  %v261_v35 = vld [vmem:[%s308_s17 + $0x7] ss:$0 sm:$0xff] }
  0x18   : > { %v90_v7 = vsel %vm89_vm2, %v86_v4, 1.0  ;;  %vm120_vm5 = vcmp.eq.s32.totalorder %v81_v2, 3  ;;  %vm131_vm6 = vcmp.eq.s32.totalorder %v81_v2, 4  ;;  %v139_v26 = vsel %vm94_vm0, %v259_v25, 0.0 }
  0x19   : > { %v91_v8 = vsel %vm85_vm1, %v90_v7, 0.0  ;;  %vm142_vm7 = vcmp.eq.s32.totalorder %v81_v2, 5  ;;  %v150_v31 = vsel %vm94_vm0, %v260_v30, 0.0  ;;  %vm153_vm8 = vcmp.eq.s32.totalorder %v81_v2, 6 }
  0x1a   : > { %v99_v9 = vmul.f32 %v95_v6, %v91_v8  ;;  %v161_v36 = vsel %vm94_vm0, %v261_v35, 0.0  ;;  %vm164_vm9 = vcmp.eq.s32.totalorder %v81_v2, 7 }
  0x1c   : > { %100 = vadd.xlane.f32.xlu0 %v99_v9 }
  0xa5   : > { %v101_v12 = vpop.xlane.xlu0 %100 }
  0xa6   : > { %v102_v13 = vsel %vm98_vm3, %v101_v12, %v91_v8 }
  0xa7   : > { %v110_v14 = vmul.f32 %v106_v11, %v102_v13 }
  0xa9   : > { %111 = vadd.xlane.f32.xlu0 %v110_v14 }
 0x132   : > { %v112_v17 = vpop.xlane.xlu0 %111 }
 0x133   : > { %v113_v18 = vsel %vm109_vm4, %v112_v17, %v102_v13 }
 0x134   : > { %v121_v19 = vmul.f32 %v117_v16, %v113_v18 }
 0x136   : > { %122 = vadd.xlane.f32.xlu1 %v121_v19 }
 0x1bf   : > { %v123_v22 = vpop.xlane.xlu1 %122 }
 0x1c0   : > { %v124_v23 = vsel %vm120_vm5, %v123_v22, %v113_v18 }
 0x1c1   : > { %v132_v24 = vmul.f32 %v128_v21, %v124_v23 }
 0x1c3   : > { %133 = vadd.xlane.f32.xlu1 %v132_v24 }
 0x24c   : > { %v134_v27 = vpop.xlane.xlu1 %133 }
 0x24d   : > { %v135_v28 = vsel %vm131_vm6, %v134_v27, %v124_v23 }
 0x24e   : > { %v143_v29 = vmul.f32 %v139_v26, %v135_v28 }
 0x250   : > { %144 = vadd.xlane.f32.xlu0 %v143_v29 }
 0x2d9   : > { %v145_v32 = vpop.xlane.xlu0 %144 }
 0x2da   : > { %v146_v33 = vsel %vm142_vm7, %v145_v32, %v135_v28 }
 0x2db   : > { %v154_v34 = vmul.f32 %v150_v31, %v146_v33 }
 0x2dd   : > { %155 = vadd.xlane.f32.xlu1 %v154_v34 }
 0x366   : > { %v156_v37 = vpop.xlane.xlu1 %155 }
 0x367   : > { %v157_v38 = vsel %vm153_vm8, %v156_v37, %v146_v33 }
 0x368   : > { %v165_v39 = vmul.f32 %v161_v36, %v157_v38 }
 0x36a   : > { %166 = vadd.xlane.f32.xlu0 %v165_v39 }
 0x3f3   : > { %v167_v40 = vpop.xlane.xlu0 %166 }
 0x3f4   : > { %v168_v41 = vsel %vm164_vm9, %v167_v40, %v157_v38 }
 0x3f5   : > { %205 = vst [vmem:[%s175_s21] sm:$0xff] %v168_v41 }
 0x3f6 PF: > { %s7_s6 = sadd.s32 1, %s280_s6  }
 0x3f7   : > { %p4_p4 = scmp.ge.s32.totalorder %s7_s6, 1026  }
 0x3f9   :  { %6 = sbr.rel (!%p4_p4) target bundleno = 1 (0x1), region = 125 }

// kernel: neg.3
= control target key start
LH: loop header
LB: loop body
LE: loop exit
PB: predicated region body
PF: predicated region fallthrough
CT: control target
= control target key end

     0   :  { %2 = vsyncpa [#allocation1], 0  ;;  %s1189_s16 = smov [#allocation0]   ;;  %s1592_s0 = inlined_call_operand.vmem [shape: f32[1024,8], index: 0, kind: input, shape index: {}]   ;;  %s1593_s1 = inlined_call_operand.hbm [shape: f32[1024,8], index: 1, kind: output, shape index: {}]  }
   0x1   :  { %v3_v0 = vld [vmem:[%s1592_s0] sm:$0xff]  ;;  %v1037_v1 = vld [vmem:[%s1592_s0 + $0x8] sm:$0xff]  ;;  %v1038_v4 = vld [vmem:[%s1592_s0 + $0x10] sm:$0xff]  ;;  %s1217_s17 = sshll.u32 %s1189_s16, 4  ;;  %s1029_s17 = int_to_ptr.vmem [resolvable:$true] %s1217_s17 }
   0x2   :  { %v6_v2 = vxor.u32 2147483648, %v3_v0  ;;  %v13_v3 = vxor.u32 2147483648, %v1037_v1  ;;  %v1039_v5 = vld [vmem:[%s1592_s0 + $0x18] sm:$0xff]  ;;  %v1040_v6 = vld [vmem:[%s1592_s0 + $0x20] sm:$0xff]  ;;  %v21_v7 = vxor.u32 2147483648, %v1038_v4  ;;  %v1041_v10 = vld [vmem:[%s1592_s0 + $0x28] sm:$0xff]  ;;  %p1172_p1 = scmp.lt.s32.totalorder %s1029_s17, %s1029_s17 }
   0x3   :  { %v29_v8 = vxor.u32 2147483648, %v1039_v5  ;;  %v37_v9 = vxor.u32 2147483648, %v1040_v6  ;;  %v1042_v11 = vld [vmem:[%s1592_s0 + $0x30] sm:$0xff]  ;;  %v1043_v12 = vld [vmem:[%s1592_s0 + $0x38] sm:$0xff]  ;;  %v45_v13 = vxor.u32 2147483648, %v1041_v10  ;;  %v1044_v16 = vld [vmem:[%s1592_s0 + $0x40] sm:$0xff] }
   0x4   :  { %8 = vst [vmem:[#allocation0] sm:$0xff] %v6_v2  ;;  %16 = vst [vmem:[#allocation0 + $0x8] sm:$0xff] %v13_v3  ;;  %v53_v14 = vxor.u32 2147483648, %v1042_v11  ;;  %v61_v15 = vxor.u32 2147483648, %v1043_v12  ;;  %v1045_v17 = vld [vmem:[%s1592_s0 + $0x48] sm:$0xff]  ;;  %v1046_v18 = vld [vmem:[%s1592_s0 + $0x50] sm:$0xff] }
   0x5   :  { %24 = vst [vmem:[#allocation0 + $0x10] sm:$0xff] %v21_v7  ;;  %32 = vst [vmem:[#allocation0 + $0x18] sm:$0xff] %v29_v8  ;;  %v69_v19 = vxor.u32 2147483648, %v1044_v16  ;;  %v77_v20 = vxor.u32 2147483648, %v1045_v17  ;;  %v85_v21 = vxor.u32 2147483648, %v1046_v18  ;;  %v1047_v22 = vld [vmem:[%s1592_s0 + $0x58] sm:$0xff] }
   0x6   :  { %40 = vst [vmem:[#allocation0 + $0x20] sm:$0xff] %v37_v9  ;;  %v1048_v23 = vld [vmem:[%s1592_s0 + $0x60] sm:$0xff]  ;;  %v1049_v24 = vld [vmem:[%s1592_s0 + $0x68] sm:$0xff]  ;;  %48 = vst [vmem:[#allocation0 + $0x28] sm:$0xff] %v45_v13  ;;  %v93_v25 = vxor.u32 2147483648, %v1047_v22 }
   0x7   :  { %56 = vst [vmem:[#allocation0 + $0x30] sm:$0xff] %v53_v14  ;;  %64 = vst [vmem:[#allocation0 + $0x38] sm:$0xff] %v61_v15  ;;  %v101_v26 = vxor.u32 2147483648, %v1048_v23  ;;  %v109_v27 = vxor.u32 2147483648, %v1049_v24  ;;  %v1050_v28 = vld [vmem:[%s1592_s0 + $0x70] sm:$0xff]  ;;  %v1051_v29 = vld [vmem:[%s1592_s0 + $0x78] sm:$0xff] }
   0x8   :  { %v1052_v30 = vld [vmem:[%s1592_s0 + $0x80] sm:$0xff]  ;;  %72 = vst [vmem:[#allocation0 + $0x40] sm:$0xff] %v69_v19  ;;  %80 = vst [vmem:[#allocation0 + $0x48] sm:$0xff] %v77_v20  ;;  %v117_v31 = vxor.u32 2147483648, %v1050_v28  ;;  %v125_v32 = vxor.u32 2147483648, %v1051_v29  ;;  %v1053_v34 = vld [vmem:[%s1592_s0 + $0x88] sm:$0xff] }
   0x9   :  { %88 = vst [vmem:[#allocation0 + $0x50] sm:$0xff] %v85_v21  ;;  %v133_v33 = vxor.u32 2147483648, %v1052_v30  ;;  %v1054_v35 = vld [vmem:[%s1592_s0 + $0x90] sm:$0xff]  ;;  %v1055_v36 = vld [vmem:[%s1592_s0 + $0x98] sm:$0xff]  ;;  %96 = vst [vmem:[#allocation0 + $0x58] sm:$0xff] %v93_v25  ;;  %v141_v37 = vxor.u32 2147483648, %v1053_v34 }
   0xa   :  { %104 = vst [vmem:[#allocation0 + $0x60] sm:$0xff] %v101_v26  ;;  %112 = vst [vmem:[#allocation0 + $0x68] sm:$0xff] %v109_v27  ;;  %v149_v38 = vxor.u32 2147483648, %v1054_v35  ;;  %v157_v39 = vxor.u32 2147483648, %v1055_v36  ;;  %v1056_v40 = vld [vmem:[%s1592_s0 + $0xa0] sm:$0xff]  ;;  %v1057_v41 = vld [vmem:[%s1592_s0 + $0xa8] sm:$0xff] }
   0xb   :  { %v1058_v42 = vld [vmem:[%s1592_s0 + $0xb0] sm:$0xff]  ;;  %120 = vst [vmem:[#allocation0 + $0x70] sm:$0xff] %v117_v31  ;;  %128 = vst [vmem:[#allocation0 + $0x78] sm:$0xff] %v125_v32  ;;  %v165_v43 = vxor.u32 2147483648, %v1056_v40  ;;  %v173_v44 = vxor.u32 2147483648, %v1057_v41  ;;  %v1059_v46 = vld [vmem:[%s1592_s0 + $0xb8] sm:$0xff] }
   0xc   :  { %136 = vst [vmem:[#allocation0 + $0x80] sm:$0xff] %v133_v33  ;;  %v181_v45 = vxor.u32 2147483648, %v1058_v42  ;;  %v1060_v47 = vld [vmem:[%s1592_s0 + $0xc0] sm:$0xff]  ;;  %v1061_v48 = vld [vmem:[%s1592_s0 + $0xc8] sm:$0xff]  ;;  %144 = vst [vmem:[#allocation0 + $0x88] sm:$0xff] %v141_v37  ;;  %v189_v49 = vxor.u32 2147483648, %v1059_v46 }
   0xd   :  { %152 = vst [vmem:[#allocation0 + $0x90] sm:$0xff] %v149_v38  ;;  %160 = vst [vmem:[#allocation0 + $0x98] sm:$0xff] %v157_v39  ;;  %v197_v50 = vxor.u32 2147483648, %v1060_v47  ;;  %v205_v51 = vxor.u32 2147483648, %v1061_v48  ;;  %v1062_v52 = vld [vmem:[%s1592_s0 + $0xd0] sm:$0xff]  ;;  %v1063_v53 = vld [vmem:[%s1592_s0 + $0xd8] sm:$0xff] }
   0xe   :  { %v1064_v54 = vld [vmem:[%s1592_s0 + $0xe0] sm:$0xff]  ;;  %168 = vst [vmem:[#allocation0 + $0xa0] sm:$0xff] %v165_v43  ;;  %176 = vst [vmem:[#allocation0 + $0xa8] sm:$0xff] %v173_v44  ;;  %v213_v55 = vxor.u32 2147483648, %v1062_v52  ;;  %v221_v56 = vxor.u32 2147483648, %v1063_v53  ;;  %v1065_v58 = vld [vmem:[%s1592_s0 + $0xe8] sm:$0xff] }
   0xf   :  { %184 = vst [vmem:[#allocation0 + $0xb0] sm:$0xff] %v181_v45  ;;  %v229_v57 = vxor.u32 2147483648, %v1064_v54  ;;  %v1066_v59 = vld [vmem:[%s1592_s0 + $0xf0] sm:$0xff]  ;;  %v1067_v60 = vld [vmem:[%s1592_s0 + $0xf8] sm:$0xff]  ;;  %192 = vst [vmem:[#allocation0 + $0xb8] sm:$0xff] %v189_v49  ;;  %v237_v61 = vxor.u32 2147483648, %v1065_v58 }
  0x10   :  { %200 = vst [vmem:[#allocation0 + $0xc0] sm:$0xff] %v197_v50  ;;  %208 = vst [vmem:[#allocation0 + $0xc8] sm:$0xff] %v205_v51  ;;  %v245_v62 = vxor.u32 2147483648, %v1066_v59  ;;  %v253_v63 = vxor.u32 2147483648, %v1067_v60  ;;  %v1068_v0 = vld [vmem:[%s1592_s0 + $0x100] sm:$0xff]  ;;  %v1069_v1 = vld [vmem:[%s1592_s0 + $0x108] sm:$0xff] }
  0x11   :  { %v1070_v2 = vld [vmem:[%s1592_s0 + $0x110] sm:$0xff]  ;;  %216 = vst [vmem:[#allocation0 + $0xd0] sm:$0xff] %v213_v55  ;;  %224 = vst [vmem:[#allocation0 + $0xd8] sm:$0xff] %v221_v56  ;;  %v261_v3 = vxor.u32 2147483648, %v1068_v0  ;;  %v269_v4 = vxor.u32 2147483648, %v1069_v1  ;;  %v1071_v6 = vld [vmem:[%s1592_s0 + $0x118] sm:$0xff] }
  0x12   :  { %232 = vst [vmem:[#allocation0 + $0xe0] sm:$0xff] %v229_v57  ;;  %v277_v5 = vxor.u32 2147483648, %v1070_v2  ;;  %v1072_v7 = vld [vmem:[%s1592_s0 + $0x120] sm:$0xff]  ;;  %v1073_v8 = vld [vmem:[%s1592_s0 + $0x128] sm:$0xff]  ;;  %240 = vst [vmem:[#allocation0 + $0xe8] sm:$0xff] %v237_v61  ;;  %v285_v9 = vxor.u32 2147483648, %v1071_v6 }
  0x13   :  { %248 = vst [vmem:[#allocation0 + $0xf0] sm:$0xff] %v245_v62  ;;  %256 = vst [vmem:[#allocation0 + $0xf8] sm:$0xff] %v253_v63  ;;  %v293_v10 = vxor.u32 2147483648, %v1072_v7  ;;  %v301_v11 = vxor.u32 2147483648, %v1073_v8  ;;  %v1074_v12 = vld [vmem:[%s1592_s0 + $0x130] sm:$0xff]  ;;  %v1075_v13 = vld [vmem:[%s1592_s0 + $0x138] sm:$0xff] }
  0x14   :  { %v1076_v14 = vld [vmem:[%s1592_s0 + $0x140] sm:$0xff]  ;;  %264 = vst [vmem:[#allocation0 + $0x100] sm:$0xff] %v261_v3  ;;  %272 = vst [vmem:[#allocation0 + $0x108] sm:$0xff] %v269_v4  ;;  %v309_v15 = vxor.u32 2147483648, %v1074_v12  ;;  %v317_v16 = vxor.u32 2147483648, %v1075_v13  ;;  %v1077_v18 = vld [vmem:[%s1592_s0 + $0x148] sm:$0xff] }
  0x15   :  { %280 = vst [vmem:[#allocation0 + $0x110] sm:$0xff] %v277_v5  ;;  %v325_v17 = vxor.u32 2147483648, %v1076_v14  ;;  %v1078_v19 = vld [vmem:[%s1592_s0 + $0x150] sm:$0xff]  ;;  %v1079_v20 = vld [vmem:[%s1592_s0 + $0x158] sm:$0xff]  ;;  %288 = vst [vmem:[#allocation0 + $0x118] sm:$0xff] %v285_v9  ;;  %v333_v21 = vxor.u32 2147483648, %v1077_v18 }
  0x16   :  { %296 = vst [vmem:[#allocation0 + $0x120] sm:$0xff] %v293_v10  ;;  %304 = vst [vmem:[#allocation0 + $0x128] sm:$0xff] %v301_v11  ;;  %v341_v22 = vxor.u32 2147483648, %v1078_v19  ;;  %v349_v23 = vxor.u32 2147483648, %v1079_v20  ;;  %v1080_v24 = vld [vmem:[%s1592_s0 + $0x160] sm:$0xff]  ;;  %v1081_v25 = vld [vmem:[%s1592_s0 + $0x168] sm:$0xff] }
  0x17   :  { %v1082_v26 = vld [vmem:[%s1592_s0 + $0x170] sm:$0xff]  ;;  %312 = vst [vmem:[#allocation0 + $0x130] sm:$0xff] %v309_v15  ;;  %320 = vst [vmem:[#allocation0 + $0x138] sm:$0xff] %v317_v16  ;;  %v357_v27 = vxor.u32 2147483648, %v1080_v24  ;;  %v365_v28 = vxor.u32 2147483648, %v1081_v25  ;;  %v1083_v30 = vld [vmem:[%s1592_s0 + $0x178] sm:$0xff] }
  0x18   :  { %328 = vst [vmem:[#allocation0 + $0x140] sm:$0xff] %v325_v17  ;;  %v373_v29 = vxor.u32 2147483648, %v1082_v26  ;;  %v1084_v31 = vld [vmem:[%s1592_s0 + $0x180] sm:$0xff]  ;;  %v1085_v32 = vld [vmem:[%s1592_s0 + $0x188] sm:$0xff]  ;;  %336 = vst [vmem:[#allocation0 + $0x148] sm:$0xff] %v333_v21  ;;  %v381_v33 = vxor.u32 2147483648, %v1083_v30 }
  0x19   :  { %344 = vst [vmem:[#allocation0 + $0x150] sm:$0xff] %v341_v22  ;;  %352 = vst [vmem:[#allocation0 + $0x158] sm:$0xff] %v349_v23  ;;  %v389_v34 = vxor.u32 2147483648, %v1084_v31  ;;  %v397_v35 = vxor.u32 2147483648, %v1085_v32  ;;  %v1086_v36 = vld [vmem:[%s1592_s0 + $0x190] sm:$0xff]  ;;  %v1087_v37 = vld [vmem:[%s1592_s0 + $0x198] sm:$0xff] }
  0x1a   :  { %v1088_v38 = vld [vmem:[%s1592_s0 + $0x1a0] sm:$0xff]  ;;  %360 = vst [vmem:[#allocation0 + $0x160] sm:$0xff] %v357_v27  ;;  %368 = vst [vmem:[#allocation0 + $0x168] sm:$0xff] %v365_v28  ;;  %v405_v39 = vxor.u32 2147483648, %v1086_v36  ;;  %v413_v40 = vxor.u32 2147483648, %v1087_v37  ;;  %v1089_v42 = vld [vmem:[%s1592_s0 + $0x1a8] sm:$0xff] }
  0x1b   :  { %376 = vst [vmem:[#allocation0 + $0x170] sm:$0xff] %v373_v29  ;;  %v421_v41 = vxor.u32 2147483648, %v1088_v38  ;;  %v1090_v43 = vld [vmem:[%s1592_s0 + $0x1b0] sm:$0xff]  ;;  %v1091_v44 = vld [vmem:[%s1592_s0 + $0x1b8] sm:$0xff]  ;;  %384 = vst [vmem:[#allocation0 + $0x178] sm:$0xff] %v381_v33  ;;  %v429_v45 = vxor.u32 2147483648, %v1089_v42 }
  0x1c   :  { %392 = vst [vmem:[#allocation0 + $0x180] sm:$0xff] %v389_v34  ;;  %400 = vst [vmem:[#allocation0 + $0x188] sm:$0xff] %v397_v35  ;;  %v437_v46 = vxor.u32 2147483648, %v1090_v43  ;;  %v445_v47 = vxor.u32 2147483648, %v1091_v44  ;;  %v1092_v48 = vld [vmem:[%s1592_s0 + $0x1c0] sm:$0xff]  ;;  %v1093_v49 = vld [vmem:[%s1592_s0 + $0x1c8] sm:$0xff] }
  0x1d   :  { %v1094_v50 = vld [vmem:[%s1592_s0 + $0x1d0] sm:$0xff]  ;;  %408 = vst [vmem:[#allocation0 + $0x190] sm:$0xff] %v405_v39  ;;  %416 = vst [vmem:[#allocation0 + $0x198] sm:$0xff] %v413_v40  ;;  %v453_v51 = vxor.u32 2147483648, %v1092_v48  ;;  %v461_v52 = vxor.u32 2147483648, %v1093_v49  ;;  %v1095_v54 = vld [vmem:[%s1592_s0 + $0x1d8] sm:$0xff] }
  0x1e   :  { %424 = vst [vmem:[#allocation0 + $0x1a0] sm:$0xff] %v421_v41  ;;  %v469_v53 = vxor.u32 2147483648, %v1094_v50  ;;  %v1096_v55 = vld [vmem:[%s1592_s0 + $0x1e0] sm:$0xff]  ;;  %v1097_v56 = vld [vmem:[%s1592_s0 + $0x1e8] sm:$0xff]  ;;  %432 = vst [vmem:[#allocation0 + $0x1a8] sm:$0xff] %v429_v45  ;;  %v477_v57 = vxor.u32 2147483648, %v1095_v54 }
  0x1f   :  { %440 = vst [vmem:[#allocation0 + $0x1b0] sm:$0xff] %v437_v46  ;;  %448 = vst [vmem:[#allocation0 + $0x1b8] sm:$0xff] %v445_v47  ;;  %v485_v58 = vxor.u32 2147483648, %v1096_v55  ;;  %v493_v59 = vxor.u32 2147483648, %v1097_v56  ;;  %v1098_v60 = vld [vmem:[%s1592_s0 + $0x1f0] sm:$0xff]  ;;  %v1099_v61 = vld [vmem:[%s1592_s0 + $0x1f8] sm:$0xff] }
  0x20   :  { %v1100_v62 = vld [vmem:[%s1592_s0 + $0x200] sm:$0xff]  ;;  %456 = vst [vmem:[#allocation0 + $0x1c0] sm:$0xff] %v453_v51  ;;  %464 = vst [vmem:[#allocation0 + $0x1c8] sm:$0xff] %v461_v52  ;;  %v501_v63 = vxor.u32 2147483648, %v1098_v60  ;;  %v509_v0 = vxor.u32 2147483648, %v1099_v61  ;;  %v1101_v2 = vld [vmem:[%s1592_s0 + $0x208] sm:$0xff] }
  0x21   :  { %472 = vst [vmem:[#allocation0 + $0x1d0] sm:$0xff] %v469_v53  ;;  %v517_v1 = vxor.u32 2147483648, %v1100_v62  ;;  %v1102_v3 = vld [vmem:[%s1592_s0 + $0x210] sm:$0xff]  ;;  %v1103_v4 = vld [vmem:[%s1592_s0 + $0x218] sm:$0xff]  ;;  %480 = vst [vmem:[#allocation0 + $0x1d8] sm:$0xff] %v477_v57  ;;  %v525_v5 = vxor.u32 2147483648, %v1101_v2 }
  0x22   :  { %488 = vst [vmem:[#allocation0 + $0x1e0] sm:$0xff] %v485_v58  ;;  %496 = vst [vmem:[#allocation0 + $0x1e8] sm:$0xff] %v493_v59  ;;  %v533_v6 = vxor.u32 2147483648, %v1102_v3  ;;  %v541_v7 = vxor.u32 2147483648, %v1103_v4  ;;  %v1104_v8 = vld [vmem:[%s1592_s0 + $0x220] sm:$0xff]  ;;  %v1105_v9 = vld [vmem:[%s1592_s0 + $0x228] sm:$0xff] }
  0x23   :  { %v1106_v10 = vld [vmem:[%s1592_s0 + $0x230] sm:$0xff]  ;;  %504 = vst [vmem:[#allocation0 + $0x1f0] sm:$0xff] %v501_v63  ;;  %512 = vst [vmem:[#allocation0 + $0x1f8] sm:$0xff] %v509_v0  ;;  %v549_v11 = vxor.u32 2147483648, %v1104_v8  ;;  %v557_v12 = vxor.u32 2147483648, %v1105_v9  ;;  %v1107_v14 = vld [vmem:[%s1592_s0 + $0x238] sm:$0xff] }
  0x24   :  { %520 = vst [vmem:[#allocation0 + $0x200] sm:$0xff] %v517_v1  ;;  %v565_v13 = vxor.u32 2147483648, %v1106_v10  ;;  %v1108_v15 = vld [vmem:[%s1592_s0 + $0x240] sm:$0xff]  ;;  %v1109_v16 = vld [vmem:[%s1592_s0 + $0x248] sm:$0xff]  ;;  %528 = vst [vmem:[#allocation0 + $0x208] sm:$0xff] %v525_v5  ;;  %v573_v17 = vxor.u32 2147483648, %v1107_v14 }
  0x25   :  { %536 = vst [vmem:[#allocation0 + $0x210] sm:$0xff] %v533_v6  ;;  %544 = vst [vmem:[#allocation0 + $0x218] sm:$0xff] %v541_v7  ;;  %v581_v18 = vxor.u32 2147483648, %v1108_v15  ;;  %v589_v19 = vxor.u32 2147483648, %v1109_v16  ;;  %v1110_v20 = vld [vmem:[%s1592_s0 + $0x250] sm:$0xff]  ;;  %v1111_v21 = vld [vmem:[%s1592_s0 + $0x258] sm:$0xff] }
  0x26   :  { %v1112_v22 = vld [vmem:[%s1592_s0 + $0x260] sm:$0xff]  ;;  %552 = vst [vmem:[#allocation0 + $0x220] sm:$0xff] %v549_v11  ;;  %560 = vst [vmem:[#allocation0 + $0x228] sm:$0xff] %v557_v12  ;;  %v597_v23 = vxor.u32 2147483648, %v1110_v20  ;;  %v605_v24 = vxor.u32 2147483648, %v1111_v21  ;;  %v1113_v26 = vld [vmem:[%s1592_s0 + $0x268] sm:$0xff] }
  0x27   :  { %568 = vst [vmem:[#allocation0 + $0x230] sm:$0xff] %v565_v13  ;;  %v613_v25 = vxor.u32 2147483648, %v1112_v22  ;;  %v1114_v27 = vld [vmem:[%s1592_s0 + $0x270] sm:$0xff]  ;;  %v1115_v28 = vld [vmem:[%s1592_s0 + $0x278] sm:$0xff]  ;;  %576 = vst [vmem:[#allocation0 + $0x238] sm:$0xff] %v573_v17  ;;  %v621_v29 = vxor.u32 2147483648, %v1113_v26 }
  0x28   :  { %584 = vst [vmem:[#allocation0 + $0x240] sm:$0xff] %v581_v18  ;;  %592 = vst [vmem:[#allocation0 + $0x248] sm:$0xff] %v589_v19  ;;  %v629_v30 = vxor.u32 2147483648, %v1114_v27  ;;  %v637_v31 = vxor.u32 2147483648, %v1115_v28  ;;  %v1116_v32 = vld [vmem:[%s1592_s0 + $0x280] sm:$0xff]  ;;  %v1117_v33 = vld [vmem:[%s1592_s0 + $0x288] sm:$0xff] }
  0x29   :  { %v1118_v34 = vld [vmem:[%s1592_s0 + $0x290] sm:$0xff]  ;;  %600 = vst [vmem:[#allocation0 + $0x250] sm:$0xff] %v597_v23  ;;  %608 = vst [vmem:[#allocation0 + $0x258] sm:$0xff] %v605_v24  ;;  %v645_v35 = vxor.u32 2147483648, %v1116_v32  ;;  %v653_v36 = vxor.u32 2147483648, %v1117_v33  ;;  %v1119_v38 = vld [vmem:[%s1592_s0 + $0x298] sm:$0xff] }
  0x2a   :  { %616 = vst [vmem:[#allocation0 + $0x260] sm:$0xff] %v613_v25  ;;  %v661_v37 = vxor.u32 2147483648, %v1118_v34  ;;  %v1120_v39 = vld [vmem:[%s1592_s0 + $0x2a0] sm:$0xff]  ;;  %v1121_v40 = vld [vmem:[%s1592_s0 + $0x2a8] sm:$0xff]  ;;  %624 = vst [vmem:[#allocation0 + $0x268] sm:$0xff] %v621_v29  ;;  %v669_v41 = vxor.u32 2147483648, %v1119_v38 }
  0x2b   :  { %632 = vst [vmem:[#allocation0 + $0x270] sm:$0xff] %v629_v30  ;;  %640 = vst [vmem:[#allocation0 + $0x278] sm:$0xff] %v637_v31  ;;  %v677_v42 = vxor.u32 2147483648, %v1120_v39  ;;  %v685_v43 = vxor.u32 2147483648, %v1121_v40  ;;  %v1122_v44 = vld [vmem:[%s1592_s0 + $0x2b0] sm:$0xff]  ;;  %v1123_v45 = vld [vmem:[%s1592_s0 + $0x2b8] sm:$0xff] }
  0x2c   :  { %v1124_v46 = vld [vmem:[%s1592_s0 + $0x2c0] sm:$0xff]  ;;  %648 = vst [vmem:[#allocation0 + $0x280] sm:$0xff] %v645_v35  ;;  %656 = vst [vmem:[#allocation0 + $0x288] sm:$0xff] %v653_v36  ;;  %v693_v47 = vxor.u32 2147483648, %v1122_v44  ;;  %v701_v48 = vxor.u32 2147483648, %v1123_v45  ;;  %v1125_v50 = vld [vmem:[%s1592_s0 + $0x2c8] sm:$0xff] }
  0x2d   :  { %664 = vst [vmem:[#allocation0 + $0x290] sm:$0xff] %v661_v37  ;;  %v709_v49 = vxor.u32 2147483648, %v1124_v46  ;;  %v1126_v51 = vld [vmem:[%s1592_s0 + $0x2d0] sm:$0xff]  ;;  %v1127_v52 = vld [vmem:[%s1592_s0 + $0x2d8] sm:$0xff]  ;;  %672 = vst [vmem:[#allocation0 + $0x298] sm:$0xff] %v669_v41  ;;  %v717_v53 = vxor.u32 2147483648, %v1125_v50 }
  0x2e   :  { %680 = vst [vmem:[#allocation0 + $0x2a0] sm:$0xff] %v677_v42  ;;  %688 = vst [vmem:[#allocation0 + $0x2a8] sm:$0xff] %v685_v43  ;;  %v725_v54 = vxor.u32 2147483648, %v1126_v51  ;;  %v733_v55 = vxor.u32 2147483648, %v1127_v52  ;;  %v1128_v56 = vld [vmem:[%s1592_s0 + $0x2e0] sm:$0xff]  ;;  %v1129_v57 = vld [vmem:[%s1592_s0 + $0x2e8] sm:$0xff] }
  0x2f   :  { %v1130_v58 = vld [vmem:[%s1592_s0 + $0x2f0] sm:$0xff]  ;;  %696 = vst [vmem:[#allocation0 + $0x2b0] sm:$0xff] %v693_v47  ;;  %704 = vst [vmem:[#allocation0 + $0x2b8] sm:$0xff] %v701_v48  ;;  %v741_v59 = vxor.u32 2147483648, %v1128_v56  ;;  %v749_v60 = vxor.u32 2147483648, %v1129_v57  ;;  %v1131_v62 = vld [vmem:[%s1592_s0 + $0x2f8] sm:$0xff] }
  0x30   :  { %712 = vst [vmem:[#allocation0 + $0x2c0] sm:$0xff] %v709_v49  ;;  %v757_v61 = vxor.u32 2147483648, %v1130_v58  ;;  %v1132_v63 = vld [vmem:[%s1592_s0 + $0x300] sm:$0xff]  ;;  %v1133_v0 = vld [vmem:[%s1592_s0 + $0x308] sm:$0xff]  ;;  %720 = vst [vmem:[#allocation0 + $0x2c8] sm:$0xff] %v717_v53  ;;  %v765_v1 = vxor.u32 2147483648, %v1131_v62 }
  0x31   :  { %728 = vst [vmem:[#allocation0 + $0x2d0] sm:$0xff] %v725_v54  ;;  %736 = vst [vmem:[#allocation0 + $0x2d8] sm:$0xff] %v733_v55  ;;  %v773_v2 = vxor.u32 2147483648, %v1132_v63  ;;  %v781_v3 = vxor.u32 2147483648, %v1133_v0  ;;  %v1134_v4 = vld [vmem:[%s1592_s0 + $0x310] sm:$0xff]  ;;  %v1135_v5 = vld [vmem:[%s1592_s0 + $0x318] sm:$0xff] }
  0x32   :  { %v1136_v6 = vld [vmem:[%s1592_s0 + $0x320] sm:$0xff]  ;;  %744 = vst [vmem:[#allocation0 + $0x2e0] sm:$0xff] %v741_v59  ;;  %752 = vst [vmem:[#allocation0 + $0x2e8] sm:$0xff] %v749_v60  ;;  %v789_v7 = vxor.u32 2147483648, %v1134_v4  ;;  %v797_v8 = vxor.u32 2147483648, %v1135_v5  ;;  %v1137_v10 = vld [vmem:[%s1592_s0 + $0x328] sm:$0xff] }
  0x33   :  { %760 = vst [vmem:[#allocation0 + $0x2f0] sm:$0xff] %v757_v61  ;;  %v805_v9 = vxor.u32 2147483648, %v1136_v6  ;;  %v1138_v11 = vld [vmem:[%s1592_s0 + $0x330] sm:$0xff]  ;;  %v1139_v12 = vld [vmem:[%s1592_s0 + $0x338] sm:$0xff]  ;;  %768 = vst [vmem:[#allocation0 + $0x2f8] sm:$0xff] %v765_v1  ;;  %v813_v13 = vxor.u32 2147483648, %v1137_v10 }
  0x34   :  { %776 = vst [vmem:[#allocation0 + $0x300] sm:$0xff] %v773_v2  ;;  %784 = vst [vmem:[#allocation0 + $0x308] sm:$0xff] %v781_v3  ;;  %v821_v14 = vxor.u32 2147483648, %v1138_v11  ;;  %v829_v15 = vxor.u32 2147483648, %v1139_v12  ;;  %v1140_v16 = vld [vmem:[%s1592_s0 + $0x340] sm:$0xff]  ;;  %v1141_v17 = vld [vmem:[%s1592_s0 + $0x348] sm:$0xff] }
  0x35   :  { %v1142_v18 = vld [vmem:[%s1592_s0 + $0x350] sm:$0xff]  ;;  %792 = vst [vmem:[#allocation0 + $0x310] sm:$0xff] %v789_v7  ;;  %800 = vst [vmem:[#allocation0 + $0x318] sm:$0xff] %v797_v8  ;;  %v837_v19 = vxor.u32 2147483648, %v1140_v16  ;;  %v845_v20 = vxor.u32 2147483648, %v1141_v17  ;;  %v1143_v22 = vld [vmem:[%s1592_s0 + $0x358] sm:$0xff] }
  0x36   :  { %808 = vst [vmem:[#allocation0 + $0x320] sm:$0xff] %v805_v9  ;;  %v853_v21 = vxor.u32 2147483648, %v1142_v18  ;;  %v1144_v23 = vld [vmem:[%s1592_s0 + $0x360] sm:$0xff]  ;;  %v1145_v24 = vld [vmem:[%s1592_s0 + $0x368] sm:$0xff]  ;;  %816 = vst [vmem:[#allocation0 + $0x328] sm:$0xff] %v813_v13  ;;  %v861_v25 = vxor.u32 2147483648, %v1143_v22 }
  0x37   :  { %824 = vst [vmem:[#allocation0 + $0x330] sm:$0xff] %v821_v14  ;;  %832 = vst [vmem:[#allocation0 + $0x338] sm:$0xff] %v829_v15  ;;  %v869_v26 = vxor.u32 2147483648, %v1144_v23  ;;  %v877_v27 = vxor.u32 2147483648, %v1145_v24  ;;  %v1146_v28 = vld [vmem:[%s1592_s0 + $0x370] sm:$0xff]  ;;  %v1147_v29 = vld [vmem:[%s1592_s0 + $0x378] sm:$0xff] }
  0x38   :  { %v1148_v30 = vld [vmem:[%s1592_s0 + $0x380] sm:$0xff]  ;;  %840 = vst [vmem:[#allocation0 + $0x340] sm:$0xff] %v837_v19  ;;  %848 = vst [vmem:[#allocation0 + $0x348] sm:$0xff] %v845_v20  ;;  %v885_v31 = vxor.u32 2147483648, %v1146_v28  ;;  %v893_v32 = vxor.u32 2147483648, %v1147_v29  ;;  %v1149_v34 = vld [vmem:[%s1592_s0 + $0x388] sm:$0xff] }
  0x39   :  { %856 = vst [vmem:[#allocation0 + $0x350] sm:$0xff] %v853_v21  ;;  %v901_v33 = vxor.u32 2147483648, %v1148_v30  ;;  %v1150_v35 = vld [vmem:[%s1592_s0 + $0x390] sm:$0xff]  ;;  %v1151_v36 = vld [vmem:[%s1592_s0 + $0x398] sm:$0xff]  ;;  %864 = vst [vmem:[#allocation0 + $0x358] sm:$0xff] %v861_v25  ;;  %v909_v37 = vxor.u32 2147483648, %v1149_v34 }
  0x3a   :  { %872 = vst [vmem:[#allocation0 + $0x360] sm:$0xff] %v869_v26  ;;  %880 = vst [vmem:[#allocation0 + $0x368] sm:$0xff] %v877_v27  ;;  %v917_v38 = vxor.u32 2147483648, %v1150_v35  ;;  %v925_v39 = vxor.u32 2147483648, %v1151_v36  ;;  %v1152_v40 = vld [vmem:[%s1592_s0 + $0x3a0] sm:$0xff]  ;;  %v1153_v41 = vld [vmem:[%s1592_s0 + $0x3a8] sm:$0xff] }
  0x3b   :  { %v1154_v42 = vld [vmem:[%s1592_s0 + $0x3b0] sm:$0xff]  ;;  %888 = vst [vmem:[#allocation0 + $0x370] sm:$0xff] %v885_v31  ;;  %896 = vst [vmem:[#allocation0 + $0x378] sm:$0xff] %v893_v32  ;;  %v933_v43 = vxor.u32 2147483648, %v1152_v40  ;;  %v941_v44 = vxor.u32 2147483648, %v1153_v41  ;;  %v1155_v46 = vld [vmem:[%s1592_s0 + $0x3b8] sm:$0xff] }
  0x3c   :  { %904 = vst [vmem:[#allocation0 + $0x380] sm:$0xff] %v901_v33  ;;  %v949_v45 = vxor.u32 2147483648, %v1154_v42  ;;  %v1156_v47 = vld [vmem:[%s1592_s0 + $0x3c0] sm:$0xff]  ;;  %v1157_v48 = vld [vmem:[%s1592_s0 + $0x3c8] sm:$0xff]  ;;  %912 = vst [vmem:[#allocation0 + $0x388] sm:$0xff] %v909_v37  ;;  %v957_v49 = vxor.u32 2147483648, %v1155_v46 }
  0x3d   :  { %920 = vst [vmem:[#allocation0 + $0x390] sm:$0xff] %v917_v38  ;;  %928 = vst [vmem:[#allocation0 + $0x398] sm:$0xff] %v925_v39  ;;  %v965_v50 = vxor.u32 2147483648, %v1156_v47  ;;  %v973_v51 = vxor.u32 2147483648, %v1157_v48  ;;  %v1158_v52 = vld [vmem:[%s1592_s0 + $0x3d0] sm:$0xff]  ;;  %v1159_v53 = vld [vmem:[%s1592_s0 + $0x3d8] sm:$0xff] }
  0x3e   :  { %v1160_v54 = vld [vmem:[%s1592_s0 + $0x3e0] sm:$0xff]  ;;  %936 = vst [vmem:[#allocation0 + $0x3a0] sm:$0xff] %v933_v43  ;;  %944 = vst [vmem:[#allocation0 + $0x3a8] sm:$0xff] %v941_v44  ;;  %v981_v55 = vxor.u32 2147483648, %v1158_v52  ;;  %v989_v56 = vxor.u32 2147483648, %v1159_v53  ;;  %v1161_v58 = vld [vmem:[%s1592_s0 + $0x3e8] sm:$0xff] }
  0x3f   :  { %952 = vst [vmem:[#allocation0 + $0x3b0] sm:$0xff] %v949_v45  ;;  %v997_v57 = vxor.u32 2147483648, %v1160_v54  ;;  %v1162_v59 = vld [vmem:[%s1592_s0 + $0x3f0] sm:$0xff]  ;;  %v1163_v60 = vld [vmem:[%s1592_s0 + $0x3f8] sm:$0xff]  ;;  %960 = vst [vmem:[#allocation0 + $0x3b8] sm:$0xff] %v957_v49  ;;  %v1005_v61 = vxor.u32 2147483648, %v1161_v58 }
  0x40   :  { %968 = vst [vmem:[#allocation0 + $0x3c0] sm:$0xff] %v965_v50  ;;  %976 = vst [vmem:[#allocation0 + $0x3c8] sm:$0xff] %v973_v51  ;;  %v1013_v62 = vxor.u32 2147483648, %v1162_v59  ;;  %v1021_v63 = vxor.u32 2147483648, %v1163_v60  ;;  %s1167_s0 = scalar_lea.vmem %s1029_s17, 16384 }
  0x41   :  { %984 = vst [vmem:[#allocation0 + $0x3d0] sm:$0xff] %v981_v55  ;;  %992 = vst [vmem:[#allocation0 + $0x3d8] sm:$0xff] %v989_v56  ;;  %p1168_p0 = scmp.ne.s32.totalorder %s1029_s17, %s1167_s0  ;;  %p1173_p2 = scmp.lt.s32.totalorder %s1167_s0, %s1167_s0 }
  0x42   :  { %1000 = vst [vmem:[#allocation0 + $0x3e0] sm:$0xff] %v997_v57  ;;  %1008 = vst [vmem:[#allocation0 + $0x3e8] sm:$0xff] %v1005_v61 }
  0x43   :  { %1016 = vst [vmem:[#allocation0 + $0x3f0] sm:$0xff] %v1013_v62  ;;  %1024 = vst [vmem:[#allocation0 + $0x3f8] sm:$0xff] %v1021_v63  ;;  %p1174_p3 = por %p1173_p2, %p1172_p1 }
  0x45   :  { %p1175_p4 = pnand %p1174_p3, %p1168_p0 }
  0x47   :  { %1178 = shalt.err (!%p1175_p4)
}
  0x48   :  { %s1190_s11 = smov 128   ;;  %s1191_s12 = smov 8  }
  0x49   :  { %1034 = dma.vmem_to_hbm [thread:$0]  %s1029_s17, 16384, %s1593_s1, [#allocation1], %s1190_s11, %s1190_s11, %s1191_s12  }
  0x4a   :  { %1187 = dma.done.wait [#allocation1], 16384  }
  0x4b   :  { %1188 = vsyncadd [#allocation1], 4294950912 }
  0x4c   :  { %1036 = vsyncpa [#allocation1], 1 }

// kernel: custom-call.74
= control target key start
LH: loop header
LB: loop body
LE: loop exit
PB: predicated region body
PF: predicated region fallthrough
CT: control target
= control target key end

     0   :  { %s471_s6 = smov 0   ;;  %s473_s7 = smov 0   ;;  %s551_s0 = inlined_call_operand.vmem [shape: f32[1024,8,8], index: 0, kind: input, shape index: {}]   ;;  %s552_s1 = inlined_call_operand.vmem [shape: f32[1024,8,8], index: 1, kind: output, shape index: {}]  }
   0x1   :  { %s475_s8 = smov 0  }
   0x2 LB: > { %s369_s9 = sadd.s32 4294967295, %s458_s8   ;;  %s26_s10 = sadd.s32 1, %s454_s7  ;;  %s458_s8 = sphi %s475_s8, %s7_s8   ;;  %s454_s7 = sphi %s473_s7, %s554_s7   ;;  %s450_s6 = sphi %s471_s6, %s553_s6  }
   0x3   : > { %p28_p0 = scmp.ge.s32.totalorder %s26_s10, 1024  ;;  %p371_p1 = scmp.ge.s32.totalorder %s458_s8, 1024 }
   0x4   : > { %s42_s11 = sand.u32 (!%p371_p1), 1, %s458_s8   ;;  %s373_s12 = sshll.u32 (!%p371_p1), %s454_s7, 3 }
   0x5   : > { %s556_s10 = smov (%p28_p0, %s26_s10), 0  ;;  %40 = sbr.rel (%p371_p1) target bundleno = 12 (0xc), region = 16 }
   0x6   : > { %s372_s13 = sshll.u32 (!%p371_p1), %s42_s11, 3  ;;  %s48_s16 = scalar_lea.vmem (!%p371_p1), %s551_s0, %s373_s12 }
   0x7   : > { %s44_s17 = scalar_lea.vmem (!%p371_p1), [#allocation0], %s372_s13 }
   0xa   : > { %v77_v0 = vld [vmem:[%s48_s16] sm:$0xff] }
   0xb   : > { %78 = vst [vmem:[%s44_s17] sm:$0xff] %v77_v0 }
   0xc PF: > { %p374_p2 = scmp.ge.s32.totalorder %s458_s8, 1  ;;  %p83_p3 = scmp.lt.s32.totalorder %s458_s8, 1025 }
   0xe   : > { %p84_p4 = pnand %p374_p2, %p83_p3 }
   0xf   : > { %s90_s18 = sand.u32 (!%p84_p4), 1, %s369_s9   ;;  %s392_s22 = sshll.u32 (!%p84_p4), %s450_s6, 3 }
  0x10   : > { %87 = sbr.rel (%p84_p4) target bundleno = 1373 (0x55d), region = 54  ;;  %s375_s19 = sshll.u32 (!%p84_p4), %s90_s18, 3 }
  0x11   : > { %s498_s20 = scalar_lea.vmem (!%p84_p4), [#allocation1], %s375_s19  ;;  %s502_s21 = scalar_lea.vmem (!%p84_p4), [#allocation0], %s375_s19 }
  0x12   : > { %s281_s25 = scalar_lea.vmem (!%p84_p4), %s552_s1, %s392_s22 }
  0x15   : > { %v460_v1 = vmov 0.0   ;;  %v104_v5 = vld [vmem:[%s502_s21] ss:$0 sm:$0xff]  ;;  %vm102_vm0 = vcmask 7168   ;;  %v378_v17 = vld [vmem:[%s502_s21 + $0x1] ss:$0 sm:$0xff] }
  0x16   : > { %101 = vst [vmem:[%s498_s20] sm:$0xff] %v460_v1  ;;  %v506_v9 = vld [vmem:[%s502_s21] sm:$0xff]  ;;  %vm120_vm1 = vcmask 15368   ;;  %vm137_vm2 = vcmask 1047553   ;;  %vm142_vm4 = vcmask 23568   ;;  %vm159_vm5 = vcmask 1047554  }
  0x17   : > { %vm138_vm3 = vmand %vm120_vm1, %vm137_vm2  ;;  %v380_v29 = vld [vmem:[%s502_s21 + $0x2] ss:$0 sm:$0xff]  ;;  %v382_v41 = vld [vmem:[%s502_s21 + $0x3] ss:$0 sm:$0xff]  ;;  %vm164_vm7 = vcmask 31768   ;;  %vm181_vm8 = vcmask 1047555  }
  0x18   : > { %vm160_vm6 = vmand %vm142_vm4, %vm159_vm5  ;;  %v384_v53 = vld [vmem:[%s502_s21 + $0x4] ss:$0 sm:$0xff]  ;;  %vm186_vm10 = vcmask 39968   ;;  %vm203_vm11 = vcmask 1047556   ;;  %v386_v1 = vld [vmem:[%s502_s21 + $0x5] ss:$0 sm:$0xff] }
  0x19   : > { %vm182_vm9 = vmand %vm164_vm7, %vm181_vm8  ;;  %vm208_vm13 = vcmask 48168   ;;  %vm225_vm14 = vcmask 1047557   ;;  %vm247_vm1 = vcmask 1047558   ;;  %vm269_vm4 = vcmask 1047559  }
  0x1a   : > { %vm204_vm12 = vmand %vm186_vm10, %vm203_vm11 }
  0x1b   : > { %vm226_vm15 = vmand %vm208_vm13, %vm225_vm14 }
  0x1d   : > { %v103_v2 = vld [vmem:[%s498_s20] ss:$0 sm:$0xff] }
  0x1e   : > { %v105_v3 = vmul.f32 %v103_v2, %v103_v2  ;;  %v112_v4 = vmul.f32 0.0, %v103_v2 }
  0x20   : > { %106 = vadd.xlane.f32.xlu0 %v105_v3 }
  0x24   : > { %113 = vadd.xlane.f32.xlu0 %v112_v4 }
  0xa9   : > { %v107_v6 = vpop.xlane.xlu0 %106 }
  0xaa   : > { %v108_v7 = vsub.f32 %v104_v5, %v107_v6 }
  0xac   : > { %420 = vrsqrt.f32 %v108_v7 }
  0xad   : > { %v114_v8 = vpop.xlane.xlu0 %113 }
  0xae   : > { %v115_v10 = vsub.f32 %v506_v9, %v114_v8 }
  0xb9   : > { %v421_v11 = vpop.eup %420 }
  0xba   : > { %v116_v12 = vmul.f32 %v421_v11, %v115_v10 }
  0xbc   : > { %v117_v13 = vsel %vm102_vm0, %v116_v12, 0.0  ;;  %vm230_vm0 = vcmask 56368  }
  0xbd   : > { %119 = vst [vmem:[%s498_s20] sm:$0xff] %v117_v13  ;;  %vm248_vm2 = vmand %vm230_vm0, %vm247_vm1 }
  0xc4   : > { %v377_v14 = vld [vmem:[%s498_s20 + $0x1] ss:$0 sm:$0xff] }
  0xc5   : > { %v125_v15 = vmul.f32 %v377_v14, %v377_v14  ;;  %v132_v16 = vmul.f32 %v377_v14, %v117_v13  ;;  %v388_v14 = vld [vmem:[%s502_s21 + $0x6] ss:$0 sm:$0xff] }
  0xc7   : > { %126 = vadd.xlane.f32.xlu1 %v125_v15 }
  0xcb   : > { %133 = vadd.xlane.f32.xlu1 %v132_v16 }
 0x150   : > { %v127_v18 = vpop.xlane.xlu1 %126 }
 0x151   : > { %v128_v19 = vsub.f32 %v378_v17, %v127_v18 }
 0x153   : > { %422 = vrsqrt.f32 %v128_v19 }
 0x154   : > { %v134_v20 = vpop.xlane.xlu1 %133 }
 0x155   : > { %v135_v21 = vsub.f32 %v506_v9, %v134_v20 }
 0x160   : > { %v423_v22 = vpop.eup %422 }
 0x161   : > { %v136_v23 = vmul.f32 %v423_v22, %v135_v21 }
 0x163   : > { %v139_v24 = vsel %vm138_vm3, %v136_v23, 0.0  ;;  %vm252_vm3 = vcmask 64568  }
 0x164   : > { %v140_v25 = vadd.f32 %v139_v24, %v117_v13  ;;  %vm270_vm5 = vmand %vm252_vm3, %vm269_vm4 }
 0x166   : > { %141 = vst [vmem:[%s498_s20] sm:$0xff] %v140_v25 }
 0x16d   : > { %v379_v26 = vld [vmem:[%s498_s20 + $0x2] ss:$0 sm:$0xff] }
 0x16e   : > { %v154_v27 = vmul.f32 %v379_v26, %v140_v25  ;;  %v147_v28 = vmul.f32 %v379_v26, %v379_v26  ;;  %v390_v26 = vld [vmem:[%s502_s21 + $0x7] ss:$0 sm:$0xff] }
 0x170   : > { %155 = vadd.xlane.f32.xlu1 %v154_v27  ;;  %148 = vadd.xlane.f32.xlu0 %v147_v28 }
 0x1f9   : > { %v149_v30 = vpop.xlane.xlu0 %148  ;;  %v156_v32 = vpop.xlane.xlu1 %155 }
 0x1fa   : > { %v150_v31 = vsub.f32 %v380_v29, %v149_v30  ;;  %v157_v33 = vsub.f32 %v506_v9, %v156_v32 }
 0x1fc   : > { %424 = vrsqrt.f32 %v150_v31 }
 0x209   : > { %v425_v34 = vpop.eup %424 }
 0x20a   : > { %v158_v35 = vmul.f32 %v425_v34, %v157_v33 }
 0x20c   : > { %v161_v36 = vsel %vm160_vm6, %v158_v35, 0.0 }
 0x20d   : > { %v162_v37 = vadd.f32 %v161_v36, %v140_v25 }
 0x20f   : > { %163 = vst [vmem:[%s498_s20] sm:$0xff] %v162_v37 }
 0x216   : > { %v381_v38 = vld [vmem:[%s498_s20 + $0x3] ss:$0 sm:$0xff] }
 0x217   : > { %v176_v39 = vmul.f32 %v381_v38, %v162_v37  ;;  %v169_v40 = vmul.f32 %v381_v38, %v381_v38 }
 0x219   : > { %177 = vadd.xlane.f32.xlu1 %v176_v39  ;;  %170 = vadd.xlane.f32.xlu0 %v169_v40 }
 0x2a2   : > { %v171_v42 = vpop.xlane.xlu0 %170  ;;  %v178_v44 = vpop.xlane.xlu1 %177 }
 0x2a3   : > { %v172_v43 = vsub.f32 %v382_v41, %v171_v42  ;;  %v179_v45 = vsub.f32 %v506_v9, %v178_v44 }
 0x2a5   : > { %426 = vrsqrt.f32 %v172_v43 }
 0x2b2   : > { %v427_v46 = vpop.eup %426 }
 0x2b3   : > { %v180_v47 = vmul.f32 %v427_v46, %v179_v45 }
 0x2b5   : > { %v183_v48 = vsel %vm182_vm9, %v180_v47, 0.0 }
 0x2b6   : > { %v184_v49 = vadd.f32 %v183_v48, %v162_v37 }
 0x2b8   : > { %185 = vst [vmem:[%s498_s20] sm:$0xff] %v184_v49 }
 0x2bf   : > { %v383_v50 = vld [vmem:[%s498_s20 + $0x4] ss:$0 sm:$0xff] }
 0x2c0   : > { %v198_v51 = vmul.f32 %v383_v50, %v184_v49  ;;  %v191_v52 = vmul.f32 %v383_v50, %v383_v50 }
 0x2c2   : > { %199 = vadd.xlane.f32.xlu1 %v198_v51  ;;  %192 = vadd.xlane.f32.xlu0 %v191_v52 }
 0x34b   : > { %v193_v54 = vpop.xlane.xlu0 %192  ;;  %v200_v56 = vpop.xlane.xlu1 %199 }
 0x34c   : > { %v194_v55 = vsub.f32 %v384_v53, %v193_v54  ;;  %v201_v57 = vsub.f32 %v506_v9, %v200_v56 }
 0x34e   : > { %428 = vrsqrt.f32 %v194_v55 }
 0x35b   : > { %v429_v58 = vpop.eup %428 }
 0x35c   : > { %v202_v59 = vmul.f32 %v429_v58, %v201_v57 }
 0x35e   : > { %v205_v60 = vsel %vm204_vm12, %v202_v59, 0.0 }
 0x35f   : > { %v206_v61 = vadd.f32 %v205_v60, %v184_v49 }
 0x361   : > { %207 = vst [vmem:[%s498_s20] sm:$0xff] %v206_v61 }
 0x368   : > { %v385_v62 = vld [vmem:[%s498_s20 + $0x5] ss:$0 sm:$0xff] }
 0x369   : > { %v220_v63 = vmul.f32 %v385_v62, %v206_v61  ;;  %v213_v0 = vmul.f32 %v385_v62, %v385_v62 }
 0x36b   : > { %221 = vadd.xlane.f32.xlu1 %v220_v63  ;;  %214 = vadd.xlane.f32.xlu0 %v213_v0 }
 0x3f4   : > { %v215_v2 = vpop.xlane.xlu0 %214  ;;  %v222_v4 = vpop.xlane.xlu1 %221 }
 0x3f5   : > { %v216_v3 = vsub.f32 %v386_v1, %v215_v2  ;;  %v223_v5 = vsub.f32 %v506_v9, %v222_v4 }
 0x3f7   : > { %430 = vrsqrt.f32 %v216_v3 }
 0x404   : > { %v431_v6 = vpop.eup %430 }
 0x405   : > { %v224_v7 = vmul.f32 %v431_v6, %v223_v5 }
 0x407   : > { %v227_v8 = vsel %vm226_vm15, %v224_v7, 0.0 }
 0x408   : > { %v228_v10 = vadd.f32 %v227_v8, %v206_v61 }
 0x40a   : > { %229 = vst [vmem:[%s498_s20] sm:$0xff] %v228_v10 }
 0x411   : > { %v387_v11 = vld [vmem:[%s498_s20 + $0x6] ss:$0 sm:$0xff] }
 0x412   : > { %v242_v12 = vmul.f32 %v387_v11, %v228_v10  ;;  %v235_v13 = vmul.f32 %v387_v11, %v387_v11 }
 0x414   : > { %243 = vadd.xlane.f32.xlu1 %v242_v12  ;;  %236 = vadd.xlane.f32.xlu0 %v235_v13 }
 0x49d   : > { %v237_v15 = vpop.xlane.xlu0 %236  ;;  %v244_v17 = vpop.xlane.xlu1 %243 }
 0x49e   : > { %v238_v16 = vsub.f32 %v388_v14, %v237_v15  ;;  %v245_v18 = vsub.f32 %v506_v9, %v244_v17 }
 0x4a0   : > { %432 = vrsqrt.f32 %v238_v16 }
 0x4ad   : > { %v433_v19 = vpop.eup %432 }
 0x4ae   : > { %v246_v20 = vmul.f32 %v433_v19, %v245_v18 }
 0x4b0   : > { %v249_v21 = vsel %vm248_vm2, %v246_v20, 0.0 }
 0x4b1   : > { %v250_v22 = vadd.f32 %v249_v21, %v228_v10 }
 0x4b3   : > { %251 = vst [vmem:[%s498_s20] sm:$0xff] %v250_v22 }
 0x4ba   : > { %v389_v23 = vld [vmem:[%s498_s20 + $0x7] ss:$0 sm:$0xff] }
 0x4bb   : > { %v264_v24 = vmul.f32 %v389_v23, %v250_v22  ;;  %v257_v25 = vmul.f32 %v389_v23, %v389_v23 }
 0x4bd   : > { %265 = vadd.xlane.f32.xlu1 %v264_v24  ;;  %258 = vadd.xlane.f32.xlu0 %v257_v25 }
 0x546   : > { %v259_v27 = vpop.xlane.xlu0 %258  ;;  %v266_v29 = vpop.xlane.xlu1 %265 }
 0x547   : > { %v260_v28 = vsub.f32 %v390_v26, %v259_v27  ;;  %v267_v30 = vsub.f32 %v506_v9, %v266_v29 }
 0x549   : > { %434 = vrsqrt.f32 %v260_v28 }
 0x556   : > { %v435_v31 = vpop.eup %434 }
 0x557   : > { %v268_v32 = vmul.f32 %v435_v31, %v267_v30 }
 0x559   : > { %v271_v33 = vsel %vm270_vm5, %v268_v32, 0.0 }
 0x55a   : > { %v272_v34 = vadd.f32 %v271_v33, %v250_v22 }
 0x55c   : > { %273 = vst [vmem:[%s498_s20] sm:$0xff] %v272_v34  ;;  %311 = vst [vmem:[%s281_s25] sm:$0xff] %v272_v34 }
 0x55d PF: > { %s7_s8 = sadd.s32 1, %s458_s8   ;;  %s553_s6 = smov %s454_s7 }
 0x55e   : > { %p4_p5 = scmp.ge.s32.totalorder %s7_s8, 1026   ;;  %s554_s7 = smov %s556_s10 }
 0x560   :  { %6 = sbr.rel (!%p4_p5) target bundleno = 2 (0x2), region = 132 }

// kernel: custom-call.34
= control target key start
LH: loop header
LB: loop body
LE: loop exit
PB: predicated region body
PF: predicated region fallthrough
CT: control target
= control target key end

     0   :  { %s1724_s30 = smov 0   ;;  %s1726_s10 = smov 0   ;;  %s2051_s0 = inlined_call_operand.vmem [shape: f32[1024,4,4], index: 0, kind: input, shape index: {}]   ;;  %s2052_s1 = inlined_call_operand.vmem [shape: f32[1024,4,4], index: 1, kind: input, shape index: {}]   ;;  %s2053_s2 = inlined_call_operand.vmem [shape: f32[1024,4,4], index: 2, kind: input, shape index: {}]   ;;  %s2054_s3 = inlined_call_operand.vmem [shape: f32[1024,4,4], index: 3, kind: input, shape index: {}]   ;;  %s2055_s4 = inlined_call_operand.vmem [shape: f32[1024,4], index: 4, kind: output, shape index: {0}]   ;;  %s2056_s5 = inlined_call_operand.vmem [shape: f32[1024,4], index: 5, kind: output, shape index: {1}]   ;;  %s2057_s6 = inlined_call_operand.vmem [shape: f32[1024,4,4], index: 6, kind: output, shape index: {2}]   ;;  %s2058_s7 = inlined_call_operand.vmem [shape: f32[1024,4,4], index: 7, kind: output, shape index: {3}]   ;;  %s2059_s8 = inlined_call_operand.vmem [shape: f32[1024,4,4], index: 8, kind: output, shape index: {4}]   ;;  %s2060_s9 = inlined_call_operand.vmem [shape: f32[1024,4,4], index: 9, kind: output, shape index: {5}]  }
   0x1   :  { %s1728_s11 = smov 0  }
   0x2 LB: > { %s1740_s12 = sadd.s32 4294967295, %s1661_s11   ;;  %s1743_s13 = sadd.s32 1, %s1661_s11   ;;  %s1661_s11 = sphi %s1728_s11, %s2079_s11   ;;  %s1657_s10 = sphi %s1726_s10, %s2078_s10   ;;  %s1653_s30 = sphi %s1724_s30, %s2077_s30  }
   0x3   : > { %s20_s14 = sshrl.u32 %s1661_s11, 3  ;;  %s21_s15 = sshrl.u32 %s1743_s13, 3 }
   0x4   : > { %s22_s16 = ssub.s32 %s20_s14, %s21_s15  ;;  %s25_s17 = sadd.s32 1, %s1657_s10 }
   0x5   : > { %p23_p0 = scmp.eq.s32.totalorder %s22_s16, 0  ;;  %p35_p1 = scmp.ne.s32.totalorder %s1657_s10, %s1653_s30 }
   0x6   : > { %p36_p2 = scmp.eq.s32.totalorder %s1740_s12, 1023  ;;  %p1522_p4 = scmp.ge.s32.totalorder %s1661_s11, 1024 }
   0x7   : > { %s1752_s18 = scalar_select %p23_p0, %s1657_s10, %s25_s17  }
   0x8   : > { %p1754_p3 = por %p36_p2, %p35_p1  ;;  %86 = sbr.rel (%p1522_p4) target bundleno = 18 (0x12), region = 16 }
   0x9   : > { %2061 = sst [smem:[#allocation31_spill]] %s1752_s18  ;;  %s88_s20 = sand.u32 (!%p1522_p4), 1, %s1661_s11  }
   0xa   : > { %s1524_s21 = sshll.u32 (!%p1522_p4), %s1661_s11, 2  ;;  %s1523_s22 = sshll.u32 (!%p1522_p4), %s88_s20, 2 }
   0xb   : > { %s92_s25 = scalar_lea.vmem (!%p1522_p4), %s2051_s0, %s1524_s21  ;;  %s90_s26 = scalar_lea.vmem (!%p1522_p4), [#allocation1], %s1523_s22 }
   0xc   : > { %s131_s29 = scalar_lea.vmem (!%p1522_p4), %s2052_s1, %s1524_s21  ;;  %s170_s16 = scalar_lea.vmem (!%p1522_p4), %s2053_s2, %s1524_s21 }
   0xd   : > { %v109_v0 = vld [vmem:[%s92_s25] sm:$0xf]  ;;  %s129_s17 = scalar_lea.vmem [#allocation3], %s1523_s22  ;;  %s209_s23 = scalar_lea.vmem %s2054_s3, %s1524_s21 }
   0xe   : > { %110 = vst [vmem:[%s90_s26] sm:$0xf] %v109_v0  ;;  %v148_v1 = vld [vmem:[%s131_s29] sm:$0xf]  ;;  %s168_s24 = scalar_lea.vmem [#allocation5], %s1523_s22  ;;  %s207_s25 = scalar_lea.vmem [#allocation7], %s1523_s22 }
   0xf   : > { %149 = vst [vmem:[%s129_s17] sm:$0xf] %v148_v1  ;;  %v187_v2 = vld [vmem:[%s170_s16] sm:$0xf] }
  0x10   : > { %188 = vst [vmem:[%s168_s24] sm:$0xf] %v187_v2  ;;  %v226_v3 = vld [vmem:[%s209_s23] sm:$0xf] }
  0x11   : > { %227 = vst [vmem:[%s207_s25] sm:$0xf] %v226_v3 }
  0x12 PF: > { %p1531_p5 = scmp.ge.s32.totalorder %s1661_s11, 1  ;;  %p244_p6 = scmp.lt.s32.totalorder %s1661_s11, 1025 }
  0x14   : > { %p245_p7 = pnand %p1531_p5, %p244_p6 }
  0x16   : > { %248 = sbr.rel (%p245_p7) target bundleno = 986 (0x3da), region = 140 }
  0x1b   : > { %s267_s26 = sand.u32 1, %s1740_s12   ;;  %s285_s27 = sand.u32 1, %s1653_s30   ;;  %v349_v4 = vlaneseq  ;;  %v1671_v5 = vmov 0.0  }
  0x1c   : > { %s1777_s28 = sshll.u32 %s267_s26, 2  ;;  %s1779_s18 = sshll.u32 %s285_s27, 3  ;;  %344 = vst [vmem:[#allocation10] sm:$0xff] %v1671_v5  ;;  %345 = vst [vmem:[#allocation12] sm:$0xff] %v1671_v5 }
  0x1d   : > { %346 = vst [vmem:[#allocation14] sm:$0xff] %v1671_v5  ;;  %347 = vst [vmem:[#allocation16] sm:$0xff] %v1671_v5  ;;  %v1781_v6 = vand.u32 127, %v349_v4  ;;  %v1783_v7 = vshrl.u32 %v349_v4, 7  ;;  %s269_s11 = scalar_lea.vmem [#allocation1], %s1777_s28  ;;  %s273_s30 = scalar_lea.vmem [#allocation3], %s1777_s28 }
  0x1e   : > { %v313_v8 = vld [vmem:[%s269_s11] sm:$0xf]  ;;  %v318_v9 = vld [vmem:[%s273_s30] sm:$0xf]  ;;  %s277_s21 = scalar_lea.vmem [#allocation5], %s1777_s28  ;;  %s281_s22 = scalar_lea.vmem [#allocation7], %s1777_s28 }
  0x1f   : > { %314 = vst [vmem:[#allocation0] sm:$0xf] %v313_v8  ;;  %319 = vst [vmem:[#allocation2] sm:$0xf] %v318_v9  ;;  %v323_v10 = vld [vmem:[%s277_s21] sm:$0xf]  ;;  %v351_v6 = vmov %v1781_v6  ;;  %v354_v7 = vmov %v1783_v7 }
  0x20   : > { %v328_v11 = vld [vmem:[%s281_s22] sm:$0xf]  ;;  %324 = vst [vmem:[#allocation4] sm:$0xf] %v323_v10  ;;  %v364_v6 = vmov %v1781_v6  ;;  %v367_v7 = vmov %v1783_v7  ;;  %s332_s29 = smov [#allocation18]  ;;  %s335_s14 = smov [#allocation19]  ;;  %vm358_vm0 = vcmp.eq.s32.totalorder %v354_v7, %v351_v6 }
  0x21   : > { %329 = vst [vmem:[#allocation6] sm:$0xf] %v328_v11  ;;  %vm371_vm1 = vcmp.eq.s32.totalorder %v367_v7, %v364_v6  ;;  %s348_s15 = smov [#allocation10]  ;;  %s361_s16 = smov [#allocation16]  ;;  %vm1411_vm2 = vcmp.lt.s32.totalorder %v1781_v6, 4  ;;  %v1403_v6 = vmov %v1781_v6  ;;  %v1406_v7 = vmov %v1783_v7 }
  0x22   : > { %s338_s17 = smov [#allocation20]  ;;  %s341_s20 = smov [#allocation21]  ;;  %vm1416_vm3 = vcmp.eq.s32.totalorder %v1406_v7, %v1403_v6  ;;  %v1454_v6 = vmov %v1781_v6  ;;  %v1423_v7 = vmov %v1783_v7 }
  0x23   : > { %v355_v12 = vld [vmem:[%s348_s15] sm:$0xf]  ;;  %s1407_s30 = smov [#allocation18]  ;;  %s1424_s21 = smov [#allocation19]  ;;  %v1420_v6 = vmov %v1781_v6  ;;  %v1457_v7 = vmov %v1783_v7 }
  0x24   : > { %v368_v13 = vld [vmem:[%s361_s16] sm:$0xf]  ;;  %v359_v16 = vsel %vm358_vm0, 1.0, %v355_v12  ;;  %s1441_s22 = smov [#allocation20]  ;;  %v1437_v6 = vmov %v1781_v6  ;;  %v1440_v7 = vmov %v1783_v7  ;;  %vm1467_vm4 = vcmp.eq.s32.totalorder %v1457_v7, %v1454_v6 }
  0x25   : > { %v372_v17 = vsel %vm371_vm1, 1.0, %v368_v13  ;;  %360 = vst [vmem:[%s348_s15] sm:$0xf] %v359_v16 }
  0x26   : > { %v333_v14 = vld [vmem:[#allocation0] sm:$0xff]  ;;  %v336_v15 = vld [vmem:[#allocation2] sm:$0xff]  ;;  %373 = vst [vmem:[%s361_s16] sm:$0xf] %v372_v17 }
  0x27   : > { %334 = vst [vmem:[%s332_s29] sm:$0xff] %v333_v14  ;;  %337 = vst [vmem:[%s335_s14] sm:$0xff] %v336_v15  ;;  %v339_v18 = vld [vmem:[#allocation4] sm:$0xff]  ;;  %s1458_s29 = smov [#allocation21] }
  0x28   : > { %v342_v19 = vld [vmem:[#allocation6] sm:$0xff]  ;;  %340 = vst [vmem:[%s338_s17] sm:$0xff] %v339_v18 }
  0x29   : > { %343 = vst [vmem:[%s341_s20] sm:$0xff] %v342_v19 }
  0x2e   : > { %v1413_v20 = vld [vmem:[%s1407_s30] sm:$0xf] }
  0x2f   : > { %v1430_v21 = vld [vmem:[%s1424_s21] sm:$0xf]  ;;  %v1414_v22 = vsel %vm1411_vm2, %v1413_v20, 0.0 }
  0x30   : > { %v1431_v23 = vsel %vm1411_vm2, %v1430_v21, 0.0  ;;  %v1447_v24 = vld [vmem:[%s1441_s22] sm:$0xf]  ;;  %v1415_v26 = vmul.f32 %v1414_v22, %v1414_v22 }
  0x31   : > { %v1464_v25 = vld [vmem:[%s1458_s29] sm:$0xf]  ;;  %v1432_v27 = vmul.f32 %v1431_v23, %v1431_v23  ;;  %v1448_v28 = vsel %vm1411_vm2, %v1447_v24, 0.0 }
  0x32   : > { %v1465_v29 = vsel %vm1411_vm2, %v1464_v25, 0.0  ;;  %v1449_v30 = vmul.f32 %v1448_v28, %v1448_v28  ;;  %v1417_v33 = vsel %vm1416_vm3, 0.0, %v1415_v26 }
  0x33   : > { %v1434_v31 = vadd.f32 %v1432_v27, %v1415_v26  ;;  %v1466_v32 = vmul.f32 %v1465_v29, %v1465_v29  ;;  %v1433_v34 = vadd.f32 %v1432_v27, %v1417_v33 }
  0x35   : > { %v1451_v35 = vadd.f32 %v1449_v30, %v1434_v31  ;;  %v1450_v36 = vadd.f32 %v1449_v30, %v1433_v34  ;;  %v1468_v37 = vsel %vm1467_vm4, 0.0, %v1466_v32 }
  0x37   : > { %v1470_v38 = vadd.f32 %v1466_v32, %v1451_v35  ;;  %v1469_v39 = vadd.f32 %v1468_v37, %v1450_v36 }
  0x39   : > { %1471 = vadd.xlane.f32.xlu0 %v1470_v38 }
  0x3d   : > { %1479 = vadd.xlane.f32.xlu0 %v1469_v39 }
  0xc2   : > { %v1472_v40 = vpop.xlane.xlu0 %1471 }
  0xc3   : > { %v1473_v41 = vrot.slane %v1472_v40, 4 }
  0xc5   : > { %v1474_v42 = vadd.f32 %v1473_v41, %v1472_v40 }
  0xc6   : > { %v1480_v43 = vpop.xlane.xlu0 %1479 }
  0xc7   : > { %v1475_v44 = vrot.slane %v1474_v42, 2  ;;  %v1481_v45 = vrot.slane %v1480_v43, 4 }
  0xc9   : > { %v1482_v46 = vadd.f32 %v1481_v45, %v1480_v43  ;;  %v1476_v47 = vadd.f32 %v1475_v44, %v1474_v42 }
  0xcb   : > { %v1483_v48 = vrot.slane %v1482_v46, 2  ;;  %v1477_v50 = vrot.slane %v1476_v47, 1 }
  0xcd   : > { %v1484_v49 = vadd.f32 %v1483_v48, %v1482_v46  ;;  %v1478_v53 = vadd.f32 %v1477_v50, %v1476_v47 }
  0xcf   : > { %v1485_v51 = vrot.slane %v1484_v49, 1 }
  0xd1   : > { %v1486_v52 = vadd.f32 %v1485_v51, %v1484_v49 }
  0xd3   : > { %1572 = vpush %v1486_v52 }
  0xd4   : > { %1574 = vpush %v1478_v53 }
 0x104   : > { %s1573_s14 = spop %1572 }
 0x105   : > { %s1575_s15 = spop %1574 }
 0x106   : > { %s1489_s16 = smul.f32 1e-10, %s1575_s15 }
 0x108   : > { %p1490_p8 = scmp.le.f32.partialorder %s1573_s14, %s1489_s16 }
 0x109   : > { %s1817_s17 = smov (!%p1490_p8), 0  }
 0x10a   : > { %1493 = sbr.rel (%p1490_p8) target bundleno = 948 (0x3b4), region = 475 }
 0x10f LB: >> { %s1822_s20 = smov 0   ;;  %s1665_s17 = sphi %s1817_s17, %s2063_s17  }
 0x110 LB: >>> { %s478_s30 = smov [#allocation18]  ;;  %v482_v6 = vmov %v1781_v6  ;;  %v485_v7 = vmov %v1783_v7  ;;  %s498_s21 = smov [#allocation19]  ;;  %vm801_vm14 = vcmp.eq.s32.totalorder %v1783_v7, 0  ;;  %vm813_vm15 = vcmp.eq.s32.totalorder %v1783_v7, 3  ;;  %s1669_s20 = sphi %s1822_s20, %s477_s20  }
 0x111   : >>> { %v502_v6 = vmov %v1781_v6  ;;  %v505_v7 = vmov %v1783_v7  ;;  %v486_v54 = vld [vmem:[%s478_s30] sm:$0xf]  ;;  %vm489_vm5 = vcmp.eq.s32.totalorder %v485_v7, %v482_v6  ;;  %s518_s22 = smov [#allocation21]  ;;  %s479_s29 = smov [#allocation22] }
 0x112   : >>> { %vm509_vm6 = vcmp.eq.s32.totalorder %v505_v7, %v502_v6  ;;  %v522_v6 = vmov %v1781_v6  ;;  %v525_v7 = vmov %v1783_v7  ;;  %v490_v55 = vsel %vm489_vm5, %v486_v54, 0.0  ;;  %v506_v56 = vld [vmem:[%s498_s21] sm:$0xf]  ;;  %s499_s14 = smov [#allocation23]  ;;  %s519_s15 = smov [#allocation24] }
 0x113   : >>> { %vm529_vm7 = vcmp.eq.s32.totalorder %v525_v7, %v522_v6  ;;  %v491_v57 = vrot.slane %v490_v55, 4  ;;  %v510_v58 = vsel %vm509_vm6, %v506_v56, 0.0  ;;  %v526_v59 = vld [vmem:[%s518_s22] sm:$0xf]  ;;  %s542_s16 = smov [#allocation23]  ;;  %s540_s30 = smov [#allocation22]  ;;  %v591_v6 = vmov %v1781_v6 }
 0x114   : >>> { %v511_v60 = vrot.slane %v510_v58, 4  ;;  %v530_v61 = vsel %vm529_vm7, %v526_v59, 0.0  ;;  %s544_s21 = smov [#allocation24]  ;;  %s579_s22 = smov [#allocation25]  ;;  %v594_v7 = vmov %v1783_v7  ;;  %v606_v6 = vmov %v1781_v6 }
 0x115   : >>> { %v492_v62 = vadd.f32 %v491_v57, %v490_v55  ;;  %v531_v63 = vrot.slane %v530_v61, 4  ;;  %v609_v7 = vmov %v1783_v7  ;;  %vm596_vm12 = vcmp.eq.s32.totalorder %v594_v7, %v591_v6  ;;  %s1841_s24 = smov [#allocation20]  ;;  %s1847_s23 = smov [#allocation12] }
 0x116   : >>> { %v512_v0 = vadd.f32 %v511_v60, %v510_v58  ;;  %vm611_vm13 = vcmp.eq.s32.totalorder %v609_v7, %v606_v6  ;;  %s841_s11 = smov [#allocation29]  ;;  %s1853_s27 = smov [#allocation16]  ;;  %v627_v55 = vld [vmem:[%s1841_s24] sm:$0xf]  ;;  %v704_v6 = vmov %v1781_v6  ;;  %v707_v7 = vmov %v1783_v7 }
 0x117   : >>> { %v493_v1 = vrot.slane %v492_v62, 2  ;;  %v532_v2 = vadd.f32 %v531_v63, %v530_v61  ;;  %v850_v58 = vld [vmem:[%s1847_s23] sm:$0xf]  ;;  %s619_s26 = smov [#allocation30]  ;;  %s843_s25 = smov [#allocation30]  ;;  %v718_v6 = vmov %v1781_v6  ;;  %v721_v7 = vmov %v1783_v7 }
 0x118   : >>> { %v513_v3 = vrot.slane %v512_v0, 2  ;;  %v852_v61 = vld [vmem:[%s1853_s27] sm:$0xf]  ;;  %vm711_vm0 = vcmp.eq.s32.totalorder %v707_v7, %v704_v6  ;;  %v677_v6 = vmov %v1781_v6  ;;  %v680_v7 = vmov %v1783_v7  ;;  %s477_s20 = sadd.s32 1, %s1669_s20  }
 0x119   : >>> { %v494_v4 = vadd.f32 %v493_v1, %v492_v62  ;;  %v533_v5 = vrot.slane %v532_v2, 2  ;;  %v691_v6 = vmov %v1781_v6  ;;  %v694_v7 = vmov %v1783_v7  ;;  %p474_p9 = scmp.ge.s32.totalorder %s477_s20, 7  }
 0x11a   : >>> { %v514_v8 = vadd.f32 %v513_v3, %v512_v0  ;;  %vm726_vm1 = vcmp.eq.s32.totalorder %v721_v7, %v718_v6  ;;  %vm685_vm3 = vcmp.eq.s32.totalorder %v680_v7, %v677_v6  ;;  %vm698_vm4 = vcmp.eq.s32.totalorder %v694_v7, %v691_v6 }
 0x11b   : >>> { %v495_v9 = vrot.slane %v494_v4, 1  ;;  %v534_v10 = vadd.f32 %v533_v5, %v532_v2  ;;  %vm740_vm5 = vcmp.eq.s32.totalorder %v1781_v6, 0  ;;  %vm744_vm6 = vcmp.eq.s32.totalorder %v1781_v6, 1 }
 0x11c   : >>> { %v515_v11 = vrot.slane %v514_v8, 1  ;;  %vm757_vm7 = vcmp.eq.s32.totalorder %v1781_v6, 3  ;;  %v378_v6 = vmov (%p474_p9), %v1781_v6  ;;  %v381_v7 = vmov (%p474_p9), %v1783_v7 }
 0x11d   : >>> { %v496_v12 = vadd.f32 %v495_v9, %v494_v4  ;;  %v535_v13 = vrot.slane %v534_v10, 1  ;;  %v431_v6 = vmov (%p474_p9), %v1781_v6 }
 0x11e   : >>> { %v516_v14 = vadd.f32 %v515_v11, %v514_v8 }
 0x11f   : >>> { %497 = vst [vmem:[%s479_s29] sm:$0x1] %v496_v12  ;;  %v536_v15 = vadd.f32 %v535_v13, %v534_v10  ;;  %s581_s29 = smov [#allocation26] }
 0x120   : >>> { %517 = vst [vmem:[%s499_s14] sm:$0x1] %v516_v14  ;;  %s538_s14 = smov [#allocation27] }
 0x121   : >>> { %537 = vst [vmem:[%s519_s15] sm:$0x1] %v536_v15  ;;  %s539_s15 = smov [#allocation28]  ;;  %s583_s14 = smov %s538_s14 }
 0x122   : >>> { %s585_s15 = smov %s539_s15 }
 0x126   : >>> { %v541_v18 = vld [vmem:[%s540_s30] sm:$0xff]  ;;  %s602_s30 = smov [#allocation28] }
 0x127   : >>> { %v543_v16 = vld [vmem:[%s542_s16] sm:$0xff]  ;;  %v564_v33 = vand.u32 2147483647, %v541_v18  ;;  %s587_s16 = smov [#allocation27] }
 0x128   : >>> { %v547_v17 = vmul.f32 2.0, %v543_v16  ;;  %v545_v19 = vld [vmem:[%s544_s21] sm:$0xff]  ;;  %v565_v36 = vand.u32 2147483647, %v543_v16  ;;  %s600_s21 = smov [#allocation29] }
 0x129   : >>> { %v546_v20 = vsub.f32 %v545_v19, %v541_v18  ;;  %v566_v34 = vand.u32 2147483647, %v545_v19 }
 0x12a   : >>> { %1623 = vrcp.f32 %v547_v17 }
 0x12b   : >>> { %v567_v35 = vmin.f32 %v564_v33, %v566_v34 }
 0x12d   : >>> { %v568_v37 = vmul.f32 1.1920929e-08, %v567_v35 }
 0x12f   : >>> { %vm569_vm11 = vcmp.le.f32.partialorder %v565_v36, %v568_v37 }
 0x137   : >>> { %v1624_v21 = vpop.eup %1623 }
 0x138   : >>> { %v549_v22 = vmul.f32 %v1624_v21, %v546_v20 }
 0x13a   : >>> { %v551_v23 = vmul.f32 %v549_v22, %v549_v22  ;;  %vm550_vm10 = vcmp.ge.f32.partialorder %v549_v22, 0.0 }
 0x13c   : >>> { %v552_v24 = vadd.f32 1.0, %v551_v23 }
 0x13e   : >>> { %1625 = vrsqrt.f32 %v552_v24  ;;  %vm555_vm8 = vcmp.eq.f32.partialorder %v552_v24, inf  ;;  %v558_v26 = vand.u32 2147483648, %v552_v24  ;;  %vm557_vm9 = vcmp.eq.f32.partialorder %v552_v24, 0.0 }
 0x14b   : >>> { %v1626_v25 = vpop.eup %1625 }
 0x14c   : >>> { %v554_v27 = vmul.f32 %v1626_v25, %v552_v24 }
 0x14e   : >>> { %v556_v28 = vsel %vm555_vm8, %v552_v24, %v554_v27  ;;  %vm393_vm8 = vcmp.eq.s32.totalorder (%p474_p9), %v381_v7, %v378_v6  ;;  %v434_v7 = vmov (%p474_p9), %v1783_v7  ;;  %v397_v6 = vmov (%p474_p9), %v1781_v6 }
 0x14f   : >>> { %v559_v29 = vsel %vm557_vm9, %v558_v26, %v556_v28  ;;  %v400_v7 = vmov (%p474_p9), %v1783_v7  ;;  %v414_v6 = vmov (%p474_p9), %v1781_v6  ;;  %vm446_vm9 = vcmp.eq.s32.totalorder (%p474_p9), %v434_v7, %v431_v6 }
 0x150   : >>> { %v560_v30 = vxor.u32 2147483648, %v559_v29  ;;  %v417_v7 = vmov (%p474_p9), %v1783_v7 }
 0x152   : >>> { %v561_v31 = vsel %vm550_vm10, %v559_v29, %v560_v30 }
 0x153   : >>> { %v562_v32 = vadd.f32 %v561_v31, %v549_v22 }
 0x155   : >>> { %1627 = vrcp.f32 %v562_v32 }
 0x162   : >>> { %v1628_v38 = vpop.eup %1627 }
 0x163   : >>> { %v570_v39 = vsel %vm569_vm11, 0.0, %v1628_v38 }
 0x164   : >>> { %v571_v40 = vmul.f32 %v570_v39, %v570_v39  ;;  %v575_v41 = vmul.f32 %v570_v39, %v543_v16 }
 0x166   : >>> { %v572_v42 = vadd.f32 1.0, %v571_v40  ;;  %v576_v43 = vsub.f32 %v541_v18, %v575_v41  ;;  %v578_v44 = vadd.f32 %v575_v41, %v545_v19 }
 0x168   : >>> { %1629 = vrsqrt.f32 %v572_v42  ;;  %580 = vst [vmem:[%s579_s22] sm:$0xff] %v576_v43  ;;  %582 = vst [vmem:[%s581_s29] sm:$0xff] %v578_v44  ;;  %s617_s22 = smov [#allocation29]  ;;  %s1837_s29 = smov [#allocation18] }
 0x169   : >>> { %v625_v53 = vld [vmem:[%s1837_s29] sm:$0xf] }
 0x175   : >>> { %v1630_v45 = vpop.eup %1629 }
 0x176   : >>> { %584 = vst [vmem:[%s583_s14] sm:$0xff] %v1630_v45  ;;  %v574_v46 = vmul.f32 %v1630_v45, %v570_v39  ;;  %s615_s14 = smov [#allocation30] }
 0x178   : >>> { %586 = vst [vmem:[%s585_s15] sm:$0xff] %v574_v46  ;;  %s1839_s15 = smov [#allocation19] }
 0x179   : >>> { %v626_v54 = vld [vmem:[%s1839_s15] sm:$0xf] }
 0x17d   : >>> { %v588_v47 = vld [vmem:[%s587_s16] ss:$0 sm:$0xff]  ;;  %s1843_s16 = smov [#allocation21] }
 0x17e   : >>> { %v597_v48 = vsel %vm596_vm12, %v588_v47, 0.0  ;;  %v628_v56 = vld [vmem:[%s1843_s16] sm:$0xf] }
 0x17f   : >>> { %598 = vadd.xlane.f32.xlu0 %v597_v48  ;;  %v603_v49 = vld [vmem:[%s602_s30] ss:$0 sm:$0xff]  ;;  %s1845_s30 = smov [#allocation10] }
 0x180   : >>> { %v612_v50 = vsel %vm611_vm13, %v603_v49, 0.0  ;;  %v849_v57 = vld [vmem:[%s1845_s30] sm:$0xf] }
 0x183   : >>> { %613 = vadd.xlane.f32.xlu0 %v612_v50 }
 0x208   : >>> { %v599_v51 = vpop.xlane.xlu0 %598 }
 0x209   : >>> { %601 = vst [vmem:[%s600_s21] sm:$0xff] %v599_v51  ;;  %s1849_s21 = smov [#allocation14] }
 0x20a   : >>> { %v851_v59 = vld [vmem:[%s1849_s21] sm:$0xf] }
 0x20c   : >>> { %v614_v52 = vpop.xlane.xlu0 %613 }
 0x20d   : >>> { %616 = vst [vmem:[%s615_s14] sm:$0xff] %v614_v52  ;;  %s1873_s14 = smov [#allocation21] }
 0x210   : >>> { %v618_v60 = vld [vmem:[%s617_s22] sm:$0xff]  ;;  %s1871_s22 = smov [#allocation20] }
 0x211   : >>> { %v842_v62 = vld [vmem:[%s841_s11] sm:$0xff]  ;;  %v629_v63 = vmul.f32 %v625_v53, %v618_v60  ;;  %v632_v0 = vmul.f32 %v626_v54, %v618_v60  ;;  %v636_v1 = vmul.f32 %v627_v55, %v618_v60  ;;  %v639_v2 = vmul.f32 %v628_v56, %v618_v60  ;;  %s1869_s11 = smov [#allocation10] }
 0x212   : >>> { %v853_v3 = vmul.f32 %v849_v57, %v842_v62  ;;  %v856_v4 = vmul.f32 %v850_v58, %v842_v62  ;;  %v860_v5 = vmul.f32 %v851_v59, %v842_v62  ;;  %v863_v8 = vmul.f32 %v852_v61, %v842_v62 }
 0x214   : >>> { %v620_v9 = vld [vmem:[%s619_s26] sm:$0xff]  ;;  %s647_s26 = smov [#allocation28] }
 0x215   : >>> { %v844_v10 = vld [vmem:[%s843_s25] sm:$0xff]  ;;  %v630_v11 = vmul.f32 %v627_v55, %v620_v9  ;;  %v633_v12 = vmul.f32 %v628_v56, %v620_v9  ;;  %v635_v13 = vmul.f32 %v625_v53, %v620_v9  ;;  %v638_v14 = vmul.f32 %v626_v54, %v620_v9  ;;  %s645_s25 = smov [#allocation27] }
 0x216   : >>> { %v854_v15 = vmul.f32 %v851_v59, %v844_v10  ;;  %v857_v16 = vmul.f32 %v852_v61, %v844_v10  ;;  %v859_v17 = vmul.f32 %v849_v57, %v844_v10  ;;  %v862_v18 = vmul.f32 %v850_v58, %v844_v10  ;;  %v646_v27 = vld [vmem:[%s645_s25] ss:$0 sm:$0xff]  ;;  %s674_s25 = smov [#allocation25] }
 0x217   : >>> { %v631_v19 = vsub.f32 %v629_v63, %v630_v11  ;;  %v634_v20 = vsub.f32 %v632_v0, %v633_v12  ;;  %v637_v21 = vadd.f32 %v636_v1, %v635_v13  ;;  %v640_v22 = vadd.f32 %v639_v2, %v638_v14  ;;  %v648_v28 = vld [vmem:[%s647_s26] ss:$0 sm:$0xff]  ;;  %s673_s26 = smov [#allocation18] }
 0x218   : >>> { %v855_v23 = vsub.f32 %v853_v3, %v854_v15  ;;  %v858_v24 = vsub.f32 %v856_v4, %v857_v16  ;;  %v861_v25 = vadd.f32 %v860_v5, %v859_v17  ;;  %v864_v26 = vadd.f32 %v863_v8, %v862_v18  ;;  %v681_v63 = vld [vmem:[%s674_s25] ss:$0 sm:$0xff]  ;;  %s917_s25 = sadd.s32 (%p474_p9), 1, %s1665_s17  }
 0x219   : >>> { %642 = vst [vmem:[%s1839_s15] sm:$0xf] %v634_v20  ;;  %644 = vst [vmem:[%s1843_s16] sm:$0xf] %v640_v22  ;;  %s1875_s15 = smov [#allocation18]  ;;  %s715_s16 = smov [#allocation26] }
 0x21a   : >>> { %641 = vst [vmem:[%s1837_s29] sm:$0xf] %v631_v19  ;;  %643 = vst [vmem:[%s1841_s24] sm:$0xf] %v637_v21  ;;  %s1877_s24 = smov [#allocation14]  ;;  %s1885_s29 = smov [#allocation19]  ;;  %v722_v59 = vld [vmem:[%s715_s16] ss:$0 sm:$0xff] }
 0x21b   : >>> { %865 = vst [vmem:[%s1845_s30] sm:$0xf] %v855_v23  ;;  %866 = vst [vmem:[%s1847_s23] sm:$0xf] %v858_v24  ;;  %s1879_s23 = smov [#allocation12]  ;;  %s701_s30 = smov [#allocation20] }
 0x21c   : >>> { %867 = vst [vmem:[%s1849_s21] sm:$0xf] %v861_v25  ;;  %868 = vst [vmem:[%s1853_s27] sm:$0xf] %v864_v26  ;;  %s1883_s27 = smov [#allocation16]  ;;  %s714_s21 = smov [#allocation21] }
 0x21d   : >>> { %s817_s16 = smov [#allocation19]  ;;  %p470_p10 = scmp.ge.s32.totalorder (%p474_p9), %s917_s25, 15 }
 0x21e   : >> { %s2063_s17 = smov (%p474_p9), %s917_s25 }
 0x220   : >>> { %v656_v30 = vld [vmem:[%s1873_s14] sm:$0xf] }
 0x221   : >>> { %v655_v29 = vld [vmem:[%s1871_s22] sm:$0xf]  ;;  %v664_v36 = vmul.f32 %v656_v30, %v648_v28  ;;  %v667_v42 = vmul.f32 %v656_v30, %v646_v27 }
 0x222   : >>> { %v653_v31 = vld [vmem:[%s1875_s15] sm:$0xf]  ;;  %v663_v35 = vmul.f32 %v655_v29, %v646_v27  ;;  %v666_v37 = vmul.f32 %v655_v29, %v648_v28 }
 0x223   : >>> { %v871_v32 = vld [vmem:[%s1869_s11] ss:$0 sm:$0xff]  ;;  %v1551_v34 = vld [vmem:[%s1869_s11 + $0x3] ss:$0 sm:$0xff]  ;;  %v657_v48 = vmul.f32 %v653_v31, %v646_v27  ;;  %v660_v49 = vmul.f32 %v653_v31, %v648_v28 }
 0x224   : >>> { %v1550_v33 = vld [vmem:[%s1869_s11 - $0x1] sm:$0xe]  ;;  %v1555_v45 = vld [vmem:[%s1879_s23 + $0x3] ss:$0 sm:$0xff]  ;;  %v665_v47 = vsub.f32 %v663_v35, %v664_v36  ;;  %v668_v53 = vadd.f32 %v667_v42, %v666_v37 }
 0x225   : >>> { %v878_v38 = vsel %vm801_vm14, %v871_v32, %v1550_v33  ;;  %v882_v39 = vld [vmem:[%s1877_s24] ss:$0 sm:$0xff]  ;;  %v1553_v40 = vld [vmem:[%s1877_s24 + $0x1] sm:$0x7] }
 0x226   : >>> { %v895_v41 = vld [vmem:[%s1879_s23] ss:$0 sm:$0xff]  ;;  %881 = vst [vmem:[%s1869_s11] sm:$0xf] %v878_v38  ;;  %v890_v43 = vsel %vm813_vm15, %v1551_v34, %v1553_v40  ;;  %v1557_v51 = vld [vmem:[%s1883_s27 + $0x1] sm:$0x7]  ;;  %671 = vst [vmem:[%s1871_s22] sm:$0xf] %v665_v47 }
 0x227   : >>> { %v1554_v44 = vld [vmem:[%s1879_s23 - $0x1] sm:$0xe]  ;;  %1552 = vst [vmem:[%s1869_s11 + $0x1] sm:$0x1] %v882_v39  ;;  %892 = vst [vmem:[%s1877_s24] sm:$0xf] %v890_v43  ;;  %v914_v54 = vsel %vm813_vm15, %v1555_v45, %v1557_v51  ;;  %s688_s11 = smov [#allocation19] }
 0x228   : >>> { %v906_v46 = vld [vmem:[%s1883_s27] ss:$0 sm:$0xff]  ;;  %v902_v50 = vsel %vm801_vm14, %v895_v41, %v1554_v44  ;;  %672 = vst [vmem:[%s1873_s14] sm:$0xf] %v668_v53  ;;  %s1927_s22 = smov [#allocation20]  ;;  %s1672_s14 = smov 1  }
 0x229   : >>> { %v654_v52 = vld [vmem:[%s1885_s29] sm:$0xf]  ;;  %905 = vst [vmem:[%s1879_s23] sm:$0xf] %v902_v50  ;;  %916 = vst [vmem:[%s1883_s27] sm:$0xf] %v914_v54  ;;  %s730_s24 = smov [#allocation19]  ;;  %s1930_s27 = smov [#allocation21] }
 0x22a   : >>> { %v658_v55 = vmul.f32 %v654_v52, %v648_v28  ;;  %v661_v56 = vmul.f32 %v654_v52, %v646_v27  ;;  %1556 = vst [vmem:[%s1879_s23 + $0x1] sm:$0x1] %v906_v46  ;;  %s1673_s23 = smov 127  }
 0x22c   : >>> { %v659_v57 = vsub.f32 %v657_v48, %v658_v55  ;;  %v662_v58 = vadd.f32 %v661_v56, %v660_v49 }
 0x22d   : >>> { %v708_v60 = vld [vmem:[%s701_s30] sm:$0xf] }
 0x22e   : >>> { %669 = vst [vmem:[%s1875_s15] sm:$0xf] %v659_v57  ;;  %670 = vst [vmem:[%s1885_s29] sm:$0xf] %v662_v58  ;;  %v712_v61 = vsel %vm711_vm0, 0.0, %v708_v60  ;;  %s729_s15 = smov [#allocation18]  ;;  %s793_s29 = smov [#allocation18] }
 0x22f   : >>> { %v723_v62 = vld [vmem:[%s714_s21] sm:$0xf]  ;;  %713 = vst [vmem:[%s701_s30] sm:$0xf] %v712_v61  ;;  %s794_s30 = smov [#allocation20] }
 0x230   : >>> { %v727_v0 = vsel %vm726_vm1, %v722_v59, %v723_v62 }
 0x231   : >>> { %728 = vst [vmem:[%s714_s21] sm:$0xf] %v727_v0  ;;  %s818_s21 = smov [#allocation21] }
 0x235   : >>> { %v682_v1 = vld [vmem:[%s673_s26] sm:$0xf] }
 0x236   : >>> { %v695_v2 = vld [vmem:[%s688_s11] sm:$0xf]  ;;  %v686_v3 = vsel %vm685_vm3, %v681_v63, %v682_v1 }
 0x237   : >>> { %v699_v4 = vsel %vm698_vm4, 0.0, %v695_v2  ;;  %687 = vst [vmem:[%s673_s26] sm:$0xf] %v686_v3  ;;  %v767_v5 = vld [vmem:[%s1927_s22] sm:$0xf]  ;;  %s382_s26 = smov (%p474_p9), [#allocation18] }
 0x238   : >>> { %700 = vst [vmem:[%s688_s11] sm:$0xf] %v699_v4  ;;  %768 = vrot.lane.b32.xlu0 %v767_v5, %s1672_s14  ;;  %v763_v11 = vld [vmem:[%s1930_s27] sm:$0xf]  ;;  %s401_s11 = smov (%p474_p9), [#allocation19] }
 0x239   : >>> { %v784_v12 = vld [vmem:[%s1930_s27] sm:$0xf] }
 0x23a   : >>> { %v766_v30 = vld [vmem:[%s1927_s22] sm:$0xf] }
 0x23e   : >>> { %v735_v8 = vld [vmem:[%s729_s15] sm:$0xf] }
 0x23f   : >>> { %736 = vrot.lane.b32.xlu1 %v735_v8, %s1672_s14  ;;  %v731_v9 = vld [vmem:[%s730_s24] sm:$0xf] }
 0x240   : >>> { %v752_v10 = vld [vmem:[%s730_s24] sm:$0xf] }
 0x241   : >>> { %v734_v18 = vld [vmem:[%s729_s15] sm:$0xf] }
 0x243   : >>> { %732 = vrot.lane.b32.xlu1 %v731_v9, %s1672_s14 }
 0x247   : >>> { %753 = vrot.lane.b32.xlu1 %v752_v10, %s1673_s23 }
 0x24b   : >>> { %764 = vrot.lane.b32.xlu1 %v763_v11, %s1672_s14  ;;  %s435_s14 = smov (%p474_p9), [#allocation21] }
 0x24f   : >>> { %785 = vrot.lane.b32.xlu1 %v784_v12, %s1673_s23 }
 0x2aa   : >>> { %v769_v20 = vpop.permute.xlu0 %768 }
 0x2ab   : >>> { %v773_v22 = vsel %vm740_vm5, %v767_v5, %v769_v20 }
 0x2b1   : >>> { %v737_v13 = vpop.permute.xlu1 %736 }
 0x2b2   : >>> { %v741_v14 = vsel %vm740_vm5, %v735_v8, %v737_v13 }
 0x2b5   : >>> { %v733_v15 = vpop.permute.xlu1 %732 }
 0x2b6   : >>> { %v745_v16 = vsel %vm744_vm6, %v733_v15, %v741_v14 }
 0x2b7   : >>> { %v751_v17 = vsel %vm1411_vm2, %v745_v16, 0.0 }
 0x2b8   : >>> { %759 = vst [vmem:[%s729_s15] sm:$0xf] %v751_v17 }
 0x2b9   : >>> { %v754_v19 = vpop.permute.xlu1 %753 }
 0x2ba   : >>> { %v758_v21 = vsel %vm757_vm7, %v734_v18, %v754_v19 }
 0x2bb   : >>> { %760 = vst [vmem:[%s730_s24] sm:$0xf] %v758_v21 }
 0x2bd   : >>> { %v765_v23 = vpop.permute.xlu1 %764 }
 0x2be   : >>> { %v777_v24 = vsel %vm744_vm6, %v765_v23, %v773_v22 }
 0x2bf   : >>> { %v795_v25 = vld [vmem:[%s793_s29] ss:$0 sm:$0xff]  ;;  %v1543_v27 = vld [vmem:[%s793_s29 + $0x3] ss:$0 sm:$0xff]  ;;  %v783_v29 = vsel %vm1411_vm2, %v777_v24, 0.0 }
 0x2c0   : >>> { %v1542_v26 = vld [vmem:[%s793_s29 - $0x1] sm:$0xe]  ;;  %791 = vst [vmem:[%s1927_s22] sm:$0xf] %v783_v29  ;;  %s418_s22 = smov (%p474_p9), [#allocation20] }
 0x2c1   : >>> { %v802_v28 = vsel %vm801_vm14, %v795_v25, %v1542_v26  ;;  %v786_v31 = vpop.permute.xlu1 %785 }
 0x2c2   : >>> { %805 = vst [vmem:[%s793_s29] sm:$0xf] %v802_v28  ;;  %v819_v32 = vld [vmem:[%s817_s16] ss:$0 sm:$0xff]  ;;  %v1547_v34 = vld [vmem:[%s817_s16 + $0x3] ss:$0 sm:$0xff]  ;;  %v790_v35 = vsel %vm757_vm7, %v766_v30, %v786_v31 }
 0x2c3   : >>> { %v1546_v33 = vld [vmem:[%s817_s16 - $0x1] sm:$0xe]  ;;  %792 = vst [vmem:[%s1930_s27] sm:$0xf] %v790_v35 }
 0x2c4   : >>> { %v826_v36 = vsel %vm801_vm14, %v819_v32, %v1546_v33 }
 0x2c5   : >>> { %829 = vst [vmem:[%s817_s16] sm:$0xf] %v826_v36 }
 0x2c7   : >>> { %v806_v37 = vld [vmem:[%s794_s30] ss:$0 sm:$0xff]  ;;  %v1545_v38 = vld [vmem:[%s794_s30 + $0x1] sm:$0x7] }
 0x2c8   : >>> { %1544 = vst [vmem:[%s793_s29 + $0x1] sm:$0x1] %v806_v37  ;;  %v814_v39 = vsel %vm813_vm15, %v1543_v27, %v1545_v38 }
 0x2c9   : >>> { %816 = vst [vmem:[%s794_s30] sm:$0xf] %v814_v39 }
 0x2ca   : >>> { %v830_v40 = vld [vmem:[%s818_s21] ss:$0 sm:$0xff]  ;;  %v1549_v41 = vld [vmem:[%s818_s21 + $0x1] sm:$0x7] }
 0x2cb   : >>> { %1548 = vst [vmem:[%s817_s16 + $0x1] sm:$0x1] %v830_v40  ;;  %v838_v42 = vsel %vm813_vm15, %v1547_v34, %v1549_v41 }
 0x2cc   : >>> { %840 = vst [vmem:[%s818_s21] sm:$0xf] %v838_v42  ;;  %476 = sbr.rel (!%p474_p9) target bundleno = 272 (0x110), region = 470 }
 0x2cf   : >> { %v388_v43 = vld [vmem:[%s382_s26] sm:$0xf] (%p474_p9) }
 0x2d0   : >> { %v389_v45 = vsel (%p474_p9), %vm1411_vm2, %v388_v43, 0.0  ;;  %v424_v47 = vld [vmem:[%s418_s22] sm:$0xf] (%p474_p9) }
 0x2d1   : >> { %v390_v49 = vmul.f32 %v389_v45, %v389_v45  ;;  %v425_v51 = vsel %vm1411_vm2, %v424_v47, 0.0 }
 0x2d2   : >> { %v407_v44 = vld [vmem:[%s401_s11] sm:$0xf]  ;;  %v426_v53 = vmul.f32 %v425_v51, %v425_v51 }
 0x2d3   : >> { %v408_v46 = vsel %vm1411_vm2, %v407_v44, 0.0  ;;  %v441_v48 = vld [vmem:[%s435_s14] sm:$0xf]  ;;  %v394_v56 = vsel %vm393_vm8, 0.0, %v390_v49 }
 0x2d4   : >> { %v409_v50 = vmul.f32 %v408_v46, %v408_v46  ;;  %v442_v52 = vsel %vm1411_vm2, %v441_v48, 0.0 }
 0x2d5   : >> { %v443_v55 = vmul.f32 %v442_v52, %v442_v52 }
 0x2d6   : >> { %v411_v54 = vadd.f32 %v409_v50, %v390_v49  ;;  %v410_v57 = vadd.f32 %v409_v50, %v394_v56 }
 0x2d7   : >> { %v447_v60 = vsel %vm446_vm9, 0.0, %v443_v55 }
 0x2d8   : >> { %v428_v58 = vadd.f32 %v426_v53, %v411_v54  ;;  %v427_v59 = vadd.f32 %v426_v53, %v410_v57 }
 0x2da   : >> { %v449_v61 = vadd.f32 %v443_v55, %v428_v58  ;;  %v448_v62 = vadd.f32 %v447_v60, %v427_v59 }
 0x2dc   : >> { %450 = vadd.xlane.f32.xlu0 %v449_v61 }
 0x2e0   : >> { %458 = vadd.xlane.f32.xlu0 %v448_v62 }
 0x365   : >> { %v451_v63 = vpop.xlane.xlu0 %450 }
 0x366   : >> { %v452_v0 = vrot.slane %v451_v63, 4 }
 0x368   : >> { %v453_v1 = vadd.f32 %v452_v0, %v451_v63 }
 0x369   : >> { %v459_v2 = vpop.xlane.xlu0 %458 }
 0x36a   : >> { %v454_v3 = vrot.slane %v453_v1, 2  ;;  %v460_v4 = vrot.slane %v459_v2, 4 }
 0x36c   : >> { %v461_v5 = vadd.f32 %v460_v4, %v459_v2  ;;  %v455_v8 = vadd.f32 %v454_v3, %v453_v1 }
 0x36e   : >> { %v462_v9 = vrot.slane %v461_v5, 2  ;;  %v456_v11 = vrot.slane %v455_v8, 1 }
 0x370   : >> { %v463_v10 = vadd.f32 %v462_v9, %v461_v5  ;;  %v457_v14 = vadd.f32 %v456_v11, %v455_v8 }
 0x372   : >> { %v464_v12 = vrot.slane %v463_v10, 1 }
 0x374   : >> { %v465_v13 = vadd.f32 %v464_v12, %v463_v10 }
 0x376   : >> { %1576 = vpush %v465_v13 }
 0x377   : >> { %1578 = vpush %v457_v14 }
 0x3a7   : >> { %s1577_s20 = spop %1576 }
 0x3a8   : >> { %s1579_s15 = spop %1578 }
 0x3a9   : >> { %s468_s24 = smul.f32 1e-10, %s1579_s15 }
 0x3ab   : >> { %p469_p11 = scmp.le.f32.partialorder %s1577_s20, %s468_s24 }
 0x3ad   : >> { %p471_p12 = por %p470_p10, %p469_p11 }
 0x3af   : > { %919 = sbr.rel (!%p471_p12) target bundleno = 271 (0x10f), region = 481 }
 0x3b4 PF: > { %s924_s23 = smov [#allocation18]  ;;  %v928_v6 = vmov %v1781_v6  ;;  %v931_v7 = vmov %v1783_v7  ;;  %v968_v15 = vld [vmem:[#allocation10] sm:$0xf]  ;;  %v976_v16 = vld [vmem:[#allocation12] sm:$0xf]  ;;  %s2064_s17 = scalar_lea.vmem [#allocation11], %s1777_s28 }
 0x3b5   : > { %v948_v6 = vmov %v1781_v6  ;;  %v951_v7 = vmov %v1783_v7  ;;  %v932_v17 = vld [vmem:[%s924_s23] sm:$0xf]  ;;  %vm935_vm10 = vcmp.eq.s32.totalorder %v931_v7, %v928_v6  ;;  %971 = vst [vmem:[%s2064_s17] sm:$0xf] %v968_v15  ;;  %s2065_s27 = scalar_lea.vmem [#allocation13], %s1777_s28  ;;  %v992_v19 = vld [vmem:[#allocation16] sm:$0xf] }
 0x3b6   : > { %vm955_vm11 = vcmp.eq.s32.totalorder %v951_v7, %v948_v6  ;;  %979 = vst [vmem:[%s2065_s27] sm:$0xf] %v976_v16  ;;  %v984_v18 = vld [vmem:[#allocation14] sm:$0xf]  ;;  %v936_v20 = vsel %vm935_vm10, %v932_v17, 0.0  ;;  %s944_s29 = smov [#allocation21]  ;;  %s2066_s16 = scalar_lea.vmem [#allocation15], %s1777_s28 }
 0x3b7   : > { %987 = vst [vmem:[%s2066_s16] sm:$0xf] %v984_v18  ;;  %s2067_s30 = scalar_lea.vmem [#allocation17], %s1777_s28  ;;  %v937_v21 = vrot.slane %v936_v20, 4  ;;  %v952_v22 = vld [vmem:[%s944_s29] sm:$0xf]  ;;  %s920_s21 = sand.u32 7, %s1740_s12  }
 0x3b8   : > { %995 = vst [vmem:[%s2067_s30] sm:$0xf] %v992_v19  ;;  %v956_v23 = vsel %vm955_vm11, %v952_v22, 0.0  ;;  %s2068_s25 = scalar_lea.vmem [#allocation8], %s1779_s18  ;;  %s2069_s11 = scalar_lea.vmem [#allocation9], %s1779_s18 }
 0x3b9   : > { %v938_v24 = vadd.f32 %v937_v21, %v936_v20  ;;  %v957_v25 = vrot.slane %v956_v23, 4  ;;  %s921_s26 = scalar_lea.vmem %s2068_s25, %s920_s21 [#allocation8]  ;;  %s923_s22 = scalar_lea.vmem %s2069_s11, %s920_s21 [#allocation9] }
 0x3ba   : > { %s925_s26 = smov %s921_s26  ;;  %s945_s22 = smov %s923_s22 }
 0x3bb   : > { %v939_v6 = vrot.slane %v938_v24, 2  ;;  %v958_v7 = vadd.f32 %v957_v25, %v956_v23  ;;  %s1023_s14 = sshrl.u32 (%p1754_p3), %s1740_s12, 3  ;;  %s2070_s20 = scalar_lea.vmem (%p1754_p3), [#allocation8], %s1779_s18 }
 0x3bc   : > { %s1564_s15 = sshll.u32 (%p1754_p3), %s1023_s14, 3 }
 0x3bd   : > { %v940_v26 = vadd.f32 %v939_v6, %v938_v24  ;;  %v959_v27 = vrot.slane %v958_v7, 2  ;;  %s1025_s17 = scalar_lea.vmem (%p1754_p3), %s2055_s4, %s1564_s15 }
 0x3bf   : > { %v941_v28 = vrot.slane %v940_v26, 1  ;;  %v960_v29 = vadd.f32 %v959_v27, %v958_v7 }
 0x3c1   : > { %v942_v30 = vadd.f32 %v941_v28, %v940_v26  ;;  %v961_v31 = vrot.slane %v960_v29, 1  ;;  %1022 = sbr.rel (!%p1754_p3) target bundleno = 972 (0x3cc), region = 158 }
 0x3c3   : > { %943 = vst [vmem:[%s925_s26] sm:$0x1] %v942_v30  ;;  %v962_v32 = vadd.f32 %v961_v31, %v960_v29 }
 0x3c5   : > { %963 = vst [vmem:[%s945_s22] sm:$0x1] %v962_v32 }
 0x3ca   : > { %v1054_v33 = vld [vmem:[%s2070_s20] sm:$0xff] }
 0x3cb   : > { %1055 = vst [vmem:[%s1025_s17] sm:$0xff] %v1054_v33 }
 0x3cc PF: > { %1061 = sbr.rel (!%p1754_p3) target bundleno = 980 (0x3d4), region = 196  ;;  %s1062_s27 = sshrl.u32 (%p1754_p3), %s1740_s12, 3 }
 0x3cd   : > { %s2071_s29 = scalar_lea.vmem (%p1754_p3), [#allocation9], %s1779_s18  ;;  %s1565_s16 = sshll.u32 (%p1754_p3), %s1062_s27, 3 }
 0x3ce   : > { %s1064_s25 = scalar_lea.vmem (%p1754_p3), %s2056_s5, %s1565_s16 }
 0x3d2   : > { %v1093_v34 = vld [vmem:[%s2071_s29] sm:$0xff] }
 0x3d3   : > { %1094 = vst [vmem:[%s1064_s25] sm:$0xff] %v1093_v34 }
 0x3d4 PF: > { %s1566_s26 = sshll.u32 %s1740_s12, 2  ;;  %s2072_s19 = scalar_lea.vmem [#allocation11], %s1777_s28 }
 0x3d5   : > { %v1116_v35 = vld [vmem:[%s2072_s19] sm:$0xf]  ;;  %s2073_s11 = scalar_lea.vmem [#allocation13], %s1777_s28  ;;  %s1099_s14 = scalar_lea.vmem %s2057_s6, %s1566_s26 }
 0x3d6   : > { %v1151_v36 = vld [vmem:[%s2073_s11] sm:$0xf]  ;;  %s1134_s24 = scalar_lea.vmem %s2058_s7, %s1566_s26  ;;  %s2074_s23 = scalar_lea.vmem [#allocation15], %s1777_s28  ;;  %1117 = vst [vmem:[%s1099_s14] sm:$0xf] %v1116_v35 }
 0x3d7   : > { %v1186_v37 = vld [vmem:[%s2074_s23] sm:$0xf]  ;;  %s2075_s17 = scalar_lea.vmem [#allocation17], %s1777_s28  ;;  %1152 = vst [vmem:[%s1134_s24] sm:$0xf] %v1151_v36  ;;  %s1169_s29 = scalar_lea.vmem %s2059_s8, %s1566_s26 }
 0x3d8   : > { %v1221_v38 = vld [vmem:[%s2075_s17] sm:$0xf]  ;;  %s1204_s21 = scalar_lea.vmem %s2060_s9, %s1566_s26  ;;  %1187 = vst [vmem:[%s1169_s29] sm:$0xf] %v1186_v37 }
 0x3d9   : > { %1222 = vst [vmem:[%s1204_s21] sm:$0xf] %v1221_v38 }
 0x3da PF: > { %s2076_s25 = sld [smem:[#allocation31_spill]]  ;;  %p13_p13 = scmp.ge.s32.totalorder %s1743_s13, 1026  }
 0x3db   : > { %s2077_s30 = smov %s1657_s10  ;;  %s2079_s11 = smov %s1743_s13 }
 0x3dc   :  { %15 = sbr.rel (!%p13_p13) target bundleno = 2 (0x2), region = 492 }
 0x3e0   : > { %s2078_s10 = smov %s2076_s25 }

// kernel: reverse
= control target key start
LH: loop header
LB: loop body
LE: loop exit
PB: predicated region body
PF: predicated region fallthrough
CT: control target
= control target key end

     0   :  { %s262_s6 = smov 0   ;;  %s264_s7 = smov 0   ;;  %s296_s0 = inlined_call_operand.vmem [shape: f32[1024,8], index: 0, kind: input, shape index: {}]   ;;  %s297_s1 = inlined_call_operand.vmem [shape: f32[1024,8], index: 1, kind: output, shape index: {}]  }
   0x1   :  { %s266_s8 = smov 0  }
   0x2 LB: > { %s191_s9 = sadd.s32 4294967295, %s250_s8   ;;  %s16_s10 = sadd.s32 1, %s246_s7  ;;  %s250_s8 = sphi %s266_s8, %s7_s8   ;;  %s246_s7 = sphi %s264_s7, %s299_s7   ;;  %s242_s6 = sphi %s262_s6, %s298_s6  }
   0x3   : > { %p17_p0 = scmp.ge.s32.totalorder %s16_s10, 8  ;;  %p193_p1 = scmp.ge.s32.totalorder %s250_s8, 8 }
   0x4   : > { %s35_s11 = sand.u32 (!%p193_p1), 1, %s250_s8   ;;  %s195_s12 = sshll.u32 (!%p193_p1), %s246_s7, 3 }
   0x5   : > { %s301_s10 = smov (%p17_p0, %s16_s10), 0  ;;  %33 = sbr.rel (%p193_p1) target bundleno = 12 (0xc), region = 16 }
   0x6   : > { %s194_s13 = sshll.u32 (!%p193_p1), %s35_s11, 3  ;;  %s42_s16 = scalar_lea.vmem (!%p193_p1), %s296_s0, %s195_s12 }
   0x7   : > { %s37_s17 = scalar_lea.vmem (!%p193_p1), [#allocation0], %s194_s13 }
   0xa   : > { %v71_v0 = vld [vmem:[%s42_s16] sm:$0xff] }
   0xb   : > { %72 = vst [vmem:[%s37_s17] sm:$0xff] %v71_v0 }
   0xc PF: > { %p196_p2 = scmp.ge.s32.totalorder %s250_s8, 1  ;;  %p77_p3 = scmp.lt.s32.totalorder %s250_s8, 9 }
   0xe   : > { %p78_p4 = pnand %p196_p2, %p77_p3 }
   0xf   : > { %s84_s18 = sand.u32 (!%p78_p4), 1, %s191_s9   ;;  %s201_s19 = sshll.u32 (!%p78_p4), %s242_s6, 3 }
  0x10   : > { %81 = sbr.rel (%p78_p4) target bundleno = 23 (0x17), region = 54  ;;  %s197_s20 = sshll.u32 (!%p78_p4), %s84_s18, 3 }
  0x11   : > { %s106_s23 = scalar_lea.vmem (!%p78_p4), %s297_s1, %s201_s19  ;;  %s86_s24 = scalar_lea.vmem (!%p78_p4), [#allocation0], %s197_s20 }
  0x15   : > { %v199_v1 = vld [vmem:[%s86_s24 + $0x7] ss:$-1 sm:$0xff] }
  0x16   : > { %136 = vst [vmem:[%s106_s23] sm:$0xff] %v199_v1 }
  0x17 PF: > { %s7_s8 = sadd.s32 1, %s250_s8   ;;  %s298_s6 = smov %s246_s7 }
  0x18   : > { %p4_p5 = scmp.ge.s32.totalorder %s7_s8, 10   ;;  %s299_s7 = smov %s301_s10 }
  0x1a   :  { %6 = sbr.rel (!%p4_p5) target bundleno = 2 (0x2), region = 119 }

// kernel: custom-call.27
= control target key start
LH: loop header
LB: loop body
LE: loop exit
PB: predicated region body
PF: predicated region fallthrough
CT: control target
= control target key end

     0   :  { %s1078_s25 = smov 0   ;;  %s1377_s0 = inlined_call_operand.vmem [shape: f32[1024,8,8], index: 0, kind: input, shape index: {}]   ;;  %s1378_s1 = inlined_call_operand.vmem [shape: f32[1024,8,8], index: 1, kind: output, shape index: {0}]   ;;  %s1379_s2 = inlined_call_operand.vmem [shape: f32[1024,8], index: 2, kind: output, shape index: {1}]  }
   0x1   :  { %v16_v0 = vld [vmem:[%s1377_s0] sm:$0xff]  ;;  %v18_v1 = vld [vmem:[%s1377_s0 + $0x8] sm:$0xff]  ;;  %v20_v2 = vld [vmem:[%s1377_s0 + $0x10] sm:$0xff] }
   0x2   :  { %v22_v3 = vld [vmem:[%s1377_s0 + $0x18] sm:$0xff]  ;;  %v24_v4 = vld [vmem:[%s1377_s0 + $0x20] sm:$0xff]  ;;  %v26_v5 = vld [vmem:[%s1377_s0 + $0x28] sm:$0xff]  ;;  %148 = vst [vmem:[#allocation1] sm:$0xff] %v16_v0 }
   0x3   :  { %152 = vst [vmem:[#allocation1 + $0x8] sm:$0xff] %v18_v1  ;;  %156 = vst [vmem:[#allocation1 + $0x10] sm:$0xff] %v20_v2  ;;  %v28_v6 = vld [vmem:[%s1377_s0 + $0x30] sm:$0xff]  ;;  %v30_v7 = vld [vmem:[%s1377_s0 + $0x38] sm:$0xff] }
   0x4   :  { %v32_v8 = vld [vmem:[%s1377_s0 + $0x40] sm:$0xff]  ;;  %160 = vst [vmem:[#allocation1 + $0x18] sm:$0xff] %v22_v3  ;;  %164 = vst [vmem:[#allocation1 + $0x20] sm:$0xff] %v24_v4  ;;  %v34_v9 = vld [vmem:[%s1377_s0 + $0x48] sm:$0xff] }
   0x5   :  { %168 = vst [vmem:[#allocation1 + $0x28] sm:$0xff] %v26_v5  ;;  %v36_v10 = vld [vmem:[%s1377_s0 + $0x50] sm:$0xff]  ;;  %v38_v11 = vld [vmem:[%s1377_s0 + $0x58] sm:$0xff]  ;;  %172 = vst [vmem:[#allocation1 + $0x30] sm:$0xff] %v28_v6 }
   0x6   :  { %176 = vst [vmem:[#allocation1 + $0x38] sm:$0xff] %v30_v7  ;;  %180 = vst [vmem:[#allocation1 + $0x40] sm:$0xff] %v32_v8  ;;  %v40_v12 = vld [vmem:[%s1377_s0 + $0x60] sm:$0xff]  ;;  %v42_v13 = vld [vmem:[%s1377_s0 + $0x68] sm:$0xff] }
   0x7   :  { %v44_v14 = vld [vmem:[%s1377_s0 + $0x70] sm:$0xff]  ;;  %184 = vst [vmem:[#allocation1 + $0x48] sm:$0xff] %v34_v9  ;;  %188 = vst [vmem:[#allocation1 + $0x50] sm:$0xff] %v36_v10  ;;  %v46_v15 = vld [vmem:[%s1377_s0 + $0x78] sm:$0xff] }
   0x8   :  { %192 = vst [vmem:[#allocation1 + $0x58] sm:$0xff] %v38_v11  ;;  %v48_v16 = vld [vmem:[%s1377_s0 + $0x80] sm:$0xff]  ;;  %v50_v17 = vld [vmem:[%s1377_s0 + $0x88] sm:$0xff]  ;;  %196 = vst [vmem:[#allocation1 + $0x60] sm:$0xff] %v40_v12 }
   0x9   :  { %200 = vst [vmem:[#allocation1 + $0x68] sm:$0xff] %v42_v13  ;;  %204 = vst [vmem:[#allocation1 + $0x70] sm:$0xff] %v44_v14  ;;  %v52_v18 = vld [vmem:[%s1377_s0 + $0x90] sm:$0xff]  ;;  %v54_v19 = vld [vmem:[%s1377_s0 + $0x98] sm:$0xff] }
   0xa   :  { %v56_v20 = vld [vmem:[%s1377_s0 + $0xa0] sm:$0xff]  ;;  %208 = vst [vmem:[#allocation1 + $0x78] sm:$0xff] %v46_v15  ;;  %212 = vst [vmem:[#allocation1 + $0x80] sm:$0xff] %v48_v16  ;;  %v58_v21 = vld [vmem:[%s1377_s0 + $0xa8] sm:$0xff] }
   0xb   :  { %216 = vst [vmem:[#allocation1 + $0x88] sm:$0xff] %v50_v17  ;;  %v60_v22 = vld [vmem:[%s1377_s0 + $0xb0] sm:$0xff]  ;;  %v62_v23 = vld [vmem:[%s1377_s0 + $0xb8] sm:$0xff]  ;;  %220 = vst [vmem:[#allocation1 + $0x90] sm:$0xff] %v52_v18 }
   0xc   :  { %224 = vst [vmem:[#allocation1 + $0x98] sm:$0xff] %v54_v19  ;;  %228 = vst [vmem:[#allocation1 + $0xa0] sm:$0xff] %v56_v20  ;;  %v64_v24 = vld [vmem:[%s1377_s0 + $0xc0] sm:$0xff]  ;;  %v66_v25 = vld [vmem:[%s1377_s0 + $0xc8] sm:$0xff] }
   0xd   :  { %v68_v26 = vld [vmem:[%s1377_s0 + $0xd0] sm:$0xff]  ;;  %232 = vst [vmem:[#allocation1 + $0xa8] sm:$0xff] %v58_v21  ;;  %236 = vst [vmem:[#allocation1 + $0xb0] sm:$0xff] %v60_v22  ;;  %v70_v27 = vld [vmem:[%s1377_s0 + $0xd8] sm:$0xff] }
   0xe   :  { %240 = vst [vmem:[#allocation1 + $0xb8] sm:$0xff] %v62_v23  ;;  %v72_v28 = vld [vmem:[%s1377_s0 + $0xe0] sm:$0xff]  ;;  %v74_v29 = vld [vmem:[%s1377_s0 + $0xe8] sm:$0xff]  ;;  %244 = vst [vmem:[#allocation1 + $0xc0] sm:$0xff] %v64_v24 }
   0xf   :  { %248 = vst [vmem:[#allocation1 + $0xc8] sm:$0xff] %v66_v25  ;;  %252 = vst [vmem:[#allocation1 + $0xd0] sm:$0xff] %v68_v26  ;;  %v76_v30 = vld [vmem:[%s1377_s0 + $0xf0] sm:$0xff]  ;;  %v78_v31 = vld [vmem:[%s1377_s0 + $0xf8] sm:$0xff] }
  0x10   :  { %v80_v32 = vld [vmem:[%s1377_s0 + $0x100] sm:$0xff]  ;;  %256 = vst [vmem:[#allocation1 + $0xd8] sm:$0xff] %v70_v27  ;;  %260 = vst [vmem:[#allocation1 + $0xe0] sm:$0xff] %v72_v28  ;;  %v82_v33 = vld [vmem:[%s1377_s0 + $0x108] sm:$0xff] }
  0x11   :  { %264 = vst [vmem:[#allocation1 + $0xe8] sm:$0xff] %v74_v29  ;;  %v84_v34 = vld [vmem:[%s1377_s0 + $0x110] sm:$0xff]  ;;  %v86_v35 = vld [vmem:[%s1377_s0 + $0x118] sm:$0xff]  ;;  %268 = vst [vmem:[#allocation1 + $0xf0] sm:$0xff] %v76_v30 }
  0x12   :  { %272 = vst [vmem:[#allocation1 + $0xf8] sm:$0xff] %v78_v31  ;;  %276 = vst [vmem:[#allocation1 + $0x100] sm:$0xff] %v80_v32  ;;  %v88_v36 = vld [vmem:[%s1377_s0 + $0x120] sm:$0xff]  ;;  %v90_v37 = vld [vmem:[%s1377_s0 + $0x128] sm:$0xff] }
  0x13   :  { %v92_v38 = vld [vmem:[%s1377_s0 + $0x130] sm:$0xff]  ;;  %280 = vst [vmem:[#allocation1 + $0x108] sm:$0xff] %v82_v33  ;;  %284 = vst [vmem:[#allocation1 + $0x110] sm:$0xff] %v84_v34  ;;  %v94_v39 = vld [vmem:[%s1377_s0 + $0x138] sm:$0xff] }
  0x14   :  { %288 = vst [vmem:[#allocation1 + $0x118] sm:$0xff] %v86_v35  ;;  %v96_v40 = vld [vmem:[%s1377_s0 + $0x140] sm:$0xff]  ;;  %v98_v41 = vld [vmem:[%s1377_s0 + $0x148] sm:$0xff]  ;;  %292 = vst [vmem:[#allocation1 + $0x120] sm:$0xff] %v88_v36 }
  0x15   :  { %296 = vst [vmem:[#allocation1 + $0x128] sm:$0xff] %v90_v37  ;;  %300 = vst [vmem:[#allocation1 + $0x130] sm:$0xff] %v92_v38  ;;  %v100_v42 = vld [vmem:[%s1377_s0 + $0x150] sm:$0xff]  ;;  %v102_v43 = vld [vmem:[%s1377_s0 + $0x158] sm:$0xff] }
  0x16   :  { %v104_v44 = vld [vmem:[%s1377_s0 + $0x160] sm:$0xff]  ;;  %304 = vst [vmem:[#allocation1 + $0x138] sm:$0xff] %v94_v39  ;;  %308 = vst [vmem:[#allocation1 + $0x140] sm:$0xff] %v96_v40  ;;  %v106_v45 = vld [vmem:[%s1377_s0 + $0x168] sm:$0xff] }
  0x17   :  { %312 = vst [vmem:[#allocation1 + $0x148] sm:$0xff] %v98_v41  ;;  %v108_v46 = vld [vmem:[%s1377_s0 + $0x170] sm:$0xff]  ;;  %v110_v47 = vld [vmem:[%s1377_s0 + $0x178] sm:$0xff]  ;;  %316 = vst [vmem:[#allocation1 + $0x150] sm:$0xff] %v100_v42 }
  0x18   :  { %320 = vst [vmem:[#allocation1 + $0x158] sm:$0xff] %v102_v43  ;;  %324 = vst [vmem:[#allocation1 + $0x160] sm:$0xff] %v104_v44  ;;  %v112_v48 = vld [vmem:[%s1377_s0 + $0x180] sm:$0xff]  ;;  %v114_v49 = vld [vmem:[%s1377_s0 + $0x188] sm:$0xff] }
  0x19   :  { %v116_v50 = vld [vmem:[%s1377_s0 + $0x190] sm:$0xff]  ;;  %328 = vst [vmem:[#allocation1 + $0x168] sm:$0xff] %v106_v45  ;;  %332 = vst [vmem:[#allocation1 + $0x170] sm:$0xff] %v108_v46  ;;  %v118_v51 = vld [vmem:[%s1377_s0 + $0x198] sm:$0xff] }
  0x1a   :  { %336 = vst [vmem:[#allocation1 + $0x178] sm:$0xff] %v110_v47  ;;  %v120_v52 = vld [vmem:[%s1377_s0 + $0x1a0] sm:$0xff]  ;;  %v122_v53 = vld [vmem:[%s1377_s0 + $0x1a8] sm:$0xff]  ;;  %340 = vst [vmem:[#allocation1 + $0x180] sm:$0xff] %v112_v48 }
  0x1b   :  { %344 = vst [vmem:[#allocation1 + $0x188] sm:$0xff] %v114_v49  ;;  %348 = vst [vmem:[#allocation1 + $0x190] sm:$0xff] %v116_v50  ;;  %v124_v54 = vld [vmem:[%s1377_s0 + $0x1b0] sm:$0xff]  ;;  %v126_v55 = vld [vmem:[%s1377_s0 + $0x1b8] sm:$0xff] }
  0x1c   :  { %v128_v56 = vld [vmem:[%s1377_s0 + $0x1c0] sm:$0xff]  ;;  %352 = vst [vmem:[#allocation1 + $0x198] sm:$0xff] %v118_v51  ;;  %356 = vst [vmem:[#allocation1 + $0x1a0] sm:$0xff] %v120_v52  ;;  %v130_v57 = vld [vmem:[%s1377_s0 + $0x1c8] sm:$0xff] }
  0x1d   :  { %360 = vst [vmem:[#allocation1 + $0x1a8] sm:$0xff] %v122_v53  ;;  %v132_v58 = vld [vmem:[%s1377_s0 + $0x1d0] sm:$0xff]  ;;  %v134_v59 = vld [vmem:[%s1377_s0 + $0x1d8] sm:$0xff]  ;;  %364 = vst [vmem:[#allocation1 + $0x1b0] sm:$0xff] %v124_v54 }
  0x1e   :  { %368 = vst [vmem:[#allocation1 + $0x1b8] sm:$0xff] %v126_v55  ;;  %372 = vst [vmem:[#allocation1 + $0x1c0] sm:$0xff] %v128_v56  ;;  %v136_v60 = vld [vmem:[%s1377_s0 + $0x1e0] sm:$0xff]  ;;  %v138_v61 = vld [vmem:[%s1377_s0 + $0x1e8] sm:$0xff] }
  0x1f   :  { %v140_v62 = vld [vmem:[%s1377_s0 + $0x1f0] sm:$0xff]  ;;  %376 = vst [vmem:[#allocation1 + $0x1c8] sm:$0xff] %v130_v57  ;;  %380 = vst [vmem:[#allocation1 + $0x1d0] sm:$0xff] %v132_v58  ;;  %v142_v63 = vld [vmem:[%s1377_s0 + $0x1f8] sm:$0xff] }
  0x20   :  { %384 = vst [vmem:[#allocation1 + $0x1d8] sm:$0xff] %v134_v59  ;;  %388 = vst [vmem:[#allocation1 + $0x1e0] sm:$0xff] %v136_v60 }
  0x21   :  { %392 = vst [vmem:[#allocation1 + $0x1e8] sm:$0xff] %v138_v61  ;;  %396 = vst [vmem:[#allocation1 + $0x1f0] sm:$0xff] %v140_v62 }
  0x22   :  { %400 = vst [vmem:[#allocation1 + $0x1f8] sm:$0xff] %v142_v63 }
  0x23 LB: > { %s797_s26 = sshll.u32 %s859_s25, 3  ;;  %v869_v0 = vmov 0.0   ;;  %s1086_s28 = smov 0   ;;  %s859_s25 = sphi %s1078_s25, %s406_s25  }
  0x24   : > { %s408_s27 = scalar_lea.vmem [#allocation2], %s797_s26 }
  0x25   : > { %409 = vst [vmem:[%s408_s27] sm:$0xff] %v869_v0 }
  0x26 LB: >> { %v421_v1 = vlaneseq  ;;  %s798_s0 = sshll.u32 %s863_s28, 3  ;;  %v1095_v3 = vstv %s863_s28  ;;  %s444_s3 = sshrl.u32 %s863_s28, 3  ;;  %v870_v53 = vmov 1.0   ;;  %s863_s28 = sphi %s1086_s28, %s1383_s28  }
  0x27   : >> { %s417_s29 = sadd.s32 %s859_s25, %s798_s0  ;;  %s445_s5 = sand.u32 7, %s863_s28  }
  0x28   : >> { %v1092_v2 = vshrl.u32 %v421_v1, 7  ;;  %s799_s30 = sshll.u32 %s417_s29, 3  ;;  %s1112_s6 = sshll.u32 %s444_s3, 6 }
  0x29   : >> { %s1103_s4 = scalar_lea.vmem [#allocation1], %s799_s30  ;;  %s1116_s7 = sadd.s32 %s797_s26, %s445_s5 }
  0x2a   : >> { %vm425_vm0 = vcmp.gt.s32.totalorder %v1092_v2, %v1095_v3  ;;  %v487_v2 = vmov %v1092_v2  ;;  %v420_v4 = vld [vmem:[%s1103_s4] sm:$0xff]  ;;  %s484_s4 = smov %s1103_s4  ;;  %s506_s8 = sadd.s32 %s1112_s6, %s1116_s7 }
  0x2b   : >> { %vm491_vm1 = vcmp.gt.s32.totalorder %v487_v2, %v1095_v3  ;;  %vm492_vm2 = vcmp.lt.s32.totalorder %v487_v2, 8  ;;  %v428_v6 = vsel %vm425_vm0, %v420_v4, 0.0  ;;  %v488_v7 = vld [vmem:[%s484_s4] sm:$0xff]  ;;  %s1123_s9 = sadd.s32 1, %s863_s28   ;;  %s447_s10 = sadd.s32 %s1112_s6, %s445_s5 }
  0x2c   : >> { %vm1108_vm3 = vmand %vm491_vm1, %vm492_vm2  ;;  %v429_v8 = vmul.f32 %v428_v6, %v428_v6  ;;  %s448_s11 = scalar_lea.vmem %s1103_s4, %s447_s10 [#allocation1]  ;;  %s507_s12 = scalar_lea.vmem [#allocation2], %s506_s8 }
  0x2d   : >> { %v494_v9 = vsel %vm1108_vm3, %v488_v7, 0.0  ;;  %v449_v16 = vld [vmem:[%s448_s11] ss:$0 sm:$0xff]  ;;  %s499_s13 = scalar_lea.vmem [#allocation3], %s863_s28  ;;  %p783_p0 = scmp.ge.s32.totalorder %s1123_s9, 8 }
  0x2e   : >> { %v430_v10 = vrot.slane %v429_v8, 4  ;;  %v450_v17 = vand.u32 2147483647, %v449_v16  ;;  %vm475_vm9 = vcmp.lt.f32.partialorder %v449_v16, 0.0  ;;  %s1382_s14 = smov (!%p783_p0), %s1123_s9 }
  0x30   : >> { %v431_v11 = vadd.f32 %v430_v10, %v429_v8  ;;  %v451_v22 = vmax.f32 %v450_v17, 0.0 }
  0x32   : >> { %v432_v12 = vrot.slane %v431_v11, 2 }
  0x34   : >> { %v433_v13 = vadd.f32 %v432_v12, %v431_v11 }
  0x36   : >> { %v434_v14 = vrot.slane %v433_v13, 1 }
  0x38   : >> { %v435_v15 = vadd.f32 %v434_v14, %v433_v13 }
  0x3a   : >> { %835 = vrsqrt.f32 %v435_v15  ;;  %vm438_vm4 = vcmp.eq.f32.partialorder %v435_v15, inf  ;;  %v441_v19 = vand.u32 2147483648, %v435_v15  ;;  %vm440_vm5 = vcmp.eq.f32.partialorder %v435_v15, 0.0 }
  0x47   : >> { %v836_v18 = vpop.eup %835 }
  0x48   : >> { %v437_v20 = vmul.f32 %v836_v18, %v435_v15 }
  0x4a   : >> { %v439_v21 = vsel %vm438_vm4, %v435_v15, %v437_v20 }
  0x4b   : >> { %v442_v23 = vsel %vm440_vm5, %v441_v19, %v439_v21 }
  0x4c   : >> { %v452_v24 = vand.u32 2147483647, %v442_v23 }
  0x4e   : >> { %v453_v25 = vmax.f32 %v451_v22, %v452_v24 }
  0x50   : >> { %837 = vrcp.f32 %v453_v25  ;;  %vm465_vm8 = vcmp.eq.f32.partialorder %v453_v25, 0.0 }
  0x5d   : >> { %v838_v26 = vpop.eup %837 }
  0x5e   : >> { %v455_v27 = vmul.f32 %v838_v26, %v450_v17  ;;  %v458_v28 = vmul.f32 0.0, %v838_v26  ;;  %v462_v29 = vmul.f32 %v838_v26, %v452_v24 }
  0x60   : >> { %v456_v30 = vmul.f32 %v455_v27, %v455_v27  ;;  %v459_v31 = vmul.f32 %v458_v28, %v458_v28  ;;  %v463_v32 = vmul.f32 %v462_v29, %v462_v29 }
  0x62   : >> { %v460_v33 = vadd.f32 %v459_v31, %v456_v30 }
  0x64   : >> { %v464_v34 = vadd.f32 %v463_v32, %v460_v33 }
  0x66   : >> { %839 = vrsqrt.f32 %v464_v34  ;;  %vm468_vm6 = vcmp.eq.f32.partialorder %v464_v34, inf  ;;  %v471_v36 = vand.u32 2147483648, %v464_v34  ;;  %vm470_vm7 = vcmp.eq.f32.partialorder %v464_v34, 0.0 }
  0x73   : >> { %v840_v35 = vpop.eup %839 }
  0x74   : >> { %v467_v37 = vmul.f32 %v840_v35, %v464_v34 }
  0x76   : >> { %v469_v38 = vsel %vm468_vm6, %v464_v34, %v467_v37 }
  0x77   : >> { %v472_v39 = vsel %vm470_vm7, %v471_v36, %v469_v38 }
  0x78   : >> { %v473_v40 = vmul.f32 %v472_v39, %v453_v25 }
  0x7a   : >> { %v474_v41 = vsel %vm465_vm8, 0.0, %v473_v40 }
  0x7b   : >> { %v476_v42 = vxor.u32 2147483648, %v474_v41 }
  0x7d   : >> { %v477_v43 = vsel %vm475_vm9, %v474_v41, %v476_v42 }
  0x7e   : >> { %841 = vrcp.f32 %v477_v43  ;;  %v481_v44 = vsel %vm440_vm5, %v449_v16, %v477_v43  ;;  %v478_v46 = vsub.f32 %v477_v43, %v449_v16 }
  0x7f   : >> { %v483_v45 = vsub.f32 %v449_v16, %v481_v44 }
  0x81   : >> { %843 = vrcp.f32 %v483_v45 }
  0x8b   : >> { %v842_v47 = vpop.eup %841 }
  0x8c   : >> { %v480_v48 = vmul.f32 %v842_v47, %v478_v46 }
  0x8e   : >> { %v844_v49 = vpop.eup %843  ;;  %v482_v50 = vsel %vm440_vm5, 0.0, %v480_v48 }
  0x8f   : >> { %v496_v51 = vmul.f32 %v844_v49, %v494_v9  ;;  %508 = vst [vmem:[%s507_s12] sm:$0x1] %v482_v50  ;;  %784 = sbr.rel (%p783_p0) target bundleno = 178 (0xb2), region = 229 }
  0x91   : >> { %v497_v52 = vsel %vm440_vm5, 0.0, %v496_v51 }
  0x92   : >> { %498 = vst [vmem:[#allocation3] sm:$0xff] %v497_v52 }
  0x93   : >> { %500 = vst [vmem:[%s499_s13] sm:$0x1] %v870_v53 }
  0x94 LB: >>> { %s803_s15 = sshll.u32 %s867_s14, 3  ;;  %v518_v2 = vmov %v1092_v2  ;;  %s513_s14 = sadd.s32 1, %s867_s14   ;;  %s867_s14 = sphi %s1382_s14, %s513_s14  }
  0x95   : >>> { %s522_s16 = sadd.s32 %s859_s25, %s803_s15  ;;  %vm527_vm10 = vcmp.lt.s32.totalorder %v518_v2, 8  ;;  %v537_v2 = vmov %v1092_v2  ;;  %p512_p1 = scmp.ge.s32.totalorder %s513_s14, 8 }
  0x96   : >>> { %s804_s17 = sshll.u32 %s522_s16, 3  ;;  %vm548_vm11 = vcmp.ge.s32.totalorder %v537_v2, %v1095_v3 }
  0x97   : >>> { %s524_s18 = scalar_lea.vmem [#allocation1], %s804_s17 }
  0x98   : >>> { %v525_v55 = vld [vmem:[%s524_s18] sm:$0xff] }
  0x9a   : >>> { %v520_v54 = vld [vmem:[#allocation3] sm:$0xff] }
  0x9b   : >>> { %v526_v56 = vmul.f32 %v525_v55, %v520_v54 }
  0x9d   : >>> { %v528_v57 = vsel %vm527_vm10, %v526_v56, 0.0 }
  0x9e   : >>> { %v529_v58 = vrot.slane %v528_v57, 4 }
  0xa0   : >>> { %v530_v59 = vadd.f32 %v529_v58, %v528_v57 }
  0xa2   : >>> { %v531_v60 = vrot.slane %v530_v59, 2 }
  0xa4   : >>> { %v532_v61 = vadd.f32 %v531_v60, %v530_v59 }
  0xa6   : >>> { %v533_v62 = vrot.slane %v532_v61, 1 }
  0xa8   : >>> { %v534_v63 = vadd.f32 %v533_v62, %v532_v61 }
  0xaa   : >>> { %v538_v0 = vmul.f32 %v534_v63, %v482_v50 }
  0xac   : >>> { %v541_v1 = vmul.f32 %v538_v0, %v520_v54 }
  0xad   : >> { %515 = sbr.rel (!%p512_p1) target bundleno = 148 (0x94), region = 235 }
  0xae   : >>> { %v549_v4 = vsub.f32 %v525_v55, %v541_v1 }
  0xb0   : >>> { %v550_v5 = vsel %vm548_vm11, %v549_v4, %v525_v55 }
  0xb1   : >>> { %551 = vst [vmem:[%s524_s18] sm:$0xff] %v550_v5 }
  0xb2 PF: >> { %v554_v2 = vmov %v1092_v2  ;;  %s1383_s28 = smov %s1123_s9  ;;  %s406_s25 = sadd.s32 (%p783_p0), 1, %s859_s25  }
  0xb3   : >> { %vm563_vm12 = vcmp.gt.s32.totalorder %v554_v2, %v1095_v3  ;;  %vm566_vm13 = vcmp.eq.s32.totalorder %v554_v2, %v1095_v3  ;;  %p403_p2 = scmp.ge.s32.totalorder (%p783_p0), %s406_s25, 8  }
  0xb8   : >> { %v556_v6 = vld [vmem:[#allocation3] sm:$0xff]  ;;  %414 = sbr.rel (!%p783_p0) target bundleno = 38 (0x26), region = 246 }
  0xb9   : >> { %v561_v7 = vld [vmem:[%s1103_s4] sm:$0xff] }
  0xba   : >> { %v564_v8 = vsel %vm563_vm12, %v556_v6, %v561_v7 }
  0xbb   : >> { %v567_v9 = vsel %vm566_vm13, %v481_v44, %v564_v8 }
  0xbc   : >> { %568 = vst [vmem:[%s1103_s4] sm:$0xff] %v567_v9 }
  0xbd   :  { %405 = sbr.rel (!%p403_p2) target bundleno = 35 (0x23), region = 257 }
  0xc3   :  { %v581_v10 = vld [vmem:[#allocation1] sm:$0xff]  ;;  %v583_v11 = vld [vmem:[#allocation1 + $0x8] sm:$0xff]  ;;  %v585_v12 = vld [vmem:[#allocation1 + $0x10] sm:$0xff] }
  0xc4   :  { %582 = vst [vmem:[%s1378_s1] sm:$0xff] %v581_v10  ;;  %584 = vst [vmem:[%s1378_s1 + $0x8] sm:$0xff] %v583_v11  ;;  %v587_v2 = vld [vmem:[#allocation1 + $0x18] sm:$0xff]  ;;  %v589_v3 = vld [vmem:[#allocation1 + $0x20] sm:$0xff] }
  0xc5   :  { %586 = vst [vmem:[%s1378_s1 + $0x10] sm:$0xff] %v585_v12  ;;  %v591_v13 = vld [vmem:[#allocation1 + $0x28] sm:$0xff]  ;;  %588 = vst [vmem:[%s1378_s1 + $0x18] sm:$0xff] %v587_v2  ;;  %v593_v14 = vld [vmem:[#allocation1 + $0x30] sm:$0xff] }
  0xc6   :  { %590 = vst [vmem:[%s1378_s1 + $0x20] sm:$0xff] %v589_v3  ;;  %592 = vst [vmem:[%s1378_s1 + $0x28] sm:$0xff] %v591_v13  ;;  %v595_v15 = vld [vmem:[#allocation1 + $0x38] sm:$0xff]  ;;  %v597_v16 = vld [vmem:[#allocation1 + $0x40] sm:$0xff] }
  0xc7   :  { %594 = vst [vmem:[%s1378_s1 + $0x30] sm:$0xff] %v593_v14  ;;  %596 = vst [vmem:[%s1378_s1 + $0x38] sm:$0xff] %v595_v15  ;;  %v599_v17 = vld [vmem:[#allocation1 + $0x48] sm:$0xff]  ;;  %v601_v18 = vld [vmem:[#allocation1 + $0x50] sm:$0xff] }
  0xc8   :  { %598 = vst [vmem:[%s1378_s1 + $0x40] sm:$0xff] %v597_v16  ;;  %v603_v19 = vld [vmem:[#allocation1 + $0x58] sm:$0xff]  ;;  %600 = vst [vmem:[%s1378_s1 + $0x48] sm:$0xff] %v599_v17  ;;  %v605_v20 = vld [vmem:[#allocation1 + $0x60] sm:$0xff] }
  0xc9   :  { %602 = vst [vmem:[%s1378_s1 + $0x50] sm:$0xff] %v601_v18  ;;  %604 = vst [vmem:[%s1378_s1 + $0x58] sm:$0xff] %v603_v19  ;;  %v607_v21 = vld [vmem:[#allocation1 + $0x68] sm:$0xff]  ;;  %v609_v22 = vld [vmem:[#allocation1 + $0x70] sm:$0xff] }
  0xca   :  { %606 = vst [vmem:[%s1378_s1 + $0x60] sm:$0xff] %v605_v20  ;;  %608 = vst [vmem:[%s1378_s1 + $0x68] sm:$0xff] %v607_v21  ;;  %v611_v23 = vld [vmem:[#allocation1 + $0x78] sm:$0xff]  ;;  %v613_v24 = vld [vmem:[#allocation1 + $0x80] sm:$0xff] }
  0xcb   :  { %610 = vst [vmem:[%s1378_s1 + $0x70] sm:$0xff] %v609_v22  ;;  %v615_v25 = vld [vmem:[#allocation1 + $0x88] sm:$0xff]  ;;  %612 = vst [vmem:[%s1378_s1 + $0x78] sm:$0xff] %v611_v23  ;;  %v617_v26 = vld [vmem:[#allocation1 + $0x90] sm:$0xff] }
  0xcc   :  { %614 = vst [vmem:[%s1378_s1 + $0x80] sm:$0xff] %v613_v24  ;;  %616 = vst [vmem:[%s1378_s1 + $0x88] sm:$0xff] %v615_v25  ;;  %v619_v27 = vld [vmem:[#allocation1 + $0x98] sm:$0xff]  ;;  %v621_v28 = vld [vmem:[#allocation1 + $0xa0] sm:$0xff] }
  0xcd   :  { %618 = vst [vmem:[%s1378_s1 + $0x90] sm:$0xff] %v617_v26  ;;  %620 = vst [vmem:[%s1378_s1 + $0x98] sm:$0xff] %v619_v27  ;;  %v623_v29 = vld [vmem:[#allocation1 + $0xa8] sm:$0xff]  ;;  %v625_v30 = vld [vmem:[#allocation1 + $0xb0] sm:$0xff] }
  0xce   :  { %622 = vst [vmem:[%s1378_s1 + $0xa0] sm:$0xff] %v621_v28  ;;  %v627_v31 = vld [vmem:[#allocation1 + $0xb8] sm:$0xff]  ;;  %624 = vst [vmem:[%s1378_s1 + $0xa8] sm:$0xff] %v623_v29  ;;  %v629_v32 = vld [vmem:[#allocation1 + $0xc0] sm:$0xff] }
  0xcf   :  { %626 = vst [vmem:[%s1378_s1 + $0xb0] sm:$0xff] %v625_v30  ;;  %628 = vst [vmem:[%s1378_s1 + $0xb8] sm:$0xff] %v627_v31  ;;  %v631_v33 = vld [vmem:[#allocation1 + $0xc8] sm:$0xff]  ;;  %v633_v34 = vld [vmem:[#allocation1 + $0xd0] sm:$0xff] }
  0xd0   :  { %630 = vst [vmem:[%s1378_s1 + $0xc0] sm:$0xff] %v629_v32  ;;  %632 = vst [vmem:[%s1378_s1 + $0xc8] sm:$0xff] %v631_v33  ;;  %v635_v35 = vld [vmem:[#allocation1 + $0xd8] sm:$0xff]  ;;  %v637_v36 = vld [vmem:[#allocation1 + $0xe0] sm:$0xff] }
  0xd1   :  { %634 = vst [vmem:[%s1378_s1 + $0xd0] sm:$0xff] %v633_v34  ;;  %v639_v37 = vld [vmem:[#allocation1 + $0xe8] sm:$0xff]  ;;  %636 = vst [vmem:[%s1378_s1 + $0xd8] sm:$0xff] %v635_v35  ;;  %v641_v38 = vld [vmem:[#allocation1 + $0xf0] sm:$0xff] }
  0xd2   :  { %638 = vst [vmem:[%s1378_s1 + $0xe0] sm:$0xff] %v637_v36  ;;  %640 = vst [vmem:[%s1378_s1 + $0xe8] sm:$0xff] %v639_v37  ;;  %v643_v39 = vld [vmem:[#allocation1 + $0xf8] sm:$0xff]  ;;  %v645_v40 = vld [vmem:[#allocation1 + $0x100] sm:$0xff] }
  0xd3   :  { %642 = vst [vmem:[%s1378_s1 + $0xf0] sm:$0xff] %v641_v38  ;;  %644 = vst [vmem:[%s1378_s1 + $0xf8] sm:$0xff] %v643_v39  ;;  %v647_v41 = vld [vmem:[#allocation1 + $0x108] sm:$0xff]  ;;  %v649_v42 = vld [vmem:[#allocation1 + $0x110] sm:$0xff] }
  0xd4   :  { %646 = vst [vmem:[%s1378_s1 + $0x100] sm:$0xff] %v645_v40  ;;  %v651_v43 = vld [vmem:[#allocation1 + $0x118] sm:$0xff]  ;;  %648 = vst [vmem:[%s1378_s1 + $0x108] sm:$0xff] %v647_v41  ;;  %v653_v44 = vld [vmem:[#allocation1 + $0x120] sm:$0xff] }
  0xd5   :  { %650 = vst [vmem:[%s1378_s1 + $0x110] sm:$0xff] %v649_v42  ;;  %652 = vst [vmem:[%s1378_s1 + $0x118] sm:$0xff] %v651_v43  ;;  %v655_v45 = vld [vmem:[#allocation1 + $0x128] sm:$0xff]  ;;  %v657_v46 = vld [vmem:[#allocation1 + $0x130] sm:$0xff] }
  0xd6   :  { %654 = vst [vmem:[%s1378_s1 + $0x120] sm:$0xff] %v653_v44  ;;  %656 = vst [vmem:[%s1378_s1 + $0x128] sm:$0xff] %v655_v45  ;;  %v659_v47 = vld [vmem:[#allocation1 + $0x138] sm:$0xff]  ;;  %v661_v48 = vld [vmem:[#allocation1 + $0x140] sm:$0xff] }
  0xd7   :  { %658 = vst [vmem:[%s1378_s1 + $0x130] sm:$0xff] %v657_v46  ;;  %v663_v49 = vld [vmem:[#allocation1 + $0x148] sm:$0xff]  ;;  %660 = vst [vmem:[%s1378_s1 + $0x138] sm:$0xff] %v659_v47  ;;  %v665_v50 = vld [vmem:[#allocation1 + $0x150] sm:$0xff] }
  0xd8   :  { %662 = vst [vmem:[%s1378_s1 + $0x140] sm:$0xff] %v661_v48  ;;  %664 = vst [vmem:[%s1378_s1 + $0x148] sm:$0xff] %v663_v49  ;;  %v667_v51 = vld [vmem:[#allocation1 + $0x158] sm:$0xff]  ;;  %v669_v52 = vld [vmem:[#allocation1 + $0x160] sm:$0xff] }
  0xd9   :  { %666 = vst [vmem:[%s1378_s1 + $0x150] sm:$0xff] %v665_v50  ;;  %668 = vst [vmem:[%s1378_s1 + $0x158] sm:$0xff] %v667_v51  ;;  %v671_v53 = vld [vmem:[#allocation1 + $0x168] sm:$0xff]  ;;  %v673_v54 = vld [vmem:[#allocation1 + $0x170] sm:$0xff] }
  0xda   :  { %670 = vst [vmem:[%s1378_s1 + $0x160] sm:$0xff] %v669_v52  ;;  %v675_v55 = vld [vmem:[#allocation1 + $0x178] sm:$0xff]  ;;  %672 = vst [vmem:[%s1378_s1 + $0x168] sm:$0xff] %v671_v53  ;;  %v677_v56 = vld [vmem:[#allocation1 + $0x180] sm:$0xff] }
  0xdb   :  { %674 = vst [vmem:[%s1378_s1 + $0x170] sm:$0xff] %v673_v54  ;;  %676 = vst [vmem:[%s1378_s1 + $0x178] sm:$0xff] %v675_v55  ;;  %v679_v57 = vld [vmem:[#allocation1 + $0x188] sm:$0xff]  ;;  %v681_v58 = vld [vmem:[#allocation1 + $0x190] sm:$0xff] }
  0xdc   :  { %678 = vst [vmem:[%s1378_s1 + $0x180] sm:$0xff] %v677_v56  ;;  %680 = vst [vmem:[%s1378_s1 + $0x188] sm:$0xff] %v679_v57  ;;  %v683_v59 = vld [vmem:[#allocation1 + $0x198] sm:$0xff]  ;;  %v685_v60 = vld [vmem:[#allocation1 + $0x1a0] sm:$0xff] }
  0xdd   :  { %682 = vst [vmem:[%s1378_s1 + $0x190] sm:$0xff] %v681_v58  ;;  %v687_v61 = vld [vmem:[#allocation1 + $0x1a8] sm:$0xff]  ;;  %684 = vst [vmem:[%s1378_s1 + $0x198] sm:$0xff] %v683_v59  ;;  %v689_v62 = vld [vmem:[#allocation1 + $0x1b0] sm:$0xff] }
  0xde   :  { %686 = vst [vmem:[%s1378_s1 + $0x1a0] sm:$0xff] %v685_v60  ;;  %688 = vst [vmem:[%s1378_s1 + $0x1a8] sm:$0xff] %v687_v61  ;;  %v691_v63 = vld [vmem:[#allocation1 + $0x1b8] sm:$0xff]  ;;  %v693_v0 = vld [vmem:[#allocation1 + $0x1c0] sm:$0xff] }
  0xdf   :  { %690 = vst [vmem:[%s1378_s1 + $0x1b0] sm:$0xff] %v689_v62  ;;  %692 = vst [vmem:[%s1378_s1 + $0x1b8] sm:$0xff] %v691_v63  ;;  %v695_v1 = vld [vmem:[#allocation1 + $0x1c8] sm:$0xff]  ;;  %v697_v4 = vld [vmem:[#allocation1 + $0x1d0] sm:$0xff] }
  0xe0   :  { %694 = vst [vmem:[%s1378_s1 + $0x1c0] sm:$0xff] %v693_v0  ;;  %v699_v5 = vld [vmem:[#allocation1 + $0x1d8] sm:$0xff]  ;;  %696 = vst [vmem:[%s1378_s1 + $0x1c8] sm:$0xff] %v695_v1  ;;  %v701_v6 = vld [vmem:[#allocation1 + $0x1e0] sm:$0xff] }
  0xe1   :  { %698 = vst [vmem:[%s1378_s1 + $0x1d0] sm:$0xff] %v697_v4  ;;  %700 = vst [vmem:[%s1378_s1 + $0x1d8] sm:$0xff] %v699_v5  ;;  %v703_v7 = vld [vmem:[#allocation1 + $0x1e8] sm:$0xff]  ;;  %v705_v8 = vld [vmem:[#allocation1 + $0x1f0] sm:$0xff] }
  0xe2   :  { %702 = vst [vmem:[%s1378_s1 + $0x1e0] sm:$0xff] %v701_v6  ;;  %704 = vst [vmem:[%s1378_s1 + $0x1e8] sm:$0xff] %v703_v7  ;;  %v707_v9 = vld [vmem:[#allocation1 + $0x1f8] sm:$0xff]  ;;  %v724_v10 = vld [vmem:[#allocation2] sm:$0xff] }
  0xe3   :  { %706 = vst [vmem:[%s1378_s1 + $0x1f0] sm:$0xff] %v705_v8  ;;  %v726_v11 = vld [vmem:[#allocation2 + $0x8] sm:$0xff]  ;;  %708 = vst [vmem:[%s1378_s1 + $0x1f8] sm:$0xff] %v707_v9  ;;  %v728_v12 = vld [vmem:[#allocation2 + $0x10] sm:$0xff] }
  0xe4   :  { %725 = vst [vmem:[%s1379_s2] sm:$0xff] %v724_v10  ;;  %727 = vst [vmem:[%s1379_s2 + $0x8] sm:$0xff] %v726_v11  ;;  %v730_v2 = vld [vmem:[#allocation2 + $0x18] sm:$0xff]  ;;  %v732_v3 = vld [vmem:[#allocation2 + $0x20] sm:$0xff] }
  0xe5   :  { %729 = vst [vmem:[%s1379_s2 + $0x10] sm:$0xff] %v728_v12  ;;  %731 = vst [vmem:[%s1379_s2 + $0x18] sm:$0xff] %v730_v2  ;;  %v734_v13 = vld [vmem:[#allocation2 + $0x28] sm:$0xff]  ;;  %v736_v14 = vld [vmem:[#allocation2 + $0x30] sm:$0xff] }
  0xe6   :  { %733 = vst [vmem:[%s1379_s2 + $0x20] sm:$0xff] %v732_v3  ;;  %v738_v15 = vld [vmem:[#allocation2 + $0x38] sm:$0xff]  ;;  %735 = vst [vmem:[%s1379_s2 + $0x28] sm:$0xff] %v734_v13 }
  0xe7   :  { %737 = vst [vmem:[%s1379_s2 + $0x30] sm:$0xff] %v736_v14  ;;  %739 = vst [vmem:[%s1379_s2 + $0x38] sm:$0xff] %v738_v15 }

// kernel: branch_1_fun.2
= control target key start
LH: loop header
LB: loop body
LE: loop exit
PB: predicated region body
PF: predicated region fallthrough
CT: control target
= control target key end

     0   :  { %14 = vsyncpa [#allocation3], 0  ;;  %s1568_s0 = inlined_call_operand.hbm [shape: f32[8,1024], index: 0, kind: input, shape index: {}]   ;;  %s1569_s1 = inlined_call_operand.vmem [shape: f32[8,1024], index: 1, kind: input, shape index: {}]   ;;  %s1570_s2 = inlined_call_operand.vmem [shape: f32[8,8], index: 2, kind: input, shape index: {}]   ;;  %s1571_s3 = inlined_call_operand.vmem [shape: f32[8,8], index: 3, kind: input, shape index: {}]   ;;  %s1572_s4 = inlined_call_operand.vmem [shape: f32[8,1], index: 4, kind: input, shape index: {}]   ;;  %s1573_s5 = inlined_call_operand.vmem [shape: f32[8,1], index: 5, kind: input, shape index: {}]   ;;  %s1574_s6 = inlined_call_operand.vmem [shape: f32[8,8], index: 6, kind: input, shape index: {}]   ;;  %s1575_s7 = inlined_call_operand.hbm [shape: f32[8,1024], index: 7, kind: output, shape index: {0}]   ;;  %s1576_s8 = inlined_call_operand.hbm [shape: f32[8,8,1024], index: 8, kind: output, shape index: {1}]  }
   0x1   :  { %16 = vsyncpa [#allocation3 + $0x1], 0 }
   0x2   :  { %17 = vsyncpa [#allocation4], 0 }
   0x3   :  { %19 = vsyncpa [#allocation4 + $0x1], 0 }
   0x4   :  { %20 = vsyncpa [#allocation7], 0 }
   0x5   :  { %22 = vsyncpa [#allocation7 + $0x1], 0  ;;  %s1180_s27 = smov 0   ;;  %s1182_s28 = smov 0  }
   0x6   :  { %s1184_s29 = smov 0   ;;  %s1186_s30 = smov 0  }
   0x7 LB: > { %s1201_s9 = sadd.s32 4294967295, %s1125_s30   ;;  %s913_s10 = sadd.s32 4294967294, %s1125_s30   ;;  %s1125_s30 = sphi %s1186_s30, %s1597_s30   ;;  %s1121_s29 = sphi %s1184_s29, %s1596_s29   ;;  %s1117_s28 = sphi %s1182_s28, %s1595_s28   ;;  %s1113_s27 = sphi %s1180_s27, %s1594_s27  }
   0x8   : > { %s1205_s11 = sadd.s32 1, %s1125_s30   ;;  %s35_s12 = sadd.s32 1, %s1121_s29 }
   0x9   : > { %s32_s13 = ssub.s32 %s1125_s30, %s1205_s11  ;;  %p42_p0 = scmp.ne.s32.totalorder %s1121_s29, %s1117_s28 }
   0xa   : > { %p33_p1 = scmp.eq.s32.totalorder %s32_s13, 0  ;;  %p43_p2 = scmp.eq.s32.totalorder %s1125_s30, 0 }
   0xb   : > { %p48_p3 = scmp.ne.s32.totalorder %s1117_s28, %s1113_s27  ;;  %p49_p4 = scmp.eq.s32.totalorder %s1201_s9, 0 }
   0xc   : > { %s1217_s14 = scalar_select %p33_p1, %s1121_s29, %s35_s12  }
   0xd   : > { %p1219_p5 = por %p43_p2, %p42_p0  ;;  %p1223_p6 = por %p49_p4, %p48_p3 }
   0xe   : > { %1580 = sst [smem:[#allocation11_spill]] %s1217_s14  ;;  %p203_p7 = scmp.eq.s32.totalorder %s1201_s9, 1 }
   0xf   : > { %s1582_s16 = scalar_select %p1223_p6, 1, 0 }
  0x10   : > { %p209_p8 = scmp.eq.s32.totalorder %s913_s10, 1  ;;  %p955_p10 = scmp.lt.s32.totalorder %s1125_s30, 2 }
  0x11   : > { %p1230_p11 = por %p203_p7, %p42_p0  ;;  %s270_s19 = sand.u32 1, %s1121_s29  }
  0x12   : > { %p1234_p12 = por %p209_p8, %p48_p3  ;;  %s935_s20 = sshll.u32 %s1125_s30, 9 }
  0x13   : > { %s1583_s17 = scalar_select %p1230_p11, 1, 0 }
  0x14   : > { %s1584_s18 = scalar_select %p1234_p12, 1, 0 }
  0x15   : > { %s916_s21 = sshll.u32 %s270_s19, 5  ;;  %s1243_s24 = scalar_lea.hbm %s1568_s0, %s935_s20 }
  0x16   : > { %s274_s25 = scalar_lea.vmem [#allocation2], %s916_s21  ;;  %p1247_p13 = pnand %p955_p10, %p1219_p5 }
  0x17   : > { %s282_s26 = sshll.u32 %s274_s25, 4  ;;  %s271_s12 = scalar_lea.sflag [#allocation3], %s270_s19  ;;  %s1251_s26 = int_to_ptr.vmem [resolvable:$true] %s282_s26 }
  0x18   : > { %s1003_s13 = scalar_lea.hbm %s1243_s24, 512  ;;  %p1005_p3 = pneg %p1247_p13 }
  0x19   : > { %p1004_p2 = scmp.ne.s32.totalorder %s1243_s24, %s1003_s13  ;;  %s1008_s15 = scalar_lea.hbm %s1568_s0, 1024 }
  0x1a   : > { %p1009_p5 = scmp.lt.s32.totalorder %s1243_s24, %s1568_s0  ;;  %p1010_p8 = scmp.lt.s32.totalorder %s1008_s15, %s1003_s13 }
  0x1b   : > { %p1006_p4 = pnand %p1005_p3, %p1004_p2 }
  0x1c   : > { %p1011_p10 = por %p1010_p8, %p1009_p5 }
  0x1d   : > { %p1007_p7 = pneg %p1006_p4 }
  0x1f   : > { %p1012_p9 = pnand %p1011_p10, %p1007_p7 }
  0x21   : > { %1015 = shalt.err (!%p1012_p9)
}
  0x22   : > { %s1016_s19 = scalar_lea.vmem %s1251_s26, 512  ;;  %s1127_s25 = smov [#allocation2]  }
  0x23   : > { %p1017_p0 = scmp.ne.s32.totalorder %s1251_s26, %s1016_s19  ;;  %s1021_s14 = sshll.u32 %s1127_s25, 4  ;;  %s1022_s14 = int_to_ptr.vmem [resolvable:$false] %s1021_s14 }
  0x24   : > { %s1023_s20 = scalar_lea.vmem %s1022_s14, 1024  ;;  %p1024_p4 = scmp.lt.s32.totalorder %s1251_s26, %s1022_s14 }
  0x25   : > { %p1019_p1 = pnand %p1017_p0, %p1005_p3  ;;  %p1025_p12 = scmp.lt.s32.totalorder %s1023_s20, %s1016_s19 }
  0x27   : > { %p1020_p2 = pneg %p1019_p1  ;;  %p1026_p11 = por %p1025_p12, %p1024_p4 }
  0x29   : > { %p1027_p6 = pnand %p1026_p11, %p1020_p2 }
  0x2b   : > { %1030 = shalt.err (!%p1027_p6)
}
  0x2c   : > { %947 = dma.hbm_to_vmem [thread:$0]  (!%p1247_p13), %s1243_s24, 512, %s1251_s26, %s271_s12  }
  0x2d   : > { %p1586_p9 = scmp.lt.s32.totalorder %s1125_s30, 3  ;;  %p1587_p7 = scmp.ge.s32.totalorder %s1125_s30, 1 }
  0x2f   : > { %p297_p0 = pnand %p1587_p7, %p1586_p9 }
  0x30   : > { %s1278_s13 = sand.u32 (!%p297_p0), 1, %s1117_s28   ;;  %p1588_p6 = scmp.ne.s32.totalorder (!%p297_p0), %s1582_s16, 0 }
  0x31   : > { %300 = sbr.rel (%p297_p0) target bundleno = 320 (0x140), region = 48  ;;  %s920_s14 = sshll.u32 (!%p297_p0), %s1278_s13, 5 }
  0x32   : > { %s303_s21 = scalar_lea.sflag (!%p297_p0), [#allocation3], %s1278_s13  ;;  %s306_s10 = scalar_lea.vmem (!%p297_p0), [#allocation2], %s920_s14 }
  0x36   : > { %1100 = dma.done.wait (%p1588_p6), %s303_s21, 512  }
  0x37   : > { %1102 = vsyncadd (%p1588_p6), %s303_s21, 4294966784  ;;  %v554_v0 = vlaneseq  ;;  %v1128_v1 = vmov 0.0   ;;  %v1129_v2 = vmov 0   ;;  %v1288_v4 = vld [vmem:[%s306_s10 + $0x8] sm:$0xff]  ;;  %v1290_v5 = vld [vmem:[%s306_s10 + $0x18] sm:$0xff]  ;;  %vm369_vm0 = vcmask 64512  }
  0x38   : > { %437 = vmatprep.mubr.f32.mxu0 %v1128_v1  ;;  %508 = vmatprep.mubr.f32.mxu1 %v1128_v1  ;;  %v1294_v7 = vld [vmem:[%s306_s10] sm:$0xff]  ;;  %v1297_v8 = vld [vmem:[%s306_s10 + $0x10] sm:$0xff]  ;;  %s923_s21 = sshll.u32 %s1201_s9, 2  ;;  %s1579_s12 = sshll.u32 %s1201_s9, 9 }
  0x39   : > { %994 = vset.pattern.permute.xlu0 %v1129_v2  ;;  %v555_v3 = vshrl.u32 %v554_v0, 7  ;;  %403 = vmatprep.subr.mxu0 %v1288_v4  ;;  %v362_v9 = vld [vmem:[%s1571_s3] sm:$0xff]  ;;  %p351_p11 = scmp.lt.s32.totalorder %s923_s21, 7  ;;  %s341_s15 = scalar_lea.vmem [#allocation5], %s920_s14 }
  0x3a   : > { %474 = vmatprep.subr.mxu1 %v1290_v5  ;;  %404 = vmatpush1.msra.mxu0 %v1294_v7  ;;  %v363_v11 = vld [vmem:[%s1572_s4] sm:$0xff]  ;;  %s783_s22 = sshll.u32 %s341_s15, 4  ;;  %s922_s23 = sshll.u32 %s1278_s13, 8  ;;  %s1360_s22 = int_to_ptr.vmem [resolvable:$true] %s783_s22 }
  0x3b   : > { %v556_v6 = vsub.s32 0, %v555_v3  ;;  %v563_v10 = vsub.s32 1, %v555_v3  ;;  %475 = vmatpush1.msra.mxu1 %v1297_v8  ;;  %925 = vmatmul.mubr.msk.f32.vlgmr.msra.gmra.mxu0 %vm369_vm0, %v362_v9  ;;  %v610_v12 = vld [vmem:[%s1570_s2] sm:$0xff]  ;;  %v570_v14 = vsub.s32 2, %v555_v3  ;;  %v577_v17 = vsub.s32 3, %v555_v3  ;;  %s1599_s21 = smov (!%p351_p11, %s923_s21), 7  ;;  %s1358_s25 = scalar_lea.hbm %s1575_s7, %s1579_s12 }
  0x3c   : > { %926 = vmatmul.mubr.msk.f32.vlgmr.msra.gmra.mxu1 %vm369_vm0, %v362_v9  ;;  %366 = vperm.xlu0 %994, %v363_v11   ;;  %v527_v15 = vld [vmem:[%s1573_s5] sm:$0xff]  ;;  %v584_v19 = vsub.s32 4, %v555_v3  ;;  %v591_v21 = vsub.s32 5, %v555_v3  ;;  %v598_v23 = vsub.s32 6, %v555_v3  ;;  %v605_v25 = vsub.s32 7, %v555_v3  ;;  %s924_s10 = sshll.u32 %s1599_s21, 3 }
  0x3d   : > { %v614_v13 = vrot.slane %v610_v12, %v556_v6  ;;  %v621_v16 = vrot.slane %v610_v12, %v563_v10  ;;  %v628_v18 = vrot.slane %v610_v12, %v570_v14  ;;  %v635_v20 = vrot.slane %v610_v12, %v577_v17  ;;  %v553_v27 = vld [vmem:[%s1574_s6] sm:$0xff]  ;;  %s354_s26 = scalar_lea.vmem %s1569_s1, %s924_s10  ;;  %s764_s20 = scalar_lea.sflag [#allocation4], %s1278_s13 }
  0x3e   : > { %v642_v22 = vrot.slane %v610_v12, %v584_v19  ;;  %v649_v24 = vrot.slane %v610_v12, %v591_v21  ;;  %v656_v26 = vrot.slane %v610_v12, %v598_v23  ;;  %v663_v28 = vrot.slane %v610_v12, %v605_v25  ;;  %v519_v53 = vld [vmem:[%s354_s26] sm:$0xff]  ;;  %v521_v55 = vld [vmem:[%s354_s26 + $0x10] sm:$0xff]  ;;  %v520_v57 = vld [vmem:[%s354_s26 + $0x8] sm:$0xff]  ;;  %s1031_s21 = scalar_lea.vmem %s1360_s22, 512  ;;  %p1589_p13 = scmp.ne.s32.totalorder %s1583_s17, 0 }
  0x3f   : > { %616 = vbcast.lane.b32.xlu1 %v614_v13, 256  ;;  %v557_v29 = vrot.slane %v553_v27, %v556_v6  ;;  %v564_v30 = vrot.slane %v553_v27, %v563_v10  ;;  %v571_v31 = vrot.slane %v553_v27, %v570_v14  ;;  %v578_v32 = vrot.slane %v553_v27, %v577_v17  ;;  %v522_v58 = vld [vmem:[%s354_s26 + $0x18] sm:$0xff]  ;;  %p1032_p12 = scmp.ne.s32.totalorder %s1360_s22, %s1031_s21  ;;  %s1130_s10 = smov [#allocation5]  }
  0x40   : > { %530 = vperm.xlu0 %994, %v527_v15   ;;  %v585_v33 = vrot.slane %v553_v27, %v584_v19  ;;  %v592_v34 = vrot.slane %v553_v27, %v591_v21  ;;  %v599_v35 = vrot.slane %v553_v27, %v598_v23  ;;  %v606_v36 = vrot.slane %v553_v27, %v605_v25  ;;  %s1035_s16 = sshll.u32 %s1130_s10, 4  ;;  %s1036_s16 = int_to_ptr.vmem [resolvable:$false] %s1035_s16 }
  0x41   : > { %v523_v59 = vsub.f32 %v1294_v7, %v519_v53  ;;  %v525_v60 = vsub.f32 %v1297_v8, %v521_v55  ;;  %v524_v61 = vsub.f32 %v1288_v4, %v520_v57  ;;  %v526_v62 = vsub.f32 %v1290_v5, %v522_v58  ;;  %p1033_p1 = pnand %p1032_p12, %p1589_p13  ;;  %s1037_s24 = scalar_lea.vmem %s1036_s16, 1024 }
  0x42   : > { %p1038_p5 = scmp.lt.s32.totalorder %s1360_s22, %s1036_s16  ;;  %p1039_p8 = scmp.lt.s32.totalorder %s1037_s24, %s1031_s21 }
  0x43   : > { %623 = vbcast.lane.b32.xlu1 %v621_v16, 256  ;;  %p1034_p3 = pneg %p1033_p1 }
  0x44   : > { %630 = vbcast.lane.b32.xlu0 %v628_v18, 256  ;;  %p1040_p10 = por %p1039_p8, %p1038_p5 }
  0x46   : > { %p1041_p2 = pnand %p1040_p10, %p1034_p3 }
  0x47   : > { %637 = vbcast.lane.b32.xlu1 %v635_v20, 256 }
  0x48   : > { %644 = vbcast.lane.b32.xlu0 %v642_v22, 256 }
  0x4b   : > { %651 = vbcast.lane.b32.xlu1 %v649_v24, 256 }
  0x4c   : > { %658 = vbcast.lane.b32.xlu0 %v656_v26, 256 }
  0x4f   : > { %665 = vbcast.lane.b32.xlu1 %v663_v28, 256 }
  0x50   : > { %559 = vbcast.lane.b32.xlu0 %v557_v29, 256 }
  0x53   : > { %566 = vbcast.lane.b32.xlu1 %v564_v30, 256 }
  0x54   : > { %573 = vbcast.lane.b32.xlu0 %v571_v31, 256 }
  0x57   : > { %580 = vbcast.lane.b32.xlu1 %v578_v32, 256 }
  0x58   : > { %587 = vbcast.lane.b32.xlu0 %v585_v33, 256 }
  0x5b   : > { %594 = vbcast.lane.b32.xlu1 %v592_v34, 256 }
  0x5c   : > { %601 = vbcast.lane.b32.xlu0 %v599_v35, 256 }
  0x5f   : > { %608 = vbcast.lane.b32.xlu1 %v606_v36, 256 }
  0xb1   : > { %v1315_v37 = vpop.permute.xlu1 %616 }
  0xb5   : > { %v1317_v39 = vpop.permute.xlu1 %623 }
  0xb7   : > { %v367_v38 = vpop.permute.xlu0 %366 }
  0xb9   : > { %v1320_v41 = vpop.permute.xlu1 %637 }
  0xbb   : > { %v531_v40 = vpop.permute.xlu0 %530 }
  0xbc   : > { %v533_v0 = vmul.f32 %v531_v40, %v523_v59  ;;  %v535_v3 = vmul.f32 %v531_v40, %v525_v60  ;;  %v534_v9 = vmul.f32 %v531_v40, %v524_v61  ;;  %v536_v7 = vmul.f32 %v531_v40, %v526_v62 }
  0xbd   : > { %v1324_v47 = vpop.permute.xlu1 %651 }
  0xbf   : > { %v1322_v42 = vpop.permute.xlu0 %630 }
  0xc1   : > { %v1331_v54 = vpop.permute.xlu1 %665 }
  0xc3   : > { %v1326_v49 = vpop.permute.xlu0 %644 }
  0xc5   : > { %v1339_v63 = vpop.permute.xlu1 %566 }
  0xc7   : > { %v1333_v56 = vpop.permute.xlu0 %658 }
  0xc9   : > { %v1351_v19 = vpop.permute.xlu1 %580 }
  0xcb   : > { %v1341_v1 = vpop.permute.xlu0 %559 }
  0xcf   : > { %v1374_v24 = vpop.permute.xlu0 %573 }
  0xfb   : > { %v439_v43 = vpop.f32.mrf.mxu0 }
  0xfc   : > { %v440_v44 = vadd.f32 %v439_v43, %v367_v38  ;;  %v510_v45 = vpop.f32.mrf.mxu1 }
  0xfd   : > { %v511_v46 = vadd.f32 %v510_v45, %v367_v38  ;;  %v441_v48 = vpop.f32.mrf.mxu0 }
  0xfe   : > { %995 = vtanh.f32 %v440_v44  ;;  %v442_v50 = vadd.f32 %v441_v48, %v367_v38  ;;  %v512_v51 = vpop.f32.mrf.mxu1 }
  0xff   : > { %997 = vtanh.f32 %v511_v46  ;;  %v513_v52 = vadd.f32 %v512_v51, %v367_v38 }
 0x100   : > { %999 = vtanh.f32 %v442_v50 }
 0x101   : > { %1001 = vtanh.f32 %v513_v52 }
 0x10b   : > { %v996_v2 = vpop.eup %995 }
 0x10c   : > { %v998_v6 = vpop.eup %997  ;;  %v537_v10 = vsub.f32 %v533_v0, %v996_v2  ;;  %v545_v11 = vmul.f32 %v996_v2, %v996_v2 }
 0x10d   : > { %v1000_v4 = vpop.eup %999  ;;  %v539_v5 = vsub.f32 %v535_v3, %v998_v6  ;;  %v547_v8 = vmul.f32 %v998_v6, %v998_v6 }
 0x10e   : > { %v1002_v12 = vpop.eup %1001  ;;  %v1346_v13 = vsub.f32 1.0, %v545_v11  ;;  %v538_v14 = vsub.f32 %v534_v9, %v1000_v4  ;;  %v546_v15 = vmul.f32 %v1000_v4, %v1000_v4  ;;  %541 = vst [vmem:[%s341_s15] sm:$0xff] %v537_v10 }
 0x10f   : > { %v1349_v16 = vsub.f32 1.0, %v547_v8  ;;  %v540_v17 = vsub.f32 %v536_v7, %v1002_v12  ;;  %v548_v18 = vmul.f32 %v1002_v12, %v1002_v12  ;;  %543 = vst [vmem:[%s341_s15 + $0x10] sm:$0xff] %v539_v5 }
 0x110   : > { %v1364_v20 = vmul.f32 %v1324_v47, %v1346_v13  ;;  %v1368_v21 = vmul.f32 %v1326_v49, %v1346_v13  ;;  %v1370_v22 = vsub.f32 1.0, %v546_v15  ;;  %v671_v23 = vmul.f32 %v1317_v39, %v1346_v13  ;;  %542 = vst [vmem:[%s341_s15 + $0x8] sm:$0xff] %v538_v14 }
 0x111   : > { %v1378_v25 = vmul.f32 %v1324_v47, %v1349_v16  ;;  %v1382_v26 = vmul.f32 %v1326_v49, %v1349_v16  ;;  %v1384_v27 = vsub.f32 1.0, %v548_v18  ;;  %v673_v28 = vmul.f32 %v1317_v39, %v1349_v16  ;;  %544 = vst [vmem:[%s341_s15 + $0x18] sm:$0xff] %v540_v17 }
 0x112   : > { %v672_v29 = vmul.f32 %v1317_v39, %v1370_v22  ;;  %v703_v30 = vsub.f32 %v1339_v63, %v671_v23  ;;  %v667_v31 = vmul.f32 %v1315_v37, %v1346_v13  ;;  %v668_v32 = vmul.f32 %v1315_v37, %v1370_v22 }
 0x113   : > { %1044 = shalt.err (!%p1041_p2)
}
 0x114   : > { %s1045_s26 = scalar_lea.hbm %s1358_s25, 512  ;;  %s1049_s19 = scalar_lea.hbm %s1575_s7, 1024 }
 0x115   : > { %p1046_p4 = scmp.ne.s32.totalorder %s1358_s25, %s1045_s26  ;;  %p1050_p0 = scmp.lt.s32.totalorder %s1358_s25, %s1575_s7 }
 0x116   : > { %p1051_p6 = scmp.lt.s32.totalorder %s1049_s19, %s1045_s26 }
 0x117   : > { %p1047_p9 = pnand %p1046_p4, %p1589_p13 }
 0x118   : > { %p1052_p11 = por %p1051_p6, %p1050_p0 }
 0x119   : > { %p1048_p7 = pneg %p1047_p9 }
 0x11b   : > { %p1053_p12 = pnand %p1052_p11, %p1048_p7 }
 0x11d   : > { %1056 = shalt.err (!%p1053_p12)
}
 0x11e   : > { %940 = dma.vmem_to_hbm [thread:$0]  (%p1589_p13), %s1360_s22, 512, %s1358_s25, %s764_s20   ;;  %v674_v33 = vmul.f32 %v1317_v39, %v1384_v27  ;;  %v705_v34 = vsub.f32 %v1339_v63, %v673_v28  ;;  %v669_v35 = vmul.f32 %v1315_v37, %v1349_v16  ;;  %v670_v36 = vmul.f32 %v1315_v37, %v1384_v27  ;;  %v595_v48 = vpop.permute.xlu1 %594  ;;  %v588_v55 = vpop.permute.xlu0 %587 }
 0x11f   : > { %v704_v38 = vsub.f32 %v1339_v63, %v672_v29  ;;  %s1426_s12 = scalar_lea.vmem [#allocation6], %s922_s23  ;;  %v699_v39 = vsub.f32 %v1341_v1, %v667_v31  ;;  %v700_v40 = vsub.f32 %v1341_v1, %v668_v32  ;;  %v679_v43 = vmul.f32 %v1320_v41, %v1346_v13  ;;  %s1590_s23 = sshll.u32 %s1201_s9, 9 }
 0x120   : > { %735 = vst [vmem:[%s1426_s12 + $0x20] sm:$0xff] %v703_v30  ;;  %v706_v37 = vsub.f32 %v1339_v63, %v674_v33  ;;  %737 = vst [vmem:[%s1426_s12 + $0x30] sm:$0xff] %v705_v34  ;;  %v701_v44 = vsub.f32 %v1341_v1, %v669_v35  ;;  %v702_v45 = vsub.f32 %v1341_v1, %v670_v36  ;;  %s796_s22 = sshll.u32 %s1426_s12, 4  ;;  %s1515_s21 = scalar_lea.hbm %s1576_s8, %s1590_s23  ;;  %s1520_s22 = int_to_ptr.vmem [resolvable:$true] %s796_s22 }
 0x121   : > { %v680_v46 = vmul.f32 %v1320_v41, %v1370_v22  ;;  %736 = vst [vmem:[%s1426_s12 + $0x28] sm:$0xff] %v704_v38  ;;  %731 = vst [vmem:[%s1426_s12] sm:$0xff] %v699_v39  ;;  %v681_v50 = vmul.f32 %v1320_v41, %v1349_v16  ;;  %v682_v51 = vmul.f32 %v1320_v41, %v1384_v27  ;;  %s769_s9 = scalar_lea.sflag [#allocation7], %s1278_s13  ;;  %s1057_s16 = scalar_lea.vmem %s1520_s22, 4096 }
 0x122   : > { %732 = vst [vmem:[%s1426_s12 + $0x8] sm:$0xff] %v700_v40  ;;  %v711_v52 = vsub.f32 %v1351_v19, %v679_v43  ;;  %v675_v53 = vmul.f32 %v1322_v42, %v1346_v13  ;;  %738 = vst [vmem:[%s1426_s12 + $0x38] sm:$0xff] %v706_v37  ;;  %v676_v58 = vmul.f32 %v1322_v42, %v1370_v22  ;;  %v609_v5 = vpop.permute.xlu1 %608  ;;  %v602_v15 = vpop.permute.xlu0 %601  ;;  %p1058_p1 = scmp.ne.s32.totalorder %s1520_s22, %s1057_s16  ;;  %s1131_s24 = smov [#allocation6]  }
 0x123   : > { %733 = vst [vmem:[%s1426_s12 + $0x10] sm:$0xff] %v701_v44  ;;  %734 = vst [vmem:[%s1426_s12 + $0x18] sm:$0xff] %v702_v45  ;;  %v712_v57 = vsub.f32 %v1351_v19, %v680_v46  ;;  %v677_v41 = vmul.f32 %v1322_v42, %v1349_v16  ;;  %v678_v59 = vmul.f32 %v1322_v42, %v1384_v27  ;;  %s1061_s26 = sshll.u32 %s1131_s24, 4  ;;  %s1062_s26 = int_to_ptr.vmem [resolvable:$false] %s1061_s26 }
 0x124   : > { %v713_v60 = vsub.f32 %v1351_v19, %v681_v50  ;;  %v714_v61 = vsub.f32 %v1351_v19, %v682_v51  ;;  %743 = vst [vmem:[%s1426_s12 + $0x60] sm:$0xff] %v711_v52  ;;  %v707_v62 = vsub.f32 %v1374_v24, %v675_v53  ;;  %v688_v63 = vmul.f32 %v1324_v47, %v1370_v22  ;;  %p1059_p3 = pnand %p1058_p1, %p1589_p13  ;;  %s1063_s15 = scalar_lea.vmem %s1062_s26, 8192 }
 0x125   : > { %744 = vst [vmem:[%s1426_s12 + $0x68] sm:$0xff] %v712_v57  ;;  %v708_v0 = vsub.f32 %v1374_v24, %v676_v58  ;;  %v709_v1 = vsub.f32 %v1374_v24, %v677_v41  ;;  %v710_v42 = vsub.f32 %v1374_v24, %v678_v59  ;;  %v690_v2 = vmul.f32 %v1324_v47, %v1384_v27  ;;  %p1064_p8 = scmp.lt.s32.totalorder %s1520_s22, %s1062_s26  ;;  %p1065_p10 = scmp.lt.s32.totalorder %s1063_s15, %s1057_s16 }
 0x126   : > { %745 = vst [vmem:[%s1426_s12 + $0x70] sm:$0xff] %v713_v60  ;;  %746 = vst [vmem:[%s1426_s12 + $0x78] sm:$0xff] %v714_v61  ;;  %v719_v3 = vsub.f32 %v595_v48, %v1364_v20  ;;  %v720_v6 = vsub.f32 %v595_v48, %v688_v63  ;;  %v721_v9 = vsub.f32 %v595_v48, %v1378_v25  ;;  %p1060_p5 = pneg %p1059_p3 }
 0x127   : > { %739 = vst [vmem:[%s1426_s12 + $0x40] sm:$0xff] %v707_v62  ;;  %v684_v10 = vmul.f32 %v1326_v49, %v1370_v22  ;;  %740 = vst [vmem:[%s1426_s12 + $0x48] sm:$0xff] %v708_v0  ;;  %v722_v47 = vsub.f32 %v595_v48, %v690_v2  ;;  %v686_v11 = vmul.f32 %v1326_v49, %v1384_v27  ;;  %p1066_p2 = por %p1065_p10, %p1064_p8 }
 0x128   : > { %741 = vst [vmem:[%s1426_s12 + $0x50] sm:$0xff] %v709_v1  ;;  %742 = vst [vmem:[%s1426_s12 + $0x58] sm:$0xff] %v710_v42  ;;  %v715_v4 = vsub.f32 %v588_v55, %v1368_v21  ;;  %v717_v7 = vsub.f32 %v588_v55, %v1382_v26  ;;  %v695_v12 = vmul.f32 %v1331_v54, %v1346_v13 }
 0x129   : > { %751 = vst [vmem:[%s1426_s12 + $0xa0] sm:$0xff] %v719_v3  ;;  %752 = vst [vmem:[%s1426_s12 + $0xa8] sm:$0xff] %v720_v6  ;;  %v716_v8 = vsub.f32 %v588_v55, %v684_v10  ;;  %v696_v14 = vmul.f32 %v1331_v54, %v1370_v22  ;;  %v697_v49 = vmul.f32 %v1331_v54, %v1349_v16  ;;  %p1067_p4 = pnand %p1066_p2, %p1060_p5 }
 0x12a   : > { %753 = vst [vmem:[%s1426_s12 + $0xb0] sm:$0xff] %v721_v9  ;;  %754 = vst [vmem:[%s1426_s12 + $0xb8] sm:$0xff] %v722_v47  ;;  %v718_v17 = vsub.f32 %v588_v55, %v686_v11  ;;  %v698_v18 = vmul.f32 %v1331_v54, %v1384_v27  ;;  %v691_v19 = vmul.f32 %v1333_v56, %v1346_v13 }
 0x12b   : > { %747 = vst [vmem:[%s1426_s12 + $0x80] sm:$0xff] %v715_v4  ;;  %749 = vst [vmem:[%s1426_s12 + $0x90] sm:$0xff] %v717_v7  ;;  %v692_v20 = vmul.f32 %v1333_v56, %v1370_v22  ;;  %v727_v21 = vsub.f32 %v609_v5, %v695_v12  ;;  %v728_v23 = vsub.f32 %v609_v5, %v696_v14 }
 0x12c   : > { %748 = vst [vmem:[%s1426_s12 + $0x88] sm:$0xff] %v716_v8  ;;  %v729_v24 = vsub.f32 %v609_v5, %v697_v49  ;;  %v693_v25 = vmul.f32 %v1333_v56, %v1349_v16  ;;  %750 = vst [vmem:[%s1426_s12 + $0x98] sm:$0xff] %v718_v17  ;;  %v730_v54 = vsub.f32 %v609_v5, %v698_v18 }
 0x12d   : > { %v694_v13 = vmul.f32 %v1333_v56, %v1384_v27  ;;  %v723_v22 = vsub.f32 %v602_v15, %v691_v19  ;;  %v724_v26 = vsub.f32 %v602_v15, %v692_v20  ;;  %759 = vst [vmem:[%s1426_s12 + $0xe0] sm:$0xff] %v727_v21  ;;  %760 = vst [vmem:[%s1426_s12 + $0xe8] sm:$0xff] %v728_v23 }
 0x12e   : > { %761 = vst [vmem:[%s1426_s12 + $0xf0] sm:$0xff] %v729_v24  ;;  %v725_v16 = vsub.f32 %v602_v15, %v693_v25  ;;  %762 = vst [vmem:[%s1426_s12 + $0xf8] sm:$0xff] %v730_v54 }
 0x12f   : > { %v726_v56 = vsub.f32 %v602_v15, %v694_v13  ;;  %755 = vst [vmem:[%s1426_s12 + $0xc0] sm:$0xff] %v723_v22  ;;  %756 = vst [vmem:[%s1426_s12 + $0xc8] sm:$0xff] %v724_v26 }
 0x130   : > { %757 = vst [vmem:[%s1426_s12 + $0xd0] sm:$0xff] %v725_v16 }
 0x131   : > { %758 = vst [vmem:[%s1426_s12 + $0xd8] sm:$0xff] %v726_v56 }
 0x132   : > { %1070 = shalt.err (!%p1067_p4)
}
 0x133   : > { %s1071_s14 = scalar_lea.hbm %s1515_s21, 4096  ;;  %s1075_s12 = scalar_lea.hbm %s1576_s8, 8192 }
 0x134   : > { %p1072_p9 = scmp.ne.s32.totalorder %s1515_s21, %s1071_s14  ;;  %p1076_p6 = scmp.lt.s32.totalorder %s1515_s21, %s1576_s8 }
 0x135   : > { %p1077_p11 = scmp.lt.s32.totalorder %s1075_s12, %s1071_s14 }
 0x136   : > { %p1073_p7 = pnand %p1072_p9, %p1589_p13 }
 0x137   : > { %p1078_p12 = por %p1077_p11, %p1076_p6 }
 0x138   : > { %p1074_p0 = pneg %p1073_p7 }
 0x13a   : > { %p1079_p1 = pnand %p1078_p12, %p1074_p0 }
 0x13c   : > { %1082 = shalt.err (!%p1079_p1)
}
 0x13d   : > { %s1132_s20 = smov 512   ;;  %s1133_s16 = smov 1024  }
 0x13e   : > { %s1134_s24 = smov 32  }
 0x13f   : > { %941 = dma.vmem_to_hbm [thread:$0]  (%p1589_p13), %s1520_s22, 4096, %s1515_s21, %s769_s9, %s1132_s20, %s1133_s16, %s1134_s24  }
 0x140 PF: > { %s811_s26 = sand.u32 1, %s1113_s27   ;;  %p1591_p3 = scmp.ne.s32.totalorder %s1584_s18, 0 }
 0x141   : > { %p1592_p5 = scmp.ge.s32.totalorder %s1125_s30, 2  ;;  %s812_s15 = scalar_lea.sflag [#allocation4], %s811_s26 }
 0x143   : > { %p949_p8 = pnand %p1592_p5, %p1591_p3 }
 0x145   : > { %p950_p10 = pneg %p949_p8 }
 0x147   : > { %1104 = dma.done.wait (%p950_p10), %s812_s15, 512  }
 0x148   : > { %1106 = vsyncadd (%p950_p10), %s812_s15, 4294966784  ;;  %s821_s14 = scalar_lea.sflag [#allocation7], %s811_s26 }
 0x149   : > { %1108 = dma.done.wait (%p950_p10), %s821_s14, 4096  }
 0x14a   : > { %1110 = vsyncadd (%p950_p10), %s821_s14, 4294963200  ;;  %s1593_s17 = sld [smem:[#allocation11_spill]]  ;;  %p25_p13 = scmp.ge.s32.totalorder %s1205_s11, 4  }
 0x14b   : > { %s1594_s27 = smov %s1117_s28  ;;  %s1595_s28 = smov %s1121_s29 }
 0x14c   : > { %s1597_s30 = smov %s1205_s11  ;;  %27 = sbr.rel (!%p25_p13) target bundleno = 7 (0x7), region = 113 }
 0x150   : > { %s1596_s29 = smov %s1593_s17 }
 0x151   :  { %826 = vsyncpa [#allocation3], 1 }
 0x152   :  { %828 = vsyncpa [#allocation3 + $0x1], 1 }
 0x153   :  { %829 = vsyncpa [#allocation4], 1 }
 0x154   :  { %831 = vsyncpa [#allocation4 + $0x1], 1 }
 0x155   :  { %832 = vsyncpa [#allocation7], 1 }
 0x156   :  { %834 = vsyncpa [#allocation7 + $0x1], 1 }

</bundles_post_ra>
